<compile_context>
chip_gen: v6e
topology: v6e:2x2x1
jax: 0.10.0
libtpu: 0.0.40
codegen_flags: <defaults>
</compile_context>

<pallas_src>
import functools

import jax
import jax.numpy as jnp
import numpy as np
from jax.experimental import pallas as pl
from jax.experimental.pallas import tpu as pltpu

_HIGHEST = jax.lax.Precision.HIGHEST


def _round_up(n, m):
    return ((n + m - 1) // m) * m


# -----------------------------------------------------------------------------
# Kernel
# -----------------------------------------------------------------------------
def _lstm_kernel(x_ref, w_ih_ref, w_hh_ref, b_ref, w_fc_ref, b_fc_ref,
                 out_ref, xp_ref):
    """Single-invocation LSTM + FC.

    x_ref   : (T*Bp, Dp)   time-major, flattened, padded input (Dp = ru(D,8))
    w_ih_ref: (Dp, 4Hp)    W_ih^T, gate blocks [i|f|o|g], each padded to Hp
    w_hh_ref: (Hp, 4Hp)    W_hh^T, gate blocks [i|f|o|g], each padded to Hp
    b_ref   : (1, 4Hp)     b_ih + b_hh, same gate packing
    w_fc_ref: (Hp, Op)     W_fc^T padded
    b_fc_ref: (1, Op)
    out_ref : (Bp, Op)
    xp_ref  : (T*Bp, 4Hp)  VMEM scratch for the hoisted input projection
    """
    Bp = out_ref.shape[0]
    Hp = w_hh_ref.shape[0]
    T = x_ref.shape[0] // Bp

    # Hoisted input projection for ALL timesteps: one dense MXU matmul,
    # no serial dependence.
    xp_ref[...] = (
        jnp.dot(x_ref[...], w_ih_ref[...],
                precision=_HIGHEST, preferred_element_type=jnp.float32)
        + b_ref[...])

    h = jnp.zeros((Bp, Hp), jnp.float32)
    c = jnp.zeros((Bp, Hp), jnp.float32)

    # Static, fully-unrolled recurrence (T is a compile-time constant).
    for t in range(T):
        gates = xp_ref[t * Bp:(t + 1) * Bp, :] + jnp.dot(
            h, w_hh_ref[...],
            precision=_HIGHEST, preferred_element_type=jnp.float32)  # (Bp,4Hp)
        # Gate packing is [i|f|o|g]: one sigmoid over the contiguous first
        # 3*Hp lanes, one tanh over the last Hp lanes. All slices are
        # lane-block (128) aligned.
        sig = jax.nn.sigmoid(gates[:, 0:3 * Hp])
        i_g = sig[:, 0 * Hp:1 * Hp]
        f_g = sig[:, 1 * Hp:2 * Hp]
        o_g = sig[:, 2 * Hp:3 * Hp]
        g_g = jnp.tanh(gates[:, 3 * Hp:4 * Hp])
        c = f_g * c + i_g * g_g
        h = o_g * jnp.tanh(c)

    # Final FC on the last hidden state; lane-dense (Bp, Op) store.
    out_ref[...] = (
        jnp.dot(h, w_fc_ref[...],
                precision=_HIGHEST, preferred_element_type=jnp.float32)
        + b_fc_ref[...]).astype(out_ref.dtype)


# -----------------------------------------------------------------------------
# One-time parameter packing (NOT in the per-call jitted path)
# -----------------------------------------------------------------------------
def _pack_gate_cols(w, H, Hp):
    """(rows, 4H) with PyTorch gate blocks [i|f|g|o] -> (rows, 4Hp) with
    blocks reordered to [i|f|o|g], each zero-padded from width H to Hp."""
    order = (0, 1, 3, 2)  # i, f, o, g
    blocks = [jnp.pad(w[:, k * H:(k + 1) * H], ((0, 0), (0, Hp - H)))
              for k in order]
    return jnp.concatenate(blocks, axis=1)


def pack_params(params, input_dim, hidden_dim, output_dim):
    """Pad / reorder the logical params once; returns device-resident arrays."""
    w_ih, w_hh, b, w_fc, b_fc = params
    H = hidden_dim
    Dp = _round_up(input_dim, 8)      # sublane multiple only (not 128!)
    Hp = _round_up(H, 128)            # lane multiple
    Op = _round_up(output_dim, 128)   # lane multiple

    w_ih_p = jnp.pad(_pack_gate_cols(w_ih, H, Hp), ((0, Dp - input_dim), (0, 0)))
    w_hh_p = jnp.pad(_pack_gate_cols(w_hh, H, Hp), ((0, Hp - H), (0, 0)))
    b_p = _pack_gate_cols(b, H, Hp)
    w_fc_p = jnp.pad(w_fc, ((0, Hp - H), (0, Op - output_dim)))
    b_fc_p = jnp.pad(b_fc, ((0, 0), (0, Op - output_dim)))

    packed = (w_ih_p, w_hh_p, b_p, w_fc_p, b_fc_p)
    return tuple(jax.device_put(jax.block_until_ready(a)) for a in packed)


# -----------------------------------------------------------------------------
# Jitted forward (only x-side padding happens per call)
# -----------------------------------------------------------------------------
@functools.partial(jax.jit, static_argnums=(2,))
def sliding_window_lstm(x, packed_params, output_dim):
    """x: (B, T, input_dim) float32 (PyTorch batch_first layout)."""
    w_ih_p, w_hh_p, b_p, w_fc_p, b_fc_p = packed_params
    B, T, D_in = x.shape
    Dp = w_ih_p.shape[0]
    Hp = w_hh_p.shape[0]
    Op = w_fc_p.shape[1]
    Bp = _round_up(B, 8)  # sublane multiple

    # Time-major, padded, flattened input: (T*Bp, Dp).
    x_tm = jnp.transpose(x, (1, 0, 2))                       # (T, B, D_in)
    x_tm = jnp.pad(x_tm, ((0, 0), (0, Bp - B), (0, Dp - D_in)))
    x2d = x_tm.reshape(T * Bp, Dp)

    out_pad = pl.pallas_call(
        _lstm_kernel,
        out_shape=jax.ShapeDtypeStruct((Bp, Op), jnp.float32),
        in_specs=[pl.BlockSpec(memory_space=pltpu.MemorySpace.VMEM)] * 6,
        out_specs=pl.BlockSpec(memory_space=pltpu.MemorySpace.VMEM),
        scratch_shapes=[pltpu.VMEM((T * Bp, 4 * Hp), jnp.float32)],
    )(x2d, w_ih_p, w_hh_p, b_p, w_fc_p, b_fc_p)

    return out_pad[:B, :output_dim]


# -----------------------------------------------------------------------------
# Param init + pure-JAX reference (PyTorch semantics, gate order [i|f|g|o])
# -----------------------------------------------------------------------------
def init_params(key, input_dim, hidden_dim, output_dim):
    """Deterministic init matching PyTorch shapes (LSTM + Linear)."""
    k = jax.random.split(key, 6)
    s_lstm = 1.0 / np.sqrt(hidden_dim)
    s_fc = 1.0 / np.sqrt(hidden_dim)
    # PyTorch stores W_ih as (4H, D_in), W_hh as (4H, H); we keep transposed.
    w_ih = jax.random.uniform(k[0], (input_dim, 4 * hidden_dim),
                              jnp.float32, -s_lstm, s_lstm)
    w_hh = jax.random.uniform(k[1], (hidden_dim, 4 * hidden_dim),
                              jnp.float32, -s_lstm, s_lstm)
    b_ih = jax.random.uniform(k[2], (4 * hidden_dim,), jnp.float32,
                              -s_lstm, s_lstm)
    b_hh = jax.random.uniform(k[3], (4 * hidden_dim,), jnp.float32,
                              -s_lstm, s_lstm)
    b = (b_ih + b_hh).reshape(1, 4 * hidden_dim)
    w_fc = jax.random.uniform(k[4], (hidden_dim, output_dim),
                              jnp.float32, -s_fc, s_fc)
    b_fc = jax.random.uniform(k[5], (1, output_dim), jnp.float32, -s_fc, s_fc)
    return (w_ih, w_hh, b, w_fc, b_fc)


def reference_forward(x, params):
    """Pure-JAX reference of the PyTorch forward (for correctness check)."""
    w_ih, w_hh, b, w_fc, b_fc = params
    B, T, _ = x.shape
    H = w_hh.shape[0]

    def step(carry, x_t):
        h, c = carry
        gates = x_t @ w_ih + h @ w_hh + b
        i = jax.nn.sigmoid(gates[:, 0 * H:1 * H])
        f = jax.nn.sigmoid(gates[:, 1 * H:2 * H])
        g = jnp.tanh(gates[:, 2 * H:3 * H])
        o = jax.nn.sigmoid(gates[:, 3 * H:4 * H])
        c_new = f * c + i * g
        h_new = o * jnp.tanh(c_new)
        return (h_new, c_new), None

    h0 = jnp.zeros((B, H), jnp.float32)
    c0 = jnp.zeros((B, H), jnp.float32)
    (h_last, _), _ = jax.lax.scan(step, (h0, c0),
                                  jnp.transpose(x, (1, 0, 2)))
    return h_last @ w_fc + b_fc


if __name__ == "__main__":
    B, T, INPUT_DIM, HIDDEN_DIM, OUTPUT_DIM = 2, 8, 4, 32, 8

    key = jax.random.PRNGKey(0)
    kx, kp = jax.random.split(key)
    x = jax.random.normal(kx, (B, T, INPUT_DIM), dtype=jnp.float32)
    params = init_params(kp, INPUT_DIM, HIDDEN_DIM, OUTPUT_DIM)

    # One-time packing, outside the jitted forward.
    packed = pack_params(params, INPUT_DIM, HIDDEN_DIM, OUTPUT_DIM)

    out = sliding_window_lstm(x, packed, OUTPUT_DIM)
    out = jax.block_until_ready(out)

    ref = jax.block_until_ready(reference_forward(x, params))
    np.testing.assert_allclose(np.asarray(out), np.asarray(ref),
                               rtol=1e-5, atol=1e-5)

    print("KERNEL_OK")
</pallas_src>

<mosaic_0001>
module attributes {stable_mosaic.version = 11 : i64} {
  func.func @_lstm_kernel(%arg0: memref<64x8xf32, #tpu.memory_space<vmem>>, %arg1: memref<8x512xf32, #tpu.memory_space<vmem>>, %arg2: memref<128x512xf32, #tpu.memory_space<vmem>>, %arg3: memref<1x512xf32, #tpu.memory_space<vmem>>, %arg4: memref<128x128xf32, #tpu.memory_space<vmem>>, %arg5: memref<1x128xf32, #tpu.memory_space<vmem>>, %arg6: memref<8x128xf32, #tpu.memory_space<vmem>>, %arg7: memref<64x512xf32, #tpu.memory_space<vmem>>) attributes {dimension_semantics = [], scalar_prefetch = 0 : i64, scratch_operands = 1 : i64, tpu.core_type = #tpu.core_type<tc>} {
    %c0 = arith.constant 0 : index
    %c0_0 = arith.constant 0 : index
    %0 = vector.load %arg0[%c0, %c0_0] : memref<64x8xf32, #tpu.memory_space<vmem>>, vector<64x8xf32>
    %c0_1 = arith.constant 0 : index
    %c0_2 = arith.constant 0 : index
    %1 = vector.load %arg1[%c0_1, %c0_2] : memref<8x512xf32, #tpu.memory_space<vmem>>, vector<8x512xf32>
    %cst = arith.constant dense<0.000000e+00> : vector<64x512xf32>
    %2 = tpu.matmul %0, %1, %cst {dimension_numbers = #tpu.dot_dimension_numbers<[1], [0], [0], [1], [0, 0, 1, 1], [], []>, precision = #tpu.contract_precision<fp32>} : vector<64x8xf32>, vector<8x512xf32>, vector<64x512xf32> -> vector<64x512xf32>
    %c0_3 = arith.constant 0 : index
    %c0_4 = arith.constant 0 : index
    %3 = vector.load %arg3[%c0_3, %c0_4] : memref<1x512xf32, #tpu.memory_space<vmem>>, vector<1x512xf32>
    %4 = vector.broadcast %3 : vector<1x512xf32> to vector<64x512xf32>
    %5 = arith.addf %2, %4 : vector<64x512xf32>
    %c0_5 = arith.constant 0 : index
    %c0_6 = arith.constant 0 : index
    %6 = vector.load %arg7[%c0_5, %c0_6] : memref<64x512xf32, #tpu.memory_space<vmem>>, vector<64x512xf32>
    tpu.vector_store %arg7[%c0_5, %c0_6], %5 {strides = array<i32>} : memref<64x512xf32, #tpu.memory_space<vmem>>, vector<64x512xf32>,
    %cst_7 = arith.constant 0.000000e+00 : f32
    %7 = vector.broadcast %cst_7 : f32 to vector<8x128xf32>
    %cst_8 = arith.constant 0.000000e+00 : f32
    %8 = vector.broadcast %cst_8 : f32 to vector<8x128xf32>
    %c0_9 = arith.constant 0 : index
    %c0_10 = arith.constant 0 : index
    %9 = vector.load %arg7[%c0_9, %c0_10] : memref<64x512xf32, #tpu.memory_space<vmem>>, vector<8x512xf32>
    %c0_11 = arith.constant 0 : index
    %c0_12 = arith.constant 0 : index
    %10 = vector.load %arg2[%c0_11, %c0_12] : memref<128x512xf32, #tpu.memory_space<vmem>>, vector<128x512xf32>
    %cst_13 = arith.constant dense<0.000000e+00> : vector<8x512xf32>
    %11 = tpu.matmul %7, %10, %cst_13 {dimension_numbers = #tpu.dot_dimension_numbers<[1], [0], [0], [1], [0, 0, 1, 1], [], []>, precision = #tpu.contract_precision<fp32>} : vector<8x128xf32>, vector<128x512xf32>, vector<8x512xf32> -> vector<8x512xf32>
    %12 = arith.addf %9, %11 : vector<8x512xf32>
    %13 = vector.extract_strided_slice %12 {offsets = [0, 0], sizes = [8, 384], strides = [1, 1]} : vector<8x512xf32> to vector<8x384xf32>
    %14 = arith.negf %13 : vector<8x384xf32>
    %15 = math.exp %14 : vector<8x384xf32>
    %cst_14 = arith.constant 1.000000e+00 : f32
    %16 = vector.broadcast %cst_14 : f32 to vector<8x384xf32>
    %17 = arith.addf %16, %15 : vector<8x384xf32>
    %18 = arith.divf %16, %17 : vector<8x384xf32>
    %19 = vector.extract_strided_slice %18 {offsets = [0, 0], sizes = [8, 128], strides = [1, 1]} : vector<8x384xf32> to vector<8x128xf32>
    %20 = vector.extract_strided_slice %18 {offsets = [0, 128], sizes = [8, 128], strides = [1, 1]} : vector<8x384xf32> to vector<8x128xf32>
    %21 = vector.extract_strided_slice %18 {offsets = [0, 256], sizes = [8, 128], strides = [1, 1]} : vector<8x384xf32> to vector<8x128xf32>
    %22 = vector.extract_strided_slice %12 {offsets = [0, 384], sizes = [8, 128], strides = [1, 1]} : vector<8x512xf32> to vector<8x128xf32>
    %23 = math.tanh %22 : vector<8x128xf32>
    %24 = arith.mulf %20, %8 : vector<8x128xf32>
    %25 = arith.mulf %19, %23 : vector<8x128xf32>
    %26 = arith.addf %24, %25 : vector<8x128xf32>
    %27 = math.tanh %26 : vector<8x128xf32>
    %28 = arith.mulf %21, %27 : vector<8x128xf32>
    %c8 = arith.constant 8 : index
    %c0_15 = arith.constant 0 : index
    %29 = vector.load %arg7[%c8, %c0_15] : memref<64x512xf32, #tpu.memory_space<vmem>>, vector<8x512xf32>
    %c0_16 = arith.constant 0 : index
    %c0_17 = arith.constant 0 : index
    %30 = vector.load %arg2[%c0_16, %c0_17] : memref<128x512xf32, #tpu.memory_space<vmem>>, vector<128x512xf32>
    %cst_18 = arith.constant dense<0.000000e+00> : vector<8x512xf32>
    %31 = tpu.matmul %28, %30, %cst_18 {dimension_numbers = #tpu.dot_dimension_numbers<[1], [0], [0], [1], [0, 0, 1, 1], [], []>, precision = #tpu.contract_precision<fp32>} : vector<8x128xf32>, vector<128x512xf32>, vector<8x512xf32> -> vector<8x512xf32>
    %32 = arith.addf %29, %31 : vector<8x512xf32>
    %33 = vector.extract_strided_slice %32 {offsets = [0, 0], sizes = [8, 384], strides = [1, 1]} : vector<8x512xf32> to vector<8x384xf32>
    %34 = arith.negf %33 : vector<8x384xf32>
    %35 = math.exp %34 : vector<8x384xf32>
    %cst_19 = arith.constant 1.000000e+00 : f32
    %36 = vector.broadcast %cst_19 : f32 to vector<8x384xf32>
    %37 = arith.addf %36, %35 : vector<8x384xf32>
    %38 = arith.divf %36, %37 : vector<8x384xf32>
    %39 = vector.extract_strided_slice %38 {offsets = [0, 0], sizes = [8, 128], strides = [1, 1]} : vector<8x384xf32> to vector<8x128xf32>
    %40 = vector.extract_strided_slice %38 {offsets = [0, 128], sizes = [8, 128], strides = [1, 1]} : vector<8x384xf32> to vector<8x128xf32>
    %41 = vector.extract_strided_slice %38 {offsets = [0, 256], sizes = [8, 128], strides = [1, 1]} : vector<8x384xf32> to vector<8x128xf32>
    %42 = vector.extract_strided_slice %32 {offsets = [0, 384], sizes = [8, 128], strides = [1, 1]} : vector<8x512xf32> to vector<8x128xf32>
    %43 = math.tanh %42 : vector<8x128xf32>
    %44 = arith.mulf %40, %26 : vector<8x128xf32>
    %45 = arith.mulf %39, %43 : vector<8x128xf32>
    %46 = arith.addf %44, %45 : vector<8x128xf32>
    %47 = math.tanh %46 : vector<8x128xf32>
    %48 = arith.mulf %41, %47 : vector<8x128xf32>
    %c16 = arith.constant 16 : index
    %c0_20 = arith.constant 0 : index
    %49 = vector.load %arg7[%c16, %c0_20] : memref<64x512xf32, #tpu.memory_space<vmem>>, vector<8x512xf32>
    %c0_21 = arith.constant 0 : index
    %c0_22 = arith.constant 0 : index
    %50 = vector.load %arg2[%c0_21, %c0_22] : memref<128x512xf32, #tpu.memory_space<vmem>>, vector<128x512xf32>
    %cst_23 = arith.constant dense<0.000000e+00> : vector<8x512xf32>
    %51 = tpu.matmul %48, %50, %cst_23 {dimension_numbers = #tpu.dot_dimension_numbers<[1], [0], [0], [1], [0, 0, 1, 1], [], []>, precision = #tpu.contract_precision<fp32>} : vector<8x128xf32>, vector<128x512xf32>, vector<8x512xf32> -> vector<8x512xf32>
    %52 = arith.addf %49, %51 : vector<8x512xf32>
    %53 = vector.extract_strided_slice %52 {offsets = [0, 0], sizes = [8, 384], strides = [1, 1]} : vector<8x512xf32> to vector<8x384xf32>
    %54 = arith.negf %53 : vector<8x384xf32>
    %55 = math.exp %54 : vector<8x384xf32>
    %cst_24 = arith.constant 1.000000e+00 : f32
    %56 = vector.broadcast %cst_24 : f32 to vector<8x384xf32>
    %57 = arith.addf %56, %55 : vector<8x384xf32>
    %58 = arith.divf %56, %57 : vector<8x384xf32>
    %59 = vector.extract_strided_slice %58 {offsets = [0, 0], sizes = [8, 128], strides = [1, 1]} : vector<8x384xf32> to vector<8x128xf32>
    %60 = vector.extract_strided_slice %58 {offsets = [0, 128], sizes = [8, 128], strides = [1, 1]} : vector<8x384xf32> to vector<8x128xf32>
    %61 = vector.extract_strided_slice %58 {offsets = [0, 256], sizes = [8, 128], strides = [1, 1]} : vector<8x384xf32> to vector<8x128xf32>
    %62 = vector.extract_strided_slice %52 {offsets = [0, 384], sizes = [8, 128], strides = [1, 1]} : vector<8x512xf32> to vector<8x128xf32>
    %63 = math.tanh %62 : vector<8x128xf32>
    %64 = arith.mulf %60, %46 : vector<8x128xf32>
    %65 = arith.mulf %59, %63 : vector<8x128xf32>
    %66 = arith.addf %64, %65 : vector<8x128xf32>
    %67 = math.tanh %66 : vector<8x128xf32>
    %68 = arith.mulf %61, %67 : vector<8x128xf32>
    %c24 = arith.constant 24 : index
    %c0_25 = arith.constant 0 : index
    %69 = vector.load %arg7[%c24, %c0_25] : memref<64x512xf32, #tpu.memory_space<vmem>>, vector<8x512xf32>
    %c0_26 = arith.constant 0 : index
    %c0_27 = arith.constant 0 : index
    %70 = vector.load %arg2[%c0_26, %c0_27] : memref<128x512xf32, #tpu.memory_space<vmem>>, vector<128x512xf32>
    %cst_28 = arith.constant dense<0.000000e+00> : vector<8x512xf32>
    %71 = tpu.matmul %68, %70, %cst_28 {dimension_numbers = #tpu.dot_dimension_numbers<[1], [0], [0], [1], [0, 0, 1, 1], [], []>, precision = #tpu.contract_precision<fp32>} : vector<8x128xf32>, vector<128x512xf32>, vector<8x512xf32> -> vector<8x512xf32>
    %72 = arith.addf %69, %71 : vector<8x512xf32>
    %73 = vector.extract_strided_slice %72 {offsets = [0, 0], sizes = [8, 384], strides = [1, 1]} : vector<8x512xf32> to vector<8x384xf32>
    %74 = arith.negf %73 : vector<8x384xf32>
    %75 = math.exp %74 : vector<8x384xf32>
    %cst_29 = arith.constant 1.000000e+00 : f32
    %76 = vector.broadcast %cst_29 : f32 to vector<8x384xf32>
    %77 = arith.addf %76, %75 : vector<8x384xf32>
    %78 = arith.divf %76, %77 : vector<8x384xf32>
    %79 = vector.extract_strided_slice %78 {offsets = [0, 0], sizes = [8, 128], strides = [1, 1]} : vector<8x384xf32> to vector<8x128xf32>
    %80 = vector.extract_strided_slice %78 {offsets = [0, 128], sizes = [8, 128], strides = [1, 1]} : vector<8x384xf32> to vector<8x128xf32>
    %81 = vector.extract_strided_slice %78 {offsets = [0, 256], sizes = [8, 128], strides = [1, 1]} : vector<8x384xf32> to vector<8x128xf32>
    %82 = vector.extract_strided_slice %72 {offsets = [0, 384], sizes = [8, 128], strides = [1, 1]} : vector<8x512xf32> to vector<8x128xf32>
    %83 = math.tanh %82 : vector<8x128xf32>
    %84 = arith.mulf %80, %66 : vector<8x128xf32>
    %85 = arith.mulf %79, %83 : vector<8x128xf32>
    %86 = arith.addf %84, %85 : vector<8x128xf32>
    %87 = math.tanh %86 : vector<8x128xf32>
    %88 = arith.mulf %81, %87 : vector<8x128xf32>
    %c32 = arith.constant 32 : index
    %c0_30 = arith.constant 0 : index
    %89 = vector.load %arg7[%c32, %c0_30] : memref<64x512xf32, #tpu.memory_space<vmem>>, vector<8x512xf32>
    %c0_31 = arith.constant 0 : index
    %c0_32 = arith.constant 0 : index
    %90 = vector.load %arg2[%c0_31, %c0_32] : memref<128x512xf32, #tpu.memory_space<vmem>>, vector<128x512xf32>
    %cst_33 = arith.constant dense<0.000000e+00> : vector<8x512xf32>
    %91 = tpu.matmul %88, %90, %cst_33 {dimension_numbers = #tpu.dot_dimension_numbers<[1], [0], [0], [1], [0, 0, 1, 1], [], []>, precision = #tpu.contract_precision<fp32>} : vector<8x128xf32>, vector<128x512xf32>, vector<8x512xf32> -> vector<8x512xf32>
    %92 = arith.addf %89, %91 : vector<8x512xf32>
    %93 = vector.extract_strided_slice %92 {offsets = [0, 0], sizes = [8, 384], strides = [1, 1]} : vector<8x512xf32> to vector<8x384xf32>
    %94 = arith.negf %93 : vector<8x384xf32>
    %95 = math.exp %94 : vector<8x384xf32>
    %cst_34 = arith.constant 1.000000e+00 : f32
    %96 = vector.broadcast %cst_34 : f32 to vector<8x384xf32>
    %97 = arith.addf %96, %95 : vector<8x384xf32>
    %98 = arith.divf %96, %97 : vector<8x384xf32>
    %99 = vector.extract_strided_slice %98 {offsets = [0, 0], sizes = [8, 128], strides = [1, 1]} : vector<8x384xf32> to vector<8x128xf32>
    %100 = vector.extract_strided_slice %98 {offsets = [0, 128], sizes = [8, 128], strides = [1, 1]} : vector<8x384xf32> to vector<8x128xf32>
    %101 = vector.extract_strided_slice %98 {offsets = [0, 256], sizes = [8, 128], strides = [1, 1]} : vector<8x384xf32> to vector<8x128xf32>
    %102 = vector.extract_strided_slice %92 {offsets = [0, 384], sizes = [8, 128], strides = [1, 1]} : vector<8x512xf32> to vector<8x128xf32>
    %103 = math.tanh %102 : vector<8x128xf32>
    %104 = arith.mulf %100, %86 : vector<8x128xf32>
    %105 = arith.mulf %99, %103 : vector<8x128xf32>
    %106 = arith.addf %104, %105 : vector<8x128xf32>
    %107 = math.tanh %106 : vector<8x128xf32>
    %108 = arith.mulf %101, %107 : vector<8x128xf32>
    %c40 = arith.constant 40 : index
    %c0_35 = arith.constant 0 : index
    %109 = vector.load %arg7[%c40, %c0_35] : memref<64x512xf32, #tpu.memory_space<vmem>>, vector<8x512xf32>
    %c0_36 = arith.constant 0 : index
    %c0_37 = arith.constant 0 : index
    %110 = vector.load %arg2[%c0_36, %c0_37] : memref<128x512xf32, #tpu.memory_space<vmem>>, vector<128x512xf32>
    %cst_38 = arith.constant dense<0.000000e+00> : vector<8x512xf32>
    %111 = tpu.matmul %108, %110, %cst_38 {dimension_numbers = #tpu.dot_dimension_numbers<[1], [0], [0], [1], [0, 0, 1, 1], [], []>, precision = #tpu.contract_precision<fp32>} : vector<8x128xf32>, vector<128x512xf32>, vector<8x512xf32> -> vector<8x512xf32>
    %112 = arith.addf %109, %111 : vector<8x512xf32>
    %113 = vector.extract_strided_slice %112 {offsets = [0, 0], sizes = [8, 384], strides = [1, 1]} : vector<8x512xf32> to vector<8x384xf32>
    %114 = arith.negf %113 : vector<8x384xf32>
    %115 = math.exp %114 : vector<8x384xf32>
    %cst_39 = arith.constant 1.000000e+00 : f32
    %116 = vector.broadcast %cst_39 : f32 to vector<8x384xf32>
    %117 = arith.addf %116, %115 : vector<8x384xf32>
    %118 = arith.divf %116, %117 : vector<8x384xf32>
    %119 = vector.extract_strided_slice %118 {offsets = [0, 0], sizes = [8, 128], strides = [1, 1]} : vector<8x384xf32> to vector<8x128xf32>
    %120 = vector.extract_strided_slice %118 {offsets = [0, 128], sizes = [8, 128], strides = [1, 1]} : vector<8x384xf32> to vector<8x128xf32>
    %121 = vector.extract_strided_slice %118 {offsets = [0, 256], sizes = [8, 128], strides = [1, 1]} : vector<8x384xf32> to vector<8x128xf32>
    %122 = vector.extract_strided_slice %112 {offsets = [0, 384], sizes = [8, 128], strides = [1, 1]} : vector<8x512xf32> to vector<8x128xf32>
    %123 = math.tanh %122 : vector<8x128xf32>
    %124 = arith.mulf %120, %106 : vector<8x128xf32>
    %125 = arith.mulf %119, %123 : vector<8x128xf32>
    %126 = arith.addf %124, %125 : vector<8x128xf32>
    %127 = math.tanh %126 : vector<8x128xf32>
    %128 = arith.mulf %121, %127 : vector<8x128xf32>
    %c48 = arith.constant 48 : index
    %c0_40 = arith.constant 0 : index
    %129 = vector.load %arg7[%c48, %c0_40] : memref<64x512xf32, #tpu.memory_space<vmem>>, vector<8x512xf32>
    %c0_41 = arith.constant 0 : index
    %c0_42 = arith.constant 0 : index
    %130 = vector.load %arg2[%c0_41, %c0_42] : memref<128x512xf32, #tpu.memory_space<vmem>>, vector<128x512xf32>
    %cst_43 = arith.constant dense<0.000000e+00> : vector<8x512xf32>
    %131 = tpu.matmul %128, %130, %cst_43 {dimension_numbers = #tpu.dot_dimension_numbers<[1], [0], [0], [1], [0, 0, 1, 1], [], []>, precision = #tpu.contract_precision<fp32>} : vector<8x128xf32>, vector<128x512xf32>, vector<8x512xf32> -> vector<8x512xf32>
    %132 = arith.addf %129, %131 : vector<8x512xf32>
    %133 = vector.extract_strided_slice %132 {offsets = [0, 0], sizes = [8, 384], strides = [1, 1]} : vector<8x512xf32> to vector<8x384xf32>
    %134 = arith.negf %133 : vector<8x384xf32>
    %135 = math.exp %134 : vector<8x384xf32>
    %cst_44 = arith.constant 1.000000e+00 : f32
    %136 = vector.broadcast %cst_44 : f32 to vector<8x384xf32>
    %137 = arith.addf %136, %135 : vector<8x384xf32>
    %138 = arith.divf %136, %137 : vector<8x384xf32>
    %139 = vector.extract_strided_slice %138 {offsets = [0, 0], sizes = [8, 128], strides = [1, 1]} : vector<8x384xf32> to vector<8x128xf32>
    %140 = vector.extract_strided_slice %138 {offsets = [0, 128], sizes = [8, 128], strides = [1, 1]} : vector<8x384xf32> to vector<8x128xf32>
    %141 = vector.extract_strided_slice %138 {offsets = [0, 256], sizes = [8, 128], strides = [1, 1]} : vector<8x384xf32> to vector<8x128xf32>
    %142 = vector.extract_strided_slice %132 {offsets = [0, 384], sizes = [8, 128], strides = [1, 1]} : vector<8x512xf32> to vector<8x128xf32>
    %143 = math.tanh %142 : vector<8x128xf32>
    %144 = arith.mulf %140, %126 : vector<8x128xf32>
    %145 = arith.mulf %139, %143 : vector<8x128xf32>
    %146 = arith.addf %144, %145 : vector<8x128xf32>
    %147 = math.tanh %146 : vector<8x128xf32>
    %148 = arith.mulf %141, %147 : vector<8x128xf32>
    %c56 = arith.constant 56 : index
    %c0_45 = arith.constant 0 : index
    %149 = vector.load %arg7[%c56, %c0_45] : memref<64x512xf32, #tpu.memory_space<vmem>>, vector<8x512xf32>
    %c0_46 = arith.constant 0 : index
    %c0_47 = arith.constant 0 : index
    %150 = vector.load %arg2[%c0_46, %c0_47] : memref<128x512xf32, #tpu.memory_space<vmem>>, vector<128x512xf32>
    %cst_48 = arith.constant dense<0.000000e+00> : vector<8x512xf32>
    %151 = tpu.matmul %148, %150, %cst_48 {dimension_numbers = #tpu.dot_dimension_numbers<[1], [0], [0], [1], [0, 0, 1, 1], [], []>, precision = #tpu.contract_precision<fp32>} : vector<8x128xf32>, vector<128x512xf32>, vector<8x512xf32> -> vector<8x512xf32>
    %152 = arith.addf %149, %151 : vector<8x512xf32>
    %153 = vector.extract_strided_slice %152 {offsets = [0, 0], sizes = [8, 384], strides = [1, 1]} : vector<8x512xf32> to vector<8x384xf32>
    %154 = arith.negf %153 : vector<8x384xf32>
    %155 = math.exp %154 : vector<8x384xf32>
    %cst_49 = arith.constant 1.000000e+00 : f32
    %156 = vector.broadcast %cst_49 : f32 to vector<8x384xf32>
    %157 = arith.addf %156, %155 : vector<8x384xf32>
    %158 = arith.divf %156, %157 : vector<8x384xf32>
    %159 = vector.extract_strided_slice %158 {offsets = [0, 0], sizes = [8, 128], strides = [1, 1]} : vector<8x384xf32> to vector<8x128xf32>
    %160 = vector.extract_strided_slice %158 {offsets = [0, 128], sizes = [8, 128], strides = [1, 1]} : vector<8x384xf32> to vector<8x128xf32>
    %161 = vector.extract_strided_slice %158 {offsets = [0, 256], sizes = [8, 128], strides = [1, 1]} : vector<8x384xf32> to vector<8x128xf32>
    %162 = vector.extract_strided_slice %152 {offsets = [0, 384], sizes = [8, 128], strides = [1, 1]} : vector<8x512xf32> to vector<8x128xf32>
    %163 = math.tanh %162 : vector<8x128xf32>
    %164 = arith.mulf %160, %146 : vector<8x128xf32>
    %165 = arith.mulf %159, %163 : vector<8x128xf32>
    %166 = arith.addf %164, %165 : vector<8x128xf32>
    %167 = math.tanh %166 : vector<8x128xf32>
    %168 = arith.mulf %161, %167 : vector<8x128xf32>
    %c0_50 = arith.constant 0 : index
    %c0_51 = arith.constant 0 : index
    %169 = vector.load %arg4[%c0_50, %c0_51] : memref<128x128xf32, #tpu.memory_space<vmem>>, vector<128x128xf32>
    %cst_52 = arith.constant dense<0.000000e+00> : vector<8x128xf32>
    %170 = tpu.matmul %168, %169, %cst_52 {dimension_numbers = #tpu.dot_dimension_numbers<[1], [0], [0], [1], [0, 0, 1, 1], [], []>, precision = #tpu.contract_precision<fp32>} : vector<8x128xf32>, vector<128x128xf32>, vector<8x128xf32> -> vector<8x128xf32>
    %c0_53 = arith.constant 0 : index
    %c0_54 = arith.constant 0 : index
    %171 = vector.load %arg5[%c0_53, %c0_54] : memref<1x128xf32, #tpu.memory_space<vmem>>, vector<1x128xf32>
    %172 = vector.broadcast %171 : vector<1x128xf32> to vector<8x128xf32>
    %173 = arith.addf %170, %172 : vector<8x128xf32>
    %c0_55 = arith.constant 0 : index
    %c0_56 = arith.constant 0 : index
    %174 = vector.load %arg6[%c0_55, %c0_56] : memref<8x128xf32, #tpu.memory_space<vmem>>, vector<8x128xf32>
    tpu.vector_store %arg6[%c0_55, %c0_56], %173 {strides = array<i32>} : memref<8x128xf32, #tpu.memory_space<vmem>>, vector<8x128xf32>,
    return
  }
}

</mosaic_0001>

<bundles_post_ra>
// kernel: sliding_window_lstm.1
= control target key start
LH: loop header
LB: loop body
LE: loop exit
PB: predicated region body
PF: predicated region fallthrough
CT: control target
= control target key end

     0   :  { %11 = vsyncpa [#allocation4], 0  ;;  %s22339_s0 = inlined_call_operand.vmem [shape: f32[64,8], index: 0, kind: input, shape index: {}]   ;;  %s22340_s1 = inlined_call_operand.vmem [shape: f32[8,512], index: 1, kind: input, shape index: {}]   ;;  %s22341_s2 = inlined_call_operand.hbm [shape: f32[128,512], index: 2, kind: input, shape index: {}]   ;;  %s22342_s3 = inlined_call_operand.vmem [shape: f32[1,512], index: 3, kind: input, shape index: {}]   ;;  %s22343_s4 = inlined_call_operand.hbm [shape: f32[128,128], index: 4, kind: input, shape index: {}]   ;;  %s22344_s5 = inlined_call_operand.vmem [shape: f32[1,128], index: 5, kind: input, shape index: {}]   ;;  %s22345_s6 = inlined_call_operand.vmem [shape: f32[8,128], index: 6, kind: output, shape index: {}]  }
   0x1   :  { %12 = vsyncpa [#allocation6], 0  ;;  %s16921_s21 = smov [#allocation3]  }
   0x2   :  { %s22_s22 = sshll.u32 %s16921_s21, 4  ;;  %s23_s22 = int_to_ptr.vmem [resolvable:$true] %s22_s22 }
   0x3   :  { %s16885_s23 = scalar_lea.vmem %s23_s22, 8192  ;;  %p16890_p1 = scmp.lt.s32.totalorder %s23_s22, %s23_s22 }
   0x4   :  { %p16886_p0 = scmp.ne.s32.totalorder %s23_s22, %s16885_s23  ;;  %p16891_p2 = scmp.lt.s32.totalorder %s16885_s23, %s16885_s23 }
   0x6   :  { %p16892_p3 = por %p16891_p2, %p16890_p1 }
   0x8   :  { %p16893_p4 = pnand %p16892_p3, %p16886_p0 }
   0xa   :  { %16896 = shalt.err (!%p16893_p4)
}
   0xb   :  { %s16922_s24 = smov 512   ;;  %s16923_s25 = smov 32  }
   0xc   :  { %28 = dma.hbm_to_vmem [thread:$0]  %s22341_s2, 8192, %s23_s22, [#allocation4], %s16922_s24, %s16922_s24, %s16923_s25  }
   0xd   :  { %s16924_s28 = smov [#allocation5]  }
   0xe   :  { %s36_s29 = sshll.u32 %s16924_s28, 4  ;;  %s37_s29 = int_to_ptr.vmem [resolvable:$true] %s36_s29 }
   0xf   :  { %s16905_s30 = scalar_lea.vmem %s37_s29, 2048  ;;  %p16910_p6 = scmp.lt.s32.totalorder %s37_s29, %s37_s29 }
  0x10   :  { %p16906_p5 = scmp.ne.s32.totalorder %s37_s29, %s16905_s30  ;;  %p16911_p7 = scmp.lt.s32.totalorder %s16905_s30, %s16905_s30 }
  0x12   :  { %p16912_p8 = por %p16911_p7, %p16910_p6 }
  0x14   :  { %p16913_p9 = pnand %p16912_p8, %p16906_p5 }
  0x16   :  { %16916 = shalt.err (!%p16913_p9)
}
  0x17   :  { %s16925_s7 = smov 128   ;;  %s16926_s8 = smov 8  }
  0x18   :  { %42 = dma.hbm_to_vmem [thread:$0]  %s22343_s4, 2048, %s37_s29, [#allocation6], %s16925_s7, %s16925_s7, %s16926_s8  }
  0x19   :  { %16917 = dma.done.wait [#allocation4], 8192  }
  0x1a   :  { %16918 = vsyncadd [#allocation4], 4294959104 }
  0x1b   :  { %16919 = dma.done.wait [#allocation6], 2048  }
  0x1c   :  { %16920 = vsyncadd [#allocation6], 4294965248  ;;  %v22352_v0 = vmov 0.0   ;;  %vm85_vm0 = vcmask 64512   ;;  %v60_v1 = vld [vmem:[%s22340_s1 + $0x8] sm:$0xff]  ;;  %v59_v2 = vld [vmem:[%s22340_s1] sm:$0xff] }
  0x1d   :  { %176 = vmatprep.mubr.f32.mxu0 %v22352_v0  ;;  %339 = vmatprep.mubr.f32.mxu1 %v22352_v0  ;;  %v51_v3 = vld [vmem:[%s22339_s0] sm:$0xff]  ;;  %v16981_v4 = vand.u32 4294901760, %v60_v1  ;;  %v16983_v5 = vand.u32 4294901760, %v59_v2  ;;  %v52_v7 = vld [vmem:[%s22339_s0 + $0x8] sm:$0xff]  ;;  %v53_v8 = vld [vmem:[%s22339_s0 + $0x10] sm:$0xff]  ;;  %vm16928_vm1 = vmmov 0  }
  0x1e   :  { %v87_v6 = vsel %vm85_vm0, %v51_v3, 0  ;;  %v54_v9 = vld [vmem:[%s22339_s0 + $0x18] sm:$0xff]  ;;  %v90_v11 = vsel %vm85_vm0, %v52_v7, 0  ;;  %v93_v12 = vsel %vm85_vm0, %v53_v8, 0  ;;  %v55_v14 = vld [vmem:[%s22339_s0 + $0x20] sm:$0xff]  ;;  %v56_v22 = vld [vmem:[%s22339_s0 + $0x28] sm:$0xff] }
  0x1f   :  { %v16995_v10 = vand.u32 4294901760, %v87_v6  ;;  %v96_v13 = vsel %vm85_vm0, %v54_v9, 0  ;;  %141 = vmatprep.subr.mxu0 %v16981_v4  ;;  %v296_v15 = vsub.f32 %v60_v1, %v16981_v4  ;;  %v17006_v16 = vsub.f32 %v59_v2, %v16983_v5  ;;  %v57_v40 = vld [vmem:[%s22339_s0 + $0x30] sm:$0xff]  ;;  %v58_v47 = vld [vmem:[%s22339_s0 + $0x38] sm:$0xff] }
  0x20   :  { %v17008_v17 = vand.u32 4294901760, %v90_v11  ;;  %v17010_v18 = vand.u32 4294901760, %v93_v12  ;;  %143 = vmatpush1.msra.mxu0 %v16983_v5  ;;  %v17016_v20 = vand.u32 4294901760, %v96_v13  ;;  %v99_v21 = vsel %vm85_vm0, %v55_v14, 0  ;;  %v62_v63 = vld [vmem:[%s22340_s1 + $0x18] sm:$0xff] }
  0x21   :  { %v17014_v19 = vsub.f32 %v87_v6, %v16995_v10  ;;  %v297_v23 = vand.u32 4294901760, %v296_v15  ;;  %428 = vmatprep.subr.mxu0 %v296_v15  ;;  %v303_v24 = vand.u32 4294901760, %v17006_v16  ;;  %v102_v31 = vsel %vm85_vm0, %v56_v22, 0 }
  0x22   :  { %v17024_v25 = vsub.f32 %v90_v11, %v17008_v17  ;;  %v17027_v26 = vsub.f32 %v93_v12, %v17010_v18  ;;  %v17045_v34 = vsub.f32 %v96_v13, %v17016_v20  ;;  %v17047_v35 = vand.u32 4294901760, %v99_v21 }
  0x23   :  { %v17030_v27 = vand.u32 4294901760, %v17014_v19  ;;  %v298_v28 = vsub.f32 %v296_v15, %v297_v23  ;;  %v304_v29 = vsub.f32 %v17006_v16, %v303_v24  ;;  %v17056_v41 = vand.u32 4294901760, %v102_v31 }
  0x24   :  { %v17036_v30 = vand.u32 4294901760, %v17024_v25  ;;  %v17042_v33 = vand.u32 4294901760, %v17027_v26  ;;  %v17064_v44 = vand.u32 4294901760, %v17045_v34  ;;  %v17067_v45 = vsub.f32 %v99_v21, %v17047_v35 }
  0x25   :  { %v180_v32 = vsub.f32 %v17014_v19, %v17030_v27  ;;  %v299_v36 = vand.u32 4294901760, %v298_v28  ;;  %v305_v37 = vand.u32 4294901760, %v304_v29  ;;  %v105_v46 = vsel %vm85_vm0, %v57_v40, 0 }
  0x26   :  { %v191_v38 = vsub.f32 %v17024_v25, %v17036_v30  ;;  %v202_v43 = vsub.f32 %v17027_v26, %v17042_v33  ;;  %v17080_v48 = vsub.f32 %v102_v31, %v17056_v41  ;;  %v213_v50 = vsub.f32 %v17045_v34, %v17064_v44 }
  0x27   :  { %v17051_v39 = vand.u32 4294901760, %v180_v32  ;;  %300 = vmatprep.subr.mxu1 %v299_v36  ;;  %v17088_v51 = vand.u32 4294901760, %v17067_v45  ;;  %v17090_v52 = vand.u32 4294901760, %v105_v46  ;;  %v108_v53 = vsel %vm85_vm0, %v58_v47, 0  ;;  %v1814_v36 = vld [vmem:[#allocation3 + $0x1a0] sm:$0xff] }
  0x28   :  { %306 = vmatpush1.msra.mxu1 %v305_v37  ;;  %v17059_v42 = vand.u32 4294901760, %v191_v38  ;;  %v17083_v49 = vand.u32 4294901760, %v202_v43  ;;  %v17098_v54 = vand.u32 4294901760, %v17080_v48  ;;  %v17101_v55 = vand.u32 4294901760, %v213_v50  ;;  %v1811_v37 = vld [vmem:[#allocation3 + $0x188] sm:$0xff] }
  0x29   :  { %182 = vmatmul.mubr.f32.vlgmr.msra.gmra.mxu0 %v17051_v39  ;;  %341 = vmatmul.mubr.f32.vlgmr.msra.gmra.mxu1 %v16995_v10  ;;  %v224_v56 = vsub.f32 %v17067_v45, %v17088_v51  ;;  %v17106_v57 = vsub.f32 %v105_v46, %v17090_v52  ;;  %v17108_v58 = vand.u32 4294901760, %v108_v53  ;;  %v17342_v43 = vand.u32 4294901760, %v1811_v37 }
  0x2a   :  { %431 = vmatpush1.msra.mxu0 %v17006_v16  ;;  %560 = vmatprep.subr.mxu1 %v16981_v4  ;;  %v235_v60 = vsub.f32 %v17080_v48, %v17098_v54 }
  0x2b   :  { %187 = vmatprep.mubr.f32.mxu0 %v22352_v0  ;;  %562 = vmatpush1.msra.mxu1 %v16983_v5  ;;  %v17114_v59 = vand.u32 4294901760, %v224_v56  ;;  %v17119_v61 = vand.u32 4294901760, %v17106_v57  ;;  %v17122_v62 = vsub.f32 %v108_v53, %v17108_v58  ;;  %23139 = vst [vmem:[#allocation20_spill] sm:$0xff] %v17342_v43 }
  0x2c   :  { %346 = vmatprep.mubr.f32.mxu1 %v22352_v0  ;;  %701 = vmatprep.subr.mxu0 %v297_v23  ;;  %v17131_v1 = vand.u32 4294901760, %v235_v60  ;;  %v1823_v23 = vld [vmem:[#allocation3 + $0x1e8] sm:$0xff] }
  0x2d   :  { %193 = vmatmul.mubr.f32.gmra.mxu0 %v17059_v42  ;;  %348 = vmatmul.mubr.f32.gmra.mxu1 %v17008_v17  ;;  %v246_v2 = vsub.f32 %v17106_v57, %v17119_v61  ;;  %v17136_v3 = vand.u32 4294901760, %v17122_v62 }
  0x2e   :  { %198 = vmatprep.mubr.f32.mxu0 %v22352_v0  ;;  %353 = vmatprep.mubr.f32.mxu1 %v22352_v0 }
  0x2f   :  { %826 = vmatprep.subr.mxu1 %v16981_v4  ;;  %v17138_v4 = vand.u32 4294901760, %v62_v63  ;;  %v17144_v6 = vand.u32 4294901760, %v246_v2  ;;  %v257_v7 = vsub.f32 %v17122_v62, %v17136_v3 }
  0x31   :  { %204 = vmatmul.mubr.f32.gmra.mxu0 %v17083_v49  ;;  %355 = vmatmul.mubr.f32.gmra.mxu1 %v17010_v18  ;;  %v17149_v8 = vsub.f32 %v62_v63, %v17138_v4  ;;  %v17155_v9 = vand.u32 4294901760, %v257_v7 }
  0x32   :  { %209 = vmatprep.mubr.f32.mxu0 %v22352_v0  ;;  %360 = vmatprep.mubr.f32.mxu1 %v22352_v0 }
  0x33   :  { %v1105_v11 = vand.u32 4294901760, %v17149_v8 }
  0x35   :  { %215 = vmatmul.mubr.f32.gmra.mxu0 %v17101_v55  ;;  %362 = vmatmul.mubr.f32.gmra.mxu1 %v17016_v20  ;;  %v1106_v12 = vsub.f32 %v17149_v8, %v1105_v11 }
  0x36   :  { %220 = vmatprep.mubr.f32.mxu0 %v22352_v0  ;;  %367 = vmatprep.mubr.f32.mxu1 %v22352_v0 }
  0x37   :  { %v1107_v13 = vand.u32 4294901760, %v1106_v12 }
  0x39   :  { %226 = vmatmul.mubr.f32.gmra.mxu0 %v17114_v59  ;;  %369 = vmatmul.mubr.f32.gmra.mxu1 %v17047_v35 }
  0x3a   :  { %231 = vmatprep.mubr.f32.mxu0 %v22352_v0  ;;  %374 = vmatprep.mubr.f32.mxu1 %v22352_v0 }
  0x3d   :  { %237 = vmatmul.mubr.f32.gmra.mxu0 %v17131_v1  ;;  %376 = vmatmul.mubr.f32.gmra.mxu1 %v17056_v41 }
  0x3e   :  { %242 = vmatprep.mubr.f32.mxu0 %v22352_v0  ;;  %381 = vmatprep.mubr.f32.mxu1 %v22352_v0 }
  0x41   :  { %248 = vmatmul.mubr.f32.gmra.mxu0 %v17144_v6  ;;  %383 = vmatmul.mubr.f32.gmra.mxu1 %v17090_v52 }
  0x42   :  { %253 = vmatprep.mubr.f32.mxu0 %v22352_v0  ;;  %388 = vmatprep.mubr.f32.mxu1 %v22352_v0 }
  0x45   :  { %259 = vmatmul.mubr.f32.gmra.mxu0 %v17155_v9  ;;  %390 = vmatmul.mubr.f32.gmra.mxu1 %v17108_v58 }
  0x46   :  { %464 = vmatprep.mubr.f32.mxu0 %v22352_v0  ;;  %595 = vmatprep.mubr.f32.mxu1 %v22352_v0 }
  0x49   :  { %467 = vmatmul.mubr.f32.vlgmr.msra.gmra.mxu0 %v17014_v19  ;;  %599 = vmatmul.mubr.f32.vlgmr.msra.gmra.mxu1 %v17030_v27 }
  0x4a   :  { %705 = vmatpush1.msra.mxu0 %v303_v24  ;;  %828 = vmatpush1.msra.mxu1 %v16983_v5  ;;  %v61_v5 = vld [vmem:[%s22340_s1 + $0x10] sm:$0xff]  ;;  %v17273_v24 = vand.u32 4294901760, %v1823_v23 }
  0x4b   :  { %472 = vmatprep.mubr.f32.mxu0 %v22352_v0  ;;  %604 = vmatprep.mubr.f32.mxu1 %v22352_v0  ;;  %v17191_v14 = vand.u32 4294901760, %v61_v5 }
  0x4c   :  { %949 = vmatprep.subr.mxu0 %v17138_v4  ;;  %1108 = vmatprep.subr.mxu1 %v1107_v13  ;;  %23128 = vst [vmem:[#allocation9_spill] sm:$0xff] %v17273_v24  ;;  %v17280_v28 = vsub.f32 %v1823_v23, %v17273_v24 }
  0x4d   :  { %475 = vmatmul.mubr.f32.gmra.mxu0 %v17024_v25  ;;  %608 = vmatmul.mubr.f32.gmra.mxu1 %v17036_v30  ;;  %v17198_v15 = vsub.f32 %v61_v5, %v17191_v14 }
  0x4e   :  { %480 = vmatprep.mubr.f32.mxu0 %v22352_v0  ;;  %613 = vmatprep.mubr.f32.mxu1 %v22352_v0  ;;  %23129 = vst [vmem:[#allocation10_spill] sm:$0xff] %v17280_v28  ;;  %v17287_v29 = vand.u32 4294901760, %v17280_v28 }
  0x4f   :  { %v1111_v16 = vand.u32 4294901760, %v17198_v15 }
  0x50   :  { %23130 = vst [vmem:[#allocation11_spill] sm:$0xff] %v17287_v29  ;;  %v1932_v31 = vsub.f32 %v17280_v28, %v17287_v29 }
  0x51   :  { %483 = vmatmul.mubr.f32.gmra.mxu0 %v17027_v26  ;;  %617 = vmatmul.mubr.f32.gmra.mxu1 %v17042_v33  ;;  %v1112_v21 = vsub.f32 %v17198_v15, %v1111_v16 }
  0x52   :  { %488 = vmatprep.mubr.f32.mxu0 %v22352_v0  ;;  %622 = vmatprep.mubr.f32.mxu1 %v22352_v0  ;;  %v17299_v32 = vand.u32 4294901760, %v1932_v31 }
  0x53   :  { %v1113_v22 = vand.u32 4294901760, %v1112_v21 }
  0x54   :  { %23131 = vst [vmem:[#allocation12_spill] sm:$0xff] %v17299_v32 }
  0x55   :  { %491 = vmatmul.mubr.f32.gmra.mxu0 %v17045_v34  ;;  %626 = vmatmul.mubr.f32.gmra.mxu1 %v17064_v44 }
  0x56   :  { %496 = vmatprep.mubr.f32.mxu0 %v22352_v0  ;;  %631 = vmatprep.mubr.f32.mxu1 %v22352_v0 }
  0x59   :  { %499 = vmatmul.mubr.f32.gmra.mxu0 %v17067_v45  ;;  %635 = vmatmul.mubr.f32.gmra.mxu1 %v17088_v51 }
  0x5a   :  { %504 = vmatprep.mubr.f32.mxu0 %v22352_v0  ;;  %640 = vmatprep.mubr.f32.mxu1 %v22352_v0 }
  0x5d   :  { %507 = vmatmul.mubr.f32.gmra.mxu0 %v17080_v48  ;;  %644 = vmatmul.mubr.f32.gmra.mxu1 %v17098_v54 }
  0x5e   :  { %512 = vmatprep.mubr.f32.mxu0 %v22352_v0  ;;  %649 = vmatprep.mubr.f32.mxu1 %v22352_v0 }
  0x61   :  { %515 = vmatmul.mubr.f32.gmra.mxu0 %v17106_v57  ;;  %653 = vmatmul.mubr.f32.gmra.mxu1 %v17119_v61 }
  0x62   :  { %520 = vmatprep.mubr.f32.mxu0 %v22352_v0  ;;  %658 = vmatprep.mubr.f32.mxu1 %v22352_v0 }
  0x65   :  { %523 = vmatmul.mubr.f32.gmra.mxu0 %v17122_v62  ;;  %662 = vmatmul.mubr.f32.gmra.mxu1 %v17136_v3 }
  0x66   :  { %738 = vmatprep.mubr.f32.mxu0 %v22352_v0  ;;  %861 = vmatprep.mubr.f32.mxu1 %v22352_v0 }
  0x69   :  { %740 = vmatmul.mubr.f32.vlgmr.msra.gmra.mxu0 %v16995_v10  ;;  %863 = vmatmul.mubr.f32.vlgmr.msra.gmra.mxu1 %v16995_v10 }
  0x6a   :  { %951 = vmatpush1.msra.mxu0 %v17191_v14  ;;  %1114 = vmatpush1.msra.mxu1 %v1113_v22 }
  0x6b   :  { %745 = vmatprep.mubr.f32.mxu0 %v22352_v0  ;;  %868 = vmatprep.mubr.f32.mxu1 %v22352_v0 }
  0x6c   :  { %1236 = vmatprep.subr.mxu0 %v17149_v8  ;;  %1368 = vmatprep.subr.mxu1 %v17138_v4  ;;  %v1799_v8 = vld [vmem:[#allocation3 + $0x128] sm:$0xff] }
  0x6d   :  { %747 = vmatmul.mubr.f32.gmra.mxu0 %v17008_v17  ;;  %870 = vmatmul.mubr.f32.gmra.mxu1 %v17008_v17  ;;  %v17422_v22 = vand.u32 4294901760, %v1799_v8 }
  0x6e   :  { %752 = vmatprep.mubr.f32.mxu0 %v22352_v0  ;;  %875 = vmatprep.mubr.f32.mxu1 %v22352_v0 }
  0x6f   :  { %23162 = vst [vmem:[#allocation43_spill] sm:$0xff] %v17422_v22 }
  0x71   :  { %754 = vmatmul.mubr.f32.gmra.mxu0 %v17010_v18  ;;  %877 = vmatmul.mubr.f32.gmra.mxu1 %v17010_v18 }
  0x72   :  { %759 = vmatprep.mubr.f32.mxu0 %v22352_v0  ;;  %882 = vmatprep.mubr.f32.mxu1 %v22352_v0 }
  0x75   :  { %761 = vmatmul.mubr.f32.gmra.mxu0 %v17016_v20  ;;  %884 = vmatmul.mubr.f32.gmra.mxu1 %v17016_v20 }
  0x76   :  { %766 = vmatprep.mubr.f32.mxu0 %v22352_v0  ;;  %889 = vmatprep.mubr.f32.mxu1 %v22352_v0 }
  0x79   :  { %768 = vmatmul.mubr.f32.gmra.mxu0 %v17047_v35  ;;  %891 = vmatmul.mubr.f32.gmra.mxu1 %v17047_v35 }
  0x7a   :  { %773 = vmatprep.mubr.f32.mxu0 %v22352_v0  ;;  %896 = vmatprep.mubr.f32.mxu1 %v22352_v0 }
  0x7d   :  { %775 = vmatmul.mubr.f32.gmra.mxu0 %v17056_v41  ;;  %898 = vmatmul.mubr.f32.gmra.mxu1 %v17056_v41 }
  0x7e   :  { %780 = vmatprep.mubr.f32.mxu0 %v22352_v0  ;;  %903 = vmatprep.mubr.f32.mxu1 %v22352_v0 }
  0x81   :  { %782 = vmatmul.mubr.f32.gmra.mxu0 %v17090_v52  ;;  %905 = vmatmul.mubr.f32.gmra.mxu1 %v17090_v52 }
  0x82   :  { %787 = vmatprep.mubr.f32.mxu0 %v22352_v0  ;;  %910 = vmatprep.mubr.f32.mxu1 %v22352_v0 }
  0x85   :  { %789 = vmatmul.mubr.f32.gmra.mxu0 %v17108_v58  ;;  %912 = vmatmul.mubr.f32.gmra.mxu1 %v17108_v58 }
  0x86   :  { %984 = vmatprep.mubr.f32.mxu0 %v22352_v0  ;;  %1147 = vmatprep.mubr.f32.mxu1 %v22352_v0 }
  0x89   :  { %990 = vmatmul.mubr.f32.vlgmr.msra.gmra.mxu0 %v17051_v39  ;;  %1149 = vmatmul.mubr.f32.vlgmr.msra.gmra.mxu1 %v16995_v10 }
  0x8a   :  { %1239 = vmatpush1.msra.mxu0 %v17198_v15  ;;  %1370 = vmatpush1.msra.mxu1 %v17191_v14 }
  0x8b   :  { %995 = vmatprep.mubr.f32.mxu0 %v22352_v0  ;;  %1154 = vmatprep.mubr.f32.mxu1 %v22352_v0 }
  0x8c   :  { %1509 = vmatprep.subr.mxu0 %v1105_v11  ;;  %1634 = vmatprep.subr.mxu1 %v17138_v4 }
  0x8d   :  { %1001 = vmatmul.mubr.f32.gmra.mxu0 %v17059_v42  ;;  %1156 = vmatmul.mubr.f32.gmra.mxu1 %v17008_v17  ;;  %v17340_v42 = vand.u32 4294901760, %v1814_v36 }
  0x8e   :  { %1006 = vmatprep.mubr.f32.mxu0 %v22352_v0  ;;  %1161 = vmatprep.mubr.f32.mxu1 %v22352_v0 }
  0x8f   :  { %23138 = vst [vmem:[#allocation19_spill] sm:$0xff] %v17340_v42  ;;  %v17363_v53 = vsub.f32 %v1814_v36, %v17340_v42 }
  0x91   :  { %1012 = vmatmul.mubr.f32.gmra.mxu0 %v17083_v49  ;;  %1163 = vmatmul.mubr.f32.gmra.mxu1 %v17010_v18  ;;  %23145 = vst [vmem:[#allocation26_spill] sm:$0xff] %v17363_v53 }
  0x92   :  { %1017 = vmatprep.mubr.f32.mxu0 %v22352_v0  ;;  %1168 = vmatprep.mubr.f32.mxu1 %v22352_v0 }
  0x95   :  { %1023 = vmatmul.mubr.f32.gmra.mxu0 %v17101_v55  ;;  %1170 = vmatmul.mubr.f32.gmra.mxu1 %v17016_v20  ;;  %v1803_v55 = vld [vmem:[#allocation3 + $0x148] sm:$0xff] }
  0x96   :  { %1028 = vmatprep.mubr.f32.mxu0 %v22352_v0  ;;  %1175 = vmatprep.mubr.f32.mxu1 %v22352_v0  ;;  %v17388_v4 = vand.u32 4294901760, %v1803_v55 }
  0x98   :  { %23152 = vst [vmem:[#allocation33_spill] sm:$0xff] %v17388_v4  ;;  %v17420_v21 = vsub.f32 %v1803_v55, %v17388_v4 }
  0x99   :  { %1034 = vmatmul.mubr.f32.gmra.mxu0 %v17114_v59  ;;  %1177 = vmatmul.mubr.f32.gmra.mxu1 %v17047_v35 }
  0x9a   :  { %1039 = vmatprep.mubr.f32.mxu0 %v22352_v0  ;;  %1182 = vmatprep.mubr.f32.mxu1 %v22352_v0  ;;  %23161 = vst [vmem:[#allocation42_spill] sm:$0xff] %v17420_v21  ;;  %v17455_v55 = vand.u32 4294901760, %v17420_v21 }
  0x9c   :  { %23170 = vst [vmem:[#allocation51_spill] sm:$0xff] %v17455_v55 }
  0x9d   :  { %1045 = vmatmul.mubr.f32.gmra.mxu0 %v17131_v1  ;;  %1184 = vmatmul.mubr.f32.gmra.mxu1 %v17056_v41  ;;  %v1802_v1 = vld [vmem:[#allocation3 + $0x140] sm:$0xff] }
  0x9e   :  { %1050 = vmatprep.mubr.f32.mxu0 %v22352_v0  ;;  %1189 = vmatprep.mubr.f32.mxu1 %v22352_v0  ;;  %v17404_v12 = vand.u32 4294901760, %v1802_v1 }
  0xa0   :  { %23156 = vst [vmem:[#allocation37_spill] sm:$0xff] %v17404_v12  ;;  %v17439_v36 = vsub.f32 %v1802_v1, %v17404_v12 }
  0xa1   :  { %1056 = vmatmul.mubr.f32.gmra.mxu0 %v17144_v6  ;;  %1191 = vmatmul.mubr.f32.gmra.mxu1 %v17090_v52  ;;  %v17392_v6 = vand.u32 4294901760, %v17363_v53 }
  0xa2   :  { %1061 = vmatprep.mubr.f32.mxu0 %v22352_v0  ;;  %1196 = vmatprep.mubr.f32.mxu1 %v22352_v0  ;;  %23166 = vst [vmem:[#allocation47_spill] sm:$0xff] %v17439_v36 }
  0xa3   :  { %23153 = vst [vmem:[#allocation34_spill] sm:$0xff] %v17392_v6  ;;  %v1962_v23 = vsub.f32 %v17363_v53, %v17392_v6 }
  0xa5   :  { %1067 = vmatmul.mubr.f32.gmra.mxu0 %v17155_v9  ;;  %1198 = vmatmul.mubr.f32.gmra.mxu1 %v17108_v58 }
  0xa6   :  { %1272 = vmatprep.mubr.f32.mxu0 %v22352_v0  ;;  %1403 = vmatprep.mubr.f32.mxu1 %v22352_v0 }
  0xa9   :  { %1275 = vmatmul.mubr.f32.vlgmr.msra.gmra.mxu0 %v17014_v19  ;;  %1407 = vmatmul.mubr.f32.vlgmr.msra.gmra.mxu1 %v17030_v27  ;;  %v1822_v19 = vld [vmem:[#allocation3 + $0x1e0] sm:$0xff] }
  0xaa   :  { %1513 = vmatpush1.msra.mxu0 %v1111_v16  ;;  %1636 = vmatpush1.msra.mxu1 %v17191_v14  ;;  %v17321_v27 = vand.u32 4294901760, %v1822_v19  ;;  %v1795_v14 = vld [vmem:[#allocation3 + $0x108] sm:$0xff] }
  0xab   :  { %1280 = vmatprep.mubr.f32.mxu0 %v22352_v0  ;;  %1412 = vmatprep.mubr.f32.mxu1 %v22352_v0 }
  0xac   :  { %1827 = vmatprep.subr.mxu0 %v17273_v24  ;;  %1934 = vmatprep.subr.mxu1 %v17299_v32  ;;  %23132 = vst [vmem:[#allocation13_spill] sm:$0xff] %v17321_v27  ;;  %v17332_v38 = vsub.f32 %v1822_v19, %v17321_v27  ;;  %v17476_v32 = vand.u32 4294901760, %v17439_v36 }
  0xad   :  { %1283 = vmatmul.mubr.f32.gmra.mxu0 %v17024_v25  ;;  %1416 = vmatmul.mubr.f32.gmra.mxu1 %v17036_v30  ;;  %v1819_v25 = vld [vmem:[#allocation3 + $0x1c8] sm:$0xff]  ;;  %v1818_v30 = vld [vmem:[#allocation3 + $0x1c0] sm:$0xff] }
  0xae   :  { %1288 = vmatprep.mubr.f32.mxu0 %v22352_v0  ;;  %1421 = vmatprep.mubr.f32.mxu1 %v22352_v0  ;;  %23135 = vst [vmem:[#allocation16_spill] sm:$0xff] %v17332_v38  ;;  %v17351_v46 = vand.u32 4294901760, %v17332_v38  ;;  %23176 = vst [vmem:[#allocation57_spill] sm:$0xff] %v17476_v32 }
  0xb0   :  { %23141 = vst [vmem:[#allocation22_spill] sm:$0xff] %v17351_v46 }
  0xb1   :  { %1291 = vmatmul.mubr.f32.gmra.mxu0 %v17027_v26  ;;  %1425 = vmatmul.mubr.f32.gmra.mxu1 %v17042_v33  ;;  %v17323_v26 = vand.u32 4294901760, %v1819_v25  ;;  %v1815_v33 = vld [vmem:[#allocation3 + $0x1a8] sm:$0xff] }
  0xb2   :  { %1296 = vmatprep.mubr.f32.mxu0 %v22352_v0  ;;  %1430 = vmatprep.mubr.f32.mxu1 %v22352_v0  ;;  %v17334_v39 = vand.u32 4294901760, %v1815_v33 }
  0xb3   :  { %23133 = vst [vmem:[#allocation14_spill] sm:$0xff] %v17323_v26  ;;  %v17337_v40 = vsub.f32 %v1819_v25, %v17323_v26  ;;  %v1794_v25 = vld [vmem:[#allocation3 + $0x100] sm:$0xff] }
  0xb4   :  { %23136 = vst [vmem:[#allocation17_spill] sm:$0xff] %v17334_v39  ;;  %v17354_v47 = vsub.f32 %v1815_v33, %v17334_v39  ;;  %v17460_v1 = vand.u32 4294901760, %v1794_v25 }
  0xb5   :  { %1299 = vmatmul.mubr.f32.gmra.mxu0 %v17045_v34  ;;  %1434 = vmatmul.mubr.f32.gmra.mxu1 %v17064_v44  ;;  %v17328_v34 = vand.u32 4294901760, %v1818_v30  ;;  %23137 = vst [vmem:[#allocation18_spill] sm:$0xff] %v17337_v40  ;;  %v1810_v44 = vld [vmem:[#allocation3 + $0x180] sm:$0xff]  ;;  %v17357_v49 = vand.u32 4294901760, %v17337_v40 }
  0xb6   :  { %1304 = vmatprep.mubr.f32.mxu0 %v22352_v0  ;;  %1439 = vmatprep.mubr.f32.mxu1 %v22352_v0  ;;  %23142 = vst [vmem:[#allocation23_spill] sm:$0xff] %v17354_v47  ;;  %v17359_v50 = vand.u32 4294901760, %v1810_v44  ;;  %v17379_v60 = vand.u32 4294901760, %v17354_v47  ;;  %23172 = vst [vmem:[#allocation53_spill] sm:$0xff] %v17460_v1 }
  0xb7   :  { %23134 = vst [vmem:[#allocation15_spill] sm:$0xff] %v17328_v34  ;;  %23143 = vst [vmem:[#allocation24_spill] sm:$0xff] %v17357_v49 }
  0xb8   :  { %23144 = vst [vmem:[#allocation25_spill] sm:$0xff] %v17359_v50  ;;  %23149 = vst [vmem:[#allocation30_spill] sm:$0xff] %v17379_v60  ;;  %v17386_v2 = vsub.f32 %v1810_v44, %v17359_v50  ;;  %v1956_v5 = vsub.f32 %v17354_v47, %v17379_v60  ;;  %v17501_v60 = vsub.f32 %v1794_v25, %v17460_v1 }
  0xb9   :  { %1307 = vmatmul.mubr.f32.gmra.mxu0 %v17067_v45  ;;  %1443 = vmatmul.mubr.f32.gmra.mxu1 %v17088_v51  ;;  %v17347_v45 = vsub.f32 %v1818_v30, %v17328_v34  ;;  %v1806_v51 = vld [vmem:[#allocation3 + $0x160] sm:$0xff]  ;;  %v1998_v25 = vsub.f32 %v17439_v36, %v17476_v32 }
  0xba   :  { %1312 = vmatprep.mubr.f32.mxu0 %v22352_v0  ;;  %1448 = vmatprep.mubr.f32.mxu1 %v22352_v0  ;;  %v17381_v63 = vand.u32 4294901760, %v1806_v51  ;;  %23151 = vst [vmem:[#allocation32_spill] sm:$0xff] %v17386_v2  ;;  %v17417_v16 = vand.u32 4294901760, %v17386_v2  ;;  %v17445_v44 = vand.u32 4294901760, %v1956_v5  ;;  %v17464_v5 = vand.u32 4294901760, %v1962_v23  ;;  %23184 = vst [vmem:[#allocation64_spill] sm:$0xff] %v17501_v60 }
  0xbb   :  { %23140 = vst [vmem:[#allocation21_spill] sm:$0xff] %v17347_v45  ;;  %v17371_v56 = vand.u32 4294901760, %v17347_v45  ;;  %v17539_v29 = vand.u32 4294901760, %v17501_v60 }
  0xbc   :  { %23150 = vst [vmem:[#allocation31_spill] sm:$0xff] %v17381_v63  ;;  %23160 = vst [vmem:[#allocation41_spill] sm:$0xff] %v17417_v16 }
  0xbd   :  { %1315 = vmatmul.mubr.f32.gmra.mxu0 %v17080_v48  ;;  %1452 = vmatmul.mubr.f32.gmra.mxu1 %v17098_v54  ;;  %v1807_v48 = vld [vmem:[#allocation3 + $0x168] sm:$0xff]  ;;  %v17366_v54 = vsub.f32 %v1811_v37, %v17342_v43  ;;  %23147 = vst [vmem:[#allocation28_spill] sm:$0xff] %v17371_v56  ;;  %v1950_v9 = vsub.f32 %v17347_v45, %v17371_v56  ;;  %v17441_v37 = vand.u32 4294901760, %v1795_v14  ;;  %23168 = vst [vmem:[#allocation49_spill] sm:$0xff] %v17445_v44  ;;  %v1782_v56 = vld [vmem:[#allocation3 + $0xa0] sm:$0xff] }
  0xbe   :  { %1320 = vmatprep.mubr.f32.mxu0 %v22352_v0  ;;  %1457 = vmatprep.mubr.f32.mxu1 %v22352_v0  ;;  %v17373_v59 = vand.u32 4294901760, %v1807_v48  ;;  %23173 = vst [vmem:[#allocation54_spill] sm:$0xff] %v17464_v5  ;;  %23194 = vst [vmem:[#allocation74_spill] sm:$0xff] %v17539_v29 }
  0xbf   :  { %23146 = vst [vmem:[#allocation27_spill] sm:$0xff] %v17366_v54  ;;  %v17395_v7 = vand.u32 4294901760, %v17366_v54  ;;  %v17433_v30 = vand.u32 4294901760, %v1950_v9  ;;  %23167 = vst [vmem:[#allocation48_spill] sm:$0xff] %v17441_v37  ;;  %v1787_v9 = vld [vmem:[#allocation3 + $0xc8] sm:$0xff] }
  0xc0   :  { %23148 = vst [vmem:[#allocation29_spill] sm:$0xff] %v17373_v59  ;;  %v17402_v11 = vsub.f32 %v1807_v48, %v17373_v59 }
  0xc1   :  { %1323 = vmatmul.mubr.f32.gmra.mxu0 %v17106_v57  ;;  %1461 = vmatmul.mubr.f32.gmra.mxu1 %v17119_v61  ;;  %v1938_v57 = vsub.f32 %v17332_v38, %v17351_v46  ;;  %v1944_v61 = vsub.f32 %v17337_v40, %v17357_v49  ;;  %23154 = vst [vmem:[#allocation35_spill] sm:$0xff] %v17395_v7  ;;  %23164 = vst [vmem:[#allocation45_spill] sm:$0xff] %v17433_v30  ;;  %v1779_v49 = vld [vmem:[#allocation3 + $0x88] sm:$0xff] }
  0xc2   :  { %1328 = vmatprep.mubr.f32.mxu0 %v22352_v0  ;;  %1466 = vmatprep.mubr.f32.mxu1 %v22352_v0  ;;  %23155 = vst [vmem:[#allocation36_spill] sm:$0xff] %v17402_v11  ;;  %v1968_v31 = vsub.f32 %v17366_v54, %v17395_v7  ;;  %v17436_v33 = vand.u32 4294901760, %v17402_v11  ;;  %v17489_v7 = vand.u32 4294901760, %v1787_v9 }
  0xc3   :  { %v17407_v13 = vand.u32 4294901760, %v1938_v57  ;;  %v17414_v15 = vand.u32 4294901760, %v1944_v61  ;;  %v17458_v57 = vsub.f32 %v1799_v8, %v17422_v22  ;;  %v1790_v61 = vld [vmem:[#allocation3 + $0xe0] sm:$0xff] }
  0xc4   :  { %23165 = vst [vmem:[#allocation46_spill] sm:$0xff] %v17436_v33  ;;  %v1980_v8 = vsub.f32 %v17402_v11, %v17436_v33  ;;  %23181 = vst [vmem:[#allocation61_spill] sm:$0xff] %v17489_v7  ;;  %v1992_v33 = vsub.f32 %v17420_v21, %v17455_v55 }
  0xc5   :  { %1331 = vmatmul.mubr.f32.gmra.mxu0 %v17122_v62  ;;  %1470 = vmatmul.mubr.f32.gmra.mxu1 %v17136_v3  ;;  %v1798_v62 = vld [vmem:[#allocation3 + $0x120] sm:$0xff]  ;;  %23157 = vst [vmem:[#allocation38_spill] sm:$0xff] %v17407_v13  ;;  %v17412_v3 = vsub.f32 %v1806_v51, %v17381_v63  ;;  %23159 = vst [vmem:[#allocation40_spill] sm:$0xff] %v17414_v15  ;;  %v1974_v51 = vsub.f32 %v17386_v2, %v17417_v16  ;;  %v23179_v16 = vmov 0.0   ;;  %v17498_v6 = vand.u32 4294901760, %v17458_v57 }
  0xc6   :  { %1546 = vmatprep.mubr.f32.mxu0 %v22352_v0  ;;  %1669 = vmatprep.mubr.f32.mxu1 %v22352_v0  ;;  %v17429_v19 = vand.u32 4294901760, %v1798_v62  ;;  %23171 = vst [vmem:[#allocation52_spill] sm:$0xff] %v17458_v57 }
  0xc7   :  { %23158 = vst [vmem:[#allocation39_spill] sm:$0xff] %v17412_v3  ;;  %v17448_v48 = vand.u32 4294901760, %v17412_v3  ;;  %23183 = vst [vmem:[#allocation63_spill] sm:$0xff] %v17498_v6  ;;  %v2004_v32 = vsub.f32 %v17458_v57, %v17498_v6  ;;  %v1778_v6 = vld [vmem:[#allocation3 + $0x80] sm:$0xff]  ;;  %v17556_v57 = vand.u32 4294901760, %v1998_v25  ;;  %v2022_v25 = vsub.f32 %v17501_v60, %v17539_v29 }
  0xc8   :  { %23163 = vst [vmem:[#allocation44_spill] sm:$0xff] %v17429_v19 }
  0xc9   :  { %1548 = vmatmul.mubr.f32.vlgmr.msra.gmra.mxu0 %v16995_v10  ;;  %1671 = vmatmul.mubr.f32.vlgmr.msra.gmra.mxu1 %v16995_v10  ;;  %23169 = vst [vmem:[#allocation50_spill] sm:$0xff] %v17448_v48  ;;  %v1791_v10 = vld [vmem:[#allocation3 + $0xe8] sm:$0xff]  ;;  %23199 = vst [vmem:[#allocation79_spill] sm:$0xff] %v17556_v57 }
  0xca   :  { %1829 = vmatpush1.msra.mxu0 %v17321_v27  ;;  %1940 = vmatpush1.msra.mxu1 %v17407_v13  ;;  %v17469_v13 = vsub.f32 %v1798_v62, %v17429_v19  ;;  %v17481_v23 = vand.u32 4294901760, %v1791_v10  ;;  %v1986_v62 = vsub.f32 %v17412_v3, %v17448_v48 }
  0xcb   :  { %1831 = vmatprep.subr.mxu0 %v17323_v26  ;;  %1946 = vmatprep.subr.mxu1 %v17414_v15  ;;  %v17466_v15 = vand.u32 4294901760, %v1968_v31  ;;  %v1786_v31 = vld [vmem:[#allocation3 + $0xc0] sm:$0xff] }
  0xcc   :  { %1833 = vmatpush1.msra.mxu0 %v17328_v34  ;;  %1553 = vmatprep.mubr.f32.mxu0 %v22352_v0  ;;  %23175 = vst [vmem:[#allocation56_spill] sm:$0xff] %v17469_v13  ;;  %v17479_v0 = vsub.f32 %v1795_v14, %v17441_v37  ;;  %23178 = vst [vmem:[#allocation59_spill] sm:$0xff] %v17481_v23  ;;  %v17493_v14 = vand.u32 4294901760, %v1974_v51  ;;  %v17506_v48 = vand.u32 4294901760, %v17469_v13  ;;  %v17512_v51 = vand.u32 4294901760, %v1980_v8 }
  0xcd   :  { %1835 = vmatprep.subr.mxu0 %v17334_v39  ;;  %23174 = vst [vmem:[#allocation55_spill] sm:$0xff] %v17466_v15  ;;  %1952 = vmatpush1.msra.mxu1 %v17433_v30  ;;  %v17487_v30 = vand.u32 4294901760, %v1790_v61  ;;  %v17524_v46 = vand.u32 4294901760, %v1986_v62 }
  0xce   :  { %1555 = vmatmul.mubr.f32.gmra.mxu0 %v17008_v17  ;;  %23177 = vst [vmem:[#allocation58_spill] sm:$0xff] %v17479_v0  ;;  %1676 = vmatprep.mubr.f32.mxu1 %v23179_v16  ;;  %23182 = vst [vmem:[#allocation62_spill] sm:$0xff] %v17493_v14  ;;  %v17517_v55 = vand.u32 4294901760, %v17479_v0 }
  0xcf   :  { %1837 = vmatpush1.msra.mxu0 %v17340_v42  ;;  %23180 = vst [vmem:[#allocation60_spill] sm:$0xff] %v17487_v30  ;;  %1958 = vmatprep.subr.mxu1 %v17445_v44  ;;  %23185 = vst [vmem:[#allocation65_spill] sm:$0xff] %v17506_v48  ;;  %v17508_v44 = vand.u32 4294901760, %v1786_v31  ;;  %v17527_v8 = vsub.f32 %v1790_v61, %v17487_v30  ;;  %v2010_v61 = vsub.f32 %v17469_v13, %v17506_v48 }
  0xd0   :  { %1678 = vmatmul.mubr.f32.gmra.mxu1 %v17008_v17  ;;  %1839 = vmatprep.subr.mxu0 %v17342_v43  ;;  %v1783_v17 = vld [vmem:[#allocation3 + $0xa8] sm:$0xff]  ;;  %23187 = vst [vmem:[#allocation67_spill] sm:$0xff] %v17512_v51  ;;  %23188 = vst [vmem:[#allocation68_spill] sm:$0xff] %v17517_v55  ;;  %v2016_v36 = vsub.f32 %v17479_v0, %v17517_v55  ;;  %v1774_v0 = vld [vmem:[#allocation3 + $0x60] sm:$0xff] }
  0xd1   :  { %1964 = vmatpush1.msra.mxu1 %v17464_v5  ;;  %23186 = vst [vmem:[#allocation66_spill] sm:$0xff] %v17508_v44  ;;  %1841 = vmatpush1.msra.mxu0 %v17359_v50  ;;  %v17520_v5 = vsub.f32 %v1791_v10, %v17481_v23  ;;  %23190 = vst [vmem:[#allocation70_spill] sm:$0xff] %v17524_v46  ;;  %v17534_v10 = vand.u32 4294901760, %v1992_v33  ;;  %v17541_v62 = vand.u32 4294901760, %v1783_v17  ;;  %v17550_v33 = vand.u32 4294901760, %v1782_v56 }
  0xd2   :  { %1970 = vmatprep.subr.mxu1 %v17466_v15  ;;  %1560 = vmatprep.mubr.f32.mxu0 %v23179_v16  ;;  %23191 = vst [vmem:[#allocation71_spill] sm:$0xff] %v17527_v8  ;;  %v17530_v15 = vsub.f32 %v1787_v9, %v17489_v7  ;;  %v17548_v9 = vsub.f32 %v1786_v31, %v17508_v44  ;;  %v17566_v31 = vand.u32 4294901760, %v17527_v8  ;;  %v17584_v13 = vand.u32 4294901760, %v2010_v61 }
  0xd3   :  { %23189 = vst [vmem:[#allocation69_spill] sm:$0xff] %v17520_v5  ;;  %1843 = vmatprep.subr.mxu0 %v17373_v59  ;;  %1976 = vmatpush1.msra.mxu1 %v17493_v14  ;;  %23193 = vst [vmem:[#allocation73_spill] sm:$0xff] %v17534_v10  ;;  %v17552_v14 = vand.u32 4294901760, %v1779_v49  ;;  %v17578_v55 = vsub.f32 %v1783_v17, %v17541_v62  ;;  %v1771_v17 = vld [vmem:[#allocation3 + $0x48] sm:$0xff]  ;;  %v17597_v29 = vand.u32 4294901760, %v2016_v36  ;;  %v1770_v36 = vld [vmem:[#allocation3 + $0x40] sm:$0xff] }
  0xd4   :  { %23192 = vst [vmem:[#allocation72_spill] sm:$0xff] %v17530_v15  ;;  %1562 = vmatmul.mubr.f32.gmra.mxu0 %v17010_v18  ;;  %23195 = vst [vmem:[#allocation75_spill] sm:$0xff] %v17541_v62  ;;  %1683 = vmatprep.mubr.f32.mxu1 %v23179_v16  ;;  %v17569_v48 = vand.u32 4294901760, %v17530_v15 }
  0xd5   :  { %1845 = vmatpush1.msra.mxu0 %v17381_v63  ;;  %23196 = vst [vmem:[#allocation76_spill] sm:$0xff] %v17548_v9  ;;  %23197 = vst [vmem:[#allocation77_spill] sm:$0xff] %v17550_v33  ;;  %1982 = vmatprep.subr.mxu1 %v17512_v51  ;;  %v17561_v63 = vand.u32 4294901760, %v17520_v5  ;;  %v1775_v51 = vld [vmem:[#allocation3 + $0x68] sm:$0xff] }
  0xd6   :  { %23198 = vst [vmem:[#allocation78_spill] sm:$0xff] %v17552_v14  ;;  %1685 = vmatmul.mubr.f32.gmra.mxu1 %v17010_v18  ;;  %1847 = vmatprep.subr.mxu0 %v17388_v4  ;;  %23201 = vst [vmem:[#allocation81_spill] sm:$0xff] %v17566_v31  ;;  %v17573_v18 = vand.u32 4294901760, %v2004_v32  ;;  %v17590_v32 = vsub.f32 %v1782_v56, %v17550_v33  ;;  %v17601_v60 = vand.u32 4294901760, %v1775_v51  ;;  %v17621_v4 = vand.u32 4294901760, %v1771_v17 }
  0xd7   :  { %23200 = vst [vmem:[#allocation80_spill] sm:$0xff] %v17561_v63  ;;  %1988 = vmatpush1.msra.mxu1 %v17524_v46  ;;  %23202 = vst [vmem:[#allocation82_spill] sm:$0xff] %v17569_v48  ;;  %1849 = vmatpush1.msra.mxu0 %v17404_v12  ;;  %v17580_v46 = vand.u32 4294901760, %v1778_v6  ;;  %v17587_v12 = vand.u32 4294901760, %v17548_v9  ;;  %v2028_v61 = vsub.f32 %v17520_v5, %v17561_v63  ;;  %v17613_v63 = vand.u32 4294901760, %v2022_v25  ;;  %v1767_v25 = vld [vmem:[#allocation3 + $0x28] sm:$0xff] }
  0xd8   :  { %1994 = vmatprep.subr.mxu1 %v17534_v10  ;;  %23203 = vst [vmem:[#allocation83_spill] sm:$0xff] %v17573_v18  ;;  %23204 = vst [vmem:[#allocation84_spill] sm:$0xff] %v17578_v55  ;;  %1567 = vmatprep.mubr.f32.mxu0 %v23179_v16  ;;  %v17593_v10 = vsub.f32 %v1779_v49, %v17552_v14  ;;  %v2034_v49 = vsub.f32 %v17527_v8, %v17566_v31  ;;  %v17616_v5 = vand.u32 4294901760, %v17578_v55 }
  0xd9   :  { %23205 = vst [vmem:[#allocation85_spill] sm:$0xff] %v17580_v46  ;;  %1851 = vmatprep.subr.mxu0 %v17422_v22  ;;  %23206 = vst [vmem:[#allocation86_spill] sm:$0xff] %v17584_v13  ;;  %2000 = vmatpush1.msra.mxu1 %v17556_v57  ;;  %v65_v22 = vlaneseq  ;;  %v2040_v56 = vsub.f32 %v17530_v15, %v17569_v48  ;;  %v17609_v57 = vand.u32 4294901760, %v1774_v0  ;;  %v2046_v48 = vsub.f32 %v17548_v9, %v17587_v12  ;;  %v1766_v15 = vld [vmem:[#allocation3 + $0x20] sm:$0xff] }
  0xda   :  { %23207 = vst [vmem:[#allocation87_spill] sm:$0xff] %v17587_v12  ;;  %23208 = vst [vmem:[#allocation88_spill] sm:$0xff] %v17590_v32  ;;  %1569 = vmatmul.mubr.f32.gmra.mxu0 %v17016_v20  ;;  %1690 = vmatprep.mubr.f32.mxu1 %v23179_v16  ;;  %v17638_v31 = vsub.f32 %v1775_v51, %v17601_v60  ;;  %v17646_v9 = vand.u32 4294901760, %v2034_v49  ;;  %v17663_v49 = vand.u32 4294901760, %v1767_v25 }
  0xdb   :  { %23209 = vst [vmem:[#allocation89_spill] sm:$0xff] %v17593_v10  ;;  %23210 = vst [vmem:[#allocation90_spill] sm:$0xff] %v17597_v29  ;;  %1853 = vmatpush1.msra.mxu0 %v17429_v19  ;;  %2006 = vmatprep.subr.mxu1 %v17573_v18  ;;  %v17619_v19 = vsub.f32 %v1778_v6, %v17580_v46  ;;  %v17628_v18 = vand.u32 4294901760, %v17590_v32  ;;  %v17635_v6 = vand.u32 4294901760, %v2028_v61  ;;  %v17642_v12 = vshrl.u32 %v65_v22, 7  ;;  %v1763_v61 = vld [vmem:[#allocation3 + $0x8] sm:$0xff] }
  0xdc   :  { %23211 = vst [vmem:[#allocation91_spill] sm:$0xff] %v17601_v60  ;;  %23212 = vst [vmem:[#allocation92_spill] sm:$0xff] %v17609_v57  ;;  %1692 = vmatmul.mubr.f32.gmra.mxu1 %v17016_v20  ;;  %1855 = vmatprep.subr.mxu0 %v17441_v37  ;;  %v17631_v20 = vand.u32 4294901760, %v17593_v10  ;;  %v17648_v8 = vand.u32 4294901760, %v2040_v56  ;;  %v2052_v22 = vsub.f32 %v17578_v55, %v17616_v5  ;;  %v1762_v56 = vld [vmem:[#allocation3] sm:$0xff]  ;;  %v17673_v55 = vand.u32 4294901760, %v1766_v15 }
  0xdd   :  { %23213 = vst [vmem:[#allocation93_spill] sm:$0xff] %v17613_v63  ;;  %23214 = vst [vmem:[#allocation94_spill] sm:$0xff] %v17616_v5  ;;  %2012 = vmatpush1.msra.mxu1 %v17584_v13  ;;  %1857 = vmatpush1.msra.mxu0 %v17460_v1  ;;  %v17640_v13 = vand.u32 4294901760, %v1770_v36  ;;  %v17658_v51 = vand.u32 4294901760, %v17619_v19 }
  0xde   :  { %23215 = vst [vmem:[#allocation95_spill] sm:$0xff] %v17619_v19  ;;  %23216 = vst [vmem:[#allocation96_spill] sm:$0xff] %v17621_v4  ;;  %2018 = vmatprep.subr.mxu1 %v17597_v29  ;;  %1574 = vmatprep.mubr.f32.mxu0 %v23179_v16  ;;  %v17651_v29 = vsub.f32 %v1774_v0, %v17609_v57  ;;  %v17667_v0 = vand.u32 4294901760, %v2046_v48  ;;  %v2064_v5 = vsub.f32 %v17593_v10, %v17631_v20 }
  0xdf   :  { %23217 = vst [vmem:[#allocation97_spill] sm:$0xff] %v17628_v18  ;;  %23218 = vst [vmem:[#allocation98_spill] sm:$0xff] %v17631_v20  ;;  %1859 = vmatprep.subr.mxu0 %v17481_v23  ;;  %2024 = vmatpush1.msra.mxu1 %v17613_v63  ;;  %v17661_v23 = vsub.f32 %v1771_v17, %v17621_v4  ;;  %v2058_v63 = vsub.f32 %v17590_v32, %v17628_v18  ;;  %v17678_v17 = vand.u32 4294901760, %v17638_v31 }
  0xe0   :  { %23219 = vst [vmem:[#allocation99_spill] sm:$0xff] %v17635_v6  ;;  %23220 = vst [vmem:[#allocation100_spill] sm:$0xff] %v17638_v31  ;;  %1576 = vmatmul.mubr.f32.gmra.mxu0 %v17047_v35  ;;  %1697 = vmatprep.mubr.f32.mxu1 %v23179_v16  ;;  %v17681_v1 = vsub.f32 %v1770_v36, %v17640_v13  ;;  %v17683_v48 = vand.u32 4294901760, %v1763_v61  ;;  %v17689_v20 = vand.u32 4294901760, %v17651_v29  ;;  %v17698_v36 = vand.u32 4294901760, %v2052_v22 }
  0xe1   :  { %23221 = vst [vmem:[#allocation101_spill] sm:$0xff] %v17640_v13  ;;  %23222 = vst [vmem:[#allocation102_spill] sm:$0xff] %v17642_v12  ;;  %1861 = vmatpush1.msra.mxu0 %v17487_v30  ;;  %2030 = vmatprep.subr.mxu1 %v17635_v6  ;;  %v67_v30 = vsub.s32 0, %v17642_v12  ;;  %v17691_v6 = vand.u32 4294901760, %v1762_v56  ;;  %v2070_v12 = vsub.f32 %v17619_v19, %v17658_v51  ;;  %v17710_v10 = vand.u32 4294901760, %v2058_v63 }
  0xe2   :  { %23223 = vst [vmem:[#allocation103_spill] sm:$0xff] %v17646_v9  ;;  %23224 = vst [vmem:[#allocation104_spill] sm:$0xff] %v17648_v8  ;;  %1699 = vmatmul.mubr.f32.gmra.mxu1 %v17047_v35  ;;  %1863 = vmatprep.subr.mxu0 %v17489_v7  ;;  %v63_v35 = vld [vmem:[%s22342_s3] sm:$0xf]  ;;  %v17706_v18 = vsub.f32 %v1767_v25, %v17663_v49  ;;  %v17712_v32 = vand.u32 4294901760, %v2064_v5  ;;  %v17715_v22 = vsub.f32 %v1766_v15, %v17673_v55 }
  0xe3   :  { %23225 = vst [vmem:[#allocation105_spill] sm:$0xff] %v17651_v29  ;;  %23226 = vst [vmem:[#allocation106_spill] sm:$0xff] %v17658_v51  ;;  %2036 = vmatpush1.msra.mxu1 %v17646_v9  ;;  %1865 = vmatpush1.msra.mxu0 %v17508_v44  ;;  %v17703_v9 = vand.u32 4294901760, %v17661_v23  ;;  %v17722_v25 = vand.u32 4294901760, %v17681_v1  ;;  %v17725_v51 = vsub.f32 %v1763_v61, %v17683_v48 }
  0xe4   :  { %23227 = vst [vmem:[#allocation107_spill] sm:$0xff] %v17661_v23  ;;  %23228 = vst [vmem:[#allocation108_spill] sm:$0xff] %v17663_v49  ;;  %2042 = vmatprep.subr.mxu1 %v17648_v8  ;;  %1581 = vmatprep.mubr.f32.mxu0 %v23179_v16  ;;  %v2076_v8 = vsub.f32 %v17638_v31, %v17678_v17  ;;  %v17727_v63 = vrot.slane %v63_v35, %v67_v30  ;;  %v17743_v61 = vand.u32 4294901760, %v17706_v18 }
  0xe5   :  { %23229 = vst [vmem:[#allocation109_spill] sm:$0xff] %v17667_v0  ;;  %23230 = vst [vmem:[#allocation110_spill] sm:$0xff] %v17673_v55  ;;  %1867 = vmatprep.subr.mxu0 %v17541_v62  ;;  %2048 = vmatpush1.msra.mxu1 %v17667_v0  ;;  %v2082_v15 = vsub.f32 %v17651_v29, %v17689_v20  ;;  %v17734_v5 = vsub.f32 %v1762_v56, %v17691_v6  ;;  %v17738_v0 = vand.u32 4294901760, %v2070_v12 }
  0xe6   :  { %23231 = vst [vmem:[#allocation111_spill] sm:$0xff] %v17678_v17  ;;  %23232 = vst [vmem:[#allocation112_spill] sm:$0xff] %v17681_v1  ;;  %1583 = vmatmul.mubr.f32.gmra.mxu0 %v17056_v41  ;;  %1704 = vmatprep.mubr.f32.mxu1 %v23179_v16  ;;  %v2088_v30 = vsub.f32 %v17661_v23, %v17703_v9  ;;  %v17748_v35 = vand.u32 4294901760, %v17715_v22  ;;  %v2094_v12 = vsub.f32 %v17681_v1, %v17722_v25 }
  0xe7   :  { %23233 = vst [vmem:[#allocation113_spill] sm:$0xff] %v17683_v48  ;;  %23234 = vst [vmem:[#allocation114_spill] sm:$0xff] %v17689_v20  ;;  %1869 = vmatpush1.msra.mxu0 %v17550_v33  ;;  %2054 = vmatprep.subr.mxu1 %v17698_v36  ;;  %v17765_v17 = vand.u32 4294901760, %v17734_v5 }
  0xe8   :  { %23235 = vst [vmem:[#allocation115_spill] sm:$0xff] %v17691_v6  ;;  %23236 = vst [vmem:[#allocation116_spill] sm:$0xff] %v17698_v36  ;;  %1706 = vmatmul.mubr.f32.gmra.mxu1 %v17056_v41  ;;  %1871 = vmatprep.subr.mxu0 %v17552_v14  ;;  %v17752_v41 = vand.u32 4294901760, %v2076_v8  ;;  %v17757_v36 = vand.u32 4294901760, %v17725_v51 }
  0xe9   :  { %23237 = vst [vmem:[#allocation117_spill] sm:$0xff] %v17703_v9  ;;  %23238 = vst [vmem:[#allocation118_spill] sm:$0xff] %v17706_v18  ;;  %2060 = vmatpush1.msra.mxu1 %v17710_v10  ;;  %v183_v56 = vpop.f32.mrf.mxu0  ;;  %1873 = vmatpush1.msra.mxu0 %v17580_v46  ;;  %v342_v20 = vpop.f32.mrf.mxu1 }
  0xea   :  { %23239 = vst [vmem:[#allocation119_spill] sm:$0xff] %v17710_v10  ;;  %23240 = vst [vmem:[#allocation120_spill] sm:$0xff] %v17712_v32  ;;  %2066 = vmatprep.subr.mxu1 %v17712_v32  ;;  %v184_v9 = vadd.f32 %v183_v56, %v17727_v63  ;;  %1588 = vmatprep.mubr.f32.mxu0 %v23179_v16  ;;  %v17762_v10 = vand.u32 4294901760, %v2082_v15  ;;  %v17771_v32 = vand.u32 4294901760, %v2088_v30  ;;  %v17785_v30 = vand.u32 4294901760, %v2094_v12 }
  0xeb   :  { %23241 = vst [vmem:[#allocation121_spill] sm:$0xff] %v17715_v22  ;;  %23242 = vst [vmem:[#allocation122_spill] sm:$0xff] %v17722_v25  ;;  %1875 = vmatprep.subr.mxu0 %v17601_v60  ;;  %v17767_v8 = vpop.f32.mrf.mxu0  ;;  %2072 = vmatpush1.msra.mxu1 %v17738_v0  ;;  %v2100_v56 = vsub.f32 %v17706_v18, %v17743_v61  ;;  %v17777_v1 = vpop.f32.mrf.mxu1  ;;  %v2106_v15 = vsub.f32 %v17715_v22, %v17748_v35 }
  0xec   :  { %23243 = vst [vmem:[#allocation123_spill] sm:$0xff] %v17725_v51  ;;  %23244 = vst [vmem:[#allocation124_spill] sm:$0xff] %v17734_v5  ;;  %1590 = vmatmul.mubr.f32.gmra.mxu0 %v17090_v52  ;;  %v17775_v25 = vadd.f32 %v342_v20, %v184_v9  ;;  %1711 = vmatprep.mubr.f32.mxu1 %v23179_v16  ;;  %v2112_v9 = vsub.f32 %v17725_v51, %v17757_v36 }
  0xed   :  { %23245 = vst [vmem:[#allocation125_spill] sm:$0xff] %v17738_v0  ;;  %23246 = vst [vmem:[#allocation126_spill] sm:$0xff] %v17743_v61  ;;  %1877 = vmatpush1.msra.mxu0 %v17609_v57  ;;  %2078 = vmatprep.subr.mxu1 %v17752_v41  ;;  %v2118_v0 = vsub.f32 %v17734_v5, %v17765_v17 }
  0xee   :  { %23247 = vst [vmem:[#allocation127_spill] sm:$0xff] %v17748_v35  ;;  %23248 = vst [vmem:[#allocation128_spill] sm:$0xff] %v17752_v41  ;;  %1713 = vmatmul.mubr.f32.gmra.mxu1 %v17090_v52  ;;  %1879 = vmatprep.subr.mxu0 %v17621_v4  ;;  %v17798_v52 = vand.u32 4294901760, %v2100_v56 }
  0xef   :  { %23249 = vst [vmem:[#allocation129_spill] sm:$0xff] %v17757_v36  ;;  %23250 = vst [vmem:[#allocation130_spill] sm:$0xff] %v17762_v10  ;;  %2084 = vmatpush1.msra.mxu1 %v17762_v10  ;;  %1881 = vmatpush1.msra.mxu0 %v17640_v13 }
  0xf0   :  { %23251 = vst [vmem:[#allocation131_spill] sm:$0xff] %v17765_v17  ;;  %23252 = vst [vmem:[#allocation132_spill] sm:$0xff] %v17767_v8  ;;  %v194_v8 = vpop.f32.mrf.mxu0  ;;  %2090 = vmatprep.subr.mxu1 %v17771_v32  ;;  %1595 = vmatprep.mubr.f32.mxu0 %v23179_v16 }
  0xf1   :  { %23253 = vst [vmem:[#allocation133_spill] sm:$0xff] %v17771_v32  ;;  %23254 = vst [vmem:[#allocation134_spill] sm:$0xff] %v17777_v1  ;;  %v195_v20 = vadd.f32 %v194_v8, %v17727_v63  ;;  %v349_v1 = vpop.f32.mrf.mxu1  ;;  %1883 = vmatprep.subr.mxu0 %v17663_v49  ;;  %v17806_v8 = vand.u32 4294901760, %v2106_v15  ;;  %2096 = vmatpush1.msra.mxu1 %v17785_v30 }
  0xf2   :  { %23255 = vst [vmem:[#allocation135_spill] sm:$0xff] %v17785_v30  ;;  %v17794_v35 = vpop.f32.mrf.mxu0  ;;  %23257 = vst [vmem:[#allocation137_spill] sm:$0xff] %v17798_v52  ;;  %1597 = vmatmul.mubr.f32.gmra.mxu0 %v17108_v58  ;;  %1718 = vmatprep.mubr.f32.mxu1 %v23179_v16 }
  0xf3   :  { %23256 = vst [vmem:[#allocation136_spill] sm:$0xff] %v17794_v35  ;;  %v17800_v12 = vadd.f32 %v349_v1, %v195_v20  ;;  %v17802_v41 = vpop.f32.mrf.mxu1  ;;  %23259 = vst [vmem:[#allocation139_spill] sm:$0xff] %v17806_v8  ;;  %v17810_v35 = vand.u32 4294901760, %v2112_v9  ;;  %1885 = vmatpush1.msra.mxu0 %v17673_v55  ;;  %v17815_v1 = vand.u32 4294901760, %v2118_v0  ;;  %2102 = vmatprep.subr.mxu1 %v17798_v52 }
  0xf4   :  { %23258 = vst [vmem:[#allocation138_spill] sm:$0xff] %v17802_v41  ;;  %v205_v10 = vpop.f32.mrf.mxu0  ;;  %1720 = vmatmul.mubr.f32.gmra.mxu1 %v17108_v58  ;;  %1887 = vmatprep.subr.mxu0 %v17683_v48 }
  0xf5   :  { %23260 = vst [vmem:[#allocation140_spill] sm:$0xff] %v17810_v35  ;;  %v206_v56 = vadd.f32 %v205_v10, %v17727_v63  ;;  %v356_v32 = vpop.f32.mrf.mxu1  ;;  %23261 = vst [vmem:[#allocation141_spill] sm:$0xff] %v17815_v1  ;;  %2108 = vmatpush1.msra.mxu1 %v17806_v8  ;;  %1889 = vmatpush1.msra.mxu0 %v17691_v6  ;;  %v23295_v8 = vld [vmem:[#allocation89_spill] sm:$0xff] }
  0xf6   :  { %v17817_v20 = vpop.f32.mrf.mxu0  ;;  %2114 = vmatprep.subr.mxu1 %v17810_v35  ;;  %1922 = vmatprep.mubr.f32.mxu0 %v23179_v16  ;;  %v23288_v35 = vld [vmem:[#allocation72_spill] sm:$0xff] }
  0xf7   :  { %23262 = vst [vmem:[#allocation142_spill] sm:$0xff] %v17817_v20  ;;  %v17821_v15 = vadd.f32 %v356_v32, %v206_v56  ;;  %v17823_v41 = vpop.f32.mrf.mxu1  ;;  %2120 = vmatpush1.msra.mxu1 %v17815_v1  ;;  %2162 = vmatprep.subr.mxu0 %v17280_v28  ;;  %v23285_v28 = vld [vmem:[#allocation53_spill] sm:$0xff] }
  0xf8   :  { %23263 = vst [vmem:[#allocation143_spill] sm:$0xff] %v17823_v41  ;;  %v216_v10 = vpop.f32.mrf.mxu0  ;;  %1923 = vmatmul.mubr.f32.vlgmr.msra.gmra.mxu0 %v23179_v16  ;;  %2153 = vmatprep.mubr.f32.mxu1 %v23179_v16 }
  0xf9   :  { %v217_v0 = vadd.f32 %v216_v10, %v17727_v63  ;;  %v363_v9 = vpop.f32.mrf.mxu1  ;;  %2165 = vmatpush1.msra.mxu0 %v17332_v38  ;;  %2296 = vmatprep.subr.mxu1 %v17273_v24  ;;  %v23279_v38 = vld [vmem:[#allocation58_spill] sm:$0xff] }
  0xfa   :  { %v17832_v58 = vpop.f32.mrf.mxu0  ;;  %2154 = vmatmul.mubr.f32.vlgmr.msra.gmra.mxu1 %v23179_v16  ;;  %2168 = vmatprep.subr.mxu0 %v17337_v40 }
  0xfb   :  { %23264 = vst [vmem:[#allocation144_spill] sm:$0xff] %v17832_v58  ;;  %v17836_v32 = vadd.f32 %v363_v9, %v217_v0  ;;  %v17838_v56 = vpop.f32.mrf.mxu1  ;;  %2298 = vmatpush1.msra.mxu1 %v17321_v27  ;;  %2171 = vmatpush1.msra.mxu0 %v17347_v45  ;;  %v23277_v45 = vld [vmem:[#allocation56_spill] sm:$0xff] }
  0xfc   :  { %23265 = vst [vmem:[#allocation145_spill] sm:$0xff] %v17838_v56  ;;  %v227_v10 = vpop.f32.mrf.mxu0  ;;  %2300 = vmatprep.subr.mxu1 %v17323_v26  ;;  %2174 = vmatprep.subr.mxu0 %v17354_v47  ;;  %v23276_v47 = vld [vmem:[#allocation37_spill] sm:$0xff] }
  0xfd   :  { %v228_v41 = vadd.f32 %v227_v10, %v17727_v63  ;;  %v370_v58 = vpop.f32.mrf.mxu1  ;;  %2302 = vmatpush1.msra.mxu1 %v17328_v34  ;;  %2177 = vmatpush1.msra.mxu0 %v17363_v53 }
  0xfe   :  { %v17847_v0 = vpop.f32.mrf.mxu0  ;;  %2304 = vmatprep.subr.mxu1 %v17334_v39  ;;  %2180 = vmatprep.subr.mxu0 %v17366_v54 }
  0xff   :  { %23266 = vst [vmem:[#allocation146_spill] sm:$0xff] %v17847_v0  ;;  %v17851_v9 = vadd.f32 %v370_v58, %v228_v41  ;;  %v17853_v56 = vpop.f32.mrf.mxu1  ;;  %2306 = vmatpush1.msra.mxu1 %v17340_v42  ;;  %2183 = vmatpush1.msra.mxu0 %v17386_v2  ;;  %v23270_v2 = vld [vmem:[#allocation31_spill] sm:$0xff] }
 0x100   :  { %23267 = vst [vmem:[#allocation147_spill] sm:$0xff] %v17853_v56  ;;  %v238_v10 = vpop.f32.mrf.mxu0  ;;  %2308 = vmatprep.subr.mxu1 %v17342_v43  ;;  %2186 = vmatprep.subr.mxu0 %v17402_v11 }
 0x101   :  { %v239_v20 = vadd.f32 %v238_v10, %v17727_v63  ;;  %v377_v0 = vpop.f32.mrf.mxu1  ;;  %2310 = vmatpush1.msra.mxu1 %v17359_v50  ;;  %2189 = vmatpush1.msra.mxu0 %v17412_v3  ;;  %v23275_v3 = vld [vmem:[#allocation52_spill] sm:$0xff] }
 0x102   :  { %v17862_v41 = vpop.f32.mrf.mxu0  ;;  %2312 = vmatprep.subr.mxu1 %v17373_v59  ;;  %2192 = vmatprep.subr.mxu0 %v17420_v21  ;;  %v23278_v21 = vld [vmem:[#allocation43_spill] sm:$0xff] }
 0x103   :  { %23268 = vst [vmem:[#allocation148_spill] sm:$0xff] %v17862_v41  ;;  %v17866_v58 = vadd.f32 %v377_v0, %v239_v20  ;;  %v17868_v56 = vpop.f32.mrf.mxu1  ;;  %2314 = vmatpush1.msra.mxu1 %v23270_v2  ;;  %v23272_v0 = vld [vmem:[#allocation47_spill] sm:$0xff]  ;;  %2288 = vmatprep.mubr.f32.mxu0 %v23179_v16 }
 0x104   :  { %23269 = vst [vmem:[#allocation149_spill] sm:$0xff] %v17868_v56  ;;  %v249_v10 = vpop.f32.mrf.mxu0  ;;  %2195 = vmatpush1.msra.mxu0 %v23272_v0  ;;  %v23273_v56 = vld [vmem:[#allocation33_spill] sm:$0xff]  ;;  %v23280_v0 = vld [vmem:[#allocation44_spill] sm:$0xff]  ;;  %2391 = vmatprep.mubr.f32.mxu1 %v23179_v16 }
 0x105   :  { %v250_v54 = vadd.f32 %v249_v10, %v17727_v63  ;;  %v384_v41 = vpop.f32.mrf.mxu1  ;;  %2316 = vmatprep.subr.mxu1 %v23273_v56  ;;  %2198 = vmatprep.subr.mxu0 %v23275_v3 }
 0x106   :  { %v17877_v20 = vpop.f32.mrf.mxu0  ;;  %2318 = vmatpush1.msra.mxu1 %v23276_v47  ;;  %2201 = vmatpush1.msra.mxu0 %v23277_v45  ;;  %v23284_v45 = vld [vmem:[#allocation69_spill] sm:$0xff] }
 0x107   :  { %23271 = vst [vmem:[#allocation150_spill] sm:$0xff] %v17877_v20  ;;  %v17881_v11 = vadd.f32 %v384_v41, %v250_v54  ;;  %v17883_v53 = vpop.f32.mrf.mxu1  ;;  %2320 = vmatprep.subr.mxu1 %v23278_v21  ;;  %2204 = vmatprep.subr.mxu0 %v23279_v38  ;;  %v23282_v41 = vld [vmem:[#allocation64_spill] sm:$0xff]  ;;  %v23287_v38 = vld [vmem:[#allocation59_spill] sm:$0xff] }
 0x108   :  { %23274 = vst [vmem:[#allocation151_spill] sm:$0xff] %v17883_v53  ;;  %v260_v10 = vpop.f32.mrf.mxu0  ;;  %2322 = vmatpush1.msra.mxu1 %v23280_v0  ;;  %2207 = vmatpush1.msra.mxu0 %v23282_v41  ;;  %v23289_v41 = vld [vmem:[#allocation60_spill] sm:$0xff] }
 0x109   :  { %v261_v40 = vadd.f32 %v260_v10, %v17727_v63  ;;  %v391_v20 = vpop.f32.mrf.mxu1  ;;  %2324 = vmatprep.subr.mxu1 %v17441_v37  ;;  %2210 = vmatprep.subr.mxu0 %v23284_v45  ;;  %v23286_v10 = vld [vmem:[#allocation71_spill] sm:$0xff] }
 0x10a   :  { %v17892_v54 = vpop.f32.mrf.mxu0  ;;  %2326 = vmatpush1.msra.mxu1 %v23285_v28  ;;  %2213 = vmatpush1.msra.mxu0 %v23286_v10  ;;  %v23293_v10 = vld [vmem:[#allocation84_spill] sm:$0xff] }
 0x10b   :  { %23281 = vst [vmem:[#allocation152_spill] sm:$0xff] %v17892_v54  ;;  %v17896_v53 = vadd.f32 %v391_v20, %v261_v40  ;;  %v17898_v3 = vpop.f32.mrf.mxu1  ;;  %2328 = vmatprep.subr.mxu1 %v23287_v38  ;;  %2216 = vmatprep.subr.mxu0 %v23288_v35  ;;  %v23291_v20 = vld [vmem:[#allocation76_spill] sm:$0xff] }
 0x10c   :  { %23283 = vst [vmem:[#allocation153_spill] sm:$0xff] %v17898_v3  ;;  %v468_v63 = vpop.f32.mrf.mxu0  ;;  %2330 = vmatpush1.msra.mxu1 %v23289_v41  ;;  %2219 = vmatpush1.msra.mxu0 %v23291_v20 }
 0x10d   :  { %v469_v1 = vadd.f32 %v468_v63, %v17775_v25  ;;  %v600_v54 = vpop.f32.mrf.mxu1  ;;  %2332 = vmatprep.subr.mxu1 %v17489_v7  ;;  %2222 = vmatprep.subr.mxu0 %v23293_v10  ;;  %v23294_v63 = vld [vmem:[#allocation88_spill] sm:$0xff] }
 0x10e   :  { %v17907_v40 = vpop.f32.mrf.mxu0  ;;  %2334 = vmatpush1.msra.mxu1 %v17508_v44  ;;  %2225 = vmatpush1.msra.mxu0 %v23294_v63  ;;  %v23320_v63 = vld [vmem:[#allocation46_spill] sm:$0xff] }
 0x10f   :  { %23290 = vst [vmem:[#allocation154_spill] sm:$0xff] %v17907_v40  ;;  %v17911_v3 = vadd.f32 %v600_v54, %v469_v1  ;;  %v17913_v45 = vpop.f32.mrf.mxu1  ;;  %2336 = vmatprep.subr.mxu1 %v17541_v62  ;;  %2228 = vmatprep.subr.mxu0 %v23295_v8 }
 0x110   :  { %23292 = vst [vmem:[#allocation155_spill] sm:$0xff] %v17913_v45  ;;  %v476_v25 = vpop.f32.mrf.mxu0  ;;  %2338 = vmatpush1.msra.mxu1 %v17550_v33  ;;  %2231 = vmatpush1.msra.mxu0 %v17619_v19  ;;  %v23326_v45 = vld [vmem:[#allocation51_spill] sm:$0xff] }
 0x111   :  { %v477_v35 = vadd.f32 %v476_v25, %v17800_v12  ;;  %v609_v40 = vpop.f32.mrf.mxu1  ;;  %2340 = vmatprep.subr.mxu1 %v17552_v14  ;;  %2234 = vmatprep.subr.mxu0 %v17638_v31 }
 0x112   :  { %v17922_v1 = vpop.f32.mrf.mxu0  ;;  %2342 = vmatpush1.msra.mxu1 %v17580_v46  ;;  %2237 = vmatpush1.msra.mxu0 %v17651_v29 }
 0x113   :  { %23296 = vst [vmem:[#allocation156_spill] sm:$0xff] %v17922_v1  ;;  %v17926_v54 = vadd.f32 %v609_v40, %v477_v35  ;;  %v17928_v10 = vpop.f32.mrf.mxu1  ;;  %2344 = vmatprep.subr.mxu1 %v17601_v60  ;;  %2240 = vmatprep.subr.mxu0 %v17661_v23  ;;  %v23299_v40 = vld [vmem:[#allocation112_spill] sm:$0xff] }
 0x114   :  { %23297 = vst [vmem:[#allocation157_spill] sm:$0xff] %v17928_v10  ;;  %v484_v12 = vpop.f32.mrf.mxu0  ;;  %2346 = vmatpush1.msra.mxu1 %v17609_v57  ;;  %2243 = vmatpush1.msra.mxu0 %v23299_v40  ;;  %v23307_v40 = vld [vmem:[#allocation24_spill] sm:$0xff] }
 0x115   :  { %v485_v25 = vadd.f32 %v484_v12, %v17821_v15  ;;  %v618_v1 = vpop.f32.mrf.mxu1  ;;  %2348 = vmatprep.subr.mxu1 %v17621_v4  ;;  %2246 = vmatprep.subr.mxu0 %v17706_v18  ;;  %v23309_v23 = vld [vmem:[#allocation28_spill] sm:$0xff] }
 0x116   :  { %v17937_v35 = vpop.f32.mrf.mxu0  ;;  %2350 = vmatpush1.msra.mxu1 %v17640_v13  ;;  %2249 = vmatpush1.msra.mxu0 %v17715_v22 }
 0x117   :  { %23298 = vst [vmem:[#allocation158_spill] sm:$0xff] %v17937_v35  ;;  %v17941_v10 = vadd.f32 %v618_v1, %v485_v25  ;;  %v17943_v31 = vpop.f32.mrf.mxu1  ;;  %2352 = vmatprep.subr.mxu1 %v17663_v49  ;;  %2252 = vmatprep.subr.mxu0 %v17725_v51  ;;  %v1825_v51 = vld [vmem:[#allocation3 + $0x1f8] sm:$0xff] }
 0x118   :  { %23300 = vst [vmem:[#allocation159_spill] sm:$0xff] %v17943_v31  ;;  %v492_v15 = vpop.f32.mrf.mxu0  ;;  %2354 = vmatpush1.msra.mxu1 %v17673_v55  ;;  %2255 = vmatpush1.msra.mxu0 %v17734_v5  ;;  %v23303_v5 = vld [vmem:[#allocation11_spill] sm:$0xff] }
 0x119   :  { %v493_v12 = vadd.f32 %v492_v15, %v17836_v32  ;;  %v627_v35 = vpop.f32.mrf.mxu1  ;;  %2356 = vmatprep.subr.mxu1 %v17683_v48  ;;  %2289 = vmatmul.mubr.f32.vlgmr.msra.gmra.mxu0 %v23179_v16 }
 0x11a   :  { %v17952_v1 = vpop.f32.mrf.mxu0  ;;  %2358 = vmatpush1.msra.mxu1 %v17691_v6  ;;  %2401 = vmatprep.subr.mxu0 %v23303_v5  ;;  %v1821_v5 = vld [vmem:[#allocation3 + $0x1d8] sm:$0xff] }
 0x11b   :  { %23301 = vst [vmem:[#allocation160_spill] sm:$0xff] %v17952_v1  ;;  %v17956_v25 = vadd.f32 %v627_v35, %v493_v12  ;;  %v17958_v31 = vpop.f32.mrf.mxu1  ;;  %2392 = vmatmul.mubr.f32.vlgmr.msra.gmra.mxu1 %v23179_v16  ;;  %v1824_v12 = vld [vmem:[#allocation3 + $0x1f0] sm:$0xff]  ;;  %2566 = vmatprep.subr.mxu1 %v17273_v24  ;;  %v17994_v19 = vand.u32 4294901760, %v1821_v5 }
 0x11c   :  { %23302 = vst [vmem:[#allocation161_spill] sm:$0xff] %v17958_v31  ;;  %v500_v32 = vpop.f32.mrf.mxu0  ;;  %v23305_v31 = vld [vmem:[#allocation22_spill] sm:$0xff]  ;;  %2568 = vmatpush1.msra.mxu1 %v17321_v27  ;;  %v17982_v29 = vand.u32 4294901760, %v1824_v12  ;;  %2558 = vmatprep.mubr.f32.mxu0 %v23179_v16 }
 0x11d   :  { %v501_v15 = vadd.f32 %v500_v32, %v17851_v9  ;;  %v636_v1 = vpop.f32.mrf.mxu1  ;;  %2405 = vmatpush1.msra.mxu0 %v23305_v31  ;;  %v17977_v32 = vand.u32 4294901760, %v1825_v51  ;;  %2570 = vmatprep.subr.mxu1 %v17323_v26  ;;  %23315 = vst [vmem:[#allocation168_spill] sm:$0xff] %v17994_v19  ;;  %v1801_v26 = vld [vmem:[#allocation3 + $0x138] sm:$0xff] }
 0x11e   :  { %v17967_v35 = vpop.f32.mrf.mxu0  ;;  %2409 = vmatprep.subr.mxu0 %v23307_v40  ;;  %23310 = vst [vmem:[#allocation165_spill] sm:$0xff] %v17982_v29  ;;  %2572 = vmatpush1.msra.mxu1 %v17328_v34 }
 0x11f   :  { %23304 = vst [vmem:[#allocation162_spill] sm:$0xff] %v17967_v35  ;;  %v17971_v22 = vadd.f32 %v636_v1, %v501_v15  ;;  %v17973_v18 = vpop.f32.mrf.mxu1  ;;  %23308 = vst [vmem:[#allocation164_spill] sm:$0xff] %v17977_v32  ;;  %2413 = vmatpush1.msra.mxu0 %v23309_v23  ;;  %v23311_v1 = vld [vmem:[#allocation30_spill] sm:$0xff]  ;;  %2574 = vmatprep.subr.mxu1 %v17334_v39  ;;  %v17999_v8 = vsub.f32 %v1825_v51, %v17977_v32  ;;  %v23347_v39 = vld [vmem:[#allocation81_spill] sm:$0xff] }
 0x120   :  { %23306 = vst [vmem:[#allocation163_spill] sm:$0xff] %v17973_v18  ;;  %v508_v9 = vpop.f32.mrf.mxu0  ;;  %2417 = vmatprep.subr.mxu0 %v23311_v1  ;;  %v23313_v18 = vld [vmem:[#allocation34_spill] sm:$0xff]  ;;  %2576 = vmatpush1.msra.mxu1 %v17340_v42 }
 0x121   :  { %v509_v35 = vadd.f32 %v508_v9, %v17866_v58  ;;  %v645_v31 = vpop.f32.mrf.mxu1  ;;  %2421 = vmatpush1.msra.mxu0 %v23313_v18  ;;  %v1820_v58 = vld [vmem:[#allocation3 + $0x1d0] sm:$0xff]  ;;  %23317 = vst [vmem:[#allocation169_spill] sm:$0xff] %v17999_v8  ;;  %2578 = vmatprep.subr.mxu1 %v17342_v43  ;;  %v1817_v18 = vld [vmem:[#allocation3 + $0x1b8] sm:$0xff]  ;;  %v23323_v51 = vld [vmem:[#allocation50_spill] sm:$0xff] }
 0x122   :  { %v17986_v15 = vpop.f32.mrf.mxu0  ;;  %v23316_v9 = vld [vmem:[#allocation35_spill] sm:$0xff]  ;;  %2580 = vmatpush1.msra.mxu1 %v17359_v50  ;;  %v18011_v20 = vand.u32 4294901760, %v1820_v58  ;;  %v18027_v52 = vand.u32 4294901760, %v1817_v18  ;;  %v23342_v43 = vld [vmem:[#allocation80_spill] sm:$0xff]  ;;  %2661 = vmatprep.mubr.f32.mxu1 %v23179_v16 }
 0x123   :  { %23312 = vst [vmem:[#allocation166_spill] sm:$0xff] %v17986_v15  ;;  %v17990_v40 = vadd.f32 %v645_v31, %v509_v35  ;;  %v17992_v23 = vpop.f32.mrf.mxu1  ;;  %2425 = vmatprep.subr.mxu0 %v23316_v9  ;;  %v23318_v15 = vld [vmem:[#allocation41_spill] sm:$0xff]  ;;  %2582 = vmatprep.subr.mxu1 %v17373_v59 }
 0x124   :  { %23314 = vst [vmem:[#allocation167_spill] sm:$0xff] %v17992_v23  ;;  %v516_v1 = vpop.f32.mrf.mxu0  ;;  %2429 = vmatpush1.msra.mxu0 %v23318_v15  ;;  %v18005_v23 = vsub.f32 %v1824_v12, %v17982_v29  ;;  %23322 = vst [vmem:[#allocation172_spill] sm:$0xff] %v18011_v20  ;;  %v18020_v12 = vsub.f32 %v1821_v5, %v17994_v19  ;;  %2584 = vmatpush1.msra.mxu1 %v23270_v2 }
 0x125   :  { %v517_v31 = vadd.f32 %v516_v1, %v17881_v11  ;;  %v654_v35 = vpop.f32.mrf.mxu1  ;;  %2433 = vmatprep.subr.mxu0 %v23320_v63  ;;  %v1816_v1 = vld [vmem:[#allocation3 + $0x1b0] sm:$0xff]  ;;  %23328 = vst [vmem:[#allocation176_spill] sm:$0xff] %v18027_v52  ;;  %2586 = vmatprep.subr.mxu1 %v23273_v56  ;;  %v18040_v2 = vsub.f32 %v1820_v58, %v18011_v20 }
 0x126   :  { %23319 = vst [vmem:[#allocation170_spill] sm:$0xff] %v18005_v23  ;;  %v18009_v9 = vpop.f32.mrf.mxu0  ;;  %2437 = vmatpush1.msra.mxu0 %v23323_v51  ;;  %23325 = vst [vmem:[#allocation174_spill] sm:$0xff] %v18020_v12  ;;  %v23329_v51 = vld [vmem:[#allocation57_spill] sm:$0xff]  ;;  %v18033_v5 = vand.u32 4294901760, %v18005_v23  ;;  %2588 = vmatpush1.msra.mxu1 %v23276_v47  ;;  %v18042_v59 = vand.u32 4294901760, %v1816_v1  ;;  %v18051_v56 = vand.u32 4294901760, %v18020_v12 }
 0x127   :  { %23321 = vst [vmem:[#allocation171_spill] sm:$0xff] %v18009_v9  ;;  %v18015_v15 = vadd.f32 %v654_v35, %v517_v31  ;;  %v18017_v11 = vpop.f32.mrf.mxu1  ;;  %2441 = vmatprep.subr.mxu0 %v23326_v45  ;;  %v18025_v9 = vand.u32 4294901760, %v17999_v8  ;;  %v23331_v45 = vld [vmem:[#allocation63_spill] sm:$0xff]  ;;  %23333 = vst [vmem:[#allocation179_spill] sm:$0xff] %v18040_v2  ;;  %2590 = vmatprep.subr.mxu1 %v23278_v21  ;;  %v23338_v47 = vld [vmem:[#allocation68_spill] sm:$0xff]  ;;  %v18072_v42 = vand.u32 4294901760, %v18040_v2 }
 0x128   :  { %23324 = vst [vmem:[#allocation173_spill] sm:$0xff] %v18017_v11  ;;  %v524_v63 = vpop.f32.mrf.mxu0  ;;  %2445 = vmatpush1.msra.mxu0 %v23329_v51  ;;  %23330 = vst [vmem:[#allocation177_spill] sm:$0xff] %v18033_v5  ;;  %v1813_v11 = vld [vmem:[#allocation3 + $0x198] sm:$0xff]  ;;  %v23335_v51 = vld [vmem:[#allocation65_spill] sm:$0xff]  ;;  %2592 = vmatpush1.msra.mxu1 %v23280_v0 }
 0x129   :  { %23327 = vst [vmem:[#allocation175_spill] sm:$0xff] %v18025_v9  ;;  %v525_v31 = vadd.f32 %v524_v63, %v17896_v53  ;;  %v663_v35 = vpop.f32.mrf.mxu1  ;;  %2449 = vmatprep.subr.mxu0 %v23331_v45  ;;  %23334 = vst [vmem:[#allocation180_spill] sm:$0xff] %v18042_v59  ;;  %v1812_v45 = vld [vmem:[#allocation3 + $0x190] sm:$0xff]  ;;  %v18060_v21 = vand.u32 4294901760, %v1813_v11  ;;  %2594 = vmatprep.subr.mxu1 %v17441_v37 }
 0x12a   :  { %v18037_v30 = vpop.f32.mrf.mxu0  ;;  %2453 = vmatpush1.msra.mxu0 %v23335_v51  ;;  %23337 = vst [vmem:[#allocation182_spill] sm:$0xff] %v18051_v56  ;;  %v18058_v51 = vsub.f32 %v1817_v18, %v18027_v52  ;;  %v1808_v0 = vld [vmem:[#allocation3 + $0x170] sm:$0xff]  ;;  %2596 = vmatpush1.msra.mxu1 %v23285_v28  ;;  %23344 = vst [vmem:[#allocation186_spill] sm:$0xff] %v18072_v42  ;;  %v18077_v37 = vand.u32 4294901760, %v1812_v45 }
 0x12b   :  { %23332 = vst [vmem:[#allocation178_spill] sm:$0xff] %v18037_v30  ;;  %v18046_v53 = vadd.f32 %v663_v35, %v525_v31  ;;  %v18048_v63 = vpop.f32.mrf.mxu1  ;;  %2457 = vmatprep.subr.mxu0 %v23338_v47  ;;  %v2774_v30 = vsub.f32 %v17999_v8, %v18025_v9  ;;  %23340 = vst [vmem:[#allocation184_spill] sm:$0xff] %v18060_v21  ;;  %v1809_v31 = vld [vmem:[#allocation3 + $0x178] sm:$0xff]  ;;  %v23341_v35 = vld [vmem:[#allocation74_spill] sm:$0xff]  ;;  %v2780_v47 = vsub.f32 %v18005_v23, %v18033_v5 }
 0x12c   :  { %23336 = vst [vmem:[#allocation181_spill] sm:$0xff] %v18048_v63  ;;  %v741_v58 = vpop.f32.mrf.mxu0  ;;  %23339 = vst [vmem:[#allocation183_spill] sm:$0xff] %v18058_v51  ;;  %2461 = vmatpush1.msra.mxu0 %v23341_v35  ;;  %v18075_v35 = vsub.f32 %v1816_v1, %v18042_v59  ;;  %2598 = vmatprep.subr.mxu1 %v23287_v38  ;;  %v18087_v28 = vand.u32 4294901760, %v1809_v31  ;;  %v23351_v1 = vld [vmem:[#allocation82_spill] sm:$0xff]  ;;  %v1797_v5 = vld [vmem:[#allocation3 + $0x118] sm:$0xff] }
 0x12d   :  { %v742_v63 = vadd.f32 %v741_v58, %v17911_v3  ;;  %v864_v50 = vpop.f32.mrf.mxu1  ;;  %2465 = vmatprep.subr.mxu0 %v23342_v43  ;;  %23346 = vst [vmem:[#allocation188_spill] sm:$0xff] %v18077_v37  ;;  %v1805_v3 = vld [vmem:[#allocation3 + $0x158] sm:$0xff]  ;;  %v1804_v58 = vld [vmem:[#allocation3 + $0x150] sm:$0xff]  ;;  %v2786_v43 = vsub.f32 %v18020_v12, %v18051_v56  ;;  %2600 = vmatpush1.msra.mxu1 %v23289_v41  ;;  %v18091_v27 = vand.u32 4294901760, %v2774_v30  ;;  %v18103_v38 = vand.u32 4294901760, %v2780_v47  ;;  %v23360_v9 = vld [vmem:[#allocation94_spill] sm:$0xff] }
 0x12e   :  { %v18069_v18 = vpop.f32.mrf.mxu0  ;;  %23345 = vst [vmem:[#allocation187_spill] sm:$0xff] %v18075_v35  ;;  %2469 = vmatpush1.msra.mxu0 %v23347_v39  ;;  %23350 = vst [vmem:[#allocation191_spill] sm:$0xff] %v18087_v28  ;;  %v18094_v39 = vand.u32 4294901760, %v18058_v51  ;;  %2602 = vmatprep.subr.mxu1 %v17489_v7  ;;  %v18106_v41 = vand.u32 4294901760, %v1805_v3  ;;  %v18108_v56 = vand.u32 4294901760, %v1804_v58  ;;  %v1796_v7 = vld [vmem:[#allocation3 + $0x110] sm:$0xff] }
 0x12f   :  { %23343 = vst [vmem:[#allocation185_spill] sm:$0xff] %v18069_v18  ;;  %v18081_v34 = vadd.f32 %v864_v50, %v742_v63  ;;  %v18085_v18 = vpop.f32.mrf.mxu1  ;;  %2473 = vmatprep.subr.mxu0 %v23351_v1  ;;  %23352 = vst [vmem:[#allocation192_spill] sm:$0xff] %v18091_v27  ;;  %v18097_v50 = vsub.f32 %v1813_v11, %v18060_v21  ;;  %v18099_v63 = vand.u32 4294901760, %v1808_v0  ;;  %2604 = vmatpush1.msra.mxu1 %v17508_v44  ;;  %v23365_v12 = vld [vmem:[#allocation97_spill] sm:$0xff]  ;;  %v23371_v23 = vld [vmem:[#allocation98_spill] sm:$0xff] }
 0x130   :  { %23349 = vst [vmem:[#allocation190_spill] sm:$0xff] %v18085_v18  ;;  %v748_v24 = vpop.f32.mrf.mxu0  ;;  %23353 = vst [vmem:[#allocation193_spill] sm:$0xff] %v18094_v39  ;;  %v23356_v18 = vld [vmem:[#allocation87_spill] sm:$0xff]  ;;  %v2792_v11 = vsub.f32 %v18040_v2, %v18072_v42  ;;  %2606 = vmatprep.subr.mxu1 %v17541_v62  ;;  %v18133_v2 = vsub.f32 %v1809_v31, %v18087_v28  ;;  %v23375_v31 = vld [vmem:[#allocation106_spill] sm:$0xff]  ;;  %v18156_v62 = vsub.f32 %v1804_v58, %v18108_v56 }
 0x131   :  { %23348 = vst [vmem:[#allocation189_spill] sm:$0xff] %v18081_v34  ;;  %23354 = vst [vmem:[#allocation194_spill] sm:$0xff] %v18097_v50  ;;  %v1800_v34 = vld [vmem:[#allocation3 + $0x130] sm:$0xff]  ;;  %2477 = vmatpush1.msra.mxu0 %v23356_v18  ;;  %v749_v1 = vadd.f32 %v748_v24, %v17926_v54  ;;  %v871_v30 = vpop.f32.mrf.mxu1  ;;  %v18115_v18 = vand.u32 4294901760, %v18075_v35  ;;  %v18120_v24 = vsub.f32 %v1812_v45, %v18077_v37  ;;  %v18122_v54 = vand.u32 4294901760, %v1801_v26  ;;  %v1793_v45 = vld [vmem:[#allocation3 + $0xf8] sm:$0xff] }
 0x132   :  { %23355 = vst [vmem:[#allocation195_spill] sm:$0xff] %v18099_v63  ;;  %23357 = vst [vmem:[#allocation196_spill] sm:$0xff] %v18103_v38  ;;  %2481 = vmatprep.subr.mxu0 %v23360_v9  ;;  %v18117_v47 = vpop.f32.mrf.mxu0  ;;  %v18126_v9 = vand.u32 4294901760, %v2786_v43  ;;  %2608 = vmatpush1.msra.mxu1 %v17550_v33  ;;  %v18142_v43 = vand.u32 4294901760, %v18097_v50  ;;  %v18153_v33 = vsub.f32 %v1805_v3, %v18106_v41  ;;  %v18172_v3 = vand.u32 4294901760, %v1793_v45  ;;  %v23385_v58 = vld [vmem:[#allocation114_spill] sm:$0xff] }
 0x133   :  { %23358 = vst [vmem:[#allocation197_spill] sm:$0xff] %v18106_v41  ;;  %23359 = vst [vmem:[#allocation198_spill] sm:$0xff] %v18108_v56  ;;  %2485 = vmatpush1.msra.mxu0 %v23365_v12  ;;  %v18128_v44 = vadd.f32 %v871_v30, %v749_v1  ;;  %v18130_v42 = vpop.f32.mrf.mxu1  ;;  %v2798_v12 = vsub.f32 %v18058_v51, %v18094_v39  ;;  %v18145_v30 = vsub.f32 %v1808_v0, %v18099_v63  ;;  %v23379_v51 = vld [vmem:[#allocation111_spill] sm:$0xff]  ;;  %v23390_v8 = vld [vmem:[#allocation117_spill] sm:$0xff] }
 0x134   :  { %23361 = vst [vmem:[#allocation199_spill] sm:$0xff] %v18115_v18  ;;  %23362 = vst [vmem:[#allocation200_spill] sm:$0xff] %v18117_v47  ;;  %v18135_v47 = vand.u32 4294901760, %v1800_v34  ;;  %2489 = vmatprep.subr.mxu0 %v23371_v23  ;;  %v755_v1 = vpop.f32.mrf.mxu0  ;;  %2610 = vmatprep.subr.mxu1 %v17552_v14  ;;  %v18158_v39 = vand.u32 4294901760, %v1796_v7  ;;  %v18162_v0 = vand.u32 4294901760, %v2792_v11  ;;  %v18179_v11 = vand.u32 4294901760, %v18133_v2 }
 0x135   :  { %23363 = vst [vmem:[#allocation201_spill] sm:$0xff] %v18120_v24  ;;  %23364 = vst [vmem:[#allocation202_spill] sm:$0xff] %v18122_v54  ;;  %2493 = vmatpush1.msra.mxu0 %v23375_v31  ;;  %v878_v23 = vpop.f32.mrf.mxu1  ;;  %2612 = vmatpush1.msra.mxu1 %v17580_v46  ;;  %v18165_v31 = vand.u32 4294901760, %v18120_v24 }
 0x136   :  { %23366 = vst [vmem:[#allocation203_spill] sm:$0xff] %v18126_v9  ;;  %23367 = vst [vmem:[#allocation204_spill] sm:$0xff] %v18128_v44  ;;  %v18147_v44 = vand.u32 4294901760, %v1797_v5  ;;  %2497 = vmatprep.subr.mxu0 %v23379_v51  ;;  %v18167_v14 = vpop.f32.mrf.mxu0  ;;  %2614 = vmatprep.subr.mxu1 %v17601_v60  ;;  %v2810_v60 = vsub.f32 %v18097_v50, %v18142_v43 }
 0x137   :  { %23368 = vst [vmem:[#allocation205_spill] sm:$0xff] %v18130_v42  ;;  %23369 = vst [vmem:[#allocation206_spill] sm:$0xff] %v18133_v2  ;;  %v756_v42 = vadd.f32 %v755_v1, %v17941_v10  ;;  %v18170_v10 = vsub.f32 %v1801_v26, %v18122_v54  ;;  %2501 = vmatpush1.msra.mxu0 %v23385_v58  ;;  %v2804_v1 = vsub.f32 %v18075_v35, %v18115_v18  ;;  %v18183_v46 = vpop.f32.mrf.mxu1  ;;  %v1792_v26 = vld [vmem:[#allocation3 + $0xf0] sm:$0xff] }
 0x138   :  { %23370 = vst [vmem:[#allocation207_spill] sm:$0xff] %v18135_v47  ;;  %23372 = vst [vmem:[#allocation208_spill] sm:$0xff] %v18142_v43  ;;  %2505 = vmatprep.subr.mxu0 %v23390_v8  ;;  %2616 = vmatpush1.msra.mxu1 %v17609_v57  ;;  %v18190_v58 = vand.u32 4294901760, %v2798_v12  ;;  %v18195_v18 = vand.u32 4294901760, %v18145_v30  ;;  %v18206_v12 = vand.u32 4294901760, %v18156_v62  ;;  %v18210_v57 = vsub.f32 %v1796_v7, %v18158_v39  ;;  %v1789_v43 = vld [vmem:[#allocation3 + $0xd8] sm:$0xff] }
 0x139   :  { %23373 = vst [vmem:[#allocation209_spill] sm:$0xff] %v18145_v30  ;;  %23374 = vst [vmem:[#allocation210_spill] sm:$0xff] %v18147_v44  ;;  %v18181_v51 = vadd.f32 %v878_v23, %v756_v42  ;;  %v762_v42 = vpop.f32.mrf.mxu0  ;;  %v18198_v23 = vsub.f32 %v1797_v5, %v18147_v44  ;;  %2618 = vmatprep.subr.mxu1 %v17621_v4  ;;  %v885_v8 = vpop.f32.mrf.mxu1  ;;  %v2816_v5 = vsub.f32 %v18120_v24, %v18165_v31  ;;  %v23402_v7 = vld [vmem:[#allocation127_spill] sm:$0xff] }
 0x13a   :  { %23376 = vst [vmem:[#allocation211_spill] sm:$0xff] %v18153_v33  ;;  %23377 = vst [vmem:[#allocation212_spill] sm:$0xff] %v18156_v62  ;;  %2620 = vmatpush1.msra.mxu1 %v17640_v13  ;;  %v18221_v50 = vand.u32 4294901760, %v1792_v26 }
 0x13b   :  { %23378 = vst [vmem:[#allocation213_spill] sm:$0xff] %v18158_v39  ;;  %23380 = vst [vmem:[#allocation214_spill] sm:$0xff] %v18162_v0  ;;  %v18219_v4 = vpop.f32.mrf.mxu0  ;;  %2622 = vmatprep.subr.mxu1 %v17663_v49 }
 0x13c   :  { %23381 = vst [vmem:[#allocation215_spill] sm:$0xff] %v18165_v31  ;;  %23382 = vst [vmem:[#allocation216_spill] sm:$0xff] %v18167_v14  ;;  %v18186_v14 = vsub.f32 %v1800_v34, %v18135_v47  ;;  %v18203_v34 = vand.u32 4294901760, %v18153_v33  ;;  %2624 = vmatpush1.msra.mxu1 %v17673_v55 }
 0x13d   :  { %23383 = vst [vmem:[#allocation217_spill] sm:$0xff] %v18170_v10  ;;  %23384 = vst [vmem:[#allocation218_spill] sm:$0xff] %v18172_v3  ;;  %v769_v49 = vpop.f32.mrf.mxu0  ;;  %2626 = vmatprep.subr.mxu1 %v17683_v48 }
 0x13e   :  { %23386 = vst [vmem:[#allocation219_spill] sm:$0xff] %v18179_v11  ;;  %23387 = vst [vmem:[#allocation220_spill] sm:$0xff] %v18181_v51  ;;  %v23394_v51 = vld [vmem:[#allocation122_spill] sm:$0xff]  ;;  %v18235_v31 = vand.u32 4294901760, %v18186_v14  ;;  %2628 = vmatpush1.msra.mxu1 %v17691_v6 }
 0x13f   :  { %23388 = vst [vmem:[#allocation221_spill] sm:$0xff] %v18183_v46  ;;  %23389 = vst [vmem:[#allocation222_spill] sm:$0xff] %v18186_v14  ;;  %2509 = vmatpush1.msra.mxu0 %v23394_v51  ;;  %v763_v46 = vadd.f32 %v762_v42, %v17956_v25  ;;  %v18217_v51 = vand.u32 4294901760, %v18170_v10  ;;  %v18224_v25 = vsub.f32 %v1793_v45, %v18172_v3  ;;  %v18228_v42 = vand.u32 4294901760, %v2804_v1 }
 0x140   :  { %23391 = vst [vmem:[#allocation223_spill] sm:$0xff] %v18190_v58  ;;  %23392 = vst [vmem:[#allocation224_spill] sm:$0xff] %v18195_v18  ;;  %2513 = vmatprep.subr.mxu0 %v17743_v61  ;;  %v2822_v61 = vsub.f32 %v18133_v2, %v18179_v11  ;;  %v18241_v45 = vand.u32 4294901760, %v2810_v60  ;;  %v2828_v1 = vsub.f32 %v18145_v30, %v18195_v18  ;;  %v1785_v18 = vld [vmem:[#allocation3 + $0xb8] sm:$0xff]  ;;  %2662 = vmatmul.mubr.f32.vlgmr.msra.gmra.mxu1 %v23179_v16 }
 0x141   :  { %23393 = vst [vmem:[#allocation225_spill] sm:$0xff] %v18198_v23  ;;  %23395 = vst [vmem:[#allocation226_spill] sm:$0xff] %v18203_v34  ;;  %2517 = vmatpush1.msra.mxu0 %v23402_v7  ;;  %v18232_v13 = vadd.f32 %v885_v8, %v763_v46  ;;  %v18246_v7 = vand.u32 4294901760, %v18198_v23  ;;  %v18248_v46 = vand.u32 4294901760, %v1789_v43  ;;  %v1788_v8 = vld [vmem:[#allocation3 + $0xd0] sm:$0xff]  ;;  %v2840_v60 = vsub.f32 %v18156_v62, %v18206_v12  ;;  %v18272_v62 = vpop.f32.mrf.mxu0 }
 0x142   :  { %23396 = vst [vmem:[#allocation227_spill] sm:$0xff] %v18206_v12  ;;  %23397 = vst [vmem:[#allocation228_spill] sm:$0xff] %v18210_v57  ;;  %2521 = vmatprep.subr.mxu0 %v17757_v36  ;;  %v770_v36 = vadd.f32 %v769_v49, %v17971_v22  ;;  %v2846_v11 = vsub.f32 %v18170_v10, %v18217_v51  ;;  %v18270_v12 = vsub.f32 %v1792_v26, %v18221_v50  ;;  %v1784_v10 = vld [vmem:[#allocation3 + $0xb0] sm:$0xff] }
 0x143   :  { %23398 = vst [vmem:[#allocation229_spill] sm:$0xff] %v18217_v51  ;;  %23399 = vst [vmem:[#allocation230_spill] sm:$0xff] %v18219_v4  ;;  %v18237_v4 = vpop.f32.mrf.mxu1  ;;  %2525 = vmatpush1.msra.mxu0 %v17765_v17  ;;  %v18262_v17 = vand.u32 4294901760, %v2816_v5  ;;  %v18276_v49 = vand.u32 4294901760, %v2822_v61  ;;  %v2852_v22 = vsub.f32 %v18186_v14, %v18235_v31  ;;  %v18282_v48 = vand.u32 4294901760, %v1788_v8  ;;  %2776 = vmatprep.subr.mxu1 %v18091_v27 }
 0x144   :  { %23400 = vst [vmem:[#allocation231_spill] sm:$0xff] %v18221_v50  ;;  %23401 = vst [vmem:[#allocation232_spill] sm:$0xff] %v18224_v25  ;;  %2559 = vmatmul.mubr.f32.vlgmr.msra.gmra.mxu0 %v23179_v16  ;;  %2669 = vmatprep.subr.mxu0 %v17977_v32  ;;  %v18288_v26 = vand.u32 4294901760, %v2828_v1  ;;  %v2858_v61 = vsub.f32 %v18198_v23, %v18246_v7  ;;  %v18295_v6 = vand.u32 4294901760, %v1785_v18  ;;  %v18308_v23 = vand.u32 4294901760, %v2846_v11 }
 0x145   :  { %23403 = vst [vmem:[#allocation233_spill] sm:$0xff] %v18228_v42  ;;  %23404 = vst [vmem:[#allocation234_spill] sm:$0xff] %v18232_v13  ;;  %v2834_v13 = vsub.f32 %v18153_v33, %v18203_v34  ;;  %v892_v55 = vpop.f32.mrf.mxu1  ;;  %v18267_v34 = vand.u32 4294901760, %v18224_v25  ;;  %2671 = vmatpush1.msra.mxu0 %v17982_v29  ;;  %2782 = vmatpush1.msra.mxu1 %v18103_v38  ;;  %v18324_v11 = vsub.f32 %v1788_v8, %v18282_v48  ;;  %v23439_v33 = vld [vmem:[#allocation102_spill] sm:$0xff] }
 0x146   :  { %23405 = vst [vmem:[#allocation235_spill] sm:$0xff] %v18235_v31  ;;  %23406 = vst [vmem:[#allocation236_spill] sm:$0xff] %v18237_v4  ;;  %v18257_v4 = vand.u32 4294901760, %v18210_v57  ;;  %v18280_v5 = vadd.f32 %v892_v55, %v770_v36  ;;  %v776_v55 = vpop.f32.mrf.mxu0  ;;  %v1781_v36 = vld [vmem:[#allocation3 + $0x98] sm:$0xff]  ;;  %2673 = vmatprep.subr.mxu0 %v17994_v19  ;;  %2788 = vmatprep.subr.mxu1 %v18126_v9  ;;  %v75_v30 = vsub.s32 2, %v23439_v33  ;;  %v1768_v33 = vld [vmem:[#allocation3 + $0x30] sm:$0xff] }
 0x147   :  { %23407 = vst [vmem:[#allocation237_spill] sm:$0xff] %v18241_v45  ;;  %23408 = vst [vmem:[#allocation238_spill] sm:$0xff] %v18246_v7  ;;  %v18284_v51 = vpop.f32.mrf.mxu1  ;;  %v777_v7 = vadd.f32 %v776_v55, %v17990_v40  ;;  %v2870_v27 = vsub.f32 %v18224_v25, %v18267_v34  ;;  %2675 = vmatpush1.msra.mxu0 %v18011_v20  ;;  %v18321_v40 = vand.u32 4294901760, %v2852_v22  ;;  %v18328_v38 = vand.u32 4294901760, %v1781_v36  ;;  %v1776_v25 = vld [vmem:[#allocation3 + $0x70] sm:$0xff] }
 0x148   :  { %23409 = vst [vmem:[#allocation239_spill] sm:$0xff] %v18248_v46  ;;  %23410 = vst [vmem:[#allocation240_spill] sm:$0xff] %v18257_v4  ;;  %v2864_v1 = vsub.f32 %v18210_v57, %v18257_v4  ;;  %v18317_v14 = vpop.f32.mrf.mxu0  ;;  %v1777_v4 = vld [vmem:[#allocation3 + $0x78] sm:$0xff]  ;;  %2677 = vmatprep.subr.mxu0 %v18027_v52  ;;  %2794 = vmatpush1.msra.mxu1 %v18162_v0  ;;  %v18340_v22 = vsub.f32 %v1785_v18, %v18295_v6  ;;  %v1772_v57 = vld [vmem:[#allocation3 + $0x50] sm:$0xff] }
 0x149   :  { %23411 = vst [vmem:[#allocation241_spill] sm:$0xff] %v18262_v17  ;;  %23412 = vst [vmem:[#allocation242_spill] sm:$0xff] %v18267_v34  ;;  %v899_v31 = vpop.f32.mrf.mxu1  ;;  %2679 = vmatpush1.msra.mxu0 %v18042_v59  ;;  %2800 = vmatprep.subr.mxu1 %v18190_v58  ;;  %v18354_v18 = vand.u32 4294901760, %v2870_v27  ;;  %v18361_v58 = vand.u32 4294901760, %v1776_v25  ;;  %v18371_v27 = vsub.f32 %v1781_v36, %v18328_v38 }
 0x14a   :  { %23413 = vst [vmem:[#allocation243_spill] sm:$0xff] %v18270_v12  ;;  %23414 = vst [vmem:[#allocation244_spill] sm:$0xff] %v18272_v62  ;;  %v18293_v62 = vsub.f32 %v1789_v43, %v18248_v46  ;;  %v1780_v43 = vld [vmem:[#allocation3 + $0x90] sm:$0xff]  ;;  %v18326_v55 = vadd.f32 %v899_v31, %v777_v7  ;;  %v783_v31 = vpop.f32.mrf.mxu0  ;;  %v1773_v7 = vld [vmem:[#allocation3 + $0x58] sm:$0xff]  ;;  %2681 = vmatprep.subr.mxu0 %v18060_v21  ;;  %2806 = vmatpush1.msra.mxu1 %v18228_v42 }
 0x14b   :  { %23415 = vst [vmem:[#allocation245_spill] sm:$0xff] %v18276_v49  ;;  %23416 = vst [vmem:[#allocation246_spill] sm:$0xff] %v18280_v5  ;;  %v18299_v5 = vand.u32 4294901760, %v2834_v13  ;;  %v18313_v13 = vand.u32 4294901760, %v18270_v12  ;;  %v18330_v34 = vpop.f32.mrf.mxu1  ;;  %v18342_v8 = vand.u32 4294901760, %v1780_v43  ;;  %2683 = vmatpush1.msra.mxu0 %v18077_v37  ;;  %2812 = vmatprep.subr.mxu1 %v18241_v45  ;;  %v18384_v45 = vand.u32 4294901760, %v18340_v22 }
 0x14c   :  { %23417 = vst [vmem:[#allocation247_spill] sm:$0xff] %v18282_v48  ;;  %23418 = vst [vmem:[#allocation248_spill] sm:$0xff] %v18284_v51  ;;  %v18301_v51 = vand.u32 4294901760, %v2840_v60  ;;  %v18315_v60 = vand.u32 4294901760, %v1784_v10  ;;  %v18337_v9 = vand.u32 4294901760, %v18293_v62  ;;  %v18363_v24 = vpop.f32.mrf.mxu0  ;;  %2685 = vmatprep.subr.mxu0 %v18087_v28  ;;  %2818 = vmatpush1.msra.mxu1 %v18262_v17  ;;  %v1764_v28 = vld [vmem:[#allocation3 + $0x10] sm:$0xff] }
 0x14d   :  { %23419 = vst [vmem:[#allocation249_spill] sm:$0xff] %v18288_v26  ;;  %23420 = vst [vmem:[#allocation250_spill] sm:$0xff] %v18293_v62  ;;  %v906_v0 = vpop.f32.mrf.mxu1  ;;  %v2876_v2 = vsub.f32 %v18270_v12, %v18313_v13  ;;  %v18387_v36 = vsub.f32 %v1780_v43, %v18342_v8  ;;  %2687 = vmatpush1.msra.mxu0 %v18099_v63  ;;  %2824 = vmatprep.subr.mxu1 %v18276_v49  ;;  %v18402_v43 = vld [vmem:[%s22342_s3] sm:$0xf] }
 0x14e   :  { %23421 = vst [vmem:[#allocation251_spill] sm:$0xff] %v18295_v6  ;;  %23422 = vst [vmem:[#allocation252_spill] sm:$0xff] %v18299_v5  ;;  %v18405_v12 = vrot.slane %v18402_v43, %v75_v30  ;;  %2689 = vmatprep.subr.mxu0 %v18106_v41  ;;  %2830 = vmatpush1.msra.mxu1 %v18288_v26 }
 0x14f   :  { %23423 = vst [vmem:[#allocation253_spill] sm:$0xff] %v18301_v51  ;;  %23424 = vst [vmem:[#allocation254_spill] sm:$0xff] %v18308_v23  ;;  %2691 = vmatpush1.msra.mxu0 %v18108_v56  ;;  %2836 = vmatprep.subr.mxu1 %v18299_v5  ;;  %v18440_v5 = vand.u32 4294901760, %v18387_v36 }
 0x150   :  { %23425 = vst [vmem:[#allocation255_spill] sm:$0xff] %v18313_v13  ;;  %23426 = vst [vmem:[#allocation256_spill] sm:$0xff] %v18315_v60  ;;  %v18375_v13 = vand.u32 4294901760, %v1773_v7  ;;  %2693 = vmatprep.subr.mxu0 %v18122_v54  ;;  %2842 = vmatpush1.msra.mxu1 %v18301_v51 }
 0x151   :  { %23427 = vst [vmem:[#allocation257_spill] sm:$0xff] %v18317_v14  ;;  %23428 = vst [vmem:[#allocation258_spill] sm:$0xff] %v18321_v40  ;;  %v18334_v14 = vand.u32 4294901760, %v2858_v61  ;;  %v784_v61 = vadd.f32 %v783_v31, %v18015_v15  ;;  %v1769_v15 = vld [vmem:[#allocation3 + $0x38] sm:$0xff]  ;;  %v18368_v31 = vand.u32 4294901760, %v18324_v11  ;;  %2695 = vmatpush1.msra.mxu0 %v18135_v47  ;;  %2848 = vmatprep.subr.mxu1 %v18308_v23 }
 0x152   :  { %23429 = vst [vmem:[#allocation259_spill] sm:$0xff] %v18324_v11  ;;  %23430 = vst [vmem:[#allocation260_spill] sm:$0xff] %v18326_v55  ;;  %v18346_v55 = vand.u32 4294901760, %v2864_v1  ;;  %v18359_v1 = vsub.f32 %v1784_v10, %v18315_v60  ;;  %v18377_v10 = vpop.f32.mrf.mxu1  ;;  %v18429_v26 = vsub.f32 %v1773_v7, %v18375_v13  ;;  %2697 = vmatprep.subr.mxu0 %v18147_v44  ;;  %2854 = vmatpush1.msra.mxu1 %v18321_v40 }
 0x153   :  { %23431 = vst [vmem:[#allocation261_spill] sm:$0xff] %v18328_v38  ;;  %23432 = vst [vmem:[#allocation262_spill] sm:$0xff] %v18330_v34  ;;  %v18348_v34 = vand.u32 4294901760, %v1777_v4  ;;  %v18373_v42 = vadd.f32 %v906_v0, %v784_v61  ;;  %v18389_v0 = vand.u32 4294901760, %v1772_v57  ;;  %v790_v61 = vpop.f32.mrf.mxu0  ;;  %v2888_v30 = vsub.f32 %v18324_v11, %v18368_v31  ;;  %2699 = vmatpush1.msra.mxu0 %v18158_v39 }
 0x154   :  { %23433 = vst [vmem:[#allocation263_spill] sm:$0xff] %v18334_v14  ;;  %23434 = vst [vmem:[#allocation264_spill] sm:$0xff] %v18337_v9  ;;  %v791_v17 = vadd.f32 %v790_v61, %v18046_v53  ;;  %v18412_v49 = vand.u32 4294901760, %v18359_v1  ;;  %v18415_v53 = vsub.f32 %v1776_v25, %v18361_v58  ;;  %v18417_v61 = vand.u32 4294901760, %v1768_v33  ;;  %2860 = vmatprep.subr.mxu1 %v18334_v14 }
 0x155   :  { %23435 = vst [vmem:[#allocation265_spill] sm:$0xff] %v18340_v22  ;;  %23436 = vst [vmem:[#allocation266_spill] sm:$0xff] %v18342_v8  ;;  %v18419_v63 = vpop.f32.mrf.mxu0  ;;  %v18479_v40 = vand.u32 4294901760, %v18429_v26  ;;  %2701 = vmatprep.subr.mxu0 %v18172_v3  ;;  %2866 = vmatpush1.msra.mxu1 %v18346_v55 }
 0x156   :  { %23437 = vst [vmem:[#allocation267_spill] sm:$0xff] %v18346_v55  ;;  %23438 = vst [vmem:[#allocation268_spill] sm:$0xff] %v18348_v34  ;;  %v2900_v23 = vsub.f32 %v18359_v1, %v18412_v49  ;;  %2703 = vmatpush1.msra.mxu0 %v18221_v50  ;;  %2872 = vmatprep.subr.mxu1 %v18354_v18 }
 0x157   :  { %23440 = vst [vmem:[#allocation269_spill] sm:$0xff] %v18354_v18  ;;  %23441 = vst [vmem:[#allocation270_spill] sm:$0xff] %v18359_v1  ;;  %v991_v7 = vpop.f32.mrf.mxu0  ;;  %2705 = vmatprep.subr.mxu0 %v18248_v46  ;;  %2764 = vmatprep.mubr.f32.mxu0 %v23179_v16 }
 0x158   :  { %23442 = vst [vmem:[#allocation271_spill] sm:$0xff] %v18361_v58  ;;  %23443 = vst [vmem:[#allocation272_spill] sm:$0xff] %v18363_v24  ;;  %v2882_v24 = vsub.f32 %v18293_v62, %v18337_v9  ;;  %v913_v9 = vpop.f32.mrf.mxu1  ;;  %v1765_v62 = vld [vmem:[#allocation3 + $0x18] sm:$0xff]  ;;  %2707 = vmatpush1.msra.mxu0 %v18282_v48  ;;  %2995 = vmatprep.mubr.f32.mxu1 %v23179_v16 }
 0x159   :  { %23444 = vst [vmem:[#allocation273_spill] sm:$0xff] %v18368_v31  ;;  %23445 = vst [vmem:[#allocation274_spill] sm:$0xff] %v18371_v27  ;;  %v18431_v25 = vadd.f32 %v913_v9, %v791_v17  ;;  %v18443_v31 = vsub.f32 %v1772_v57, %v18389_v0  ;;  %v18445_v11 = vand.u32 4294901760, %v1765_v62  ;;  %2709 = vmatprep.subr.mxu0 %v18295_v6 }
 0x15a   :  { %23446 = vst [vmem:[#allocation275_spill] sm:$0xff] %v18373_v42  ;;  %23447 = vst [vmem:[#allocation276_spill] sm:$0xff] %v18375_v13  ;;  %v18394_v42 = vsub.f32 %v1777_v4, %v18348_v34  ;;  %v18409_v4 = vand.u32 4294901760, %v2876_v2  ;;  %v18426_v2 = vand.u32 4294901760, %v18371_v27  ;;  %v18460_v57 = vand.u32 4294901760, %v2882_v24  ;;  %2711 = vmatpush1.msra.mxu0 %v18315_v60 }
 0x15b   :  { %23448 = vst [vmem:[#allocation277_spill] sm:$0xff] %v18377_v10  ;;  %23449 = vst [vmem:[#allocation278_spill] sm:$0xff] %v18384_v45  ;;  %v18396_v10 = vand.u32 4294901760, %v1769_v15  ;;  %v18492_v14 = vand.u32 4294901760, %v18443_v31  ;;  %2713 = vmatprep.subr.mxu0 %v18328_v38 }
 0x15c   :  { %23450 = vst [vmem:[#allocation279_spill] sm:$0xff] %v18387_v36  ;;  %23451 = vst [vmem:[#allocation280_spill] sm:$0xff] %v18389_v0  ;;  %v18450_v17 = vand.u32 4294901760, %v18394_v42  ;;  %v2906_v24 = vsub.f32 %v18371_v27, %v18426_v2  ;;  %2878 = vmatpush1.msra.mxu1 %v18409_v4  ;;  %2715 = vmatpush1.msra.mxu0 %v18342_v8 }
 0x15d   :  { %23452 = vst [vmem:[#allocation281_spill] sm:$0xff] %v18394_v42  ;;  %23453 = vst [vmem:[#allocation282_spill] sm:$0xff] %v18396_v10  ;;  %v18453_v9 = vsub.f32 %v1769_v15, %v18396_v10  ;;  %v18468_v15 = vsub.f32 %v1768_v33, %v18417_v61  ;;  %2884 = vmatprep.subr.mxu1 %v18460_v57  ;;  %2717 = vmatprep.subr.mxu0 %v18348_v34 }
 0x15e   :  { %23454 = vst [vmem:[#allocation283_spill] sm:$0xff] %v18402_v43  ;;  %23455 = vst [vmem:[#allocation284_spill] sm:$0xff] %v18409_v4  ;;  %v18433_v43 = vpop.f32.mrf.mxu1  ;;  %2719 = vmatpush1.msra.mxu0 %v18361_v58 }
 0x15f   :  { %23456 = vst [vmem:[#allocation285_spill] sm:$0xff] %v18412_v49  ;;  %23457 = vst [vmem:[#allocation286_spill] sm:$0xff] %v18415_v53  ;;  %2721 = vmatprep.subr.mxu0 %v18375_v13 }
 0x160   :  { %23458 = vst [vmem:[#allocation287_spill] sm:$0xff] %v18417_v61  ;;  %23459 = vst [vmem:[#allocation288_spill] sm:$0xff] %v18419_v63  ;;  %v2894_v63 = vsub.f32 %v18340_v22, %v18384_v45  ;;  %v1150_v51 = vpop.f32.mrf.mxu1  ;;  %v18465_v45 = vand.u32 4294901760, %v18415_v53  ;;  %v18470_v22 = vpop.f32.mrf.mxu0  ;;  %2723 = vmatpush1.msra.mxu0 %v18389_v0 }
 0x161   :  { %23460 = vst [vmem:[#allocation289_spill] sm:$0xff] %v18426_v2  ;;  %23461 = vst [vmem:[#allocation290_spill] sm:$0xff] %v18429_v26  ;;  %2725 = vmatprep.subr.mxu0 %v18396_v10 }
 0x162   :  { %23462 = vst [vmem:[#allocation291_spill] sm:$0xff] %v18431_v25  ;;  %23463 = vst [vmem:[#allocation292_spill] sm:$0xff] %v18433_v43  ;;  %v18455_v25 = vand.u32 4294901760, %v1764_v28  ;;  %v992_v43 = vadd.f32 %v991_v7, %v18405_v12  ;;  %v18474_v7 = vand.u32 4294901760, %v2888_v30  ;;  %v18483_v1 = vpop.f32.mrf.mxu1  ;;  %v18487_v33 = vand.u32 4294901760, %v2894_v63  ;;  %v1002_v2 = vpop.f32.mrf.mxu0  ;;  %2727 = vmatpush1.msra.mxu0 %v18417_v61 }
 0x163   :  { %23464 = vst [vmem:[#allocation293_spill] sm:$0xff] %v18440_v5  ;;  %23465 = vst [vmem:[#allocation294_spill] sm:$0xff] %v18443_v31  ;;  %v2912_v30 = vsub.f32 %v18387_v36, %v18440_v5  ;;  %v18502_v63 = vand.u32 4294901760, %v18453_v9  ;;  %v1003_v55 = vadd.f32 %v1002_v2, %v18405_v12  ;;  %v2924_v18 = vsub.f32 %v18415_v53, %v18465_v45 }
 0x164   :  { %23466 = vst [vmem:[#allocation295_spill] sm:$0xff] %v18445_v11  ;;  %23467 = vst [vmem:[#allocation296_spill] sm:$0xff] %v18450_v17  ;;  %v18481_v49 = vadd.f32 %v1150_v51, %v992_v43  ;;  %v2918_v51 = vsub.f32 %v18394_v42, %v18450_v17  ;;  %v18505_v43 = vsub.f32 %v1764_v28, %v18455_v25  ;;  %v18515_v17 = vand.u32 4294901760, %v18468_v15  ;;  %v18517_v5 = vpop.f32.mrf.mxu0 }
 0x165   :  { %23468 = vst [vmem:[#allocation297_spill] sm:$0xff] %v18453_v9  ;;  %23469 = vst [vmem:[#allocation298_spill] sm:$0xff] %v18455_v25  ;;  %v18521_v28 = vand.u32 4294901760, %v2906_v24  ;;  %v2930_v2 = vsub.f32 %v18429_v26, %v18479_v40  ;;  %2890 = vmatpush1.msra.mxu1 %v18474_v7  ;;  %2729 = vmatprep.subr.mxu0 %v18445_v11 }
 0x166   :  { %23470 = vst [vmem:[#allocation299_spill] sm:$0xff] %v18460_v57  ;;  %23471 = vst [vmem:[#allocation300_spill] sm:$0xff] %v18465_v45  ;;  %v18531_v45 = vand.u32 4294901760, %v2912_v30  ;;  %v1013_v24 = vpop.f32.mrf.mxu0  ;;  %2896 = vmatprep.subr.mxu1 %v18487_v33  ;;  %2731 = vmatpush1.msra.mxu0 %v18455_v25 }
 0x167   :  { %23472 = vst [vmem:[#allocation301_spill] sm:$0xff] %v18468_v15  ;;  %23473 = vst [vmem:[#allocation302_spill] sm:$0xff] %v18470_v22  ;;  %v18495_v22 = vsub.f32 %v1765_v62, %v18445_v11  ;;  %v18510_v62 = vand.u32 4294901760, %v2900_v23  ;;  %v1014_v30 = vadd.f32 %v1013_v24, %v18405_v12  ;;  %2765 = vmatmul.mubr.f32.vlgmr.msra.gmra.mxu0 %v23179_v16 }
 0x168   :  { %23474 = vst [vmem:[#allocation303_spill] sm:$0xff] %v18474_v7  ;;  %23475 = vst [vmem:[#allocation304_spill] sm:$0xff] %v18479_v40  ;;  %3130 = vmatprep.mubr.f32.mxu0 %v23179_v16 }
 0x169   :  { %23476 = vst [vmem:[#allocation305_spill] sm:$0xff] %v18483_v1  ;;  %23477 = vst [vmem:[#allocation306_spill] sm:$0xff] %v18487_v33  ;;  %v1157_v1 = vpop.f32.mrf.mxu1  ;;  %v18536_v57 = vand.u32 4294901760, %v18495_v22  ;;  %2902 = vmatpush1.msra.mxu1 %v18510_v62  ;;  %v2948_v33 = vsub.f32 %v18468_v15, %v18515_v17 }
 0x16a   :  { %23478 = vst [vmem:[#allocation307_spill] sm:$0xff] %v18492_v14  ;;  %23479 = vst [vmem:[#allocation308_spill] sm:$0xff] %v18495_v22  ;;  %v18525_v4 = vadd.f32 %v1157_v1, %v1003_v55  ;;  %v18540_v55 = vand.u32 4294901760, %v2918_v51  ;;  %v2942_v1 = vsub.f32 %v18453_v9, %v18502_v63  ;;  %v18554_v51 = vpop.f32.mrf.mxu0  ;;  %2908 = vmatprep.subr.mxu1 %v18521_v28 }
 0x16b   :  { %23480 = vst [vmem:[#allocation309_spill] sm:$0xff] %v18502_v63  ;;  %23481 = vst [vmem:[#allocation310_spill] sm:$0xff] %v18505_v43  ;;  %v18527_v23 = vpop.f32.mrf.mxu1  ;;  %v18558_v63 = vand.u32 4294901760, %v2930_v2  ;;  %2914 = vmatpush1.msra.mxu1 %v18531_v45 }
 0x16c   :  { %23482 = vst [vmem:[#allocation311_spill] sm:$0xff] %v18510_v62  ;;  %23483 = vst [vmem:[#allocation312_spill] sm:$0xff] %v18515_v17  ;;  %v2954_v62 = vsub.f32 %v18495_v22, %v18536_v57  ;;  %2920 = vmatprep.subr.mxu1 %v18540_v55  ;;  %v18572_v2 = vand.u32 4294901760, %v2942_v1  ;;  %v23507_v17 = vld [vmem:[#allocation183_spill] sm:$0xff] }
 0x16d   :  { %23484 = vst [vmem:[#allocation313_spill] sm:$0xff] %v18517_v5  ;;  %23485 = vst [vmem:[#allocation314_spill] sm:$0xff] %v18521_v28  ;;  %v2936_v5 = vsub.f32 %v18443_v31, %v18492_v14  ;;  %v1164_v7 = vpop.f32.mrf.mxu1  ;;  %v18550_v14 = vand.u32 4294901760, %v2924_v18 }
 0x16e   :  { %23486 = vst [vmem:[#allocation315_spill] sm:$0xff] %v18527_v23  ;;  %23487 = vst [vmem:[#allocation316_spill] sm:$0xff] %v18531_v45  ;;  %v18545_v23 = vand.u32 4294901760, %v18505_v43  ;;  %v18560_v40 = vadd.f32 %v1164_v7, %v1014_v30 }
 0x16f   :  { %23488 = vst [vmem:[#allocation317_spill] sm:$0xff] %v18536_v57  ;;  %23489 = vst [vmem:[#allocation318_spill] sm:$0xff] %v18540_v55  ;;  %v18562_v24 = vpop.f32.mrf.mxu1  ;;  %v18566_v18 = vand.u32 4294901760, %v2936_v5  ;;  %2926 = vmatpush1.msra.mxu1 %v18550_v14  ;;  %v18579_v5 = vand.u32 4294901760, %v2948_v33 }
 0x170   :  { %23490 = vst [vmem:[#allocation319_spill] sm:$0xff] %v18545_v23  ;;  %23491 = vst [vmem:[#allocation320_spill] sm:$0xff] %v18550_v14  ;;  %v2960_v7 = vsub.f32 %v18505_v43, %v18545_v23  ;;  %2932 = vmatprep.subr.mxu1 %v18558_v63  ;;  %v23506_v23 = vld [vmem:[#allocation179_spill] sm:$0xff] }
 0x171   :  { %23492 = vst [vmem:[#allocation321_spill] sm:$0xff] %v18554_v51  ;;  %23493 = vst [vmem:[#allocation322_spill] sm:$0xff] %v18558_v63  ;;  %v1024_v51 = vpop.f32.mrf.mxu0  ;;  %2938 = vmatpush1.msra.mxu1 %v18566_v18 }
 0x172   :  { %23494 = vst [vmem:[#allocation323_spill] sm:$0xff] %v18562_v24  ;;  %23495 = vst [vmem:[#allocation324_spill] sm:$0xff] %v18566_v18  ;;  %v1025_v30 = vadd.f32 %v1024_v51, %v18405_v12  ;;  %v1171_v24 = vpop.f32.mrf.mxu1  ;;  %v18591_v51 = vand.u32 4294901760, %v2954_v62  ;;  %2944 = vmatprep.subr.mxu1 %v18572_v2  ;;  %v18595_v33 = vand.u32 4294901760, %v2960_v7 }
 0x173   :  { %23496 = vst [vmem:[#allocation325_spill] sm:$0xff] %v18572_v2  ;;  %23497 = vst [vmem:[#allocation326_spill] sm:$0xff] %v18579_v5  ;;  %v18581_v45 = vpop.f32.mrf.mxu0  ;;  %2950 = vmatpush1.msra.mxu1 %v18579_v5  ;;  %v23501_v2 = vld [vmem:[#allocation169_spill] sm:$0xff] }
 0x174   :  { %v18585_v1 = vadd.f32 %v1171_v24, %v1025_v30  ;;  %v18587_v55 = vpop.f32.mrf.mxu1  ;;  %23498 = vst [vmem:[#allocation327_spill] sm:$0xff] %v18591_v51  ;;  %23499 = vst [vmem:[#allocation328_spill] sm:$0xff] %v18595_v33  ;;  %2956 = vmatprep.subr.mxu1 %v18591_v51  ;;  %3004 = vmatprep.subr.mxu0 %v23501_v2 }
 0x175   :  { %v1035_v28 = vpop.f32.mrf.mxu0  ;;  %2962 = vmatpush1.msra.mxu1 %v18595_v33  ;;  %v23505_v33 = vld [vmem:[#allocation174_spill] sm:$0xff] }
 0x176   :  { %v1036_v14 = vadd.f32 %v1035_v28, %v18405_v12  ;;  %v1178_v63 = vpop.f32.mrf.mxu1  ;;  %2996 = vmatmul.mubr.f32.vlgmr.msra.gmra.mxu1 %v23179_v16  ;;  %3138 = vmatprep.subr.mxu1 %v17977_v32 }
 0x177   :  { %v18600_v24 = vpop.f32.mrf.mxu0  ;;  %3140 = vmatpush1.msra.mxu1 %v17982_v29  ;;  %3233 = vmatprep.mubr.f32.mxu1 %v23179_v16 }
 0x178   :  { %v18604_v62 = vadd.f32 %v1178_v63, %v1036_v14  ;;  %v18606_v30 = vpop.f32.mrf.mxu1  ;;  %v23503_v63 = vld [vmem:[#allocation170_spill] sm:$0xff]  ;;  %3142 = vmatprep.subr.mxu1 %v17994_v19 }
 0x179   :  { %23500 = vst [vmem:[#allocation329_spill] sm:$0xff] %v18606_v30  ;;  %v1046_v28 = vpop.f32.mrf.mxu0  ;;  %3007 = vmatpush1.msra.mxu0 %v23503_v63  ;;  %3144 = vmatpush1.msra.mxu1 %v18011_v20  ;;  %v23511_v63 = vld [vmem:[#allocation201_spill] sm:$0xff] }
 0x17a   :  { %v1047_v7 = vadd.f32 %v1046_v28, %v18405_v12  ;;  %v1185_v5 = vpop.f32.mrf.mxu1  ;;  %3010 = vmatprep.subr.mxu0 %v23505_v33  ;;  %3146 = vmatprep.subr.mxu1 %v18027_v52  ;;  %v23520_v30 = vld [vmem:[#allocation217_spill] sm:$0xff] }
 0x17b   :  { %v18615_v14 = vpop.f32.mrf.mxu0  ;;  %3013 = vmatpush1.msra.mxu0 %v23506_v23  ;;  %v23510_v23 = vld [vmem:[#allocation194_spill] sm:$0xff]  ;;  %3148 = vmatpush1.msra.mxu1 %v18042_v59 }
 0x17c   :  { %23502 = vst [vmem:[#allocation330_spill] sm:$0xff] %v18615_v14  ;;  %v18619_v51 = vadd.f32 %v1185_v5, %v1047_v7  ;;  %v18621_v18 = vpop.f32.mrf.mxu1  ;;  %3016 = vmatprep.subr.mxu0 %v23507_v17  ;;  %3150 = vmatprep.subr.mxu1 %v18060_v21  ;;  %v23518_v14 = vld [vmem:[#allocation195_spill] sm:$0xff] }
 0x17d   :  { %23504 = vst [vmem:[#allocation331_spill] sm:$0xff] %v18621_v18  ;;  %v1057_v28 = vpop.f32.mrf.mxu0  ;;  %3019 = vmatpush1.msra.mxu0 %v18075_v35  ;;  %v23512_v18 = vld [vmem:[#allocation206_spill] sm:$0xff]  ;;  %3152 = vmatpush1.msra.mxu1 %v18077_v37  ;;  %v23515_v35 = vld [vmem:[#allocation191_spill] sm:$0xff] }
 0x17e   :  { %v1058_v2 = vadd.f32 %v1057_v28, %v18405_v12  ;;  %v1192_v57 = vpop.f32.mrf.mxu1  ;;  %3022 = vmatprep.subr.mxu0 %v23510_v23  ;;  %3154 = vmatprep.subr.mxu1 %v23515_v35 }
 0x17f   :  { %v18630_v5 = vpop.f32.mrf.mxu0  ;;  %3025 = vmatpush1.msra.mxu0 %v23511_v63  ;;  %v23517_v63 = vld [vmem:[#allocation211_spill] sm:$0xff]  ;;  %3156 = vmatpush1.msra.mxu1 %v23518_v14 }
 0x180   :  { %23508 = vst [vmem:[#allocation332_spill] sm:$0xff] %v18630_v5  ;;  %v18634_v7 = vadd.f32 %v1192_v57, %v1058_v2  ;;  %v18636_v33 = vpop.f32.mrf.mxu1  ;;  %3028 = vmatprep.subr.mxu0 %v23512_v18  ;;  %v23514_v2 = vld [vmem:[#allocation209_spill] sm:$0xff]  ;;  %3158 = vmatprep.subr.mxu1 %v18106_v41 }
 0x181   :  { %23509 = vst [vmem:[#allocation333_spill] sm:$0xff] %v18636_v33  ;;  %v1068_v28 = vpop.f32.mrf.mxu0  ;;  %3031 = vmatpush1.msra.mxu0 %v23514_v2  ;;  %3160 = vmatpush1.msra.mxu1 %v18108_v56 }
 0x182   :  { %v1069_v17 = vadd.f32 %v1068_v28, %v18405_v12  ;;  %v1199_v5 = vpop.f32.mrf.mxu1  ;;  %3034 = vmatprep.subr.mxu0 %v23517_v63  ;;  %v23519_v28 = vld [vmem:[#allocation212_spill] sm:$0xff]  ;;  %3162 = vmatprep.subr.mxu1 %v18122_v54 }
 0x183   :  { %v18645_v57 = vpop.f32.mrf.mxu0  ;;  %3037 = vmatpush1.msra.mxu0 %v23519_v28  ;;  %v23524_v28 = vld [vmem:[#allocation225_spill] sm:$0xff]  ;;  %3164 = vmatpush1.msra.mxu1 %v18135_v47 }
 0x184   :  { %23513 = vst [vmem:[#allocation334_spill] sm:$0xff] %v18645_v57  ;;  %v18649_v23 = vadd.f32 %v1199_v5, %v1069_v17  ;;  %v18651_v33 = vpop.f32.mrf.mxu1  ;;  %3040 = vmatprep.subr.mxu0 %v23520_v30  ;;  %v23522_v5 = vld [vmem:[#allocation222_spill] sm:$0xff]  ;;  %3166 = vmatprep.subr.mxu1 %v18147_v44 }
 0x185   :  { %23516 = vst [vmem:[#allocation335_spill] sm:$0xff] %v18651_v33  ;;  %v1276_v12 = vpop.f32.mrf.mxu0  ;;  %3043 = vmatpush1.msra.mxu0 %v23522_v5  ;;  %v23526_v33 = vld [vmem:[#allocation232_spill] sm:$0xff]  ;;  %3168 = vmatpush1.msra.mxu1 %v18158_v39 }
 0x186   :  { %v1277_v18 = vadd.f32 %v1276_v12, %v18481_v49  ;;  %v1408_v57 = vpop.f32.mrf.mxu1  ;;  %3046 = vmatprep.subr.mxu0 %v23524_v28  ;;  %v23525_v12 = vld [vmem:[#allocation228_spill] sm:$0xff]  ;;  %3170 = vmatprep.subr.mxu1 %v18172_v3 }
 0x187   :  { %v18660_v17 = vpop.f32.mrf.mxu0  ;;  %3049 = vmatpush1.msra.mxu0 %v23525_v12  ;;  %v23530_v12 = vld [vmem:[#allocation250_spill] sm:$0xff]  ;;  %3172 = vmatpush1.msra.mxu1 %v18221_v50 }
 0x188   :  { %23521 = vst [vmem:[#allocation336_spill] sm:$0xff] %v18660_v17  ;;  %v18664_v63 = vadd.f32 %v1408_v57, %v1277_v18  ;;  %v18666_v2 = vpop.f32.mrf.mxu1  ;;  %3052 = vmatprep.subr.mxu0 %v23526_v33  ;;  %v23528_v57 = vld [vmem:[#allocation243_spill] sm:$0xff]  ;;  %3174 = vmatprep.subr.mxu1 %v18248_v46 }
 0x189   :  { %v1284_v49 = vpop.f32.mrf.mxu0  ;;  %3055 = vmatpush1.msra.mxu0 %v23528_v57  ;;  %3176 = vmatpush1.msra.mxu1 %v18282_v48  ;;  %v23549_v57 = vld [vmem:[#allocation229_spill] sm:$0xff] }
 0x18a   :  { %23523 = vst [vmem:[#allocation337_spill] sm:$0xff] %v18664_v63  ;;  %v1285_v30 = vadd.f32 %v1284_v49, %v18525_v4  ;;  %v1417_v17 = vpop.f32.mrf.mxu1  ;;  %3058 = vmatprep.subr.mxu0 %v23530_v12  ;;  %v23531_v49 = vld [vmem:[#allocation259_spill] sm:$0xff]  ;;  %v23532_v63 = vld [vmem:[#allocation265_spill] sm:$0xff]  ;;  %3178 = vmatprep.subr.mxu1 %v18295_v6 }
 0x18b   :  { %v18675_v18 = vpop.f32.mrf.mxu0  ;;  %3061 = vmatpush1.msra.mxu0 %v23531_v49  ;;  %3180 = vmatpush1.msra.mxu1 %v18315_v60  ;;  %v23547_v49 = vld [vmem:[#allocation226_spill] sm:$0xff] }
 0x18c   :  { %23527 = vst [vmem:[#allocation338_spill] sm:$0xff] %v18675_v18  ;;  %v18679_v28 = vadd.f32 %v1417_v17, %v1285_v30  ;;  %v18681_v5 = vpop.f32.mrf.mxu1  ;;  %3064 = vmatprep.subr.mxu0 %v23532_v63  ;;  %v23534_v17 = vld [vmem:[#allocation270_spill] sm:$0xff]  ;;  %3182 = vmatprep.subr.mxu1 %v18328_v38 }
 0x18d   :  { %23529 = vst [vmem:[#allocation339_spill] sm:$0xff] %v18681_v5  ;;  %v1292_v4 = vpop.f32.mrf.mxu0  ;;  %3067 = vmatpush1.msra.mxu0 %v23534_v17  ;;  %3184 = vmatpush1.msra.mxu1 %v18342_v8  ;;  %v23542_v17 = vld [vmem:[#allocation208_spill] sm:$0xff]  ;;  %v23546_v63 = vld [vmem:[#allocation102_spill] sm:$0xff] }
 0x18e   :  { %v1293_v33 = vadd.f32 %v1292_v4, %v18560_v40  ;;  %v1426_v18 = vpop.f32.mrf.mxu1  ;;  %3070 = vmatprep.subr.mxu0 %v18371_v27  ;;  %3186 = vmatprep.subr.mxu1 %v18348_v34 }
 0x18f   :  { %v18690_v30 = vpop.f32.mrf.mxu0  ;;  %3073 = vmatpush1.msra.mxu0 %v18387_v36  ;;  %3188 = vmatpush1.msra.mxu1 %v18361_v58 }
 0x190   :  { %23533 = vst [vmem:[#allocation340_spill] sm:$0xff] %v18690_v30  ;;  %v18694_v5 = vadd.f32 %v1426_v18, %v1293_v33  ;;  %v18696_v12 = vpop.f32.mrf.mxu1  ;;  %3076 = vmatprep.subr.mxu0 %v18394_v42  ;;  %3190 = vmatprep.subr.mxu1 %v18375_v13 }
 0x191   :  { %23535 = vst [vmem:[#allocation341_spill] sm:$0xff] %v18696_v12  ;;  %v1300_v40 = vpop.f32.mrf.mxu0  ;;  %3079 = vmatpush1.msra.mxu0 %v18415_v53  ;;  %3192 = vmatpush1.msra.mxu1 %v18389_v0  ;;  %v23538_v53 = vld [vmem:[#allocation182_spill] sm:$0xff] }
 0x192   :  { %v1301_v4 = vadd.f32 %v1300_v40, %v18585_v1  ;;  %v1435_v30 = vpop.f32.mrf.mxu1  ;;  %3082 = vmatprep.subr.mxu0 %v18429_v26  ;;  %3194 = vmatprep.subr.mxu1 %v18396_v10 }
 0x193   :  { %v18705_v33 = vpop.f32.mrf.mxu0  ;;  %3085 = vmatpush1.msra.mxu0 %v18443_v31  ;;  %3196 = vmatpush1.msra.mxu1 %v18417_v61 }
 0x194   :  { %v18709_v18 = vadd.f32 %v1435_v30, %v1301_v4  ;;  %v18711_v12 = vpop.f32.mrf.mxu1  ;;  %3088 = vmatprep.subr.mxu0 %v18453_v9  ;;  %3198 = vmatprep.subr.mxu1 %v18445_v11 }
 0x195   :  { %v1308_v1 = vpop.f32.mrf.mxu0  ;;  %3091 = vmatpush1.msra.mxu0 %v18468_v15  ;;  %3200 = vmatpush1.msra.mxu1 %v18455_v25 }
 0x196   :  { %v1309_v40 = vadd.f32 %v1308_v1, %v18604_v62  ;;  %v1444_v42 = vpop.f32.mrf.mxu1  ;;  %3094 = vmatprep.subr.mxu0 %v18495_v22  ;;  %3234 = vmatmul.mubr.f32.vlgmr.msra.gmra.mxu1 %v23179_v16 }
 0x197   :  { %v18720_v30 = vpop.f32.mrf.mxu0  ;;  %3097 = vmatpush1.msra.mxu0 %v18505_v43  ;;  %v23536_v43 = vld [vmem:[#allocation175_spill] sm:$0xff]  ;;  %3408 = vmatprep.subr.mxu1 %v17977_v32 }
 0x198   :  { %v18724_v4 = vadd.f32 %v1444_v42, %v1309_v40  ;;  %v18726_v26 = vpop.f32.mrf.mxu1  ;;  %3131 = vmatmul.mubr.f32.vlgmr.msra.gmra.mxu0 %v23179_v16  ;;  %3243 = vmatprep.subr.mxu0 %v23536_v43 }
 0x199   :  { %v1316_v62 = vpop.f32.mrf.mxu0  ;;  %3410 = vmatpush1.msra.mxu1 %v17982_v29  ;;  %3400 = vmatprep.mubr.f32.mxu0 %v23179_v16 }
 0x19a   :  { %v1317_v1 = vadd.f32 %v1316_v62, %v18619_v51  ;;  %v1453_v9 = vpop.f32.mrf.mxu1  ;;  %v23537_v62 = vld [vmem:[#allocation177_spill] sm:$0xff]  ;;  %3412 = vmatprep.subr.mxu1 %v17994_v19  ;;  %3503 = vmatprep.mubr.f32.mxu1 %v23179_v16 }
 0x19b   :  { %v18735_v42 = vpop.f32.mrf.mxu0  ;;  %3247 = vmatpush1.msra.mxu0 %v23537_v62  ;;  %v23540_v62 = vld [vmem:[#allocation193_spill] sm:$0xff]  ;;  %3414 = vmatpush1.msra.mxu1 %v18011_v20 }
 0x19c   :  { %v18739_v40 = vadd.f32 %v1453_v9, %v1317_v1  ;;  %v18741_v22 = vpop.f32.mrf.mxu1  ;;  %3251 = vmatprep.subr.mxu0 %v23538_v53  ;;  %v23539_v1 = vld [vmem:[#allocation186_spill] sm:$0xff]  ;;  %3416 = vmatprep.subr.mxu1 %v18027_v52 }
 0x19d   :  { %v1324_v51 = vpop.f32.mrf.mxu0  ;;  %3255 = vmatpush1.msra.mxu0 %v23539_v1  ;;  %3418 = vmatpush1.msra.mxu1 %v18042_v59  ;;  %v23662_v52 = vld [vmem:[#allocation154_spill] sm:$0xff] }
 0x19e   :  { %v1325_v15 = vadd.f32 %v1324_v51, %v18634_v7  ;;  %v1462_v31 = vpop.f32.mrf.mxu1  ;;  %3259 = vmatprep.subr.mxu0 %v23540_v62  ;;  %v23541_v51 = vld [vmem:[#allocation199_spill] sm:$0xff]  ;;  %3420 = vmatprep.subr.mxu1 %v18060_v21 }
 0x19f   :  { %v18750_v9 = vpop.f32.mrf.mxu0  ;;  %3263 = vmatpush1.msra.mxu0 %v23541_v51  ;;  %v23544_v51 = vld [vmem:[#allocation219_spill] sm:$0xff]  ;;  %3422 = vmatpush1.msra.mxu1 %v18077_v37 }
 0x1a0   :  { %v18754_v43 = vadd.f32 %v1462_v31, %v1325_v15  ;;  %v18756_v36 = vpop.f32.mrf.mxu1  ;;  %3267 = vmatprep.subr.mxu0 %v23542_v17  ;;  %v23543_v15 = vld [vmem:[#allocation215_spill] sm:$0xff]  ;;  %3424 = vmatprep.subr.mxu1 %v23515_v35 }
 0x1a1   :  { %v1332_v7 = vpop.f32.mrf.mxu0  ;;  %3271 = vmatpush1.msra.mxu0 %v23543_v15  ;;  %v79_v15 = vsub.s32 3, %v23546_v63  ;;  %3426 = vmatpush1.msra.mxu1 %v23518_v14  ;;  %v23553_v14 = vld [vmem:[#allocation238_spill] sm:$0xff] }
 0x1a2   :  { %v1333_v53 = vadd.f32 %v1332_v7, %v18649_v23  ;;  %v1471_v27 = vpop.f32.mrf.mxu1  ;;  %3275 = vmatprep.subr.mxu0 %v23544_v51  ;;  %v23545_v7 = vld [vmem:[#allocation224_spill] sm:$0xff]  ;;  %3428 = vmatprep.subr.mxu1 %v18106_v41 }
 0x1a3   :  { %v18765_v31 = vpop.f32.mrf.mxu0  ;;  %3279 = vmatpush1.msra.mxu0 %v23545_v7  ;;  %3430 = vmatpush1.msra.mxu1 %v18108_v56  ;;  %v23550_v7 = vld [vmem:[#allocation235_spill] sm:$0xff]  ;;  %v23554_v41 = vld [vmem:[#allocation240_spill] sm:$0xff] }
 0x1a4   :  { %v18769_v62 = vadd.f32 %v1471_v27, %v1333_v53  ;;  %v18771_v1 = vpop.f32.mrf.mxu1  ;;  %3283 = vmatprep.subr.mxu0 %v23547_v49  ;;  %v23548_v53 = vld [vmem:[#allocation227_spill] sm:$0xff]  ;;  %3432 = vmatprep.subr.mxu1 %v18122_v54  ;;  %v23556_v54 = vld [vmem:[#allocation242_spill] sm:$0xff] }
 0x1a5   :  { %v18775_v23 = vpop.f32.mrf.mxu0  ;;  %3287 = vmatpush1.msra.mxu0 %v23548_v53  ;;  %v23551_v49 = vld [vmem:[#allocation283_spill] sm:$0xff]  ;;  %3434 = vmatpush1.msra.mxu1 %v18135_v47 }
 0x1a6   :  { %v18779_v17 = vpop.f32.mrf.mxu1  ;;  %3291 = vmatprep.subr.mxu0 %v23549_v57  ;;  %v18795_v37 = vrot.slane %v23551_v49, %v79_v15  ;;  %3436 = vmatprep.subr.mxu1 %v18147_v44 }
 0x1a7   :  { %v18784_v27 = vpop.f32.mrf.mxu0  ;;  %3295 = vmatpush1.msra.mxu0 %v23550_v7  ;;  %3438 = vmatpush1.msra.mxu1 %v18158_v39 }
 0x1a8   :  { %v18788_v51 = vpop.f32.mrf.mxu1  ;;  %23552 = vst [vmem:[#allocation102_spill] sm:$0xff] %v18795_v37  ;;  %3299 = vmatprep.subr.mxu0 %v23553_v14  ;;  %v1027_v7 = vadd.f32 %v18581_v45, %v18795_v37  ;;  %v23558_v14 = vld [vmem:[#allocation255_spill] sm:$0xff]  ;;  %3440 = vmatprep.subr.mxu1 %v18172_v3 }
 0x1a9   :  { %v1556_v35 = vpop.f32.mrf.mxu0  ;;  %3303 = vmatpush1.msra.mxu0 %v23554_v41  ;;  %3442 = vmatpush1.msra.mxu1 %v18221_v50  ;;  %v23562_v41 = vld [vmem:[#allocation278_spill] sm:$0xff] }
 0x1aa   :  { %v1557_v53 = vadd.f32 %v1556_v35, %v18679_v28  ;;  %v1679_v57 = vpop.f32.mrf.mxu1  ;;  %3307 = vmatprep.subr.mxu0 %v23556_v54  ;;  %v23560_v28 = vld [vmem:[#allocation264_spill] sm:$0xff]  ;;  %3444 = vmatprep.subr.mxu1 %v18248_v46  ;;  %v1174_v54 = vadd.f32 %v18587_v55, %v1027_v7  ;;  %v23567_v7 = vld [vmem:[#allocation293_spill] sm:$0xff] }
 0x1ab   :  { %v18802_v56 = vpop.f32.mrf.mxu0  ;;  %3311 = vmatpush1.msra.mxu0 %v23558_v14  ;;  %3446 = vmatpush1.msra.mxu1 %v18282_v48  ;;  %v23565_v14 = vld [vmem:[#allocation289_spill] sm:$0xff] }
 0x1ac   :  { %23555 = vst [vmem:[#allocation283_spill] sm:$0xff] %v18802_v56  ;;  %v18808_v15 = vadd.f32 %v1679_v57, %v1557_v53  ;;  %v18812_v35 = vpop.f32.mrf.mxu1  ;;  %3315 = vmatprep.subr.mxu0 %v23560_v28  ;;  %v23561_v56 = vld [vmem:[#allocation273_spill] sm:$0xff]  ;;  %3448 = vmatprep.subr.mxu1 %v18295_v6  ;;  %v1303_v28 = vadd.f32 %v18705_v33, %v1174_v54  ;;  %v23660_v6 = vld [vmem:[#allocation132_spill] sm:$0xff] }
 0x1ad   :  { %23559 = vst [vmem:[#allocation343_spill] sm:$0xff] %v18812_v35  ;;  %3319 = vmatpush1.msra.mxu0 %v23561_v56  ;;  %v1563_v45 = vpop.f32.mrf.mxu0  ;;  %v23563_v53 = vld [vmem:[#allocation285_spill] sm:$0xff]  ;;  %v1038_v56 = vadd.f32 %v18600_v24, %v18795_v37  ;;  %3450 = vmatpush1.msra.mxu1 %v18315_v60 }
 0x1ae   :  { %23557 = vst [vmem:[#allocation342_spill] sm:$0xff] %v18808_v15  ;;  %3323 = vmatprep.subr.mxu0 %v23562_v41  ;;  %v1564_v57 = vadd.f32 %v1563_v45, %v18694_v5  ;;  %v1686_v15 = vpop.f32.mrf.mxu1  ;;  %3452 = vmatprep.subr.mxu1 %v18328_v38  ;;  %v23569_v45 = vld [vmem:[#allocation296_spill] sm:$0xff]  ;;  %v23571_v24 = vld [vmem:[#allocation329_spill] sm:$0xff] }
 0x1af   :  { %3327 = vmatpush1.msra.mxu0 %v23563_v53  ;;  %v18824_v35 = vpop.f32.mrf.mxu0  ;;  %3454 = vmatpush1.msra.mxu1 %v18342_v8  ;;  %v1181_v33 = vadd.f32 %v23571_v24, %v1038_v56  ;;  %v23575_v56 = vld [vmem:[#allocation309_spill] sm:$0xff]  ;;  %v23577_v24 = vld [vmem:[#allocation312_spill] sm:$0xff] }
 0x1b0   :  { %23564 = vst [vmem:[#allocation344_spill] sm:$0xff] %v18824_v35  ;;  %3331 = vmatprep.subr.mxu0 %v23565_v14  ;;  %v18831_v55 = vadd.f32 %v1686_v15, %v1564_v57  ;;  %v18835_v5 = vpop.f32.mrf.mxu1  ;;  %v23570_v35 = vld [vmem:[#allocation300_spill] sm:$0xff]  ;;  %3456 = vmatprep.subr.mxu1 %v18348_v34  ;;  %v1438_v15 = vadd.f32 %v18711_v12, %v1303_v28  ;;  %v71_v34 = vsub.s32 1, %v23546_v63 }
 0x1b1   :  { %3335 = vmatpush1.msra.mxu0 %v23567_v7  ;;  %23568 = vst [vmem:[#allocation346_spill] sm:$0xff] %v18835_v5  ;;  %v1570_v54 = vpop.f32.mrf.mxu0  ;;  %v23572_v57 = vld [vmem:[#allocation304_spill] sm:$0xff]  ;;  %3458 = vmatpush1.msra.mxu1 %v18361_v58  ;;  %v23573_v5 = vld [vmem:[#allocation330_spill] sm:$0xff]  ;;  %v23574_v7 = vld [vmem:[#allocation307_spill] sm:$0xff]  ;;  %v1311_v53 = vadd.f32 %v18720_v30, %v1181_v33 }
 0x1b2   :  { %23566 = vst [vmem:[#allocation345_spill] sm:$0xff] %v18831_v55  ;;  %3339 = vmatprep.subr.mxu0 %v23569_v45  ;;  %v1571_v55 = vadd.f32 %v1570_v54, %v18709_v18  ;;  %v1049_v45 = vadd.f32 %v23573_v5, %v18795_v37  ;;  %3460 = vmatprep.subr.mxu1 %v18375_v13  ;;  %v23578_v5 = vld [vmem:[#allocation317_spill] sm:$0xff]  ;;  %v23581_v33 = vld [vmem:[#allocation331_spill] sm:$0xff] }
 0x1b3   :  { %3343 = vmatpush1.msra.mxu0 %v23570_v35  ;;  %v1693_v35 = vpop.f32.mrf.mxu1  ;;  %v1572_v14 = vpop.f32.mrf.mxu0  ;;  %3462 = vmatpush1.msra.mxu1 %v18389_v0  ;;  %v23652_v0 = vld [vmem:[#allocation140_spill] sm:$0xff]  ;;  %v23654_v13 = vld [vmem:[#allocation141_spill] sm:$0xff]  ;;  %v23657_v58 = vld [vmem:[#allocation115_spill] sm:$0xff]  ;;  %v18972_v38 = vrot.slane %v23551_v49, %v71_v34 }
 0x1b4   :  { %3347 = vmatprep.subr.mxu0 %v23572_v57  ;;  %v18853_v12 = vadd.f32 %v1693_v35, %v1571_v55  ;;  %v1573_v28 = vadd.f32 %v1572_v14, %v1438_v15  ;;  %3464 = vmatprep.subr.mxu1 %v18396_v10  ;;  %v1188_v35 = vadd.f32 %v23581_v33, %v1049_v45  ;;  %v23582_v15 = vld [vmem:[#allocation332_spill] sm:$0xff]  ;;  %v23604_v57 = vld [vmem:[#allocation67_spill] sm:$0xff] }
 0x1b5   :  { %3351 = vmatpush1.msra.mxu0 %v23574_v7  ;;  %v1695_v18 = vpop.f32.mrf.mxu1  ;;  %3466 = vmatpush1.msra.mxu1 %v18417_v61  ;;  %v23580_v7 = vld [vmem:[#allocation319_spill] sm:$0xff]  ;;  %v1577_v30 = vpop.f32.mrf.mxu0  ;;  %v1447_v14 = vadd.f32 %v18726_v26, %v1311_v53  ;;  %v23584_v45 = vld [vmem:[#allocation12_spill] sm:$0xff]  ;;  %v23634_v61 = vld [vmem:[#allocation66_spill] sm:$0xff]  ;;  %v186_v48 = vadd.f32 %v23660_v6, %v18972_v38 }
 0x1b6   :  { %3355 = vmatprep.subr.mxu0 %v23575_v56  ;;  %23576 = vst [vmem:[#allocation329_spill] sm:$0xff] %v18853_v12  ;;  %v18859_v54 = vadd.f32 %v1695_v18, %v1573_v28  ;;  %3468 = vmatprep.subr.mxu1 %v18445_v11  ;;  %v1578_v55 = vadd.f32 %v1577_v30, %v18724_v4  ;;  %v23585_v4 = vld [vmem:[#allocation38_spill] sm:$0xff]  ;;  %v23586_v30 = vld [vmem:[#allocation9_spill] sm:$0xff]  ;;  %v23594_v56 = vld [vmem:[#allocation15_spill] sm:$0xff] }
 0x1b7   :  { %3359 = vmatpush1.msra.mxu0 %v23577_v24  ;;  %v1060_v12 = vadd.f32 %v23582_v15, %v18795_v37  ;;  %3470 = vmatpush1.msra.mxu1 %v18455_v25  ;;  %v1700_v28 = vpop.f32.mrf.mxu1  ;;  %v1579_v18 = vpop.f32.mrf.mxu0  ;;  %v23650_v10 = vld [vmem:[#allocation139_spill] sm:$0xff] }
 0x1b8   :  { %3363 = vmatprep.subr.mxu0 %v23578_v5  ;;  %23579 = vst [vmem:[#allocation330_spill] sm:$0xff] %v18859_v54  ;;  %v1319_v54 = vadd.f32 %v18735_v42, %v1188_v35  ;;  %3504 = vmatmul.mubr.f32.vlgmr.msra.gmra.mxu1 %v23179_v16  ;;  %v18874_v26 = vadd.f32 %v1700_v28, %v1578_v55  ;;  %v23589_v5 = vld [vmem:[#allocation13_spill] sm:$0xff]  ;;  %v23591_v35 = vld [vmem:[#allocation14_spill] sm:$0xff] }
 0x1b9   :  { %3367 = vmatpush1.msra.mxu0 %v23580_v7  ;;  %v1580_v53 = vadd.f32 %v1579_v18, %v1447_v14  ;;  %3655 = vmatprep.subr.mxu1 %v23584_v45  ;;  %v1702_v33 = vpop.f32.mrf.mxu1  ;;  %v23588_v7 = vld [vmem:[#allocation40_spill] sm:$0xff]  ;;  %v1584_v24 = vpop.f32.mrf.mxu0  ;;  %v23590_v42 = vld [vmem:[#allocation45_spill] sm:$0xff] }
 0x1ba   :  { %3401 = vmatmul.mubr.f32.vlgmr.msra.gmra.mxu0 %v23179_v16  ;;  %23583 = vst [vmem:[#allocation331_spill] sm:$0xff] %v18874_v26  ;;  %3661 = vmatpush1.msra.mxu1 %v23585_v4  ;;  %v23592_v55 = vld [vmem:[#allocation333_spill] sm:$0xff]  ;;  %v1456_v28 = vadd.f32 %v18741_v22, %v1319_v54  ;;  %v1585_v18 = vadd.f32 %v1584_v24, %v18739_v40  ;;  %v23596_v4 = vld [vmem:[#allocation54_spill] sm:$0xff]  ;;  %v23599_v54 = vld [vmem:[#allocation55_spill] sm:$0xff] }
 0x1bb   :  { %3543 = vmatprep.subr.mxu0 %v23586_v30  ;;  %v18879_v15 = vadd.f32 %v1702_v33, %v1580_v53  ;;  %3667 = vmatprep.subr.mxu1 %v23588_v7  ;;  %v1195_v14 = vadd.f32 %v23592_v55, %v1060_v12  ;;  %v23593_v26 = vld [vmem:[#allocation49_spill] sm:$0xff]  ;;  %v23595_v53 = vld [vmem:[#allocation334_spill] sm:$0xff]  ;;  %v1586_v7 = vpop.f32.mrf.mxu0  ;;  %v23600_v40 = vld [vmem:[#allocation19_spill] sm:$0xff] }
 0x1bc   :  { %3545 = vmatpush1.msra.mxu0 %v23589_v5  ;;  %3673 = vmatpush1.msra.mxu1 %v23590_v42  ;;  %v1071_v33 = vadd.f32 %v23595_v53, %v18795_v37  ;;  %v23597_v42 = vld [vmem:[#allocation17_spill] sm:$0xff]  ;;  %v1587_v22 = vadd.f32 %v1586_v7, %v1456_v28  ;;  %v23601_v55 = vld [vmem:[#allocation62_spill] sm:$0xff]  ;;  %v23608_v7 = vld [vmem:[#allocation335_spill] sm:$0xff]  ;;  %23659 = vst [vmem:[#allocation19_spill] sm:$0xff] %v18972_v38 }
 0x1bd   :  { %23587 = vst [vmem:[#allocation332_spill] sm:$0xff] %v18879_v15  ;;  %3547 = vmatprep.subr.mxu0 %v23591_v35  ;;  %3679 = vmatprep.subr.mxu1 %v23593_v26  ;;  %v1707_v15 = vpop.f32.mrf.mxu1  ;;  %v1327_v45 = vadd.f32 %v18750_v9, %v1195_v14  ;;  %v23602_v26 = vld [vmem:[#allocation20_spill] sm:$0xff]  ;;  %v1591_v41 = vpop.f32.mrf.mxu0  ;;  %v23606_v9 = vld [vmem:[#allocation70_spill] sm:$0xff] }
 0x1be   :  { %3549 = vmatpush1.msra.mxu0 %v23594_v56  ;;  %3685 = vmatpush1.msra.mxu1 %v23596_v4  ;;  %v18895_v12 = vadd.f32 %v1707_v15, %v1585_v18  ;;  %v23605_v4 = vld [vmem:[#allocation25_spill] sm:$0xff]  ;;  %v1202_v14 = vadd.f32 %v23608_v7, %v1071_v33  ;;  %v1592_v18 = vadd.f32 %v1591_v41, %v18754_v43  ;;  %v23614_v33 = vld [vmem:[#allocation83_spill] sm:$0xff]  ;;  %v23616_v43 = vld [vmem:[#allocation86_spill] sm:$0xff] }
 0x1bf   :  { %3551 = vmatprep.subr.mxu0 %v23597_v42  ;;  %3691 = vmatprep.subr.mxu1 %v23599_v54  ;;  %v1709_v24 = vpop.f32.mrf.mxu1  ;;  %v23607_v15 = vld [vmem:[#allocation29_spill] sm:$0xff]  ;;  %v1465_v28 = vadd.f32 %v18756_v36, %v1327_v45  ;;  %v23617_v45 = vld [vmem:[#allocation43_spill] sm:$0xff] }
 0x1c0   :  { %23598 = vst [vmem:[#allocation13_spill] sm:$0xff] %v18895_v12  ;;  %3553 = vmatpush1.msra.mxu0 %v23600_v40  ;;  %3697 = vmatpush1.msra.mxu1 %v23601_v55  ;;  %v18901_v53 = vadd.f32 %v1709_v24, %v1587_v22  ;;  %v23609_v12 = vld [vmem:[#allocation73_spill] sm:$0xff]  ;;  %v23610_v55 = vld [vmem:[#allocation31_spill] sm:$0xff]  ;;  %v1593_v24 = vpop.f32.mrf.mxu0 }
 0x1c1   :  { %3555 = vmatprep.subr.mxu0 %v23602_v26  ;;  %3703 = vmatprep.subr.mxu1 %v23604_v57  ;;  %v1714_v22 = vpop.f32.mrf.mxu1  ;;  %v23612_v57 = vld [vmem:[#allocation33_spill] sm:$0xff]  ;;  %v1594_v25 = vadd.f32 %v1593_v24, %v1465_v28 }
 0x1c2   :  { %23603 = vst [vmem:[#allocation14_spill] sm:$0xff] %v18901_v53  ;;  %3557 = vmatpush1.msra.mxu0 %v23605_v4  ;;  %3709 = vmatpush1.msra.mxu1 %v23606_v9  ;;  %v23611_v53 = vld [vmem:[#allocation79_spill] sm:$0xff]  ;;  %v1335_v9 = vadd.f32 %v18765_v31, %v1202_v14  ;;  %v18915_v54 = vadd.f32 %v1714_v22, %v1592_v18  ;;  %v23615_v36 = vld [vmem:[#allocation37_spill] sm:$0xff]  ;;  %v1598_v11 = vpop.f32.mrf.mxu0  ;;  %v23622_v14 = vld [vmem:[#allocation48_spill] sm:$0xff] }
 0x1c3   :  { %3559 = vmatprep.subr.mxu0 %v23607_v15  ;;  %3715 = vmatprep.subr.mxu1 %v23609_v12  ;;  %v1716_v41 = vpop.f32.mrf.mxu1  ;;  %v23619_v12 = vld [vmem:[#allocation90_spill] sm:$0xff]  ;;  %v23621_v31 = vld [vmem:[#allocation93_spill] sm:$0xff]  ;;  %v1599_v18 = vadd.f32 %v1598_v11, %v18769_v62  ;;  %v23623_v22 = vld [vmem:[#allocation99_spill] sm:$0xff] }
 0x1c4   :  { %3561 = vmatpush1.msra.mxu0 %v23610_v55  ;;  %3721 = vmatpush1.msra.mxu1 %v23611_v53  ;;  %23613 = vst [vmem:[#allocation333_spill] sm:$0xff] %v18915_v54  ;;  %v18921_v7 = vadd.f32 %v1716_v41, %v1594_v25  ;;  %v23620_v53 = vld [vmem:[#allocation44_spill] sm:$0xff]  ;;  %v1474_v28 = vadd.f32 %v18771_v1, %v1335_v9  ;;  %v23624_v24 = vld [vmem:[#allocation53_spill] sm:$0xff]  ;;  %v1600_v25 = vpop.f32.mrf.mxu0  ;;  %v23625_v41 = vld [vmem:[#allocation103_spill] sm:$0xff] }
 0x1c5   :  { %3563 = vmatprep.subr.mxu0 %v23612_v57  ;;  %3727 = vmatprep.subr.mxu1 %v23614_v33  ;;  %v1721_v54 = vpop.f32.mrf.mxu1  ;;  %v23629_v33 = vld [vmem:[#allocation60_spill] sm:$0xff]  ;;  %v23630_v9 = vld [vmem:[#allocation109_spill] sm:$0xff] }
 0x1c6   :  { %3565 = vmatpush1.msra.mxu0 %v23615_v36  ;;  %3733 = vmatpush1.msra.mxu1 %v23616_v43  ;;  %23618 = vst [vmem:[#allocation15_spill] sm:$0xff] %v18921_v7  ;;  %v23626_v7 = vld [vmem:[#allocation59_spill] sm:$0xff]  ;;  %v1601_v43 = vadd.f32 %v1600_v25, %v1474_v28  ;;  %v23631_v11 = vld [vmem:[#allocation61_spill] sm:$0xff]  ;;  %v23637_v28 = vld [vmem:[#allocation120_spill] sm:$0xff] }
 0x1c7   :  { %3567 = vmatprep.subr.mxu0 %v23617_v45  ;;  %3739 = vmatprep.subr.mxu1 %v23619_v12  ;;  %v18933_v12 = vadd.f32 %v1721_v54, %v1599_v18  ;;  %v1723_v1 = vpop.f32.mrf.mxu1  ;;  %v23636_v54 = vld [vmem:[#allocation75_spill] sm:$0xff]  ;;  %v23638_v18 = vld [vmem:[#allocation77_spill] sm:$0xff] }
 0x1c8   :  { %3569 = vmatpush1.msra.mxu0 %v23620_v53  ;;  %3745 = vmatpush1.msra.mxu1 %v23621_v31  ;;  %v23628_v31 = vld [vmem:[#allocation104_spill] sm:$0xff]  ;;  %v18939_v62 = vadd.f32 %v1723_v1, %v1601_v43  ;;  %v23639_v25 = vld [vmem:[#allocation125_spill] sm:$0xff]  ;;  %v23643_v1 = vld [vmem:[#allocation130_spill] sm:$0xff] }
 0x1c9   :  { %3571 = vmatprep.subr.mxu0 %v23622_v14  ;;  %3751 = vmatprep.subr.mxu1 %v23623_v22  ;;  %23627 = vst [vmem:[#allocation334_spill] sm:$0xff] %v18933_v12  ;;  %v23633_v22 = vld [vmem:[#allocation116_spill] sm:$0xff]  ;;  %v23640_v12 = vld [vmem:[#allocation78_spill] sm:$0xff]  ;;  %v23642_v43 = vld [vmem:[#allocation85_spill] sm:$0xff] }
 0x1ca   :  { %3573 = vmatpush1.msra.mxu0 %v23624_v24  ;;  %3757 = vmatpush1.msra.mxu1 %v23625_v41  ;;  %23632 = vst [vmem:[#allocation17_spill] sm:$0xff] %v18939_v62  ;;  %v23635_v41 = vld [vmem:[#allocation119_spill] sm:$0xff] }
 0x1cb   :  { %3575 = vmatprep.subr.mxu0 %v23626_v7  ;;  %3763 = vmatprep.subr.mxu1 %v23628_v31  ;;  %v23644_v62 = vld [vmem:[#allocation91_spill] sm:$0xff]  ;;  %v23648_v31 = vld [vmem:[#allocation137_spill] sm:$0xff] }
 0x1cc   :  { %3577 = vmatpush1.msra.mxu0 %v23629_v33  ;;  %3769 = vmatpush1.msra.mxu1 %v23630_v9  ;;  %v23641_v9 = vld [vmem:[#allocation128_spill] sm:$0xff] }
 0x1cd   :  { %3579 = vmatprep.subr.mxu0 %v23631_v11  ;;  %3775 = vmatprep.subr.mxu1 %v23633_v22  ;;  %v23645_v22 = vld [vmem:[#allocation133_spill] sm:$0xff] }
 0x1ce   :  { %3581 = vmatpush1.msra.mxu0 %v23634_v61  ;;  %3781 = vmatpush1.msra.mxu1 %v23635_v41  ;;  %v23646_v41 = vld [vmem:[#allocation135_spill] sm:$0xff] }
 0x1cf   :  { %3583 = vmatprep.subr.mxu0 %v23636_v54  ;;  %3787 = vmatprep.subr.mxu1 %v23637_v28  ;;  %v23647_v28 = vld [vmem:[#allocation92_spill] sm:$0xff] }
 0x1d0   :  { %3585 = vmatpush1.msra.mxu0 %v23638_v18  ;;  %3793 = vmatpush1.msra.mxu1 %v23639_v25  ;;  %v23649_v25 = vld [vmem:[#allocation96_spill] sm:$0xff] }
 0x1d1   :  { %3587 = vmatprep.subr.mxu0 %v23640_v12  ;;  %3799 = vmatprep.subr.mxu1 %v23641_v9  ;;  %v23651_v9 = vld [vmem:[#allocation101_spill] sm:$0xff] }
 0x1d2   :  { %3589 = vmatpush1.msra.mxu0 %v23642_v43  ;;  %3805 = vmatpush1.msra.mxu1 %v23643_v1  ;;  %v23653_v1 = vld [vmem:[#allocation108_spill] sm:$0xff] }
 0x1d3   :  { %3591 = vmatprep.subr.mxu0 %v23644_v62  ;;  %3811 = vmatprep.subr.mxu1 %v23645_v22  ;;  %v23655_v22 = vld [vmem:[#allocation110_spill] sm:$0xff] }
 0x1d4   :  { %3874 = vmatprep.mubr.f32.mxu1 %v23179_v16  ;;  %3817 = vmatpush1.msra.mxu1 %v23646_v41  ;;  %v23656_v41 = vld [vmem:[#allocation113_spill] sm:$0xff] }
 0x1d5   :  { %3593 = vmatpush1.msra.mxu0 %v23647_v28  ;;  %3823 = vmatprep.subr.mxu1 %v23648_v31  ;;  %v23658_v31 = vld [vmem:[#allocation10_spill] sm:$0xff] }
 0x1d6   :  { %3595 = vmatprep.subr.mxu0 %v23649_v25  ;;  %3829 = vmatpush1.msra.mxu1 %v23650_v10  ;;  %v1924_v10 = vpop.f32.mrf.mxu0 }
 0x1d7   :  { %3597 = vmatpush1.msra.mxu0 %v23651_v9  ;;  %3835 = vmatprep.subr.mxu1 %v23652_v0  ;;  %v2155_v0 = vpop.f32.mrf.mxu1 }
 0x1d8   :  { %3599 = vmatprep.subr.mxu0 %v23653_v1  ;;  %3841 = vmatpush1.msra.mxu1 %v23654_v13  ;;  %v1926_v8 = vpop.f32.mrf.mxu0  ;;  %v2156_v46 = vadd.f32 %v2155_v0, %v1924_v10  ;;  %v23664_v0 = vld [vmem:[#allocation185_spill] sm:$0xff] }
 0x1d9   :  { %3601 = vmatpush1.msra.mxu0 %v23655_v22  ;;  %4020 = vmatprep.subr.mxu1 %v23586_v30  ;;  %v2157_v60 = vpop.f32.mrf.mxu1  ;;  %v23663_v30 = vld [vmem:[#allocation155_spill] sm:$0xff] }
 0x1da   :  { %3603 = vmatprep.subr.mxu0 %v23656_v41  ;;  %3638 = vmatprep.mubr.f32.mxu0 %v23179_v16  ;;  %v2290_v13 = vpop.f32.mrf.mxu0  ;;  %v2158_v39 = vadd.f32 %v2157_v60, %v1926_v8 }
 0x1db   :  { %3605 = vmatpush1.msra.mxu0 %v23657_v58  ;;  %v2393_v50 = vpop.f32.mrf.mxu1  ;;  %v2291_v44 = vadd.f32 %v2290_v13, %v2156_v46  ;;  %v23665_v13 = vld [vmem:[#allocation190_spill] sm:$0xff] }
 0x1dc   :  { %3884 = vmatprep.subr.mxu0 %v23658_v31  ;;  %v2292_v3 = vpop.f32.mrf.mxu0  ;;  %v23661_v31 = vld [vmem:[#allocation134_spill] sm:$0xff] }
 0x1dd   :  { %v345_v21 = vadd.f32 %v23661_v31, %v186_v48  ;;  %v2293_v59 = vadd.f32 %v2292_v3, %v2158_v39  ;;  %v2395_v63 = vpop.f32.mrf.mxu1  ;;  %v2394_v19 = vadd.f32 %v2393_v50, %v2291_v44  ;;  %v23666_v48 = vld [vmem:[#allocation189_spill] sm:$0xff] }
 0x1df   :  { %v471_v20 = vadd.f32 %v23662_v52, %v345_v21  ;;  %v2396_v29 = vadd.f32 %v2395_v63, %v2293_v59  ;;  %v23667_v52 = vld [vmem:[#allocation302_spill] sm:$0xff]  ;;  %v23669_v63 = vld [vmem:[#allocation336_spill] sm:$0xff] }
 0x1e1   :  { %v603_v58 = vadd.f32 %v23663_v30, %v471_v20 }
 0x1e3   :  { %v744_v38 = vadd.f32 %v23664_v0, %v603_v58 }
 0x1e5   :  { %v867_v8 = vadd.f32 %v23665_v13, %v744_v38 }
 0x200   :  { %v2663_v34 = vpop.f32.mrf.mxu1 }
 0x202   :  { %v2665_v10 = vpop.f32.mrf.mxu1 }
 0x204   :  { %v2560_v47 = vpop.f32.mrf.mxu0 }
 0x205   :  { %v2561_v32 = vadd.f32 %v2560_v47, %v2394_v19  ;;  %v23668_v47 = vld [vmem:[#allocation305_spill] sm:$0xff] }
 0x206   :  { %v2562_v49 = vpop.f32.mrf.mxu0 }
 0x207   :  { %v2563_v6 = vadd.f32 %v2562_v49, %v2396_v29  ;;  %v2664_v60 = vadd.f32 %v2663_v34, %v2561_v32  ;;  %v994_v29 = vadd.f32 %v23667_v52, %v18795_v37  ;;  %v23786_v37 = vld [vmem:[#allocation325_spill] sm:$0xff] }
 0x209   :  { %v2666_v46 = vadd.f32 %v2665_v10, %v2563_v6  ;;  %v3510_v39 = vadd.f32 %v2664_v60, %v23666_v48  ;;  %v1153_v32 = vadd.f32 %v23668_v47, %v994_v29 }
 0x20b   :  { %v3511_v3 = vadd.f32 %v2666_v46, %v867_v8  ;;  %v16403_v31 = vmul.f32 -1.442695, %v3510_v39  ;;  %v1279_v34 = vadd.f32 %v23669_v63, %v1153_v32  ;;  %v23670_v46 = vld [vmem:[#allocation337_spill] sm:$0xff] }
 0x20c   :  { %v1550_v13 = vadd.f32 %v18775_v23, %v23670_v46 }
 0x20d   :  { %v16404_v21 = vmul.f32 -1.442695, %v3511_v3  ;;  %16748 = vpow2.f32 %v16403_v31  ;;  %v1411_v60 = vadd.f32 %v18666_v2, %v1279_v34 }
 0x20f   :  { %16750 = vpow2.f32 %v16404_v21  ;;  %v1552_v31 = vadd.f32 %v18784_v27, %v1411_v60 }
 0x211   :  { %v1675_v32 = vadd.f32 %v18788_v51, %v1552_v31  ;;  %v23672_v31 = vld [vmem:[#allocation16_spill] sm:$0xff] }
 0x21a   :  { %v16749_v48 = vpop.eup %16748 }
 0x21b   :  { %v3523_v29 = vadd.f32 1.0, %v16749_v48 }
 0x21c   :  { %v16751_v3 = vpop.eup %16750 }
 0x21d   :  { %v3524_v47 = vadd.f32 1.0, %v16751_v3  ;;  %16752 = vrcp.f32 %v3523_v29  ;;  %v23678_v29 = vld [vmem:[#allocation32_spill] sm:$0xff] }
 0x21f   :  { %16754 = vrcp.f32 %v3524_v47  ;;  %v23681_v47 = vld [vmem:[#allocation42_spill] sm:$0xff] }
 0x227   :  { %v2766_v44 = vpop.f32.mrf.mxu0 }
 0x229   :  { %v2768_v19 = vpop.f32.mrf.mxu0 }
 0x22a   :  { %v16753_v27 = vpop.eup %16752 }
 0x22c   :  { %v16755_v63 = vpop.eup %16754 }
 0x236   :  { %v2997_v59 = vpop.f32.mrf.mxu1 }
 0x237   :  { %v2998_v58 = vadd.f32 %v2997_v59, %v2766_v44 }
 0x238   :  { %v2999_v50 = vpop.f32.mrf.mxu1 }
 0x239   :  { %v3000_v49 = vadd.f32 %v2999_v50, %v2768_v19  ;;  %v1673_v19 = vadd.f32 %v18779_v17, %v1550_v13 }
 0x256   :  { %v3235_v30 = vpop.f32.mrf.mxu1 }
 0x258   :  { %v3132_v20 = vpop.f32.mrf.mxu0  ;;  %v3237_v0 = vpop.f32.mrf.mxu1 }
 0x259   :  { %v3133_v6 = vadd.f32 %v3132_v20, %v2998_v58 }
 0x25a   :  { %v3134_v38 = vpop.f32.mrf.mxu0 }
 0x25b   :  { %v3135_v10 = vadd.f32 %v3134_v38, %v3000_v49  ;;  %v3236_v8 = vadd.f32 %v3235_v30, %v3133_v6  ;;  %v3533_v6 = vmul.f32 0.0, %v16755_v63  ;;  %v23689_v63 = vld [vmem:[#allocation72_spill] sm:$0xff] }
 0x25d   :  { %v3238_v21 = vadd.f32 %v3237_v0, %v3135_v10 }
 0x278   :  { %v3505_v59 = vpop.f32.mrf.mxu1 }
 0x27a   :  { %v3402_v39 = vpop.f32.mrf.mxu0  ;;  %v3507_v2 = vpop.f32.mrf.mxu1 }
 0x27b   :  { %v3403_v44 = vadd.f32 %v3402_v39, %v3236_v8 }
 0x27c   :  { %v3404_v52 = vpop.f32.mrf.mxu0 }
 0x27d   :  { %v3506_v20 = vadd.f32 %v3505_v59, %v3403_v44  ;;  %v3405_v50 = vadd.f32 %v3404_v52, %v3238_v21  ;;  %v23673_v21 = vld [vmem:[#allocation18_spill] sm:$0xff]  ;;  %v23674_v44 = vld [vmem:[#allocation21_spill] sm:$0xff]  ;;  %v23675_v59 = vld [vmem:[#allocation23_spill] sm:$0xff] }
 0x27e   :  { %v23676_v52 = vld [vmem:[#allocation26_spill] sm:$0xff] }
 0x27f   :  { %v3512_v23 = vadd.f32 %v3506_v20, %v1673_v19  ;;  %v3508_v58 = vadd.f32 %v3507_v2, %v3405_v50  ;;  %v23677_v19 = vld [vmem:[#allocation27_spill] sm:$0xff]  ;;  %v23679_v20 = vld [vmem:[#allocation36_spill] sm:$0xff] }
 0x280   :  { %v23680_v50 = vld [vmem:[#allocation39_spill] sm:$0xff] }
 0x281   :  { %v16405_v30 = vmul.f32 -1.442695, %v3512_v23  ;;  %v3513_v38 = vadd.f32 %v3508_v58, %v1675_v32  ;;  %v23682_v2 = vld [vmem:[#allocation47_spill] sm:$0xff]  ;;  %v23683_v32 = vld [vmem:[#allocation52_spill] sm:$0xff]  ;;  %v23685_v58 = vld [vmem:[#allocation58_spill] sm:$0xff] }
 0x282   :  { %v23684_v23 = vld [vmem:[#allocation56_spill] sm:$0xff] }
 0x283   :  { %16756 = vpow2.f32 %v16405_v30  ;;  %v23686_v30 = vld [vmem:[#allocation64_spill] sm:$0xff] }
 0x284   :  { %16758 = vtanh.f32 %v3513_v38  ;;  %v23687_v38 = vld [vmem:[#allocation69_spill] sm:$0xff] }
 0x290   :  { %v16757_v34 = vpop.eup %16756 }
 0x291   :  { %v16759_v49 = vpop.eup %16758  ;;  %v3525_v17 = vadd.f32 1.0, %v16757_v34  ;;  %v23690_v34 = vld [vmem:[#allocation76_spill] sm:$0xff] }
 0x292   :  { %v3534_v10 = vmul.f32 %v16759_v49, %v16753_v27  ;;  %v23688_v27 = vld [vmem:[#allocation71_spill] sm:$0xff]  ;;  %v23691_v49 = vld [vmem:[#allocation84_spill] sm:$0xff] }
 0x293   :  { %16760 = vrcp.f32 %v3525_v17  ;;  %v23692_v17 = vld [vmem:[#allocation88_spill] sm:$0xff] }
 0x294   :  { %v18992_v0 = vadd.f32 %v3534_v10, %v3533_v6  ;;  %v23693_v6 = vld [vmem:[#allocation89_spill] sm:$0xff]  ;;  %v23694_v10 = vld [vmem:[#allocation95_spill] sm:$0xff] }
 0x296   :  { %23671 = vst [vmem:[#allocation20_spill] sm:$0xff] %v18992_v0  ;;  %16762 = vtanh.f32 %v18992_v0  ;;  %v23784_v0 = vld [vmem:[#allocation324_spill] sm:$0xff] }
 0x2a0   :  { %v16761_v51 = vpop.eup %16760 }
 0x2a3   :  { %v16763_v60 = vpop.eup %16762 }
 0x2a4   :  { %v3537_v46 = vmul.f32 %v16763_v60, %v16761_v51  ;;  %v23695_v51 = vld [vmem:[#allocation115_spill] sm:$0xff]  ;;  %v23696_v60 = vld [vmem:[#allocation100_spill] sm:$0xff] }
 0x2a6   :  { %v18995_v13 = vand.u32 4294901760, %v3537_v46 }
 0x2a8   :  { %3876 = vmatmul.mubr.f32.vlgmr.msra.gmra.mxu1 %v18995_v13  ;;  %v18999_v8 = vsub.f32 %v3537_v46, %v18995_v13  ;;  %v23697_v46 = vld [vmem:[#allocation9_spill] sm:$0xff] }
 0x2a9   :  { %4022 = vmatpush1.msra.mxu1 %v23589_v5  ;;  %4115 = vmatprep.mubr.f32.mxu1 %v23179_v16 }
 0x2aa   :  { %4024 = vmatprep.subr.mxu1 %v23591_v35  ;;  %v19005_v48 = vand.u32 4294901760, %v18999_v8 }
 0x2ab   :  { %4026 = vmatpush1.msra.mxu1 %v23594_v56 }
 0x2ac   :  { %4028 = vmatprep.subr.mxu1 %v23597_v42  ;;  %v3642_v39 = vsub.f32 %v18999_v8, %v19005_v48 }
 0x2ad   :  { %4030 = vmatpush1.msra.mxu1 %v23600_v40 }
 0x2ae   :  { %4032 = vmatprep.subr.mxu1 %v23602_v26  ;;  %v19013_v3 = vand.u32 4294901760, %v3642_v39  ;;  %v23698_v39 = vld [vmem:[#allocation105_spill] sm:$0xff] }
 0x2af   :  { %4034 = vmatpush1.msra.mxu1 %v23605_v4 }
 0x2b0   :  { %4036 = vmatprep.subr.mxu1 %v23607_v15  ;;  %3644 = vmatmul.mubr.f32.vlgmr.msra.gmra.mxu0 %v19013_v3 }
 0x2b1   :  { %3887 = vmatpush1.msra.mxu0 %v23672_v31  ;;  %4038 = vmatpush1.msra.mxu1 %v23610_v55  ;;  %v23782_v31 = vld [vmem:[#allocation322_spill] sm:$0xff] }
 0x2b2   :  { %3890 = vmatprep.subr.mxu0 %v23673_v21  ;;  %4040 = vmatprep.subr.mxu1 %v23612_v57  ;;  %v23780_v21 = vld [vmem:[#allocation320_spill] sm:$0xff] }
 0x2b3   :  { %3893 = vmatpush1.msra.mxu0 %v23674_v44  ;;  %4042 = vmatpush1.msra.mxu1 %v23615_v36  ;;  %v23778_v44 = vld [vmem:[#allocation318_spill] sm:$0xff] }
 0x2b4   :  { %3896 = vmatprep.subr.mxu0 %v23675_v59  ;;  %4044 = vmatprep.subr.mxu1 %v23617_v45  ;;  %v23776_v59 = vld [vmem:[#allocation316_spill] sm:$0xff] }
 0x2b5   :  { %3899 = vmatpush1.msra.mxu0 %v23676_v52  ;;  %4046 = vmatpush1.msra.mxu1 %v23620_v53  ;;  %v23774_v52 = vld [vmem:[#allocation314_spill] sm:$0xff] }
 0x2b6   :  { %3902 = vmatprep.subr.mxu0 %v23677_v19  ;;  %4048 = vmatprep.subr.mxu1 %v23622_v14  ;;  %v23772_v19 = vld [vmem:[#allocation311_spill] sm:$0xff] }
 0x2b7   :  { %3905 = vmatpush1.msra.mxu0 %v23678_v29  ;;  %4050 = vmatpush1.msra.mxu1 %v23624_v24  ;;  %v23770_v29 = vld [vmem:[#allocation306_spill] sm:$0xff] }
 0x2b8   :  { %3908 = vmatprep.subr.mxu0 %v23679_v20  ;;  %4052 = vmatprep.subr.mxu1 %v23626_v7  ;;  %v23768_v20 = vld [vmem:[#allocation303_spill] sm:$0xff] }
 0x2b9   :  { %3911 = vmatpush1.msra.mxu0 %v23680_v50  ;;  %4054 = vmatpush1.msra.mxu1 %v23629_v33  ;;  %v23766_v50 = vld [vmem:[#allocation299_spill] sm:$0xff] }
 0x2ba   :  { %3914 = vmatprep.subr.mxu0 %v23681_v47  ;;  %4056 = vmatprep.subr.mxu1 %v23631_v11  ;;  %v23764_v47 = vld [vmem:[#allocation284_spill] sm:$0xff] }
 0x2bb   :  { %3917 = vmatpush1.msra.mxu0 %v23682_v2  ;;  %4058 = vmatpush1.msra.mxu1 %v23634_v61  ;;  %v23762_v2 = vld [vmem:[#allocation269_spill] sm:$0xff] }
 0x2bc   :  { %3920 = vmatprep.subr.mxu0 %v23683_v32  ;;  %4060 = vmatprep.subr.mxu1 %v23636_v54  ;;  %v23760_v32 = vld [vmem:[#allocation267_spill] sm:$0xff] }
 0x2bd   :  { %3923 = vmatpush1.msra.mxu0 %v23684_v23  ;;  %4062 = vmatpush1.msra.mxu1 %v23638_v18  ;;  %v23758_v23 = vld [vmem:[#allocation263_spill] sm:$0xff] }
 0x2be   :  { %3926 = vmatprep.subr.mxu0 %v23685_v58  ;;  %4064 = vmatprep.subr.mxu1 %v23640_v12  ;;  %v23756_v58 = vld [vmem:[#allocation258_spill] sm:$0xff] }
 0x2bf   :  { %3929 = vmatpush1.msra.mxu0 %v23686_v30  ;;  %4066 = vmatpush1.msra.mxu1 %v23642_v43  ;;  %v23740_v30 = vld [vmem:[#allocation233_spill] sm:$0xff] }
 0x2c0   :  { %3932 = vmatprep.subr.mxu0 %v23687_v38  ;;  %4068 = vmatprep.subr.mxu1 %v23644_v62  ;;  %v23738_v38 = vld [vmem:[#allocation223_spill] sm:$0xff] }
 0x2c1   :  { %3935 = vmatpush1.msra.mxu0 %v23688_v27  ;;  %4070 = vmatpush1.msra.mxu1 %v23647_v28  ;;  %v23737_v27 = vld [vmem:[#allocation126_spill] sm:$0xff] }
 0x2c2   :  { %3938 = vmatprep.subr.mxu0 %v23689_v63  ;;  %4072 = vmatprep.subr.mxu1 %v23649_v25  ;;  %v23735_v63 = vld [vmem:[#allocation122_spill] sm:$0xff] }
 0x2c3   :  { %3941 = vmatpush1.msra.mxu0 %v23690_v34  ;;  %4074 = vmatpush1.msra.mxu1 %v23651_v9  ;;  %v23733_v34 = vld [vmem:[#allocation117_spill] sm:$0xff] }
 0x2c4   :  { %3944 = vmatprep.subr.mxu0 %v23691_v49  ;;  %4076 = vmatprep.subr.mxu1 %v23653_v1  ;;  %v23703_v49 = vld [vmem:[#allocation123_spill] sm:$0xff] }
 0x2c5   :  { %3947 = vmatpush1.msra.mxu0 %v23692_v17  ;;  %4078 = vmatpush1.msra.mxu1 %v23655_v22  ;;  %v23699_v17 = vld [vmem:[#allocation107_spill] sm:$0xff] }
 0x2c6   :  { %3950 = vmatprep.subr.mxu0 %v23693_v6  ;;  %4080 = vmatprep.subr.mxu1 %v23656_v41  ;;  %v23700_v6 = vld [vmem:[#allocation112_spill] sm:$0xff] }
 0x2c7   :  { %3953 = vmatpush1.msra.mxu0 %v23694_v10  ;;  %4082 = vmatpush1.msra.mxu1 %v23695_v51  ;;  %v23701_v10 = vld [vmem:[#allocation118_spill] sm:$0xff] }
 0x2c8   :  { %3956 = vmatprep.subr.mxu0 %v23696_v60  ;;  %4119 = vmatmul.mubr.f32.vlgmr.msra.gmra.mxu1 %v19005_v48  ;;  %v23702_v60 = vld [vmem:[#allocation121_spill] sm:$0xff] }
 0x2c9   :  { %4294 = vmatprep.subr.mxu1 %v23697_v46  ;;  %3959 = vmatpush1.msra.mxu0 %v23698_v39  ;;  %v23704_v39 = vld [vmem:[#allocation124_spill] sm:$0xff] }
 0x2ca   :  { %4296 = vmatpush1.msra.mxu1 %v23589_v5  ;;  %3962 = vmatprep.subr.mxu0 %v23699_v17  ;;  %v23710_v17 = vld [vmem:[#allocation34_spill] sm:$0xff] }
 0x2cb   :  { %4298 = vmatprep.subr.mxu1 %v23591_v35  ;;  %3965 = vmatpush1.msra.mxu0 %v23700_v6  ;;  %v23705_v6 = vld [vmem:[#allocation11_spill] sm:$0xff] }
 0x2cc   :  { %4300 = vmatpush1.msra.mxu1 %v23594_v56  ;;  %3968 = vmatprep.subr.mxu0 %v23701_v10  ;;  %v23706_v10 = vld [vmem:[#allocation22_spill] sm:$0xff] }
 0x2cd   :  { %4302 = vmatprep.subr.mxu1 %v23597_v42  ;;  %3971 = vmatpush1.msra.mxu0 %v23702_v60  ;;  %v23707_v60 = vld [vmem:[#allocation24_spill] sm:$0xff] }
 0x2ce   :  { %4304 = vmatpush1.msra.mxu1 %v23600_v40  ;;  %3974 = vmatprep.subr.mxu0 %v23703_v49  ;;  %v23708_v49 = vld [vmem:[#allocation28_spill] sm:$0xff] }
 0x2cf   :  { %4306 = vmatprep.subr.mxu1 %v23602_v26  ;;  %3977 = vmatpush1.msra.mxu0 %v23704_v39  ;;  %v23709_v39 = vld [vmem:[#allocation30_spill] sm:$0xff] }
 0x2d0   :  { %4010 = vmatprep.mubr.f32.mxu0 %v23179_v16  ;;  %4308 = vmatpush1.msra.mxu1 %v23605_v4 }
 0x2d1   :  { %4013 = vmatmul.mubr.f32.vlgmr.msra.gmra.mxu0 %v18999_v8  ;;  %4128 = vmatprep.subr.mxu0 %v23705_v6  ;;  %v23711_v6 = vld [vmem:[#allocation35_spill] sm:$0xff] }
 0x2d2   :  { %4310 = vmatprep.subr.mxu1 %v23607_v15  ;;  %4132 = vmatpush1.msra.mxu0 %v23706_v10  ;;  %v23712_v10 = vld [vmem:[#allocation41_spill] sm:$0xff] }
 0x2d3   :  { %4312 = vmatpush1.msra.mxu1 %v23610_v55  ;;  %4136 = vmatprep.subr.mxu0 %v23707_v60  ;;  %v23713_v60 = vld [vmem:[#allocation46_spill] sm:$0xff] }
 0x2d4   :  { %4314 = vmatprep.subr.mxu1 %v23612_v57  ;;  %4140 = vmatpush1.msra.mxu0 %v23708_v49  ;;  %v23714_v49 = vld [vmem:[#allocation50_spill] sm:$0xff] }
 0x2d5   :  { %4316 = vmatpush1.msra.mxu1 %v23615_v36  ;;  %4144 = vmatprep.subr.mxu0 %v23709_v39  ;;  %v23715_v39 = vld [vmem:[#allocation51_spill] sm:$0xff] }
 0x2d6   :  { %4318 = vmatprep.subr.mxu1 %v23617_v45  ;;  %4148 = vmatpush1.msra.mxu0 %v23710_v17  ;;  %v23716_v17 = vld [vmem:[#allocation57_spill] sm:$0xff] }
 0x2d7   :  { %4320 = vmatpush1.msra.mxu1 %v23620_v53  ;;  %4152 = vmatprep.subr.mxu0 %v23711_v6  ;;  %v23717_v6 = vld [vmem:[#allocation63_spill] sm:$0xff] }
 0x2d8   :  { %4322 = vmatprep.subr.mxu1 %v23622_v14  ;;  %4156 = vmatpush1.msra.mxu0 %v23712_v10  ;;  %v23718_v10 = vld [vmem:[#allocation65_spill] sm:$0xff] }
 0x2d9   :  { %4324 = vmatpush1.msra.mxu1 %v23624_v24  ;;  %4160 = vmatprep.subr.mxu0 %v23713_v60  ;;  %v23719_v60 = vld [vmem:[#allocation68_spill] sm:$0xff] }
 0x2da   :  { %4326 = vmatprep.subr.mxu1 %v23626_v7  ;;  %4164 = vmatpush1.msra.mxu0 %v23714_v49  ;;  %v23720_v49 = vld [vmem:[#allocation74_spill] sm:$0xff] }
 0x2db   :  { %4328 = vmatpush1.msra.mxu1 %v23629_v33  ;;  %4168 = vmatprep.subr.mxu0 %v23715_v39  ;;  %v23721_v39 = vld [vmem:[#allocation80_spill] sm:$0xff] }
 0x2dc   :  { %4330 = vmatprep.subr.mxu1 %v23631_v11  ;;  %4172 = vmatpush1.msra.mxu0 %v23716_v17  ;;  %v23722_v17 = vld [vmem:[#allocation81_spill] sm:$0xff] }
 0x2dd   :  { %4332 = vmatpush1.msra.mxu1 %v23634_v61  ;;  %4176 = vmatprep.subr.mxu0 %v23717_v6  ;;  %v23723_v6 = vld [vmem:[#allocation82_spill] sm:$0xff] }
 0x2de   :  { %4334 = vmatprep.subr.mxu1 %v23636_v54  ;;  %4180 = vmatpush1.msra.mxu0 %v23718_v10  ;;  %v23724_v10 = vld [vmem:[#allocation87_spill] sm:$0xff] }
 0x2df   :  { %4336 = vmatpush1.msra.mxu1 %v23638_v18  ;;  %4184 = vmatprep.subr.mxu0 %v23719_v60  ;;  %v23725_v60 = vld [vmem:[#allocation94_spill] sm:$0xff] }
 0x2e0   :  { %4338 = vmatprep.subr.mxu1 %v23640_v12  ;;  %4188 = vmatpush1.msra.mxu0 %v23720_v49  ;;  %v23726_v49 = vld [vmem:[#allocation97_spill] sm:$0xff]  ;;  %v23805_v12 = vld [vmem:[#allocation183_spill] sm:$0xff] }
 0x2e1   :  { %4340 = vmatpush1.msra.mxu1 %v23642_v43  ;;  %4192 = vmatprep.subr.mxu0 %v23721_v39  ;;  %v23727_v39 = vld [vmem:[#allocation98_spill] sm:$0xff]  ;;  %v23804_v43 = vld [vmem:[#allocation179_spill] sm:$0xff] }
 0x2e2   :  { %4342 = vmatprep.subr.mxu1 %v23644_v62  ;;  %4196 = vmatpush1.msra.mxu0 %v23722_v17  ;;  %v23728_v17 = vld [vmem:[#allocation106_spill] sm:$0xff] }
 0x2e3   :  { %4344 = vmatpush1.msra.mxu1 %v23647_v28  ;;  %4200 = vmatprep.subr.mxu0 %v23723_v6  ;;  %v23731_v6 = vld [vmem:[#allocation114_spill] sm:$0xff] }
 0x2e4   :  { %4346 = vmatprep.subr.mxu1 %v23649_v25  ;;  %4204 = vmatpush1.msra.mxu0 %v23724_v10  ;;  %v23729_v10 = vld [vmem:[#allocation111_spill] sm:$0xff]  ;;  %v23801_v25 = vld [vmem:[#allocation169_spill] sm:$0xff]  ;;  %v23802_v28 = vld [vmem:[#allocation170_spill] sm:$0xff] }
 0x2e5   :  { %4348 = vmatpush1.msra.mxu1 %v23651_v9  ;;  %4208 = vmatprep.subr.mxu0 %v23725_v60  ;;  %v23730_v60 = vld [vmem:[#allocation192_spill] sm:$0xff]  ;;  %v23800_v9 = vld [vmem:[#allocation298_spill] sm:$0xff] }
 0x2e6   :  { %4350 = vmatprep.subr.mxu1 %v23653_v1  ;;  %4212 = vmatpush1.msra.mxu0 %v23726_v49  ;;  %v23732_v49 = vld [vmem:[#allocation196_spill] sm:$0xff]  ;;  %v23799_v1 = vld [vmem:[#allocation295_spill] sm:$0xff]  ;;  %v23803_v62 = vld [vmem:[#allocation174_spill] sm:$0xff] }
 0x2e7   :  { %4352 = vmatpush1.msra.mxu1 %v23655_v22  ;;  %4216 = vmatprep.subr.mxu0 %v23727_v39  ;;  %v23734_v39 = vld [vmem:[#allocation203_spill] sm:$0xff]  ;;  %v23792_v22 = vld [vmem:[#allocation328_spill] sm:$0xff] }
 0x2e8   :  { %4354 = vmatprep.subr.mxu1 %v23656_v41  ;;  %4220 = vmatpush1.msra.mxu0 %v23728_v17  ;;  %v23736_v17 = vld [vmem:[#allocation214_spill] sm:$0xff]  ;;  %v23790_v41 = vld [vmem:[#allocation327_spill] sm:$0xff] }
 0x2e9   :  { %4356 = vmatpush1.msra.mxu1 %v23695_v51  ;;  %4389 = vmatprep.mubr.f32.mxu1 %v23179_v16  ;;  %v23788_v51 = vld [vmem:[#allocation326_spill] sm:$0xff] }
 0x2ea   :  { %4224 = vmatprep.subr.mxu0 %v23729_v10  ;;  %4391 = vmatmul.mubr.f32.vlgmr.msra.gmra.mxu1 %v18995_v13  ;;  %v23739_v10 = vld [vmem:[#allocation127_spill] sm:$0xff] }
 0x2eb   :  { %4510 = vmatprep.subr.mxu1 %v23730_v60  ;;  %4228 = vmatpush1.msra.mxu0 %v23731_v6  ;;  %v23741_v60 = vld [vmem:[#allocation129_spill] sm:$0xff] }
 0x2ec   :  { %4516 = vmatpush1.msra.mxu1 %v23732_v49  ;;  %4232 = vmatprep.subr.mxu0 %v23733_v34  ;;  %v23742_v6 = vld [vmem:[#allocation237_spill] sm:$0xff]  ;;  %v23743_v49 = vld [vmem:[#allocation131_spill] sm:$0xff]  ;;  %v23755_v34 = vld [vmem:[#allocation180_spill] sm:$0xff] }
 0x2ed   :  { %4522 = vmatprep.subr.mxu1 %v23734_v39  ;;  %4236 = vmatpush1.msra.mxu0 %v23735_v63  ;;  %v23744_v39 = vld [vmem:[#allocation241_spill] sm:$0xff]  ;;  %v23753_v63 = vld [vmem:[#allocation176_spill] sm:$0xff] }
 0x2ee   :  { %4528 = vmatpush1.msra.mxu1 %v23736_v17  ;;  %4240 = vmatprep.subr.mxu0 %v23737_v27  ;;  %v23745_v17 = vld [vmem:[#allocation164_spill] sm:$0xff]  ;;  %v23746_v27 = vld [vmem:[#allocation245_spill] sm:$0xff] }
 0x2ef   :  { %4534 = vmatprep.subr.mxu1 %v23738_v38  ;;  %4244 = vmatpush1.msra.mxu0 %v23739_v10  ;;  %v23747_v38 = vld [vmem:[#allocation165_spill] sm:$0xff] }
 0x2f0   :  { %4540 = vmatpush1.msra.mxu1 %v23740_v30  ;;  %4248 = vmatprep.subr.mxu0 %v23741_v60  ;;  %v23748_v10 = vld [vmem:[#allocation249_spill] sm:$0xff]  ;;  %v23749_v30 = vld [vmem:[#allocation168_spill] sm:$0xff] }
 0x2f1   :  { %4546 = vmatprep.subr.mxu1 %v23742_v6  ;;  %4252 = vmatpush1.msra.mxu0 %v23743_v49  ;;  %v23750_v60 = vld [vmem:[#allocation252_spill] sm:$0xff]  ;;  %v23752_v49 = vld [vmem:[#allocation253_spill] sm:$0xff] }
 0x2f2   :  { %4285 = vmatprep.mubr.f32.mxu0 %v23179_v16  ;;  %4552 = vmatpush1.msra.mxu1 %v23744_v39  ;;  %v23751_v6 = vld [vmem:[#allocation172_spill] sm:$0xff]  ;;  %v23754_v39 = vld [vmem:[#allocation254_spill] sm:$0xff] }
 0x2f3   :  { %4287 = vmatmul.mubr.f32.vlgmr.msra.gmra.mxu0 %v18995_v13  ;;  %4398 = vmatprep.subr.mxu0 %v23745_v17 }
 0x2f4   :  { %4558 = vmatprep.subr.mxu1 %v23746_v27  ;;  %4400 = vmatpush1.msra.mxu0 %v23747_v38  ;;  %v23757_v27 = vld [vmem:[#allocation184_spill] sm:$0xff] }
 0x2f5   :  { %4564 = vmatpush1.msra.mxu1 %v23748_v10  ;;  %4402 = vmatprep.subr.mxu0 %v23749_v30  ;;  %v23759_v10 = vld [vmem:[#allocation188_spill] sm:$0xff] }
 0x2f6   :  { %4570 = vmatprep.subr.mxu1 %v23750_v60  ;;  %4404 = vmatpush1.msra.mxu0 %v23751_v6  ;;  %v23761_v60 = vld [vmem:[#allocation191_spill] sm:$0xff] }
 0x2f7   :  { %4576 = vmatpush1.msra.mxu1 %v23752_v49  ;;  %4406 = vmatprep.subr.mxu0 %v23753_v63  ;;  %v23763_v49 = vld [vmem:[#allocation195_spill] sm:$0xff] }
 0x2f8   :  { %4582 = vmatprep.subr.mxu1 %v23754_v39  ;;  %4408 = vmatpush1.msra.mxu0 %v23755_v34  ;;  %v23765_v39 = vld [vmem:[#allocation197_spill] sm:$0xff] }
 0x2f9   :  { %4588 = vmatpush1.msra.mxu1 %v23756_v58  ;;  %4410 = vmatprep.subr.mxu0 %v23757_v27  ;;  %v23767_v58 = vld [vmem:[#allocation198_spill] sm:$0xff] }
 0x2fa   :  { %4594 = vmatprep.subr.mxu1 %v23758_v23  ;;  %4412 = vmatpush1.msra.mxu0 %v23759_v10  ;;  %v23769_v23 = vld [vmem:[#allocation202_spill] sm:$0xff] }
 0x2fb   :  { %4600 = vmatpush1.msra.mxu1 %v23760_v32  ;;  %4414 = vmatprep.subr.mxu0 %v23761_v60  ;;  %v23771_v32 = vld [vmem:[#allocation207_spill] sm:$0xff] }
 0x2fc   :  { %4606 = vmatprep.subr.mxu1 %v23762_v2  ;;  %4416 = vmatpush1.msra.mxu0 %v23763_v49  ;;  %v23773_v2 = vld [vmem:[#allocation210_spill] sm:$0xff] }
 0x2fd   :  { %4612 = vmatpush1.msra.mxu1 %v23764_v47  ;;  %4418 = vmatprep.subr.mxu0 %v23765_v39  ;;  %v23775_v47 = vld [vmem:[#allocation213_spill] sm:$0xff] }
 0x2fe   :  { %4618 = vmatprep.subr.mxu1 %v23766_v50  ;;  %4420 = vmatpush1.msra.mxu0 %v23767_v58  ;;  %v23777_v50 = vld [vmem:[#allocation218_spill] sm:$0xff] }
 0x2ff   :  { %4624 = vmatpush1.msra.mxu1 %v23768_v20  ;;  %4422 = vmatprep.subr.mxu0 %v23769_v23  ;;  %v23779_v20 = vld [vmem:[#allocation231_spill] sm:$0xff] }
 0x300   :  { %4630 = vmatprep.subr.mxu1 %v23770_v29  ;;  %4424 = vmatpush1.msra.mxu0 %v23771_v32  ;;  %v23781_v29 = vld [vmem:[#allocation239_spill] sm:$0xff] }
 0x301   :  { %4636 = vmatpush1.msra.mxu1 %v23772_v19  ;;  %4426 = vmatprep.subr.mxu0 %v23773_v2  ;;  %v23783_v19 = vld [vmem:[#allocation247_spill] sm:$0xff] }
 0x302   :  { %4642 = vmatprep.subr.mxu1 %v23774_v52  ;;  %4428 = vmatpush1.msra.mxu0 %v23775_v47  ;;  %v23785_v52 = vld [vmem:[#allocation251_spill] sm:$0xff] }
 0x303   :  { %4648 = vmatpush1.msra.mxu1 %v23776_v59  ;;  %4430 = vmatprep.subr.mxu0 %v23777_v50  ;;  %v23787_v59 = vld [vmem:[#allocation256_spill] sm:$0xff] }
 0x304   :  { %4654 = vmatprep.subr.mxu1 %v23778_v44  ;;  %4432 = vmatpush1.msra.mxu0 %v23779_v20  ;;  %v23789_v44 = vld [vmem:[#allocation261_spill] sm:$0xff] }
 0x305   :  { %4660 = vmatpush1.msra.mxu1 %v23780_v21  ;;  %4434 = vmatprep.subr.mxu0 %v23781_v29  ;;  %v23791_v21 = vld [vmem:[#allocation266_spill] sm:$0xff] }
 0x306   :  { %4666 = vmatprep.subr.mxu1 %v23782_v31  ;;  %4436 = vmatpush1.msra.mxu0 %v23783_v19  ;;  %v23793_v31 = vld [vmem:[#allocation268_spill] sm:$0xff] }
 0x307   :  { %4672 = vmatpush1.msra.mxu1 %v23784_v0  ;;  %4438 = vmatprep.subr.mxu0 %v23785_v52  ;;  %v23798_v0 = vld [vmem:[#allocation287_spill] sm:$0xff] }
 0x308   :  { %4678 = vmatprep.subr.mxu1 %v23786_v37  ;;  %4440 = vmatpush1.msra.mxu0 %v23787_v59  ;;  %v23794_v37 = vld [vmem:[#allocation271_spill] sm:$0xff] }
 0x309   :  { %4684 = vmatpush1.msra.mxu1 %v23788_v51  ;;  %4442 = vmatprep.subr.mxu0 %v23789_v44  ;;  %v23795_v51 = vld [vmem:[#allocation276_spill] sm:$0xff] }
 0x30a   :  { %4690 = vmatprep.subr.mxu1 %v23790_v41  ;;  %4444 = vmatpush1.msra.mxu0 %v23791_v21  ;;  %v23796_v41 = vld [vmem:[#allocation280_spill] sm:$0xff] }
 0x30b   :  { %4696 = vmatpush1.msra.mxu1 %v23792_v22  ;;  %4729 = vmatprep.mubr.f32.mxu1 %v23179_v16  ;;  %v23797_v22 = vld [vmem:[#allocation282_spill] sm:$0xff] }
 0x30c   :  { %4446 = vmatprep.subr.mxu0 %v23793_v31  ;;  %4731 = vmatmul.mubr.f32.vlgmr.msra.gmra.mxu1 %v18995_v13 }
 0x30d   :  { %4875 = vmatprep.subr.mxu1 %v23745_v17  ;;  %4448 = vmatpush1.msra.mxu0 %v23794_v37 }
 0x30e   :  { %4877 = vmatpush1.msra.mxu1 %v23747_v38  ;;  %4450 = vmatprep.subr.mxu0 %v23795_v51 }
 0x30f   :  { %4879 = vmatprep.subr.mxu1 %v23749_v30  ;;  %4452 = vmatpush1.msra.mxu0 %v23796_v41 }
 0x310   :  { %4881 = vmatpush1.msra.mxu1 %v23751_v6  ;;  %4454 = vmatprep.subr.mxu0 %v23797_v22 }
 0x311   :  { %4883 = vmatprep.subr.mxu1 %v23753_v63  ;;  %4456 = vmatpush1.msra.mxu0 %v23798_v0 }
 0x312   :  { %4885 = vmatpush1.msra.mxu1 %v23755_v34  ;;  %4458 = vmatprep.subr.mxu0 %v23799_v1 }
 0x313   :  { %4887 = vmatprep.subr.mxu1 %v23757_v27  ;;  %4460 = vmatpush1.msra.mxu0 %v23800_v9 }
 0x314   :  { %4493 = vmatprep.mubr.f32.mxu0 %v23179_v16  ;;  %4889 = vmatpush1.msra.mxu1 %v23759_v10 }
 0x315   :  { %4499 = vmatmul.mubr.f32.vlgmr.msra.gmra.mxu0 %v19013_v3  ;;  %4739 = vmatprep.subr.mxu0 %v23801_v25  ;;  %v23806_v3 = vld [vmem:[#allocation187_spill] sm:$0xff]  ;;  %v23807_v25 = vld [vmem:[#allocation194_spill] sm:$0xff] }
 0x316   :  { %4891 = vmatprep.subr.mxu1 %v23761_v60  ;;  %4742 = vmatpush1.msra.mxu0 %v23802_v28  ;;  %v23808_v28 = vld [vmem:[#allocation201_spill] sm:$0xff] }
 0x317   :  { %4893 = vmatpush1.msra.mxu1 %v23763_v49  ;;  %4745 = vmatprep.subr.mxu0 %v23803_v62  ;;  %v23809_v62 = vld [vmem:[#allocation206_spill] sm:$0xff] }
 0x318   :  { %4895 = vmatprep.subr.mxu1 %v23765_v39  ;;  %4748 = vmatpush1.msra.mxu0 %v23804_v43  ;;  %v23810_v43 = vld [vmem:[#allocation209_spill] sm:$0xff] }
 0x319   :  { %4897 = vmatpush1.msra.mxu1 %v23767_v58  ;;  %4751 = vmatprep.subr.mxu0 %v23805_v12  ;;  %v23811_v12 = vld [vmem:[#allocation211_spill] sm:$0xff] }
 0x31a   :  { %4899 = vmatprep.subr.mxu1 %v23769_v23  ;;  %4754 = vmatpush1.msra.mxu0 %v23806_v3  ;;  %v23812_v3 = vld [vmem:[#allocation212_spill] sm:$0xff] }
 0x31b   :  { %4901 = vmatpush1.msra.mxu1 %v23771_v32  ;;  %4757 = vmatprep.subr.mxu0 %v23807_v25  ;;  %v23813_v25 = vld [vmem:[#allocation217_spill] sm:$0xff] }
 0x31c   :  { %4903 = vmatprep.subr.mxu1 %v23773_v2  ;;  %4760 = vmatpush1.msra.mxu0 %v23808_v28  ;;  %v23814_v28 = vld [vmem:[#allocation222_spill] sm:$0xff] }
 0x31d   :  { %4905 = vmatpush1.msra.mxu1 %v23775_v47  ;;  %4763 = vmatprep.subr.mxu0 %v23809_v62  ;;  %v23815_v62 = vld [vmem:[#allocation225_spill] sm:$0xff] }
 0x31e   :  { %4907 = vmatprep.subr.mxu1 %v23777_v50  ;;  %4766 = vmatpush1.msra.mxu0 %v23810_v43  ;;  %v23816_v43 = vld [vmem:[#allocation228_spill] sm:$0xff] }
 0x31f   :  { %4909 = vmatpush1.msra.mxu1 %v23779_v20  ;;  %4769 = vmatprep.subr.mxu0 %v23811_v12  ;;  %v23817_v12 = vld [vmem:[#allocation232_spill] sm:$0xff] }
 0x320   :  { %4911 = vmatprep.subr.mxu1 %v23781_v29  ;;  %4772 = vmatpush1.msra.mxu0 %v23812_v3  ;;  %v23818_v3 = vld [vmem:[#allocation243_spill] sm:$0xff] }
 0x321   :  { %4913 = vmatpush1.msra.mxu1 %v23783_v19  ;;  %4775 = vmatprep.subr.mxu0 %v23813_v25  ;;  %v23819_v25 = vld [vmem:[#allocation250_spill] sm:$0xff] }
 0x322   :  { %4915 = vmatprep.subr.mxu1 %v23785_v52  ;;  %4778 = vmatpush1.msra.mxu0 %v23814_v28  ;;  %v23820_v28 = vld [vmem:[#allocation259_spill] sm:$0xff] }
 0x323   :  { %4917 = vmatpush1.msra.mxu1 %v23787_v59  ;;  %4781 = vmatprep.subr.mxu0 %v23815_v62  ;;  %v23821_v62 = vld [vmem:[#allocation265_spill] sm:$0xff] }
 0x324   :  { %4919 = vmatprep.subr.mxu1 %v23789_v44  ;;  %4784 = vmatpush1.msra.mxu0 %v23816_v43  ;;  %v23822_v43 = vld [vmem:[#allocation270_spill] sm:$0xff] }
 0x325   :  { %4921 = vmatpush1.msra.mxu1 %v23791_v21  ;;  %4787 = vmatprep.subr.mxu0 %v23817_v12  ;;  %v23823_v12 = vld [vmem:[#allocation274_spill] sm:$0xff] }
 0x326   :  { %4923 = vmatprep.subr.mxu1 %v23793_v31  ;;  %4790 = vmatpush1.msra.mxu0 %v23818_v3  ;;  %v23824_v3 = vld [vmem:[#allocation279_spill] sm:$0xff] }
 0x327   :  { %4925 = vmatpush1.msra.mxu1 %v23794_v37  ;;  %4793 = vmatprep.subr.mxu0 %v23819_v25  ;;  %v23864_v25 = vld [vmem:[#allocation40_spill] sm:$0xff] }
 0x328   :  { %4927 = vmatprep.subr.mxu1 %v23795_v51  ;;  %4796 = vmatpush1.msra.mxu0 %v23820_v28  ;;  %v23825_v28 = vld [vmem:[#allocation281_spill] sm:$0xff] }
 0x329   :  { %4929 = vmatpush1.msra.mxu1 %v23796_v41  ;;  %4799 = vmatprep.subr.mxu0 %v23821_v62  ;;  %v23826_v62 = vld [vmem:[#allocation286_spill] sm:$0xff] }
 0x32a   :  { %4931 = vmatprep.subr.mxu1 %v23797_v22  ;;  %4802 = vmatpush1.msra.mxu0 %v23822_v43  ;;  %v23827_v43 = vld [vmem:[#allocation290_spill] sm:$0xff] }
 0x32b   :  { %4933 = vmatpush1.msra.mxu1 %v23798_v0  ;;  %4805 = vmatprep.subr.mxu0 %v23823_v12  ;;  %v23828_v12 = vld [vmem:[#allocation294_spill] sm:$0xff] }
 0x32c   :  { %4935 = vmatprep.subr.mxu1 %v23799_v1  ;;  %4808 = vmatpush1.msra.mxu0 %v23824_v3  ;;  %v23829_v3 = vld [vmem:[#allocation297_spill] sm:$0xff] }
 0x32d   :  { %4937 = vmatpush1.msra.mxu1 %v23800_v9  ;;  %4970 = vmatprep.mubr.f32.mxu1 %v23179_v16 }
 0x32e   :  { %4811 = vmatprep.subr.mxu0 %v23825_v28  ;;  %4974 = vmatmul.mubr.f32.vlgmr.msra.gmra.mxu1 %v19005_v48  ;;  %v23830_v28 = vld [vmem:[#allocation301_spill] sm:$0xff]  ;;  %v23831_v48 = vld [vmem:[#allocation308_spill] sm:$0xff] }
 0x32f   :  { %5149 = vmatprep.subr.mxu1 %v23745_v17  ;;  %4814 = vmatpush1.msra.mxu0 %v23826_v62  ;;  %v23832_v62 = vld [vmem:[#allocation310_spill] sm:$0xff] }
 0x330   :  { %5151 = vmatpush1.msra.mxu1 %v23747_v38  ;;  %4817 = vmatprep.subr.mxu0 %v23827_v43  ;;  %v23862_v43 = vld [vmem:[#allocation38_spill] sm:$0xff] }
 0x331   :  { %5153 = vmatprep.subr.mxu1 %v23749_v30  ;;  %4820 = vmatpush1.msra.mxu0 %v23828_v12  ;;  %v23833_v12 = vld [vmem:[#allocation175_spill] sm:$0xff] }
 0x332   :  { %5155 = vmatpush1.msra.mxu1 %v23751_v6  ;;  %4823 = vmatprep.subr.mxu0 %v23829_v3  ;;  %v23834_v3 = vld [vmem:[#allocation177_spill] sm:$0xff] }
 0x333   :  { %5157 = vmatprep.subr.mxu1 %v23753_v63  ;;  %4826 = vmatpush1.msra.mxu0 %v23830_v28  ;;  %v23835_v28 = vld [vmem:[#allocation182_spill] sm:$0xff] }
 0x334   :  { %5159 = vmatpush1.msra.mxu1 %v23755_v34  ;;  %4829 = vmatprep.subr.mxu0 %v23831_v48  ;;  %v23836_v48 = vld [vmem:[#allocation186_spill] sm:$0xff]  ;;  %v23912_v34 = vld [vmem:[#allocation157_spill] sm:$0xff] }
 0x335   :  { %5161 = vmatprep.subr.mxu1 %v23757_v27  ;;  %4832 = vmatpush1.msra.mxu0 %v23832_v62  ;;  %v23837_v62 = vld [vmem:[#allocation193_spill] sm:$0xff] }
 0x336   :  { %4865 = vmatprep.mubr.f32.mxu0 %v23179_v16  ;;  %5163 = vmatpush1.msra.mxu1 %v23759_v10 }
 0x337   :  { %4868 = vmatmul.mubr.f32.vlgmr.msra.gmra.mxu0 %v18999_v8  ;;  %4983 = vmatprep.subr.mxu0 %v23833_v12  ;;  %v23838_v8 = vld [vmem:[#allocation199_spill] sm:$0xff]  ;;  %v23839_v12 = vld [vmem:[#allocation208_spill] sm:$0xff] }
 0x338   :  { %5165 = vmatprep.subr.mxu1 %v23761_v60  ;;  %4987 = vmatpush1.msra.mxu0 %v23834_v3  ;;  %v23840_v3 = vld [vmem:[#allocation215_spill] sm:$0xff] }
 0x339   :  { %5167 = vmatpush1.msra.mxu1 %v23763_v49  ;;  %4991 = vmatprep.subr.mxu0 %v23835_v28  ;;  %v23841_v28 = vld [vmem:[#allocation219_spill] sm:$0xff] }
 0x33a   :  { %5169 = vmatprep.subr.mxu1 %v23765_v39  ;;  %4995 = vmatpush1.msra.mxu0 %v23836_v48  ;;  %v23842_v48 = vld [vmem:[#allocation224_spill] sm:$0xff] }
 0x33b   :  { %5171 = vmatpush1.msra.mxu1 %v23767_v58  ;;  %4999 = vmatprep.subr.mxu0 %v23837_v62  ;;  %v23843_v62 = vld [vmem:[#allocation226_spill] sm:$0xff] }
 0x33c   :  { %5173 = vmatprep.subr.mxu1 %v23769_v23  ;;  %5003 = vmatpush1.msra.mxu0 %v23838_v8  ;;  %v23844_v8 = vld [vmem:[#allocation227_spill] sm:$0xff]  ;;  %v23911_v23 = vld [vmem:[#allocation156_spill] sm:$0xff] }
 0x33d   :  { %5175 = vmatpush1.msra.mxu1 %v23771_v32  ;;  %5007 = vmatprep.subr.mxu0 %v23839_v12  ;;  %v23845_v12 = vld [vmem:[#allocation229_spill] sm:$0xff] }
 0x33e   :  { %5177 = vmatprep.subr.mxu1 %v23773_v2  ;;  %5011 = vmatpush1.msra.mxu0 %v23840_v3  ;;  %v23846_v3 = vld [vmem:[#allocation235_spill] sm:$0xff] }
 0x33f   :  { %5179 = vmatpush1.msra.mxu1 %v23775_v47  ;;  %5015 = vmatprep.subr.mxu0 %v23841_v28  ;;  %v23847_v28 = vld [vmem:[#allocation238_spill] sm:$0xff] }
 0x340   :  { %5181 = vmatprep.subr.mxu1 %v23777_v50  ;;  %5019 = vmatpush1.msra.mxu0 %v23842_v48  ;;  %v23848_v48 = vld [vmem:[#allocation240_spill] sm:$0xff]  ;;  %v23910_v47 = vld [vmem:[#allocation138_spill] sm:$0xff] }
 0x341   :  { %5183 = vmatpush1.msra.mxu1 %v23779_v20  ;;  %5023 = vmatprep.subr.mxu0 %v23843_v62  ;;  %v23849_v62 = vld [vmem:[#allocation242_spill] sm:$0xff] }
 0x342   :  { %5185 = vmatprep.subr.mxu1 %v23781_v29  ;;  %5027 = vmatpush1.msra.mxu0 %v23844_v8  ;;  %v23850_v8 = vld [vmem:[#allocation255_spill] sm:$0xff] }
 0x343   :  { %5187 = vmatpush1.msra.mxu1 %v23783_v19  ;;  %5031 = vmatprep.subr.mxu0 %v23845_v12  ;;  %v23851_v12 = vld [vmem:[#allocation264_spill] sm:$0xff] }
 0x344   :  { %5189 = vmatprep.subr.mxu1 %v23785_v52  ;;  %5035 = vmatpush1.msra.mxu0 %v23846_v3  ;;  %v23852_v3 = vld [vmem:[#allocation273_spill] sm:$0xff] }
 0x345   :  { %5191 = vmatpush1.msra.mxu1 %v23787_v59  ;;  %5039 = vmatprep.subr.mxu0 %v23847_v28  ;;  %v23853_v28 = vld [vmem:[#allocation278_spill] sm:$0xff] }
 0x346   :  { %5193 = vmatprep.subr.mxu1 %v23789_v44  ;;  %5043 = vmatpush1.msra.mxu0 %v23848_v48  ;;  %v23854_v48 = vld [vmem:[#allocation285_spill] sm:$0xff] }
 0x347   :  { %5195 = vmatpush1.msra.mxu1 %v23791_v21  ;;  %5047 = vmatprep.subr.mxu0 %v23849_v62  ;;  %v23855_v62 = vld [vmem:[#allocation289_spill] sm:$0xff] }
 0x348   :  { %5197 = vmatprep.subr.mxu1 %v23793_v31  ;;  %5051 = vmatpush1.msra.mxu0 %v23850_v8  ;;  %v23856_v8 = vld [vmem:[#allocation293_spill] sm:$0xff]  ;;  %v23909_v31 = vld [vmem:[#allocation136_spill] sm:$0xff] }
 0x349   :  { %5199 = vmatpush1.msra.mxu1 %v23794_v37  ;;  %5055 = vmatprep.subr.mxu0 %v23851_v12  ;;  %v23860_v12 = vld [vmem:[#allocation12_spill] sm:$0xff]  ;;  %v23908_v37 = vld [vmem:[#allocation19_spill] sm:$0xff] }
 0x34a   :  { %5201 = vmatprep.subr.mxu1 %v23795_v51  ;;  %5059 = vmatpush1.msra.mxu0 %v23852_v3  ;;  %v23857_v3 = vld [vmem:[#allocation296_spill] sm:$0xff]  ;;  %v197_v21 = vadd.f32 %v23909_v31, %v23908_v37 }
 0x34b   :  { %5203 = vmatpush1.msra.mxu1 %v23796_v41  ;;  %5063 = vmatprep.subr.mxu0 %v23853_v28  ;;  %v23858_v28 = vld [vmem:[#allocation300_spill] sm:$0xff] }
 0x34c   :  { %5205 = vmatprep.subr.mxu1 %v23797_v22  ;;  %5067 = vmatpush1.msra.mxu0 %v23854_v48  ;;  %v23859_v48 = vld [vmem:[#allocation304_spill] sm:$0xff]  ;;  %v352_v2 = vadd.f32 %v23910_v47, %v197_v21 }
 0x34d   :  { %5207 = vmatpush1.msra.mxu1 %v23798_v0  ;;  %5071 = vmatprep.subr.mxu0 %v23855_v62  ;;  %v23861_v62 = vld [vmem:[#allocation307_spill] sm:$0xff]  ;;  %v23915_v21 = vld [vmem:[#allocation204_spill] sm:$0xff] }
 0x34e   :  { %5209 = vmatprep.subr.mxu1 %v23799_v1  ;;  %5075 = vmatpush1.msra.mxu0 %v23856_v8  ;;  %v23863_v8 = vld [vmem:[#allocation309_spill] sm:$0xff]  ;;  %v23869_v0 = vld [vmem:[#allocation319_spill] sm:$0xff]  ;;  %v479_v58 = vadd.f32 %v23911_v23, %v352_v2 }
 0x34f   :  { %5211 = vmatpush1.msra.mxu1 %v23800_v9  ;;  %5244 = vmatprep.mubr.f32.mxu1 %v23179_v16  ;;  %v23865_v9 = vld [vmem:[#allocation312_spill] sm:$0xff]  ;;  %v23867_v1 = vld [vmem:[#allocation317_spill] sm:$0xff] }
 0x350   :  { %5079 = vmatprep.subr.mxu0 %v23857_v3  ;;  %5246 = vmatmul.mubr.f32.vlgmr.msra.gmra.mxu1 %v18995_v13  ;;  %v23866_v3 = vld [vmem:[#allocation45_spill] sm:$0xff]  ;;  %v612_v31 = vadd.f32 %v23912_v34, %v479_v58 }
 0x351   :  { %5083 = vmatpush1.msra.mxu0 %v23858_v28  ;;  %5140 = vmatprep.mubr.f32.mxu0 %v23179_v16  ;;  %v23868_v28 = vld [vmem:[#allocation49_spill] sm:$0xff] }
 0x352   :  { %5087 = vmatprep.subr.mxu0 %v23859_v48  ;;  %5397 = vmatprep.subr.mxu1 %v23860_v12  ;;  %v23870_v48 = vld [vmem:[#allocation54_spill] sm:$0xff]  ;;  %v23917_v23 = vld [vmem:[#allocation313_spill] sm:$0xff] }
 0x353   :  { %5091 = vmatpush1.msra.mxu0 %v23861_v62  ;;  %5403 = vmatpush1.msra.mxu1 %v23862_v43  ;;  %v23871_v62 = vld [vmem:[#allocation55_spill] sm:$0xff]  ;;  %v23872_v43 = vld [vmem:[#allocation62_spill] sm:$0xff] }
 0x354   :  { %5095 = vmatprep.subr.mxu0 %v23863_v8  ;;  %5409 = vmatprep.subr.mxu1 %v23864_v25  ;;  %v23873_v25 = vld [vmem:[#allocation67_spill] sm:$0xff]  ;;  %v23907_v8 = vld [vmem:[#allocation10_spill] sm:$0xff] }
 0x355   :  { %5099 = vmatpush1.msra.mxu0 %v23865_v9  ;;  %5415 = vmatpush1.msra.mxu1 %v23866_v3  ;;  %v23874_v3 = vld [vmem:[#allocation70_spill] sm:$0xff]  ;;  %v23905_v9 = vld [vmem:[#allocation113_spill] sm:$0xff] }
 0x356   :  { %5103 = vmatprep.subr.mxu0 %v23867_v1  ;;  %5421 = vmatprep.subr.mxu1 %v23868_v28  ;;  %v23875_v28 = vld [vmem:[#allocation73_spill] sm:$0xff]  ;;  %v23903_v1 = vld [vmem:[#allocation108_spill] sm:$0xff] }
 0x357   :  { %5107 = vmatpush1.msra.mxu0 %v23869_v0  ;;  %5427 = vmatpush1.msra.mxu1 %v23870_v48  ;;  %v23876_v48 = vld [vmem:[#allocation79_spill] sm:$0xff]  ;;  %v23898_v0 = vld [vmem:[#allocation141_spill] sm:$0xff] }
 0x358   :  { %5142 = vmatmul.mubr.f32.vlgmr.msra.gmra.mxu0 %v18995_v13  ;;  %5433 = vmatprep.subr.mxu1 %v23871_v62  ;;  %v23877_v13 = vld [vmem:[#allocation83_spill] sm:$0xff]  ;;  %v23896_v62 = vld [vmem:[#allocation140_spill] sm:$0xff] }
 0x359   :  { %5439 = vmatpush1.msra.mxu1 %v23872_v43  ;;  %5285 = vmatprep.subr.mxu0 %v23697_v46  ;;  %v23878_v43 = vld [vmem:[#allocation86_spill] sm:$0xff] }
 0x35a   :  { %5445 = vmatprep.subr.mxu1 %v23873_v25  ;;  %5287 = vmatpush1.msra.mxu0 %v23589_v5  ;;  %v23879_v25 = vld [vmem:[#allocation90_spill] sm:$0xff] }
 0x35b   :  { %5451 = vmatpush1.msra.mxu1 %v23874_v3  ;;  %5289 = vmatprep.subr.mxu0 %v23591_v35  ;;  %v23880_v3 = vld [vmem:[#allocation93_spill] sm:$0xff] }
 0x35c   :  { %5457 = vmatprep.subr.mxu1 %v23875_v28  ;;  %5291 = vmatpush1.msra.mxu0 %v23594_v56  ;;  %v23881_v28 = vld [vmem:[#allocation99_spill] sm:$0xff] }
 0x35d   :  { %5463 = vmatpush1.msra.mxu1 %v23876_v48  ;;  %5293 = vmatprep.subr.mxu0 %v23597_v42  ;;  %v23882_v48 = vld [vmem:[#allocation103_spill] sm:$0xff] }
 0x35e   :  { %5469 = vmatprep.subr.mxu1 %v23877_v13  ;;  %5295 = vmatpush1.msra.mxu0 %v23600_v40  ;;  %v23883_v13 = vld [vmem:[#allocation104_spill] sm:$0xff] }
 0x35f   :  { %5475 = vmatpush1.msra.mxu1 %v23878_v43  ;;  %5297 = vmatprep.subr.mxu0 %v23602_v26  ;;  %v23884_v43 = vld [vmem:[#allocation109_spill] sm:$0xff] }
 0x360   :  { %5481 = vmatprep.subr.mxu1 %v23879_v25  ;;  %5299 = vmatpush1.msra.mxu0 %v23605_v4  ;;  %v23885_v25 = vld [vmem:[#allocation116_spill] sm:$0xff] }
 0x361   :  { %5487 = vmatpush1.msra.mxu1 %v23880_v3  ;;  %5301 = vmatprep.subr.mxu0 %v23607_v15  ;;  %v23886_v3 = vld [vmem:[#allocation119_spill] sm:$0xff] }
 0x362   :  { %5493 = vmatprep.subr.mxu1 %v23881_v28  ;;  %5303 = vmatpush1.msra.mxu0 %v23610_v55  ;;  %v23887_v28 = vld [vmem:[#allocation120_spill] sm:$0xff] }
 0x363   :  { %5499 = vmatpush1.msra.mxu1 %v23882_v48  ;;  %5305 = vmatprep.subr.mxu0 %v23612_v57  ;;  %v23888_v48 = vld [vmem:[#allocation125_spill] sm:$0xff] }
 0x364   :  { %5505 = vmatprep.subr.mxu1 %v23883_v13  ;;  %5307 = vmatpush1.msra.mxu0 %v23615_v36  ;;  %v23889_v13 = vld [vmem:[#allocation128_spill] sm:$0xff] }
 0x365   :  { %5511 = vmatpush1.msra.mxu1 %v23884_v43  ;;  %5309 = vmatprep.subr.mxu0 %v23617_v45  ;;  %v23890_v43 = vld [vmem:[#allocation130_spill] sm:$0xff] }
 0x366   :  { %5517 = vmatprep.subr.mxu1 %v23885_v25  ;;  %5311 = vmatpush1.msra.mxu0 %v23620_v53  ;;  %v23891_v25 = vld [vmem:[#allocation133_spill] sm:$0xff] }
 0x367   :  { %5523 = vmatpush1.msra.mxu1 %v23886_v3  ;;  %5313 = vmatprep.subr.mxu0 %v23622_v14  ;;  %v23892_v3 = vld [vmem:[#allocation135_spill] sm:$0xff] }
 0x368   :  { %5529 = vmatprep.subr.mxu1 %v23887_v28  ;;  %5315 = vmatpush1.msra.mxu0 %v23624_v24  ;;  %v23893_v28 = vld [vmem:[#allocation137_spill] sm:$0xff]  ;;  %v3877_v41 = vpop.f32.mrf.mxu1 }
 0x369   :  { %5535 = vmatpush1.msra.mxu1 %v23888_v48  ;;  %5317 = vmatprep.subr.mxu0 %v23626_v7  ;;  %v23894_v48 = vld [vmem:[#allocation139_spill] sm:$0xff] }
 0x36a   :  { %5541 = vmatprep.subr.mxu1 %v23889_v13  ;;  %5319 = vmatpush1.msra.mxu0 %v23629_v33  ;;  %v23895_v13 = vld [vmem:[#allocation78_spill] sm:$0xff]  ;;  %v3879_v44 = vpop.f32.mrf.mxu1 }
 0x36b   :  { %5547 = vmatpush1.msra.mxu1 %v23890_v43  ;;  %5321 = vmatprep.subr.mxu0 %v23631_v11  ;;  %v23897_v43 = vld [vmem:[#allocation85_spill] sm:$0xff] }
 0x36c   :  { %5553 = vmatprep.subr.mxu1 %v23891_v25  ;;  %5323 = vmatpush1.msra.mxu0 %v23634_v61  ;;  %v23899_v25 = vld [vmem:[#allocation91_spill] sm:$0xff] }
 0x36d   :  { %5559 = vmatpush1.msra.mxu1 %v23892_v3  ;;  %5325 = vmatprep.subr.mxu0 %v23636_v54  ;;  %v23900_v3 = vld [vmem:[#allocation92_spill] sm:$0xff] }
 0x36e   :  { %5565 = vmatprep.subr.mxu1 %v23893_v28  ;;  %5327 = vmatpush1.msra.mxu0 %v23638_v18  ;;  %v23901_v28 = vld [vmem:[#allocation96_spill] sm:$0xff] }
 0x36f   :  { %5571 = vmatpush1.msra.mxu1 %v23894_v48  ;;  %5329 = vmatprep.subr.mxu0 %v23895_v13  ;;  %v23902_v48 = vld [vmem:[#allocation101_spill] sm:$0xff] }
 0x370   :  { %5577 = vmatprep.subr.mxu1 %v23896_v62  ;;  %5331 = vmatpush1.msra.mxu0 %v23897_v43  ;;  %v23904_v62 = vld [vmem:[#allocation110_spill] sm:$0xff]  ;;  %v3645_v12 = vpop.f32.mrf.mxu0 }
 0x371   :  { %5583 = vmatpush1.msra.mxu1 %v23898_v0  ;;  %5333 = vmatprep.subr.mxu0 %v23899_v25  ;;  %v23906_v0 = vld [vmem:[#allocation115_spill] sm:$0xff]  ;;  %v3878_v59 = vadd.f32 %v3877_v41, %v3645_v12  ;;  %v23913_v12 = vld [vmem:[#allocation200_spill] sm:$0xff] }
 0x372   :  { %5616 = vmatprep.mubr.f32.mxu1 %v23179_v16  ;;  %5762 = vmatprep.subr.mxu1 %v23697_v46  ;;  %v3647_v22 = vpop.f32.mrf.mxu0  ;;  %v751_v41 = vadd.f32 %v23913_v12, %v612_v31 }
 0x373   :  { %5335 = vmatpush1.msra.mxu0 %v23900_v3  ;;  %5380 = vmatprep.mubr.f32.mxu0 %v23179_v16  ;;  %v3880_v19 = vadd.f32 %v3879_v44, %v3647_v22 }
 0x374   :  { %5337 = vmatprep.subr.mxu0 %v23901_v28 }
 0x375   :  { %5339 = vmatpush1.msra.mxu0 %v23902_v48 }
 0x376   :  { %5341 = vmatprep.subr.mxu0 %v23903_v1 }
 0x377   :  { %5343 = vmatpush1.msra.mxu0 %v23904_v62 }
 0x378   :  { %5345 = vmatprep.subr.mxu0 %v23905_v9 }
 0x379   :  { %5347 = vmatpush1.msra.mxu0 %v23906_v0 }
 0x37a   :  { %5626 = vmatprep.subr.mxu0 %v23907_v8 }
 0x388   :  { %v4120_v29 = vpop.f32.mrf.mxu1 }
 0x38a   :  { %v4122_v8 = vpop.f32.mrf.mxu1 }
 0x391   :  { %v4014_v51 = vpop.f32.mrf.mxu0 }
 0x392   :  { %v4015_v20 = vadd.f32 %v4014_v51, %v3878_v59  ;;  %v23914_v51 = vld [vmem:[#allocation205_spill] sm:$0xff] }
 0x393   :  { %v4016_v52 = vpop.f32.mrf.mxu0  ;;  %v874_v63 = vadd.f32 %v23914_v51, %v751_v41 }
 0x394   :  { %v4017_v32 = vadd.f32 %v4016_v52, %v3880_v19  ;;  %v4121_v39 = vadd.f32 %v4120_v29, %v4015_v20 }
 0x396   :  { %v4123_v60 = vadd.f32 %v4122_v8, %v4017_v32  ;;  %v23916_v32 = vld [vmem:[#allocation102_spill] sm:$0xff] }
 0x397   :  { %v1005_v58 = vadd.f32 %v23917_v23, %v23916_v32  ;;  %v23919_v8 = vld [vmem:[#allocation338_spill] sm:$0xff] }
 0x3aa   :  { %v4392_v10 = vpop.f32.mrf.mxu1 }
 0x3ac   :  { %v4394_v22 = vpop.f32.mrf.mxu1 }
 0x3b3   :  { %v4288_v50 = vpop.f32.mrf.mxu0 }
 0x3b4   :  { %v4289_v27 = vadd.f32 %v4288_v50, %v4121_v39 }
 0x3b5   :  { %v4290_v49 = vpop.f32.mrf.mxu0 }
 0x3b6   :  { %v4291_v37 = vadd.f32 %v4290_v49, %v4123_v60  ;;  %v4393_v44 = vadd.f32 %v4392_v10, %v4289_v27  ;;  %v23918_v60 = vld [vmem:[#allocation315_spill] sm:$0xff] }
 0x3b7   :  { %v1160_v27 = vadd.f32 %v23918_v60, %v1005_v58 }
 0x3b8   :  { %v4395_v59 = vadd.f32 %v4394_v22, %v4291_v37  ;;  %v5252_v52 = vadd.f32 %v4393_v44, %v23915_v21  ;;  %v23920_v44 = vld [vmem:[#allocation339_spill] sm:$0xff] }
 0x3b9   :  { %v1287_v31 = vadd.f32 %v23919_v8, %v1160_v27 }
 0x3ba   :  { %v5253_v19 = vadd.f32 %v4395_v59, %v874_v63  ;;  %v16406_v47 = vmul.f32 -1.442695, %v5252_v52 }
 0x3bb   :  { %v1420_v59 = vadd.f32 %v23920_v44, %v1287_v31 }
 0x3bc   :  { %v16407_v2 = vmul.f32 -1.442695, %v5253_v19  ;;  %16764 = vpow2.f32 %v16406_v47 }
 0x3be   :  { %16766 = vpow2.f32 %v16407_v2  ;;  %v23921_v2 = vld [vmem:[#allocation283_spill] sm:$0xff] }
 0x3bf   :  { %v1559_v23 = vadd.f32 %v23921_v2, %v1420_v59 }
 0x3c9   :  { %v16765_v21 = vpop.eup %16764 }
 0x3cb   :  { %v16767_v47 = vpop.eup %16766 }
 0x3cc   :  { %v4732_v20 = vpop.f32.mrf.mxu1  ;;  %v5266_v27 = vadd.f32 1.0, %v16767_v47 }
 0x3ce   :  { %v4734_v49 = vpop.f32.mrf.mxu1 }
 0x3d5   :  { %v4500_v29 = vpop.f32.mrf.mxu0 }
 0x3d6   :  { %v4733_v37 = vadd.f32 %v4732_v20, %v4500_v29  ;;  %v5265_v20 = vadd.f32 1.0, %v16765_v21 }
 0x3d7   :  { %v4502_v50 = vpop.f32.mrf.mxu0 }
 0x3d8   :  { %v4735_v63 = vadd.f32 %v4734_v49, %v4502_v50  ;;  %16768 = vrcp.f32 %v5265_v20  ;;  %v23926_v20 = vld [vmem:[#allocation16_spill] sm:$0xff] }
 0x3d9   :  { %16770 = vrcp.f32 %v5266_v27  ;;  %v23928_v27 = vld [vmem:[#allocation21_spill] sm:$0xff] }
 0x3ee   :  { %v4975_v10 = vpop.f32.mrf.mxu1 }
 0x3f0   :  { %v4977_v22 = vpop.f32.mrf.mxu1 }
 0x3f7   :  { %v4869_v34 = vpop.f32.mrf.mxu0 }
 0x3f8   :  { %v4870_v12 = vadd.f32 %v4869_v34, %v4733_v37  ;;  %v23922_v34 = vld [vmem:[#allocation343_spill] sm:$0xff]  ;;  %v23923_v37 = vld [vmem:[#allocation342_spill] sm:$0xff] }
 0x3f9   :  { %v4871_v39 = vpop.f32.mrf.mxu0  ;;  %v1682_v49 = vadd.f32 %v23922_v34, %v1559_v23  ;;  %v23930_v34 = vld [vmem:[#allocation26_spill] sm:$0xff] }
 0x3fa   :  { %v4872_v41 = vadd.f32 %v4871_v39, %v4735_v63  ;;  %v4976_v51 = vadd.f32 %v4975_v10, %v4870_v12  ;;  %v16769_v63 = vpop.eup %16768 }
 0x3fb   :  { %v16771_v12 = vpop.eup %16770 }
 0x3fc   :  { %v4978_v58 = vadd.f32 %v4977_v22, %v4872_v41 }
 0x410   :  { %v5247_v52 = vpop.f32.mrf.mxu1 }
 0x412   :  { %v5249_v50 = vpop.f32.mrf.mxu1 }
 0x418   :  { %v5143_v19 = vpop.f32.mrf.mxu0 }
 0x419   :  { %v5144_v32 = vadd.f32 %v5143_v19, %v4976_v51 }
 0x41a   :  { %v5145_v29 = vpop.f32.mrf.mxu0 }
 0x41b   :  { %v5248_v60 = vadd.f32 %v5247_v52, %v5144_v32  ;;  %v5146_v6 = vadd.f32 %v5145_v29, %v4978_v58  ;;  %v23924_v32 = vld [vmem:[#allocation20_spill] sm:$0xff] }
 0x41c   :  { %v5275_v59 = vmul.f32 %v16771_v12, %v23924_v32  ;;  %v23938_v12 = vld [vmem:[#allocation56_spill] sm:$0xff]  ;;  %v23942_v32 = vld [vmem:[#allocation71_spill] sm:$0xff] }
 0x41d   :  { %v5254_v39 = vadd.f32 %v5248_v60, %v23923_v37  ;;  %v5250_v8 = vadd.f32 %v5249_v50, %v5146_v6  ;;  %v23927_v60 = vld [vmem:[#allocation18_spill] sm:$0xff]  ;;  %v23929_v50 = vld [vmem:[#allocation23_spill] sm:$0xff]  ;;  %v23932_v37 = vld [vmem:[#allocation32_spill] sm:$0xff] }
 0x41f   :  { %v16408_v10 = vmul.f32 -1.442695, %v5254_v39  ;;  %v5255_v31 = vadd.f32 %v5250_v8, %v1682_v49  ;;  %v23931_v49 = vld [vmem:[#allocation27_spill] sm:$0xff]  ;;  %v23933_v39 = vld [vmem:[#allocation36_spill] sm:$0xff] }
 0x420   :  { %v23934_v8 = vld [vmem:[#allocation39_spill] sm:$0xff] }
 0x421   :  { %16772 = vpow2.f32 %v16408_v10  ;;  %v23935_v10 = vld [vmem:[#allocation42_spill] sm:$0xff] }
 0x422   :  { %16774 = vtanh.f32 %v5255_v31  ;;  %v23936_v31 = vld [vmem:[#allocation47_spill] sm:$0xff] }
 0x42e   :  { %v16773_v41 = vpop.eup %16772 }
 0x42f   :  { %v16775_v22 = vpop.eup %16774  ;;  %v5267_v44 = vadd.f32 1.0, %v16773_v41  ;;  %v23939_v41 = vld [vmem:[#allocation58_spill] sm:$0xff] }
 0x430   :  { %v5276_v51 = vmul.f32 %v16775_v22, %v16769_v63  ;;  %v23937_v63 = vld [vmem:[#allocation52_spill] sm:$0xff] }
 0x431   :  { %16776 = vrcp.f32 %v5267_v44  ;;  %v23940_v22 = vld [vmem:[#allocation64_spill] sm:$0xff]  ;;  %v23941_v44 = vld [vmem:[#allocation69_spill] sm:$0xff] }
 0x432   :  { %v19432_v21 = vadd.f32 %v5276_v51, %v5275_v59  ;;  %v23943_v59 = vld [vmem:[#allocation72_spill] sm:$0xff] }
 0x433   :  { %v23944_v51 = vld [vmem:[#allocation76_spill] sm:$0xff] }
 0x434   :  { %23925 = vst [vmem:[#allocation25_spill] sm:$0xff] %v19432_v21  ;;  %16778 = vtanh.f32 %v19432_v21  ;;  %v24035_v21 = vld [vmem:[#allocation325_spill] sm:$0xff] }
 0x43e   :  { %v16777_v6 = vpop.eup %16776 }
 0x441   :  { %v16779_v52 = vpop.eup %16778 }
 0x442   :  { %v5279_v19 = vmul.f32 %v16779_v52, %v16777_v6  ;;  %v23945_v6 = vld [vmem:[#allocation84_spill] sm:$0xff] }
 0x443   :  { %v23946_v52 = vld [vmem:[#allocation88_spill] sm:$0xff] }
 0x444   :  { %v19435_v47 = vand.u32 4294901760, %v5279_v19 }
 0x446   :  { %5618 = vmatmul.mubr.f32.vlgmr.msra.gmra.mxu1 %v19435_v47  ;;  %v19439_v2 = vsub.f32 %v5279_v19, %v19435_v47  ;;  %v23947_v19 = vld [vmem:[#allocation89_spill] sm:$0xff] }
 0x447   :  { %5764 = vmatpush1.msra.mxu1 %v23589_v5  ;;  %5857 = vmatprep.mubr.f32.mxu1 %v23179_v16 }
 0x448   :  { %5766 = vmatprep.subr.mxu1 %v23591_v35  ;;  %v19445_v23 = vand.u32 4294901760, %v19439_v2 }
 0x449   :  { %5768 = vmatpush1.msra.mxu1 %v23594_v56 }
 0x44a   :  { %5770 = vmatprep.subr.mxu1 %v23597_v42  ;;  %v5384_v58 = vsub.f32 %v19439_v2, %v19445_v23 }
 0x44b   :  { %5772 = vmatpush1.msra.mxu1 %v23600_v40 }
 0x44c   :  { %5774 = vmatprep.subr.mxu1 %v23602_v26  ;;  %v19453_v29 = vand.u32 4294901760, %v5384_v58  ;;  %v23948_v58 = vld [vmem:[#allocation95_spill] sm:$0xff] }
 0x44d   :  { %5776 = vmatpush1.msra.mxu1 %v23605_v4 }
 0x44e   :  { %5778 = vmatprep.subr.mxu1 %v23607_v15  ;;  %5386 = vmatmul.mubr.f32.vlgmr.msra.gmra.mxu0 %v19453_v29 }
 0x44f   :  { %5629 = vmatpush1.msra.mxu0 %v23926_v20  ;;  %5780 = vmatpush1.msra.mxu1 %v23610_v55  ;;  %v24033_v20 = vld [vmem:[#allocation324_spill] sm:$0xff] }
 0x450   :  { %5632 = vmatprep.subr.mxu0 %v23927_v60  ;;  %5782 = vmatprep.subr.mxu1 %v23612_v57  ;;  %v24031_v60 = vld [vmem:[#allocation322_spill] sm:$0xff] }
 0x451   :  { %5635 = vmatpush1.msra.mxu0 %v23928_v27  ;;  %5784 = vmatpush1.msra.mxu1 %v23615_v36  ;;  %v24029_v27 = vld [vmem:[#allocation320_spill] sm:$0xff] }
 0x452   :  { %5638 = vmatprep.subr.mxu0 %v23929_v50  ;;  %5786 = vmatprep.subr.mxu1 %v23617_v45  ;;  %v24027_v50 = vld [vmem:[#allocation318_spill] sm:$0xff] }
 0x453   :  { %5641 = vmatpush1.msra.mxu0 %v23930_v34  ;;  %5788 = vmatpush1.msra.mxu1 %v23620_v53  ;;  %v24025_v34 = vld [vmem:[#allocation316_spill] sm:$0xff] }
 0x454   :  { %5644 = vmatprep.subr.mxu0 %v23931_v49  ;;  %5790 = vmatprep.subr.mxu1 %v23622_v14  ;;  %v24023_v49 = vld [vmem:[#allocation314_spill] sm:$0xff] }
 0x455   :  { %5647 = vmatpush1.msra.mxu0 %v23932_v37  ;;  %5792 = vmatpush1.msra.mxu1 %v23624_v24  ;;  %v24021_v37 = vld [vmem:[#allocation311_spill] sm:$0xff] }
 0x456   :  { %5650 = vmatprep.subr.mxu0 %v23933_v39  ;;  %5794 = vmatprep.subr.mxu1 %v23626_v7  ;;  %v24019_v39 = vld [vmem:[#allocation306_spill] sm:$0xff] }
 0x457   :  { %5653 = vmatpush1.msra.mxu0 %v23934_v8  ;;  %5796 = vmatpush1.msra.mxu1 %v23629_v33  ;;  %v24017_v8 = vld [vmem:[#allocation303_spill] sm:$0xff] }
 0x458   :  { %5656 = vmatprep.subr.mxu0 %v23935_v10  ;;  %5798 = vmatprep.subr.mxu1 %v23631_v11  ;;  %v24015_v10 = vld [vmem:[#allocation299_spill] sm:$0xff] }
 0x459   :  { %5659 = vmatpush1.msra.mxu0 %v23936_v31  ;;  %5800 = vmatpush1.msra.mxu1 %v23634_v61  ;;  %v24013_v31 = vld [vmem:[#allocation284_spill] sm:$0xff] }
 0x45a   :  { %5662 = vmatprep.subr.mxu0 %v23937_v63  ;;  %5802 = vmatprep.subr.mxu1 %v23636_v54  ;;  %v24011_v63 = vld [vmem:[#allocation269_spill] sm:$0xff] }
 0x45b   :  { %5665 = vmatpush1.msra.mxu0 %v23938_v12  ;;  %5804 = vmatpush1.msra.mxu1 %v23638_v18  ;;  %v23992_v12 = vld [vmem:[#allocation233_spill] sm:$0xff] }
 0x45c   :  { %5668 = vmatprep.subr.mxu0 %v23939_v41  ;;  %5806 = vmatprep.subr.mxu1 %v23895_v13  ;;  %v23990_v41 = vld [vmem:[#allocation223_spill] sm:$0xff] }
 0x45d   :  { %5671 = vmatpush1.msra.mxu0 %v23940_v22  ;;  %5808 = vmatpush1.msra.mxu1 %v23897_v43  ;;  %v23989_v22 = vld [vmem:[#allocation126_spill] sm:$0xff] }
 0x45e   :  { %5674 = vmatprep.subr.mxu0 %v23941_v44  ;;  %5810 = vmatprep.subr.mxu1 %v23899_v25  ;;  %v23987_v44 = vld [vmem:[#allocation122_spill] sm:$0xff] }
 0x45f   :  { %5677 = vmatpush1.msra.mxu0 %v23942_v32  ;;  %5812 = vmatpush1.msra.mxu1 %v23900_v3  ;;  %v23985_v32 = vld [vmem:[#allocation117_spill] sm:$0xff] }
 0x460   :  { %5680 = vmatprep.subr.mxu0 %v23943_v59  ;;  %5814 = vmatprep.subr.mxu1 %v23901_v28  ;;  %v23949_v59 = vld [vmem:[#allocation100_spill] sm:$0xff] }
 0x461   :  { %5683 = vmatpush1.msra.mxu0 %v23944_v51  ;;  %5816 = vmatpush1.msra.mxu1 %v23902_v48  ;;  %v23955_v51 = vld [vmem:[#allocation123_spill] sm:$0xff] }
 0x462   :  { %5686 = vmatprep.subr.mxu0 %v23945_v6  ;;  %5818 = vmatprep.subr.mxu1 %v23903_v1  ;;  %v23950_v6 = vld [vmem:[#allocation105_spill] sm:$0xff] }
 0x463   :  { %5689 = vmatpush1.msra.mxu0 %v23946_v52  ;;  %5820 = vmatpush1.msra.mxu1 %v23904_v62  ;;  %v23951_v52 = vld [vmem:[#allocation107_spill] sm:$0xff] }
 0x464   :  { %5692 = vmatprep.subr.mxu0 %v23947_v19  ;;  %5822 = vmatprep.subr.mxu1 %v23905_v9  ;;  %v23952_v19 = vld [vmem:[#allocation112_spill] sm:$0xff] }
 0x465   :  { %5695 = vmatpush1.msra.mxu0 %v23948_v58  ;;  %5824 = vmatpush1.msra.mxu1 %v23906_v0  ;;  %v23953_v58 = vld [vmem:[#allocation118_spill] sm:$0xff] }
 0x466   :  { %5698 = vmatprep.subr.mxu0 %v23949_v59  ;;  %5861 = vmatmul.mubr.f32.vlgmr.msra.gmra.mxu1 %v19445_v23  ;;  %v23954_v59 = vld [vmem:[#allocation121_spill] sm:$0xff] }
 0x467   :  { %6036 = vmatprep.subr.mxu1 %v23697_v46  ;;  %5701 = vmatpush1.msra.mxu0 %v23950_v6  ;;  %v23956_v6 = vld [vmem:[#allocation124_spill] sm:$0xff] }
 0x468   :  { %6038 = vmatpush1.msra.mxu1 %v23589_v5  ;;  %5704 = vmatprep.subr.mxu0 %v23951_v52  ;;  %v23962_v52 = vld [vmem:[#allocation34_spill] sm:$0xff] }
 0x469   :  { %6040 = vmatprep.subr.mxu1 %v23591_v35  ;;  %5707 = vmatpush1.msra.mxu0 %v23952_v19  ;;  %v23957_v19 = vld [vmem:[#allocation11_spill] sm:$0xff] }
 0x46a   :  { %6042 = vmatpush1.msra.mxu1 %v23594_v56  ;;  %5710 = vmatprep.subr.mxu0 %v23953_v58  ;;  %v23958_v58 = vld [vmem:[#allocation22_spill] sm:$0xff] }
 0x46b   :  { %6044 = vmatprep.subr.mxu1 %v23597_v42  ;;  %5713 = vmatpush1.msra.mxu0 %v23954_v59  ;;  %v23959_v59 = vld [vmem:[#allocation24_spill] sm:$0xff] }
 0x46c   :  { %6046 = vmatpush1.msra.mxu1 %v23600_v40  ;;  %5716 = vmatprep.subr.mxu0 %v23955_v51  ;;  %v23960_v51 = vld [vmem:[#allocation28_spill] sm:$0xff] }
 0x46d   :  { %6048 = vmatprep.subr.mxu1 %v23602_v26  ;;  %5719 = vmatpush1.msra.mxu0 %v23956_v6  ;;  %v23961_v6 = vld [vmem:[#allocation30_spill] sm:$0xff] }
 0x46e   :  { %5752 = vmatprep.mubr.f32.mxu0 %v23179_v16  ;;  %6050 = vmatpush1.msra.mxu1 %v23605_v4 }
 0x46f   :  { %5755 = vmatmul.mubr.f32.vlgmr.msra.gmra.mxu0 %v19439_v2  ;;  %5870 = vmatprep.subr.mxu0 %v23957_v19  ;;  %v23963_v19 = vld [vmem:[#allocation35_spill] sm:$0xff] }
 0x470   :  { %6052 = vmatprep.subr.mxu1 %v23607_v15  ;;  %5874 = vmatpush1.msra.mxu0 %v23958_v58  ;;  %v23964_v58 = vld [vmem:[#allocation41_spill] sm:$0xff] }
 0x471   :  { %6054 = vmatpush1.msra.mxu1 %v23610_v55  ;;  %5878 = vmatprep.subr.mxu0 %v23959_v59  ;;  %v23965_v59 = vld [vmem:[#allocation46_spill] sm:$0xff] }
 0x472   :  { %6056 = vmatprep.subr.mxu1 %v23612_v57  ;;  %5882 = vmatpush1.msra.mxu0 %v23960_v51  ;;  %v23966_v51 = vld [vmem:[#allocation50_spill] sm:$0xff] }
 0x473   :  { %6058 = vmatpush1.msra.mxu1 %v23615_v36  ;;  %5886 = vmatprep.subr.mxu0 %v23961_v6  ;;  %v23967_v6 = vld [vmem:[#allocation51_spill] sm:$0xff] }
 0x474   :  { %6060 = vmatprep.subr.mxu1 %v23617_v45  ;;  %5890 = vmatpush1.msra.mxu0 %v23962_v52  ;;  %v23968_v52 = vld [vmem:[#allocation57_spill] sm:$0xff] }
 0x475   :  { %6062 = vmatpush1.msra.mxu1 %v23620_v53  ;;  %5894 = vmatprep.subr.mxu0 %v23963_v19  ;;  %v23969_v19 = vld [vmem:[#allocation63_spill] sm:$0xff] }
 0x476   :  { %6064 = vmatprep.subr.mxu1 %v23622_v14  ;;  %5898 = vmatpush1.msra.mxu0 %v23964_v58  ;;  %v23970_v58 = vld [vmem:[#allocation65_spill] sm:$0xff] }
 0x477   :  { %6066 = vmatpush1.msra.mxu1 %v23624_v24  ;;  %5902 = vmatprep.subr.mxu0 %v23965_v59  ;;  %v23971_v59 = vld [vmem:[#allocation68_spill] sm:$0xff] }
 0x478   :  { %6068 = vmatprep.subr.mxu1 %v23626_v7  ;;  %5906 = vmatpush1.msra.mxu0 %v23966_v51  ;;  %v23972_v51 = vld [vmem:[#allocation74_spill] sm:$0xff] }
 0x479   :  { %6070 = vmatpush1.msra.mxu1 %v23629_v33  ;;  %5910 = vmatprep.subr.mxu0 %v23967_v6  ;;  %v23973_v6 = vld [vmem:[#allocation80_spill] sm:$0xff] }
 0x47a   :  { %6072 = vmatprep.subr.mxu1 %v23631_v11  ;;  %5914 = vmatpush1.msra.mxu0 %v23968_v52  ;;  %v23974_v52 = vld [vmem:[#allocation81_spill] sm:$0xff] }
 0x47b   :  { %6074 = vmatpush1.msra.mxu1 %v23634_v61  ;;  %5918 = vmatprep.subr.mxu0 %v23969_v19  ;;  %v23975_v19 = vld [vmem:[#allocation82_spill] sm:$0xff] }
 0x47c   :  { %6076 = vmatprep.subr.mxu1 %v23636_v54  ;;  %5922 = vmatpush1.msra.mxu0 %v23970_v58  ;;  %v23976_v58 = vld [vmem:[#allocation87_spill] sm:$0xff] }
 0x47d   :  { %6078 = vmatpush1.msra.mxu1 %v23638_v18  ;;  %5926 = vmatprep.subr.mxu0 %v23971_v59  ;;  %v23977_v59 = vld [vmem:[#allocation94_spill] sm:$0xff] }
 0x47e   :  { %6080 = vmatprep.subr.mxu1 %v23895_v13  ;;  %5930 = vmatpush1.msra.mxu0 %v23972_v51  ;;  %v23978_v51 = vld [vmem:[#allocation97_spill] sm:$0xff]  ;;  %v24054_v13 = vld [vmem:[#allocation183_spill] sm:$0xff] }
 0x47f   :  { %6082 = vmatpush1.msra.mxu1 %v23897_v43  ;;  %5934 = vmatprep.subr.mxu0 %v23973_v6  ;;  %v23979_v6 = vld [vmem:[#allocation98_spill] sm:$0xff]  ;;  %v24053_v43 = vld [vmem:[#allocation179_spill] sm:$0xff] }
 0x480   :  { %6084 = vmatprep.subr.mxu1 %v23899_v25  ;;  %5938 = vmatpush1.msra.mxu0 %v23974_v52  ;;  %v23980_v52 = vld [vmem:[#allocation106_spill] sm:$0xff] }
 0x481   :  { %6086 = vmatpush1.msra.mxu1 %v23900_v3  ;;  %5942 = vmatprep.subr.mxu0 %v23975_v19  ;;  %v23983_v19 = vld [vmem:[#allocation114_spill] sm:$0xff] }
 0x482   :  { %6088 = vmatprep.subr.mxu1 %v23901_v28  ;;  %5946 = vmatpush1.msra.mxu0 %v23976_v58  ;;  %v23981_v58 = vld [vmem:[#allocation111_spill] sm:$0xff]  ;;  %v24050_v28 = vld [vmem:[#allocation169_spill] sm:$0xff]  ;;  %v24051_v3 = vld [vmem:[#allocation170_spill] sm:$0xff] }
 0x483   :  { %6090 = vmatpush1.msra.mxu1 %v23902_v48  ;;  %5950 = vmatprep.subr.mxu0 %v23977_v59  ;;  %v23982_v59 = vld [vmem:[#allocation192_spill] sm:$0xff]  ;;  %v24049_v48 = vld [vmem:[#allocation298_spill] sm:$0xff] }
 0x484   :  { %6092 = vmatprep.subr.mxu1 %v23903_v1  ;;  %5954 = vmatpush1.msra.mxu0 %v23978_v51  ;;  %v23984_v51 = vld [vmem:[#allocation196_spill] sm:$0xff]  ;;  %v24048_v1 = vld [vmem:[#allocation295_spill] sm:$0xff]  ;;  %v24052_v25 = vld [vmem:[#allocation174_spill] sm:$0xff] }
 0x485   :  { %6094 = vmatpush1.msra.mxu1 %v23904_v62  ;;  %5958 = vmatprep.subr.mxu0 %v23979_v6  ;;  %v23986_v6 = vld [vmem:[#allocation203_spill] sm:$0xff]  ;;  %v24041_v62 = vld [vmem:[#allocation328_spill] sm:$0xff] }
 0x486   :  { %6096 = vmatprep.subr.mxu1 %v23905_v9  ;;  %5962 = vmatpush1.msra.mxu0 %v23980_v52  ;;  %v23988_v52 = vld [vmem:[#allocation214_spill] sm:$0xff]  ;;  %v24039_v9 = vld [vmem:[#allocation327_spill] sm:$0xff] }
 0x487   :  { %6098 = vmatpush1.msra.mxu1 %v23906_v0  ;;  %6131 = vmatprep.mubr.f32.mxu1 %v23179_v16  ;;  %v24037_v0 = vld [vmem:[#allocation326_spill] sm:$0xff] }
 0x488   :  { %5966 = vmatprep.subr.mxu0 %v23981_v58  ;;  %6133 = vmatmul.mubr.f32.vlgmr.msra.gmra.mxu1 %v19435_v47  ;;  %v23991_v58 = vld [vmem:[#allocation127_spill] sm:$0xff] }
 0x489   :  { %6252 = vmatprep.subr.mxu1 %v23982_v59  ;;  %5970 = vmatpush1.msra.mxu0 %v23983_v19  ;;  %v23993_v59 = vld [vmem:[#allocation129_spill] sm:$0xff] }
 0x48a   :  { %6258 = vmatpush1.msra.mxu1 %v23984_v51  ;;  %5974 = vmatprep.subr.mxu0 %v23985_v32  ;;  %v23994_v19 = vld [vmem:[#allocation237_spill] sm:$0xff]  ;;  %v23995_v51 = vld [vmem:[#allocation131_spill] sm:$0xff] }
 0x48b   :  { %6264 = vmatprep.subr.mxu1 %v23986_v6  ;;  %5978 = vmatpush1.msra.mxu0 %v23987_v44  ;;  %v23996_v6 = vld [vmem:[#allocation241_spill] sm:$0xff]  ;;  %v24007_v44 = vld [vmem:[#allocation263_spill] sm:$0xff] }
 0x48c   :  { %6270 = vmatpush1.msra.mxu1 %v23988_v52  ;;  %5982 = vmatprep.subr.mxu0 %v23989_v22  ;;  %v23997_v22 = vld [vmem:[#allocation245_spill] sm:$0xff]  ;;  %v24005_v52 = vld [vmem:[#allocation258_spill] sm:$0xff]  ;;  %v24009_v32 = vld [vmem:[#allocation267_spill] sm:$0xff] }
 0x48d   :  { %6276 = vmatprep.subr.mxu1 %v23990_v41  ;;  %5986 = vmatpush1.msra.mxu0 %v23991_v58  ;;  %v23998_v58 = vld [vmem:[#allocation249_spill] sm:$0xff]  ;;  %v24004_v41 = vld [vmem:[#allocation180_spill] sm:$0xff] }
 0x48e   :  { %6282 = vmatpush1.msra.mxu1 %v23992_v12  ;;  %5990 = vmatprep.subr.mxu0 %v23993_v59  ;;  %v23999_v59 = vld [vmem:[#allocation252_spill] sm:$0xff] }
 0x48f   :  { %6288 = vmatprep.subr.mxu1 %v23994_v19  ;;  %5994 = vmatpush1.msra.mxu0 %v23995_v51  ;;  %v24000_v19 = vld [vmem:[#allocation172_spill] sm:$0xff]  ;;  %v24001_v51 = vld [vmem:[#allocation253_spill] sm:$0xff] }
 0x490   :  { %6027 = vmatprep.mubr.f32.mxu0 %v23179_v16  ;;  %6294 = vmatpush1.msra.mxu1 %v23996_v6  ;;  %v24002_v12 = vld [vmem:[#allocation176_spill] sm:$0xff]  ;;  %v24003_v6 = vld [vmem:[#allocation254_spill] sm:$0xff] }
 0x491   :  { %6029 = vmatmul.mubr.f32.vlgmr.msra.gmra.mxu0 %v19435_v47  ;;  %6140 = vmatprep.subr.mxu0 %v23745_v17 }
 0x492   :  { %6300 = vmatprep.subr.mxu1 %v23997_v22  ;;  %6142 = vmatpush1.msra.mxu0 %v23747_v38  ;;  %v24006_v22 = vld [vmem:[#allocation184_spill] sm:$0xff] }
 0x493   :  { %6306 = vmatpush1.msra.mxu1 %v23998_v58  ;;  %6144 = vmatprep.subr.mxu0 %v23749_v30  ;;  %v24008_v58 = vld [vmem:[#allocation188_spill] sm:$0xff] }
 0x494   :  { %6312 = vmatprep.subr.mxu1 %v23999_v59  ;;  %6146 = vmatpush1.msra.mxu0 %v24000_v19  ;;  %v24010_v59 = vld [vmem:[#allocation191_spill] sm:$0xff] }
 0x495   :  { %6318 = vmatpush1.msra.mxu1 %v24001_v51  ;;  %6148 = vmatprep.subr.mxu0 %v24002_v12  ;;  %v24012_v51 = vld [vmem:[#allocation195_spill] sm:$0xff] }
 0x496   :  { %6324 = vmatprep.subr.mxu1 %v24003_v6  ;;  %6150 = vmatpush1.msra.mxu0 %v24004_v41  ;;  %v24014_v6 = vld [vmem:[#allocation197_spill] sm:$0xff] }
 0x497   :  { %6330 = vmatpush1.msra.mxu1 %v24005_v52  ;;  %6152 = vmatprep.subr.mxu0 %v24006_v22  ;;  %v24016_v52 = vld [vmem:[#allocation198_spill] sm:$0xff] }
 0x498   :  { %6336 = vmatprep.subr.mxu1 %v24007_v44  ;;  %6154 = vmatpush1.msra.mxu0 %v24008_v58  ;;  %v24018_v44 = vld [vmem:[#allocation202_spill] sm:$0xff] }
 0x499   :  { %6342 = vmatpush1.msra.mxu1 %v24009_v32  ;;  %6156 = vmatprep.subr.mxu0 %v24010_v59  ;;  %v24020_v32 = vld [vmem:[#allocation207_spill] sm:$0xff] }
 0x49a   :  { %6348 = vmatprep.subr.mxu1 %v24011_v63  ;;  %6158 = vmatpush1.msra.mxu0 %v24012_v51  ;;  %v24022_v63 = vld [vmem:[#allocation210_spill] sm:$0xff] }
 0x49b   :  { %6354 = vmatpush1.msra.mxu1 %v24013_v31  ;;  %6160 = vmatprep.subr.mxu0 %v24014_v6  ;;  %v24024_v31 = vld [vmem:[#allocation213_spill] sm:$0xff] }
 0x49c   :  { %6360 = vmatprep.subr.mxu1 %v24015_v10  ;;  %6162 = vmatpush1.msra.mxu0 %v24016_v52  ;;  %v24026_v10 = vld [vmem:[#allocation218_spill] sm:$0xff] }
 0x49d   :  { %6366 = vmatpush1.msra.mxu1 %v24017_v8  ;;  %6164 = vmatprep.subr.mxu0 %v24018_v44  ;;  %v24028_v8 = vld [vmem:[#allocation231_spill] sm:$0xff] }
 0x49e   :  { %6372 = vmatprep.subr.mxu1 %v24019_v39  ;;  %6166 = vmatpush1.msra.mxu0 %v24020_v32  ;;  %v24030_v39 = vld [vmem:[#allocation239_spill] sm:$0xff] }
 0x49f   :  { %6378 = vmatpush1.msra.mxu1 %v24021_v37  ;;  %6168 = vmatprep.subr.mxu0 %v24022_v63  ;;  %v24032_v37 = vld [vmem:[#allocation247_spill] sm:$0xff] }
 0x4a0   :  { %6384 = vmatprep.subr.mxu1 %v24023_v49  ;;  %6170 = vmatpush1.msra.mxu0 %v24024_v31  ;;  %v24034_v49 = vld [vmem:[#allocation251_spill] sm:$0xff] }
 0x4a1   :  { %6390 = vmatpush1.msra.mxu1 %v24025_v34  ;;  %6172 = vmatprep.subr.mxu0 %v24026_v10  ;;  %v24036_v34 = vld [vmem:[#allocation256_spill] sm:$0xff] }
 0x4a2   :  { %6396 = vmatprep.subr.mxu1 %v24027_v50  ;;  %6174 = vmatpush1.msra.mxu0 %v24028_v8  ;;  %v24038_v50 = vld [vmem:[#allocation261_spill] sm:$0xff] }
 0x4a3   :  { %6402 = vmatpush1.msra.mxu1 %v24029_v27  ;;  %6176 = vmatprep.subr.mxu0 %v24030_v39  ;;  %v24040_v27 = vld [vmem:[#allocation266_spill] sm:$0xff] }
 0x4a4   :  { %6408 = vmatprep.subr.mxu1 %v24031_v60  ;;  %6178 = vmatpush1.msra.mxu0 %v24032_v37  ;;  %v24042_v60 = vld [vmem:[#allocation268_spill] sm:$0xff] }
 0x4a5   :  { %6414 = vmatpush1.msra.mxu1 %v24033_v20  ;;  %6180 = vmatprep.subr.mxu0 %v24034_v49  ;;  %v24047_v20 = vld [vmem:[#allocation287_spill] sm:$0xff] }
 0x4a6   :  { %6420 = vmatprep.subr.mxu1 %v24035_v21  ;;  %6182 = vmatpush1.msra.mxu0 %v24036_v34  ;;  %v24043_v21 = vld [vmem:[#allocation271_spill] sm:$0xff] }
 0x4a7   :  { %6426 = vmatpush1.msra.mxu1 %v24037_v0  ;;  %6184 = vmatprep.subr.mxu0 %v24038_v50  ;;  %v24044_v0 = vld [vmem:[#allocation276_spill] sm:$0xff] }
 0x4a8   :  { %6432 = vmatprep.subr.mxu1 %v24039_v9  ;;  %6186 = vmatpush1.msra.mxu0 %v24040_v27  ;;  %v24045_v9 = vld [vmem:[#allocation280_spill] sm:$0xff] }
 0x4a9   :  { %6438 = vmatpush1.msra.mxu1 %v24041_v62  ;;  %6471 = vmatprep.mubr.f32.mxu1 %v23179_v16  ;;  %v24046_v62 = vld [vmem:[#allocation282_spill] sm:$0xff] }
 0x4aa   :  { %6188 = vmatprep.subr.mxu0 %v24042_v60  ;;  %6473 = vmatmul.mubr.f32.vlgmr.msra.gmra.mxu1 %v19435_v47 }
 0x4ab   :  { %6617 = vmatprep.subr.mxu1 %v23745_v17  ;;  %6190 = vmatpush1.msra.mxu0 %v24043_v21 }
 0x4ac   :  { %6619 = vmatpush1.msra.mxu1 %v23747_v38  ;;  %6192 = vmatprep.subr.mxu0 %v24044_v0 }
 0x4ad   :  { %6621 = vmatprep.subr.mxu1 %v23749_v30  ;;  %6194 = vmatpush1.msra.mxu0 %v24045_v9 }
 0x4ae   :  { %6623 = vmatpush1.msra.mxu1 %v24000_v19  ;;  %6196 = vmatprep.subr.mxu0 %v24046_v62 }
 0x4af   :  { %6625 = vmatprep.subr.mxu1 %v24002_v12  ;;  %6198 = vmatpush1.msra.mxu0 %v24047_v20 }
 0x4b0   :  { %6627 = vmatpush1.msra.mxu1 %v24004_v41  ;;  %6200 = vmatprep.subr.mxu0 %v24048_v1 }
 0x4b1   :  { %6629 = vmatprep.subr.mxu1 %v24006_v22  ;;  %6202 = vmatpush1.msra.mxu0 %v24049_v48 }
 0x4b2   :  { %6235 = vmatprep.mubr.f32.mxu0 %v23179_v16  ;;  %6631 = vmatpush1.msra.mxu1 %v24008_v58 }
 0x4b3   :  { %6241 = vmatmul.mubr.f32.vlgmr.msra.gmra.mxu0 %v19453_v29  ;;  %6481 = vmatprep.subr.mxu0 %v24050_v28  ;;  %v24055_v29 = vld [vmem:[#allocation187_spill] sm:$0xff]  ;;  %v24056_v28 = vld [vmem:[#allocation194_spill] sm:$0xff] }
 0x4b4   :  { %6633 = vmatprep.subr.mxu1 %v24010_v59  ;;  %6484 = vmatpush1.msra.mxu0 %v24051_v3  ;;  %v24057_v3 = vld [vmem:[#allocation201_spill] sm:$0xff] }
 0x4b5   :  { %6635 = vmatpush1.msra.mxu1 %v24012_v51  ;;  %6487 = vmatprep.subr.mxu0 %v24052_v25  ;;  %v24058_v25 = vld [vmem:[#allocation206_spill] sm:$0xff] }
 0x4b6   :  { %6637 = vmatprep.subr.mxu1 %v24014_v6  ;;  %6490 = vmatpush1.msra.mxu0 %v24053_v43  ;;  %v24059_v43 = vld [vmem:[#allocation209_spill] sm:$0xff] }
 0x4b7   :  { %6639 = vmatpush1.msra.mxu1 %v24016_v52  ;;  %6493 = vmatprep.subr.mxu0 %v24054_v13  ;;  %v24060_v13 = vld [vmem:[#allocation211_spill] sm:$0xff] }
 0x4b8   :  { %6641 = vmatprep.subr.mxu1 %v24018_v44  ;;  %6496 = vmatpush1.msra.mxu0 %v24055_v29  ;;  %v24061_v29 = vld [vmem:[#allocation212_spill] sm:$0xff] }
 0x4b9   :  { %6643 = vmatpush1.msra.mxu1 %v24020_v32  ;;  %6499 = vmatprep.subr.mxu0 %v24056_v28  ;;  %v24062_v28 = vld [vmem:[#allocation217_spill] sm:$0xff] }
 0x4ba   :  { %6645 = vmatprep.subr.mxu1 %v24022_v63  ;;  %6502 = vmatpush1.msra.mxu0 %v24057_v3  ;;  %v24063_v3 = vld [vmem:[#allocation222_spill] sm:$0xff] }
 0x4bb   :  { %6647 = vmatpush1.msra.mxu1 %v24024_v31  ;;  %6505 = vmatprep.subr.mxu0 %v24058_v25  ;;  %v24064_v25 = vld [vmem:[#allocation225_spill] sm:$0xff] }
 0x4bc   :  { %6649 = vmatprep.subr.mxu1 %v24026_v10  ;;  %6508 = vmatpush1.msra.mxu0 %v24059_v43  ;;  %v24065_v43 = vld [vmem:[#allocation228_spill] sm:$0xff] }
 0x4bd   :  { %6651 = vmatpush1.msra.mxu1 %v24028_v8  ;;  %6511 = vmatprep.subr.mxu0 %v24060_v13  ;;  %v24066_v13 = vld [vmem:[#allocation232_spill] sm:$0xff] }
 0x4be   :  { %6653 = vmatprep.subr.mxu1 %v24030_v39  ;;  %6514 = vmatpush1.msra.mxu0 %v24061_v29  ;;  %v24067_v29 = vld [vmem:[#allocation243_spill] sm:$0xff] }
 0x4bf   :  { %6655 = vmatpush1.msra.mxu1 %v24032_v37  ;;  %6517 = vmatprep.subr.mxu0 %v24062_v28  ;;  %v24068_v28 = vld [vmem:[#allocation250_spill] sm:$0xff] }
 0x4c0   :  { %6657 = vmatprep.subr.mxu1 %v24034_v49  ;;  %6520 = vmatpush1.msra.mxu0 %v24063_v3  ;;  %v24069_v3 = vld [vmem:[#allocation259_spill] sm:$0xff] }
 0x4c1   :  { %6659 = vmatpush1.msra.mxu1 %v24036_v34  ;;  %6523 = vmatprep.subr.mxu0 %v24064_v25  ;;  %v24070_v25 = vld [vmem:[#allocation265_spill] sm:$0xff] }
 0x4c2   :  { %6661 = vmatprep.subr.mxu1 %v24038_v50  ;;  %6526 = vmatpush1.msra.mxu0 %v24065_v43  ;;  %v24071_v43 = vld [vmem:[#allocation270_spill] sm:$0xff] }
 0x4c3   :  { %6663 = vmatpush1.msra.mxu1 %v24040_v27  ;;  %6529 = vmatprep.subr.mxu0 %v24066_v13  ;;  %v24072_v13 = vld [vmem:[#allocation274_spill] sm:$0xff] }
 0x4c4   :  { %6665 = vmatprep.subr.mxu1 %v24042_v60  ;;  %6532 = vmatpush1.msra.mxu0 %v24067_v29  ;;  %v24073_v29 = vld [vmem:[#allocation279_spill] sm:$0xff] }
 0x4c5   :  { %6667 = vmatpush1.msra.mxu1 %v24043_v21  ;;  %6535 = vmatprep.subr.mxu0 %v24068_v28  ;;  %v24113_v28 = vld [vmem:[#allocation40_spill] sm:$0xff] }
 0x4c6   :  { %6669 = vmatprep.subr.mxu1 %v24044_v0  ;;  %6538 = vmatpush1.msra.mxu0 %v24069_v3  ;;  %v24074_v3 = vld [vmem:[#allocation281_spill] sm:$0xff] }
 0x4c7   :  { %6671 = vmatpush1.msra.mxu1 %v24045_v9  ;;  %6541 = vmatprep.subr.mxu0 %v24070_v25  ;;  %v24075_v25 = vld [vmem:[#allocation286_spill] sm:$0xff] }
 0x4c8   :  { %6673 = vmatprep.subr.mxu1 %v24046_v62  ;;  %6544 = vmatpush1.msra.mxu0 %v24071_v43  ;;  %v24076_v43 = vld [vmem:[#allocation290_spill] sm:$0xff] }
 0x4c9   :  { %6675 = vmatpush1.msra.mxu1 %v24047_v20  ;;  %6547 = vmatprep.subr.mxu0 %v24072_v13  ;;  %v24077_v13 = vld [vmem:[#allocation294_spill] sm:$0xff] }
 0x4ca   :  { %6677 = vmatprep.subr.mxu1 %v24048_v1  ;;  %6550 = vmatpush1.msra.mxu0 %v24073_v29  ;;  %v24078_v29 = vld [vmem:[#allocation297_spill] sm:$0xff] }
 0x4cb   :  { %6679 = vmatpush1.msra.mxu1 %v24049_v48  ;;  %6712 = vmatprep.mubr.f32.mxu1 %v23179_v16 }
 0x4cc   :  { %6553 = vmatprep.subr.mxu0 %v24074_v3  ;;  %6716 = vmatmul.mubr.f32.vlgmr.msra.gmra.mxu1 %v19445_v23  ;;  %v24079_v3 = vld [vmem:[#allocation301_spill] sm:$0xff]  ;;  %v24080_v23 = vld [vmem:[#allocation308_spill] sm:$0xff] }
 0x4cd   :  { %6891 = vmatprep.subr.mxu1 %v23745_v17  ;;  %6556 = vmatpush1.msra.mxu0 %v24075_v25  ;;  %v24081_v25 = vld [vmem:[#allocation310_spill] sm:$0xff] }
 0x4ce   :  { %6893 = vmatpush1.msra.mxu1 %v23747_v38  ;;  %6559 = vmatprep.subr.mxu0 %v24076_v43  ;;  %v24111_v43 = vld [vmem:[#allocation38_spill] sm:$0xff] }
 0x4cf   :  { %6895 = vmatprep.subr.mxu1 %v23749_v30  ;;  %6562 = vmatpush1.msra.mxu0 %v24077_v13  ;;  %v24082_v13 = vld [vmem:[#allocation175_spill] sm:$0xff] }
 0x4d0   :  { %6897 = vmatpush1.msra.mxu1 %v24000_v19  ;;  %6565 = vmatprep.subr.mxu0 %v24078_v29  ;;  %v24083_v29 = vld [vmem:[#allocation177_spill] sm:$0xff] }
 0x4d1   :  { %6899 = vmatprep.subr.mxu1 %v24002_v12  ;;  %6568 = vmatpush1.msra.mxu0 %v24079_v3  ;;  %v24084_v3 = vld [vmem:[#allocation182_spill] sm:$0xff] }
 0x4d2   :  { %6901 = vmatpush1.msra.mxu1 %v24004_v41  ;;  %6571 = vmatprep.subr.mxu0 %v24080_v23  ;;  %v24085_v23 = vld [vmem:[#allocation186_spill] sm:$0xff]  ;;  %v24161_v41 = vld [vmem:[#allocation159_spill] sm:$0xff] }
 0x4d3   :  { %6903 = vmatprep.subr.mxu1 %v24006_v22  ;;  %6574 = vmatpush1.msra.mxu0 %v24081_v25  ;;  %v24086_v25 = vld [vmem:[#allocation193_spill] sm:$0xff] }
 0x4d4   :  { %6607 = vmatprep.mubr.f32.mxu0 %v23179_v16  ;;  %6905 = vmatpush1.msra.mxu1 %v24008_v58 }
 0x4d5   :  { %6610 = vmatmul.mubr.f32.vlgmr.msra.gmra.mxu0 %v19439_v2  ;;  %6725 = vmatprep.subr.mxu0 %v24082_v13  ;;  %v24087_v2 = vld [vmem:[#allocation199_spill] sm:$0xff]  ;;  %v24088_v13 = vld [vmem:[#allocation208_spill] sm:$0xff] }
 0x4d6   :  { %6907 = vmatprep.subr.mxu1 %v24010_v59  ;;  %6729 = vmatpush1.msra.mxu0 %v24083_v29  ;;  %v24089_v29 = vld [vmem:[#allocation215_spill] sm:$0xff] }
 0x4d7   :  { %6909 = vmatpush1.msra.mxu1 %v24012_v51  ;;  %6733 = vmatprep.subr.mxu0 %v24084_v3  ;;  %v24090_v3 = vld [vmem:[#allocation219_spill] sm:$0xff] }
 0x4d8   :  { %6911 = vmatprep.subr.mxu1 %v24014_v6  ;;  %6737 = vmatpush1.msra.mxu0 %v24085_v23  ;;  %v24091_v23 = vld [vmem:[#allocation224_spill] sm:$0xff] }
 0x4d9   :  { %6913 = vmatpush1.msra.mxu1 %v24016_v52  ;;  %6741 = vmatprep.subr.mxu0 %v24086_v25  ;;  %v24092_v25 = vld [vmem:[#allocation226_spill] sm:$0xff] }
 0x4da   :  { %6915 = vmatprep.subr.mxu1 %v24018_v44  ;;  %6745 = vmatpush1.msra.mxu0 %v24087_v2  ;;  %v24093_v2 = vld [vmem:[#allocation227_spill] sm:$0xff]  ;;  %v24160_v44 = vld [vmem:[#allocation158_spill] sm:$0xff] }
 0x4db   :  { %6917 = vmatpush1.msra.mxu1 %v24020_v32  ;;  %6749 = vmatprep.subr.mxu0 %v24088_v13  ;;  %v24094_v13 = vld [vmem:[#allocation229_spill] sm:$0xff] }
 0x4dc   :  { %6919 = vmatprep.subr.mxu1 %v24022_v63  ;;  %6753 = vmatpush1.msra.mxu0 %v24089_v29  ;;  %v24095_v29 = vld [vmem:[#allocation235_spill] sm:$0xff] }
 0x4dd   :  { %6921 = vmatpush1.msra.mxu1 %v24024_v31  ;;  %6757 = vmatprep.subr.mxu0 %v24090_v3  ;;  %v24096_v3 = vld [vmem:[#allocation238_spill] sm:$0xff]  ;;  %v24159_v31 = vld [vmem:[#allocation143_spill] sm:$0xff] }
 0x4de   :  { %6923 = vmatprep.subr.mxu1 %v24026_v10  ;;  %6761 = vmatpush1.msra.mxu0 %v24091_v23  ;;  %v24097_v23 = vld [vmem:[#allocation240_spill] sm:$0xff] }
 0x4df   :  { %6925 = vmatpush1.msra.mxu1 %v24028_v8  ;;  %6765 = vmatprep.subr.mxu0 %v24092_v25  ;;  %v24098_v25 = vld [vmem:[#allocation242_spill] sm:$0xff] }
 0x4e0   :  { %6927 = vmatprep.subr.mxu1 %v24030_v39  ;;  %6769 = vmatpush1.msra.mxu0 %v24093_v2  ;;  %v24099_v2 = vld [vmem:[#allocation255_spill] sm:$0xff] }
 0x4e1   :  { %6929 = vmatpush1.msra.mxu1 %v24032_v37  ;;  %6773 = vmatprep.subr.mxu0 %v24094_v13  ;;  %v24100_v13 = vld [vmem:[#allocation264_spill] sm:$0xff] }
 0x4e2   :  { %6931 = vmatprep.subr.mxu1 %v24034_v49  ;;  %6777 = vmatpush1.msra.mxu0 %v24095_v29  ;;  %v24101_v29 = vld [vmem:[#allocation273_spill] sm:$0xff] }
 0x4e3   :  { %6933 = vmatpush1.msra.mxu1 %v24036_v34  ;;  %6781 = vmatprep.subr.mxu0 %v24096_v3  ;;  %v24102_v3 = vld [vmem:[#allocation278_spill] sm:$0xff] }
 0x4e4   :  { %6935 = vmatprep.subr.mxu1 %v24038_v50  ;;  %6785 = vmatpush1.msra.mxu0 %v24097_v23  ;;  %v24103_v23 = vld [vmem:[#allocation285_spill] sm:$0xff] }
 0x4e5   :  { %6937 = vmatpush1.msra.mxu1 %v24040_v27  ;;  %6789 = vmatprep.subr.mxu0 %v24098_v25  ;;  %v24104_v25 = vld [vmem:[#allocation289_spill] sm:$0xff] }
 0x4e6   :  { %6939 = vmatprep.subr.mxu1 %v24042_v60  ;;  %6793 = vmatpush1.msra.mxu0 %v24099_v2  ;;  %v24105_v2 = vld [vmem:[#allocation293_spill] sm:$0xff]  ;;  %v24158_v60 = vld [vmem:[#allocation142_spill] sm:$0xff] }
 0x4e7   :  { %6941 = vmatpush1.msra.mxu1 %v24043_v21  ;;  %6797 = vmatprep.subr.mxu0 %v24100_v13  ;;  %v24109_v13 = vld [vmem:[#allocation12_spill] sm:$0xff]  ;;  %v24157_v21 = vld [vmem:[#allocation19_spill] sm:$0xff] }
 0x4e8   :  { %6943 = vmatprep.subr.mxu1 %v24044_v0  ;;  %6801 = vmatpush1.msra.mxu0 %v24101_v29  ;;  %v24106_v29 = vld [vmem:[#allocation296_spill] sm:$0xff]  ;;  %v208_v27 = vadd.f32 %v24158_v60, %v24157_v21 }
 0x4e9   :  { %6945 = vmatpush1.msra.mxu1 %v24045_v9  ;;  %6805 = vmatprep.subr.mxu0 %v24102_v3  ;;  %v24107_v3 = vld [vmem:[#allocation300_spill] sm:$0xff] }
 0x4ea   :  { %6947 = vmatprep.subr.mxu1 %v24046_v62  ;;  %6809 = vmatpush1.msra.mxu0 %v24103_v23  ;;  %v24108_v23 = vld [vmem:[#allocation304_spill] sm:$0xff]  ;;  %v359_v63 = vadd.f32 %v24159_v31, %v208_v27 }
 0x4eb   :  { %6949 = vmatpush1.msra.mxu1 %v24047_v20  ;;  %6813 = vmatprep.subr.mxu0 %v24104_v25  ;;  %v24110_v25 = vld [vmem:[#allocation307_spill] sm:$0xff]  ;;  %v24164_v27 = vld [vmem:[#allocation220_spill] sm:$0xff] }
 0x4ec   :  { %6951 = vmatprep.subr.mxu1 %v24048_v1  ;;  %6817 = vmatpush1.msra.mxu0 %v24105_v2  ;;  %v24112_v2 = vld [vmem:[#allocation309_spill] sm:$0xff]  ;;  %v24118_v20 = vld [vmem:[#allocation319_spill] sm:$0xff]  ;;  %v487_v52 = vadd.f32 %v24160_v44, %v359_v63  ;;  %v24165_v44 = vld [vmem:[#allocation102_spill] sm:$0xff] }
 0x4ed   :  { %6953 = vmatpush1.msra.mxu1 %v24049_v48  ;;  %6986 = vmatprep.mubr.f32.mxu1 %v23179_v16  ;;  %v24114_v48 = vld [vmem:[#allocation312_spill] sm:$0xff]  ;;  %v24116_v1 = vld [vmem:[#allocation317_spill] sm:$0xff] }
 0x4ee   :  { %6821 = vmatprep.subr.mxu0 %v24106_v29  ;;  %6988 = vmatmul.mubr.f32.vlgmr.msra.gmra.mxu1 %v19435_v47  ;;  %v24115_v29 = vld [vmem:[#allocation45_spill] sm:$0xff]  ;;  %v621_v60 = vadd.f32 %v24161_v41, %v487_v52 }
 0x4ef   :  { %6825 = vmatpush1.msra.mxu0 %v24107_v3  ;;  %6882 = vmatprep.mubr.f32.mxu0 %v23179_v16  ;;  %v24117_v3 = vld [vmem:[#allocation49_spill] sm:$0xff] }
 0x4f0   :  { %6829 = vmatprep.subr.mxu0 %v24108_v23  ;;  %7139 = vmatprep.subr.mxu1 %v24109_v13  ;;  %v24119_v23 = vld [vmem:[#allocation54_spill] sm:$0xff]  ;;  %v24166_v41 = vld [vmem:[#allocation321_spill] sm:$0xff] }
 0x4f1   :  { %6833 = vmatpush1.msra.mxu0 %v24110_v25  ;;  %7145 = vmatpush1.msra.mxu1 %v24111_v43  ;;  %v24120_v25 = vld [vmem:[#allocation55_spill] sm:$0xff]  ;;  %v24121_v43 = vld [vmem:[#allocation62_spill] sm:$0xff] }
 0x4f2   :  { %6837 = vmatprep.subr.mxu0 %v24112_v2  ;;  %7151 = vmatprep.subr.mxu1 %v24113_v28  ;;  %v24122_v28 = vld [vmem:[#allocation67_spill] sm:$0xff]  ;;  %v24156_v2 = vld [vmem:[#allocation10_spill] sm:$0xff] }
 0x4f3   :  { %6841 = vmatpush1.msra.mxu0 %v24114_v48  ;;  %7157 = vmatpush1.msra.mxu1 %v24115_v29  ;;  %v24123_v29 = vld [vmem:[#allocation70_spill] sm:$0xff]  ;;  %v24154_v48 = vld [vmem:[#allocation113_spill] sm:$0xff] }
 0x4f4   :  { %6845 = vmatprep.subr.mxu0 %v24116_v1  ;;  %7163 = vmatprep.subr.mxu1 %v24117_v3  ;;  %v24124_v3 = vld [vmem:[#allocation73_spill] sm:$0xff]  ;;  %v24152_v1 = vld [vmem:[#allocation108_spill] sm:$0xff] }
 0x4f5   :  { %6849 = vmatpush1.msra.mxu0 %v24118_v20  ;;  %7169 = vmatpush1.msra.mxu1 %v24119_v23  ;;  %v24125_v23 = vld [vmem:[#allocation79_spill] sm:$0xff]  ;;  %v24147_v20 = vld [vmem:[#allocation141_spill] sm:$0xff] }
 0x4f6   :  { %6884 = vmatmul.mubr.f32.vlgmr.msra.gmra.mxu0 %v19435_v47  ;;  %7175 = vmatprep.subr.mxu1 %v24120_v25  ;;  %v24126_v47 = vld [vmem:[#allocation83_spill] sm:$0xff]  ;;  %v24145_v25 = vld [vmem:[#allocation140_spill] sm:$0xff] }
 0x4f7   :  { %7181 = vmatpush1.msra.mxu1 %v24121_v43  ;;  %7027 = vmatprep.subr.mxu0 %v23697_v46  ;;  %v24127_v43 = vld [vmem:[#allocation86_spill] sm:$0xff] }
 0x4f8   :  { %7187 = vmatprep.subr.mxu1 %v24122_v28  ;;  %7029 = vmatpush1.msra.mxu0 %v23589_v5  ;;  %v24128_v28 = vld [vmem:[#allocation90_spill] sm:$0xff] }
 0x4f9   :  { %7193 = vmatpush1.msra.mxu1 %v24123_v29  ;;  %7031 = vmatprep.subr.mxu0 %v23591_v35  ;;  %v24129_v29 = vld [vmem:[#allocation93_spill] sm:$0xff] }
 0x4fa   :  { %7199 = vmatprep.subr.mxu1 %v24124_v3  ;;  %7033 = vmatpush1.msra.mxu0 %v23594_v56  ;;  %v24130_v3 = vld [vmem:[#allocation99_spill] sm:$0xff] }
 0x4fb   :  { %7205 = vmatpush1.msra.mxu1 %v24125_v23  ;;  %7035 = vmatprep.subr.mxu0 %v23597_v42  ;;  %v24131_v23 = vld [vmem:[#allocation103_spill] sm:$0xff] }
 0x4fc   :  { %7211 = vmatprep.subr.mxu1 %v24126_v47  ;;  %7037 = vmatpush1.msra.mxu0 %v23600_v40  ;;  %v24132_v47 = vld [vmem:[#allocation104_spill] sm:$0xff] }
 0x4fd   :  { %7217 = vmatpush1.msra.mxu1 %v24127_v43  ;;  %7039 = vmatprep.subr.mxu0 %v23602_v26  ;;  %v24133_v43 = vld [vmem:[#allocation109_spill] sm:$0xff] }
 0x4fe   :  { %7223 = vmatprep.subr.mxu1 %v24128_v28  ;;  %7041 = vmatpush1.msra.mxu0 %v23605_v4  ;;  %v24134_v28 = vld [vmem:[#allocation116_spill] sm:$0xff] }
 0x4ff   :  { %7229 = vmatpush1.msra.mxu1 %v24129_v29  ;;  %7043 = vmatprep.subr.mxu0 %v23607_v15  ;;  %v24135_v29 = vld [vmem:[#allocation119_spill] sm:$0xff] }
 0x500   :  { %7235 = vmatprep.subr.mxu1 %v24130_v3  ;;  %7045 = vmatpush1.msra.mxu0 %v23610_v55  ;;  %v24136_v3 = vld [vmem:[#allocation120_spill] sm:$0xff] }
 0x501   :  { %7241 = vmatpush1.msra.mxu1 %v24131_v23  ;;  %7047 = vmatprep.subr.mxu0 %v23612_v57  ;;  %v24137_v23 = vld [vmem:[#allocation125_spill] sm:$0xff] }
 0x502   :  { %7247 = vmatprep.subr.mxu1 %v24132_v47  ;;  %7049 = vmatpush1.msra.mxu0 %v23615_v36  ;;  %v24138_v47 = vld [vmem:[#allocation128_spill] sm:$0xff] }
 0x503   :  { %7253 = vmatpush1.msra.mxu1 %v24133_v43  ;;  %7051 = vmatprep.subr.mxu0 %v23617_v45  ;;  %v24139_v43 = vld [vmem:[#allocation130_spill] sm:$0xff] }
 0x504   :  { %7259 = vmatprep.subr.mxu1 %v24134_v28  ;;  %7053 = vmatpush1.msra.mxu0 %v23620_v53  ;;  %v24140_v28 = vld [vmem:[#allocation133_spill] sm:$0xff] }
 0x505   :  { %7265 = vmatpush1.msra.mxu1 %v24135_v29  ;;  %7055 = vmatprep.subr.mxu0 %v23622_v14  ;;  %v24141_v29 = vld [vmem:[#allocation135_spill] sm:$0xff] }
 0x506   :  { %7271 = vmatprep.subr.mxu1 %v24136_v3  ;;  %7057 = vmatpush1.msra.mxu0 %v23624_v24  ;;  %v24142_v3 = vld [vmem:[#allocation137_spill] sm:$0xff]  ;;  %v5619_v9 = vpop.f32.mrf.mxu1 }
 0x507   :  { %7277 = vmatpush1.msra.mxu1 %v24137_v23  ;;  %7059 = vmatprep.subr.mxu0 %v23626_v7  ;;  %v24143_v23 = vld [vmem:[#allocation139_spill] sm:$0xff] }
 0x508   :  { %7283 = vmatprep.subr.mxu1 %v24138_v47  ;;  %7061 = vmatpush1.msra.mxu0 %v23629_v33  ;;  %v24144_v47 = vld [vmem:[#allocation78_spill] sm:$0xff]  ;;  %v5621_v50 = vpop.f32.mrf.mxu1 }
 0x509   :  { %7289 = vmatpush1.msra.mxu1 %v24139_v43  ;;  %7063 = vmatprep.subr.mxu0 %v23631_v11  ;;  %v24146_v43 = vld [vmem:[#allocation85_spill] sm:$0xff] }
 0x50a   :  { %7295 = vmatprep.subr.mxu1 %v24140_v28  ;;  %7065 = vmatpush1.msra.mxu0 %v23634_v61  ;;  %v24148_v28 = vld [vmem:[#allocation91_spill] sm:$0xff] }
 0x50b   :  { %7301 = vmatpush1.msra.mxu1 %v24141_v29  ;;  %7067 = vmatprep.subr.mxu0 %v23636_v54  ;;  %v24149_v29 = vld [vmem:[#allocation92_spill] sm:$0xff] }
 0x50c   :  { %7307 = vmatprep.subr.mxu1 %v24142_v3  ;;  %7069 = vmatpush1.msra.mxu0 %v23638_v18  ;;  %v24150_v3 = vld [vmem:[#allocation96_spill] sm:$0xff] }
 0x50d   :  { %7313 = vmatpush1.msra.mxu1 %v24143_v23  ;;  %7071 = vmatprep.subr.mxu0 %v24144_v47  ;;  %v24151_v23 = vld [vmem:[#allocation101_spill] sm:$0xff] }
 0x50e   :  { %7319 = vmatprep.subr.mxu1 %v24145_v25  ;;  %7073 = vmatpush1.msra.mxu0 %v24146_v43  ;;  %v24153_v25 = vld [vmem:[#allocation110_spill] sm:$0xff]  ;;  %v5387_v13 = vpop.f32.mrf.mxu0 }
 0x50f   :  { %7325 = vmatpush1.msra.mxu1 %v24147_v20  ;;  %7075 = vmatprep.subr.mxu0 %v24148_v28  ;;  %v24155_v20 = vld [vmem:[#allocation115_spill] sm:$0xff]  ;;  %v5620_v34 = vadd.f32 %v5619_v9, %v5387_v13  ;;  %v24162_v9 = vld [vmem:[#allocation216_spill] sm:$0xff] }
 0x510   :  { %7358 = vmatprep.mubr.f32.mxu1 %v23179_v16  ;;  %7504 = vmatprep.subr.mxu1 %v23697_v46  ;;  %v5389_v62 = vpop.f32.mrf.mxu0  ;;  %v758_v13 = vadd.f32 %v24162_v9, %v621_v60 }
 0x511   :  { %7077 = vmatpush1.msra.mxu0 %v24149_v29  ;;  %7122 = vmatprep.mubr.f32.mxu0 %v23179_v16  ;;  %v5622_v37 = vadd.f32 %v5621_v50, %v5389_v62 }
 0x512   :  { %7079 = vmatprep.subr.mxu0 %v24150_v3 }
 0x513   :  { %7081 = vmatpush1.msra.mxu0 %v24151_v23 }
 0x514   :  { %7083 = vmatprep.subr.mxu0 %v24152_v1 }
 0x515   :  { %7085 = vmatpush1.msra.mxu0 %v24153_v25 }
 0x516   :  { %7087 = vmatprep.subr.mxu0 %v24154_v48 }
 0x517   :  { %7089 = vmatpush1.msra.mxu0 %v24155_v20 }
 0x518   :  { %7368 = vmatprep.subr.mxu0 %v24156_v2 }
 0x526   :  { %v5862_v39 = vpop.f32.mrf.mxu1 }
 0x528   :  { %v5864_v2 = vpop.f32.mrf.mxu1 }
 0x52f   :  { %v5756_v0 = vpop.f32.mrf.mxu0 }
 0x530   :  { %v5757_v8 = vadd.f32 %v5756_v0, %v5620_v34  ;;  %v24163_v34 = vld [vmem:[#allocation221_spill] sm:$0xff] }
 0x531   :  { %v5758_v49 = vpop.f32.mrf.mxu0  ;;  %v881_v12 = vadd.f32 %v24163_v34, %v758_v13 }
 0x532   :  { %v5759_v32 = vadd.f32 %v5758_v49, %v5622_v37  ;;  %v5863_v6 = vadd.f32 %v5862_v39, %v5757_v8 }
 0x534   :  { %v5865_v59 = vadd.f32 %v5864_v2, %v5759_v32  ;;  %v1016_v32 = vadd.f32 %v24166_v41, %v24165_v44  ;;  %v24168_v2 = vld [vmem:[#allocation340_spill] sm:$0xff] }
 0x548   :  { %v6134_v58 = vpop.f32.mrf.mxu1 }
 0x54a   :  { %v6136_v62 = vpop.f32.mrf.mxu1 }
 0x551   :  { %v6030_v10 = vpop.f32.mrf.mxu0 }
 0x552   :  { %v6031_v22 = vadd.f32 %v6030_v10, %v5863_v6  ;;  %v24167_v6 = vld [vmem:[#allocation323_spill] sm:$0xff] }
 0x553   :  { %v6032_v51 = vpop.f32.mrf.mxu0 }
 0x554   :  { %v6033_v21 = vadd.f32 %v6032_v51, %v5865_v59  ;;  %v6135_v50 = vadd.f32 %v6134_v58, %v6031_v22  ;;  %v1167_v22 = vadd.f32 %v24167_v6, %v1016_v32 }
 0x556   :  { %v6137_v0 = vadd.f32 %v6136_v62, %v6033_v21  ;;  %v6994_v49 = vadd.f32 %v6135_v50, %v24164_v27  ;;  %v1295_v60 = vadd.f32 %v24168_v2, %v1167_v22  ;;  %v24169_v50 = vld [vmem:[#allocation341_spill] sm:$0xff] }
 0x558   :  { %v6995_v37 = vadd.f32 %v6137_v0, %v881_v12  ;;  %v16409_v31 = vmul.f32 -1.442695, %v6994_v49  ;;  %v1429_v0 = vadd.f32 %v24169_v50, %v1295_v60 }
 0x55a   :  { %v16410_v63 = vmul.f32 -1.442695, %v6995_v37  ;;  %16780 = vpow2.f32 %v16409_v31 }
 0x55c   :  { %16782 = vpow2.f32 %v16410_v63  ;;  %v24170_v63 = vld [vmem:[#allocation344_spill] sm:$0xff] }
 0x55d   :  { %v1566_v44 = vadd.f32 %v24170_v63, %v1429_v0  ;;  %v24173_v0 = vld [vmem:[#allocation25_spill] sm:$0xff] }
 0x567   :  { %v16781_v27 = vpop.eup %16780 }
 0x569   :  { %v16783_v31 = vpop.eup %16782 }
 0x56a   :  { %v6474_v8 = vpop.f32.mrf.mxu1  ;;  %v7008_v22 = vadd.f32 1.0, %v16783_v31 }
 0x56c   :  { %v6476_v51 = vpop.f32.mrf.mxu1 }
 0x573   :  { %v6242_v39 = vpop.f32.mrf.mxu0 }
 0x574   :  { %v6475_v21 = vadd.f32 %v6474_v8, %v6242_v39  ;;  %v7007_v8 = vadd.f32 1.0, %v16781_v27 }
 0x575   :  { %v6244_v10 = vpop.f32.mrf.mxu0 }
 0x576   :  { %v6477_v12 = vadd.f32 %v6476_v51, %v6244_v10  ;;  %16784 = vrcp.f32 %v7007_v8  ;;  %v24175_v8 = vld [vmem:[#allocation16_spill] sm:$0xff] }
 0x577   :  { %16786 = vrcp.f32 %v7008_v22  ;;  %v24177_v22 = vld [vmem:[#allocation21_spill] sm:$0xff] }
 0x58c   :  { %v6717_v52 = vpop.f32.mrf.mxu1 }
 0x58e   :  { %v6719_v62 = vpop.f32.mrf.mxu1 }
 0x595   :  { %v6611_v59 = vpop.f32.mrf.mxu0 }
 0x596   :  { %v6612_v9 = vadd.f32 %v6611_v59, %v6475_v21  ;;  %v24171_v59 = vld [vmem:[#allocation346_spill] sm:$0xff]  ;;  %v24172_v21 = vld [vmem:[#allocation345_spill] sm:$0xff] }
 0x597   :  { %v6613_v58 = vpop.f32.mrf.mxu0  ;;  %v1689_v51 = vadd.f32 %v24171_v59, %v1566_v44  ;;  %v24179_v59 = vld [vmem:[#allocation26_spill] sm:$0xff] }
 0x598   :  { %v6614_v13 = vadd.f32 %v6613_v58, %v6477_v12  ;;  %v6718_v34 = vadd.f32 %v6717_v52, %v6612_v9  ;;  %v16785_v12 = vpop.eup %16784 }
 0x599   :  { %v16787_v9 = vpop.eup %16786 }
 0x59a   :  { %v6720_v32 = vadd.f32 %v6719_v62, %v6614_v13 }
 0x5ae   :  { %v6989_v49 = vpop.f32.mrf.mxu1 }
 0x5b0   :  { %v6991_v10 = vpop.f32.mrf.mxu1 }
 0x5b6   :  { %v6885_v37 = vpop.f32.mrf.mxu0 }
 0x5b7   :  { %v6886_v41 = vadd.f32 %v6885_v37, %v6718_v34  ;;  %v7017_v34 = vmul.f32 %v16787_v9, %v24173_v0  ;;  %v24187_v9 = vld [vmem:[#allocation56_spill] sm:$0xff]  ;;  %v24191_v0 = vld [vmem:[#allocation71_spill] sm:$0xff] }
 0x5b8   :  { %v6887_v39 = vpop.f32.mrf.mxu0 }
 0x5b9   :  { %v6990_v6 = vadd.f32 %v6989_v49, %v6886_v41  ;;  %v6888_v19 = vadd.f32 %v6887_v39, %v6720_v32 }
 0x5bb   :  { %v6996_v58 = vadd.f32 %v6990_v6, %v24172_v21  ;;  %v6992_v2 = vadd.f32 %v6991_v10, %v6888_v19  ;;  %v24176_v6 = vld [vmem:[#allocation18_spill] sm:$0xff]  ;;  %v24178_v10 = vld [vmem:[#allocation23_spill] sm:$0xff]  ;;  %v24181_v21 = vld [vmem:[#allocation32_spill] sm:$0xff] }
 0x5bd   :  { %v16411_v52 = vmul.f32 -1.442695, %v6996_v58  ;;  %v6997_v60 = vadd.f32 %v6992_v2, %v1689_v51  ;;  %v24180_v51 = vld [vmem:[#allocation27_spill] sm:$0xff]  ;;  %v24182_v58 = vld [vmem:[#allocation36_spill] sm:$0xff] }
 0x5be   :  { %v24183_v2 = vld [vmem:[#allocation39_spill] sm:$0xff] }
 0x5bf   :  { %16788 = vpow2.f32 %v16411_v52  ;;  %v24184_v52 = vld [vmem:[#allocation42_spill] sm:$0xff] }
 0x5c0   :  { %16790 = vtanh.f32 %v6997_v60  ;;  %v24185_v60 = vld [vmem:[#allocation47_spill] sm:$0xff] }
 0x5cc   :  { %v16789_v13 = vpop.eup %16788 }
 0x5cd   :  { %v16791_v62 = vpop.eup %16790  ;;  %v7009_v50 = vadd.f32 1.0, %v16789_v13  ;;  %v24188_v13 = vld [vmem:[#allocation58_spill] sm:$0xff] }
 0x5ce   :  { %v7018_v27 = vmul.f32 %v16791_v62, %v16785_v12  ;;  %v24186_v12 = vld [vmem:[#allocation52_spill] sm:$0xff] }
 0x5cf   :  { %16792 = vrcp.f32 %v7009_v50  ;;  %v24189_v62 = vld [vmem:[#allocation64_spill] sm:$0xff]  ;;  %v24190_v50 = vld [vmem:[#allocation69_spill] sm:$0xff] }
 0x5d0   :  { %v19872_v49 = vadd.f32 %v7018_v27, %v7017_v34  ;;  %v24192_v34 = vld [vmem:[#allocation72_spill] sm:$0xff] }
 0x5d1   :  { %v24193_v27 = vld [vmem:[#allocation76_spill] sm:$0xff] }
 0x5d2   :  { %24174 = vst [vmem:[#allocation29_spill] sm:$0xff] %v19872_v49  ;;  %16794 = vtanh.f32 %v19872_v49  ;;  %v24284_v49 = vld [vmem:[#allocation325_spill] sm:$0xff] }
 0x5dc   :  { %v16793_v19 = vpop.eup %16792 }
 0x5df   :  { %v16795_v37 = vpop.eup %16794 }
 0x5e0   :  { %v7021_v31 = vmul.f32 %v16795_v37, %v16793_v19  ;;  %v24194_v19 = vld [vmem:[#allocation84_spill] sm:$0xff] }
 0x5e1   :  { %v24195_v37 = vld [vmem:[#allocation88_spill] sm:$0xff] }
 0x5e2   :  { %v19875_v63 = vand.u32 4294901760, %v7021_v31 }
 0x5e4   :  { %7360 = vmatmul.mubr.f32.vlgmr.msra.gmra.mxu1 %v19875_v63  ;;  %v19879_v44 = vsub.f32 %v7021_v31, %v19875_v63  ;;  %v24196_v31 = vld [vmem:[#allocation89_spill] sm:$0xff] }
 0x5e5   :  { %7506 = vmatpush1.msra.mxu1 %v23589_v5  ;;  %7599 = vmatprep.mubr.f32.mxu1 %v23179_v16 }
 0x5e6   :  { %7508 = vmatprep.subr.mxu1 %v23591_v35  ;;  %v19885_v41 = vand.u32 4294901760, %v19879_v44 }
 0x5e7   :  { %7510 = vmatpush1.msra.mxu1 %v23594_v56 }
 0x5e8   :  { %7512 = vmatprep.subr.mxu1 %v23597_v42  ;;  %v7126_v32 = vsub.f32 %v19879_v44, %v19885_v41 }
 0x5e9   :  { %7514 = vmatpush1.msra.mxu1 %v23600_v40 }
 0x5ea   :  { %7516 = vmatprep.subr.mxu1 %v23602_v26  ;;  %v19893_v39 = vand.u32 4294901760, %v7126_v32  ;;  %v24197_v32 = vld [vmem:[#allocation95_spill] sm:$0xff] }
 0x5eb   :  { %7518 = vmatpush1.msra.mxu1 %v23605_v4 }
 0x5ec   :  { %7520 = vmatprep.subr.mxu1 %v23607_v15  ;;  %7128 = vmatmul.mubr.f32.vlgmr.msra.gmra.mxu0 %v19893_v39 }
 0x5ed   :  { %7371 = vmatpush1.msra.mxu0 %v24175_v8  ;;  %7522 = vmatpush1.msra.mxu1 %v23610_v55  ;;  %v24282_v8 = vld [vmem:[#allocation324_spill] sm:$0xff] }
 0x5ee   :  { %7374 = vmatprep.subr.mxu0 %v24176_v6  ;;  %7524 = vmatprep.subr.mxu1 %v23612_v57  ;;  %v24280_v6 = vld [vmem:[#allocation322_spill] sm:$0xff] }
 0x5ef   :  { %7377 = vmatpush1.msra.mxu0 %v24177_v22  ;;  %7526 = vmatpush1.msra.mxu1 %v23615_v36  ;;  %v24278_v22 = vld [vmem:[#allocation320_spill] sm:$0xff] }
 0x5f0   :  { %7380 = vmatprep.subr.mxu0 %v24178_v10  ;;  %7528 = vmatprep.subr.mxu1 %v23617_v45  ;;  %v24276_v10 = vld [vmem:[#allocation318_spill] sm:$0xff] }
 0x5f1   :  { %7383 = vmatpush1.msra.mxu0 %v24179_v59  ;;  %7530 = vmatpush1.msra.mxu1 %v23620_v53  ;;  %v24274_v59 = vld [vmem:[#allocation316_spill] sm:$0xff] }
 0x5f2   :  { %7386 = vmatprep.subr.mxu0 %v24180_v51  ;;  %7532 = vmatprep.subr.mxu1 %v23622_v14  ;;  %v24272_v51 = vld [vmem:[#allocation314_spill] sm:$0xff] }
 0x5f3   :  { %7389 = vmatpush1.msra.mxu0 %v24181_v21  ;;  %7534 = vmatpush1.msra.mxu1 %v23624_v24  ;;  %v24270_v21 = vld [vmem:[#allocation311_spill] sm:$0xff] }
 0x5f4   :  { %7392 = vmatprep.subr.mxu0 %v24182_v58  ;;  %7536 = vmatprep.subr.mxu1 %v23626_v7  ;;  %v24268_v58 = vld [vmem:[#allocation306_spill] sm:$0xff] }
 0x5f5   :  { %7395 = vmatpush1.msra.mxu0 %v24183_v2  ;;  %7538 = vmatpush1.msra.mxu1 %v23629_v33  ;;  %v24266_v2 = vld [vmem:[#allocation303_spill] sm:$0xff] }
 0x5f6   :  { %7398 = vmatprep.subr.mxu0 %v24184_v52  ;;  %7540 = vmatprep.subr.mxu1 %v23631_v11  ;;  %v24264_v52 = vld [vmem:[#allocation299_spill] sm:$0xff] }
 0x5f7   :  { %7401 = vmatpush1.msra.mxu0 %v24185_v60  ;;  %7542 = vmatpush1.msra.mxu1 %v23634_v61  ;;  %v24262_v60 = vld [vmem:[#allocation284_spill] sm:$0xff] }
 0x5f8   :  { %7404 = vmatprep.subr.mxu0 %v24186_v12  ;;  %7544 = vmatprep.subr.mxu1 %v23636_v54  ;;  %v24260_v12 = vld [vmem:[#allocation269_spill] sm:$0xff] }
 0x5f9   :  { %7407 = vmatpush1.msra.mxu0 %v24187_v9  ;;  %7546 = vmatpush1.msra.mxu1 %v23638_v18  ;;  %v24241_v9 = vld [vmem:[#allocation233_spill] sm:$0xff] }
 0x5fa   :  { %7410 = vmatprep.subr.mxu0 %v24188_v13  ;;  %7548 = vmatprep.subr.mxu1 %v24144_v47  ;;  %v24239_v13 = vld [vmem:[#allocation223_spill] sm:$0xff] }
 0x5fb   :  { %7413 = vmatpush1.msra.mxu0 %v24189_v62  ;;  %7550 = vmatpush1.msra.mxu1 %v24146_v43  ;;  %v24238_v62 = vld [vmem:[#allocation126_spill] sm:$0xff] }
 0x5fc   :  { %7416 = vmatprep.subr.mxu0 %v24190_v50  ;;  %7552 = vmatprep.subr.mxu1 %v24148_v28  ;;  %v24236_v50 = vld [vmem:[#allocation122_spill] sm:$0xff] }
 0x5fd   :  { %7419 = vmatpush1.msra.mxu0 %v24191_v0  ;;  %7554 = vmatpush1.msra.mxu1 %v24149_v29  ;;  %v24234_v0 = vld [vmem:[#allocation117_spill] sm:$0xff] }
 0x5fe   :  { %7422 = vmatprep.subr.mxu0 %v24192_v34  ;;  %7556 = vmatprep.subr.mxu1 %v24150_v3  ;;  %v24198_v34 = vld [vmem:[#allocation100_spill] sm:$0xff] }
 0x5ff   :  { %7425 = vmatpush1.msra.mxu0 %v24193_v27  ;;  %7558 = vmatpush1.msra.mxu1 %v24151_v23  ;;  %v24204_v27 = vld [vmem:[#allocation123_spill] sm:$0xff] }
 0x600   :  { %7428 = vmatprep.subr.mxu0 %v24194_v19  ;;  %7560 = vmatprep.subr.mxu1 %v24152_v1  ;;  %v24199_v19 = vld [vmem:[#allocation105_spill] sm:$0xff] }
 0x601   :  { %7431 = vmatpush1.msra.mxu0 %v24195_v37  ;;  %7562 = vmatpush1.msra.mxu1 %v24153_v25  ;;  %v24200_v37 = vld [vmem:[#allocation107_spill] sm:$0xff] }
 0x602   :  { %7434 = vmatprep.subr.mxu0 %v24196_v31  ;;  %7564 = vmatprep.subr.mxu1 %v24154_v48  ;;  %v24201_v31 = vld [vmem:[#allocation112_spill] sm:$0xff] }
 0x603   :  { %7437 = vmatpush1.msra.mxu0 %v24197_v32  ;;  %7566 = vmatpush1.msra.mxu1 %v24155_v20  ;;  %v24202_v32 = vld [vmem:[#allocation118_spill] sm:$0xff] }
 0x604   :  { %7440 = vmatprep.subr.mxu0 %v24198_v34  ;;  %7603 = vmatmul.mubr.f32.vlgmr.msra.gmra.mxu1 %v19885_v41  ;;  %v24203_v34 = vld [vmem:[#allocation121_spill] sm:$0xff] }
 0x605   :  { %7778 = vmatprep.subr.mxu1 %v23697_v46  ;;  %7443 = vmatpush1.msra.mxu0 %v24199_v19  ;;  %v24205_v19 = vld [vmem:[#allocation124_spill] sm:$0xff] }
 0x606   :  { %7780 = vmatpush1.msra.mxu1 %v23589_v5  ;;  %7446 = vmatprep.subr.mxu0 %v24200_v37  ;;  %v24211_v37 = vld [vmem:[#allocation34_spill] sm:$0xff] }
 0x607   :  { %7782 = vmatprep.subr.mxu1 %v23591_v35  ;;  %7449 = vmatpush1.msra.mxu0 %v24201_v31  ;;  %v24206_v31 = vld [vmem:[#allocation11_spill] sm:$0xff] }
 0x608   :  { %7784 = vmatpush1.msra.mxu1 %v23594_v56  ;;  %7452 = vmatprep.subr.mxu0 %v24202_v32  ;;  %v24207_v32 = vld [vmem:[#allocation22_spill] sm:$0xff] }
 0x609   :  { %7786 = vmatprep.subr.mxu1 %v23597_v42  ;;  %7455 = vmatpush1.msra.mxu0 %v24203_v34  ;;  %v24208_v34 = vld [vmem:[#allocation24_spill] sm:$0xff] }
 0x60a   :  { %7788 = vmatpush1.msra.mxu1 %v23600_v40  ;;  %7458 = vmatprep.subr.mxu0 %v24204_v27  ;;  %v24209_v27 = vld [vmem:[#allocation28_spill] sm:$0xff] }
 0x60b   :  { %7790 = vmatprep.subr.mxu1 %v23602_v26  ;;  %7461 = vmatpush1.msra.mxu0 %v24205_v19  ;;  %v24210_v19 = vld [vmem:[#allocation30_spill] sm:$0xff] }
 0x60c   :  { %7494 = vmatprep.mubr.f32.mxu0 %v23179_v16  ;;  %7792 = vmatpush1.msra.mxu1 %v23605_v4 }
 0x60d   :  { %7497 = vmatmul.mubr.f32.vlgmr.msra.gmra.mxu0 %v19879_v44  ;;  %7612 = vmatprep.subr.mxu0 %v24206_v31  ;;  %v24212_v31 = vld [vmem:[#allocation35_spill] sm:$0xff] }
 0x60e   :  { %7794 = vmatprep.subr.mxu1 %v23607_v15  ;;  %7616 = vmatpush1.msra.mxu0 %v24207_v32  ;;  %v24213_v32 = vld [vmem:[#allocation41_spill] sm:$0xff] }
 0x60f   :  { %7796 = vmatpush1.msra.mxu1 %v23610_v55  ;;  %7620 = vmatprep.subr.mxu0 %v24208_v34  ;;  %v24214_v34 = vld [vmem:[#allocation46_spill] sm:$0xff] }
 0x610   :  { %7798 = vmatprep.subr.mxu1 %v23612_v57  ;;  %7624 = vmatpush1.msra.mxu0 %v24209_v27  ;;  %v24215_v27 = vld [vmem:[#allocation50_spill] sm:$0xff] }
 0x611   :  { %7800 = vmatpush1.msra.mxu1 %v23615_v36  ;;  %7628 = vmatprep.subr.mxu0 %v24210_v19  ;;  %v24216_v19 = vld [vmem:[#allocation51_spill] sm:$0xff] }
 0x612   :  { %7802 = vmatprep.subr.mxu1 %v23617_v45  ;;  %7632 = vmatpush1.msra.mxu0 %v24211_v37  ;;  %v24217_v37 = vld [vmem:[#allocation57_spill] sm:$0xff] }
 0x613   :  { %7804 = vmatpush1.msra.mxu1 %v23620_v53  ;;  %7636 = vmatprep.subr.mxu0 %v24212_v31  ;;  %v24218_v31 = vld [vmem:[#allocation63_spill] sm:$0xff] }
 0x614   :  { %7806 = vmatprep.subr.mxu1 %v23622_v14  ;;  %7640 = vmatpush1.msra.mxu0 %v24213_v32  ;;  %v24219_v32 = vld [vmem:[#allocation65_spill] sm:$0xff] }
 0x615   :  { %7808 = vmatpush1.msra.mxu1 %v23624_v24  ;;  %7644 = vmatprep.subr.mxu0 %v24214_v34  ;;  %v24220_v34 = vld [vmem:[#allocation68_spill] sm:$0xff] }
 0x616   :  { %7810 = vmatprep.subr.mxu1 %v23626_v7  ;;  %7648 = vmatpush1.msra.mxu0 %v24215_v27  ;;  %v24221_v27 = vld [vmem:[#allocation74_spill] sm:$0xff] }
 0x617   :  { %7812 = vmatpush1.msra.mxu1 %v23629_v33  ;;  %7652 = vmatprep.subr.mxu0 %v24216_v19  ;;  %v24222_v19 = vld [vmem:[#allocation80_spill] sm:$0xff] }
 0x618   :  { %7814 = vmatprep.subr.mxu1 %v23631_v11  ;;  %7656 = vmatpush1.msra.mxu0 %v24217_v37  ;;  %v24223_v37 = vld [vmem:[#allocation81_spill] sm:$0xff] }
 0x619   :  { %7816 = vmatpush1.msra.mxu1 %v23634_v61  ;;  %7660 = vmatprep.subr.mxu0 %v24218_v31  ;;  %v24224_v31 = vld [vmem:[#allocation82_spill] sm:$0xff] }
 0x61a   :  { %7818 = vmatprep.subr.mxu1 %v23636_v54  ;;  %7664 = vmatpush1.msra.mxu0 %v24219_v32  ;;  %v24225_v32 = vld [vmem:[#allocation87_spill] sm:$0xff] }
 0x61b   :  { %7820 = vmatpush1.msra.mxu1 %v23638_v18  ;;  %7668 = vmatprep.subr.mxu0 %v24220_v34  ;;  %v24226_v34 = vld [vmem:[#allocation94_spill] sm:$0xff] }
 0x61c   :  { %7822 = vmatprep.subr.mxu1 %v24144_v47  ;;  %7672 = vmatpush1.msra.mxu0 %v24221_v27  ;;  %v24227_v27 = vld [vmem:[#allocation97_spill] sm:$0xff]  ;;  %v24303_v47 = vld [vmem:[#allocation183_spill] sm:$0xff] }
 0x61d   :  { %7824 = vmatpush1.msra.mxu1 %v24146_v43  ;;  %7676 = vmatprep.subr.mxu0 %v24222_v19  ;;  %v24228_v19 = vld [vmem:[#allocation98_spill] sm:$0xff]  ;;  %v24302_v43 = vld [vmem:[#allocation179_spill] sm:$0xff] }
 0x61e   :  { %7826 = vmatprep.subr.mxu1 %v24148_v28  ;;  %7680 = vmatpush1.msra.mxu0 %v24223_v37  ;;  %v24229_v37 = vld [vmem:[#allocation106_spill] sm:$0xff] }
 0x61f   :  { %7828 = vmatpush1.msra.mxu1 %v24149_v29  ;;  %7684 = vmatprep.subr.mxu0 %v24224_v31  ;;  %v24232_v31 = vld [vmem:[#allocation114_spill] sm:$0xff] }
 0x620   :  { %7830 = vmatprep.subr.mxu1 %v24150_v3  ;;  %7688 = vmatpush1.msra.mxu0 %v24225_v32  ;;  %v24230_v32 = vld [vmem:[#allocation111_spill] sm:$0xff]  ;;  %v24299_v3 = vld [vmem:[#allocation169_spill] sm:$0xff]  ;;  %v24300_v29 = vld [vmem:[#allocation170_spill] sm:$0xff] }
 0x621   :  { %7832 = vmatpush1.msra.mxu1 %v24151_v23  ;;  %7692 = vmatprep.subr.mxu0 %v24226_v34  ;;  %v24231_v34 = vld [vmem:[#allocation192_spill] sm:$0xff]  ;;  %v24298_v23 = vld [vmem:[#allocation298_spill] sm:$0xff] }
 0x622   :  { %7834 = vmatprep.subr.mxu1 %v24152_v1  ;;  %7696 = vmatpush1.msra.mxu0 %v24227_v27  ;;  %v24233_v27 = vld [vmem:[#allocation196_spill] sm:$0xff]  ;;  %v24297_v1 = vld [vmem:[#allocation295_spill] sm:$0xff]  ;;  %v24301_v28 = vld [vmem:[#allocation174_spill] sm:$0xff] }
 0x623   :  { %7836 = vmatpush1.msra.mxu1 %v24153_v25  ;;  %7700 = vmatprep.subr.mxu0 %v24228_v19  ;;  %v24235_v19 = vld [vmem:[#allocation203_spill] sm:$0xff]  ;;  %v24290_v25 = vld [vmem:[#allocation328_spill] sm:$0xff] }
 0x624   :  { %7838 = vmatprep.subr.mxu1 %v24154_v48  ;;  %7704 = vmatpush1.msra.mxu0 %v24229_v37  ;;  %v24237_v37 = vld [vmem:[#allocation214_spill] sm:$0xff]  ;;  %v24288_v48 = vld [vmem:[#allocation327_spill] sm:$0xff] }
 0x625   :  { %7840 = vmatpush1.msra.mxu1 %v24155_v20  ;;  %7873 = vmatprep.mubr.f32.mxu1 %v23179_v16  ;;  %v24286_v20 = vld [vmem:[#allocation326_spill] sm:$0xff] }
 0x626   :  { %7708 = vmatprep.subr.mxu0 %v24230_v32  ;;  %7875 = vmatmul.mubr.f32.vlgmr.msra.gmra.mxu1 %v19875_v63  ;;  %v24240_v32 = vld [vmem:[#allocation127_spill] sm:$0xff] }
 0x627   :  { %7994 = vmatprep.subr.mxu1 %v24231_v34  ;;  %7712 = vmatpush1.msra.mxu0 %v24232_v31  ;;  %v24242_v34 = vld [vmem:[#allocation129_spill] sm:$0xff] }
 0x628   :  { %8000 = vmatpush1.msra.mxu1 %v24233_v27  ;;  %7716 = vmatprep.subr.mxu0 %v24234_v0  ;;  %v24243_v31 = vld [vmem:[#allocation237_spill] sm:$0xff]  ;;  %v24244_v27 = vld [vmem:[#allocation131_spill] sm:$0xff] }
 0x629   :  { %8006 = vmatprep.subr.mxu1 %v24235_v19  ;;  %7720 = vmatpush1.msra.mxu0 %v24236_v50  ;;  %v24245_v19 = vld [vmem:[#allocation241_spill] sm:$0xff]  ;;  %v24256_v50 = vld [vmem:[#allocation263_spill] sm:$0xff] }
 0x62a   :  { %8012 = vmatpush1.msra.mxu1 %v24237_v37  ;;  %7724 = vmatprep.subr.mxu0 %v24238_v62  ;;  %v24246_v62 = vld [vmem:[#allocation245_spill] sm:$0xff]  ;;  %v24254_v37 = vld [vmem:[#allocation258_spill] sm:$0xff]  ;;  %v24258_v0 = vld [vmem:[#allocation267_spill] sm:$0xff] }
 0x62b   :  { %8018 = vmatprep.subr.mxu1 %v24239_v13  ;;  %7728 = vmatpush1.msra.mxu0 %v24240_v32  ;;  %v24247_v32 = vld [vmem:[#allocation249_spill] sm:$0xff]  ;;  %v24253_v13 = vld [vmem:[#allocation180_spill] sm:$0xff] }
 0x62c   :  { %8024 = vmatpush1.msra.mxu1 %v24241_v9  ;;  %7732 = vmatprep.subr.mxu0 %v24242_v34  ;;  %v24248_v34 = vld [vmem:[#allocation252_spill] sm:$0xff] }
 0x62d   :  { %8030 = vmatprep.subr.mxu1 %v24243_v31  ;;  %7736 = vmatpush1.msra.mxu0 %v24244_v27  ;;  %v24249_v31 = vld [vmem:[#allocation172_spill] sm:$0xff]  ;;  %v24250_v27 = vld [vmem:[#allocation253_spill] sm:$0xff] }
 0x62e   :  { %7769 = vmatprep.mubr.f32.mxu0 %v23179_v16  ;;  %8036 = vmatpush1.msra.mxu1 %v24245_v19  ;;  %v24251_v9 = vld [vmem:[#allocation176_spill] sm:$0xff]  ;;  %v24252_v19 = vld [vmem:[#allocation254_spill] sm:$0xff] }
 0x62f   :  { %7771 = vmatmul.mubr.f32.vlgmr.msra.gmra.mxu0 %v19875_v63  ;;  %7882 = vmatprep.subr.mxu0 %v23745_v17 }
 0x630   :  { %8042 = vmatprep.subr.mxu1 %v24246_v62  ;;  %7884 = vmatpush1.msra.mxu0 %v23747_v38  ;;  %v24255_v62 = vld [vmem:[#allocation184_spill] sm:$0xff] }
 0x631   :  { %8048 = vmatpush1.msra.mxu1 %v24247_v32  ;;  %7886 = vmatprep.subr.mxu0 %v23749_v30  ;;  %v24257_v32 = vld [vmem:[#allocation188_spill] sm:$0xff] }
 0x632   :  { %8054 = vmatprep.subr.mxu1 %v24248_v34  ;;  %7888 = vmatpush1.msra.mxu0 %v24249_v31  ;;  %v24259_v34 = vld [vmem:[#allocation191_spill] sm:$0xff] }
 0x633   :  { %8060 = vmatpush1.msra.mxu1 %v24250_v27  ;;  %7890 = vmatprep.subr.mxu0 %v24251_v9  ;;  %v24261_v27 = vld [vmem:[#allocation195_spill] sm:$0xff] }
 0x634   :  { %8066 = vmatprep.subr.mxu1 %v24252_v19  ;;  %7892 = vmatpush1.msra.mxu0 %v24253_v13  ;;  %v24263_v19 = vld [vmem:[#allocation197_spill] sm:$0xff] }
 0x635   :  { %8072 = vmatpush1.msra.mxu1 %v24254_v37  ;;  %7894 = vmatprep.subr.mxu0 %v24255_v62  ;;  %v24265_v37 = vld [vmem:[#allocation198_spill] sm:$0xff] }
 0x636   :  { %8078 = vmatprep.subr.mxu1 %v24256_v50  ;;  %7896 = vmatpush1.msra.mxu0 %v24257_v32  ;;  %v24267_v50 = vld [vmem:[#allocation202_spill] sm:$0xff] }
 0x637   :  { %8084 = vmatpush1.msra.mxu1 %v24258_v0  ;;  %7898 = vmatprep.subr.mxu0 %v24259_v34  ;;  %v24269_v0 = vld [vmem:[#allocation207_spill] sm:$0xff] }
 0x638   :  { %8090 = vmatprep.subr.mxu1 %v24260_v12  ;;  %7900 = vmatpush1.msra.mxu0 %v24261_v27  ;;  %v24271_v12 = vld [vmem:[#allocation210_spill] sm:$0xff] }
 0x639   :  { %8096 = vmatpush1.msra.mxu1 %v24262_v60  ;;  %7902 = vmatprep.subr.mxu0 %v24263_v19  ;;  %v24273_v60 = vld [vmem:[#allocation213_spill] sm:$0xff] }
 0x63a   :  { %8102 = vmatprep.subr.mxu1 %v24264_v52  ;;  %7904 = vmatpush1.msra.mxu0 %v24265_v37  ;;  %v24275_v52 = vld [vmem:[#allocation218_spill] sm:$0xff] }
 0x63b   :  { %8108 = vmatpush1.msra.mxu1 %v24266_v2  ;;  %7906 = vmatprep.subr.mxu0 %v24267_v50  ;;  %v24277_v2 = vld [vmem:[#allocation231_spill] sm:$0xff] }
 0x63c   :  { %8114 = vmatprep.subr.mxu1 %v24268_v58  ;;  %7908 = vmatpush1.msra.mxu0 %v24269_v0  ;;  %v24279_v58 = vld [vmem:[#allocation239_spill] sm:$0xff] }
 0x63d   :  { %8120 = vmatpush1.msra.mxu1 %v24270_v21  ;;  %7910 = vmatprep.subr.mxu0 %v24271_v12  ;;  %v24281_v21 = vld [vmem:[#allocation247_spill] sm:$0xff] }
 0x63e   :  { %8126 = vmatprep.subr.mxu1 %v24272_v51  ;;  %7912 = vmatpush1.msra.mxu0 %v24273_v60  ;;  %v24283_v51 = vld [vmem:[#allocation251_spill] sm:$0xff] }
 0x63f   :  { %8132 = vmatpush1.msra.mxu1 %v24274_v59  ;;  %7914 = vmatprep.subr.mxu0 %v24275_v52  ;;  %v24285_v59 = vld [vmem:[#allocation256_spill] sm:$0xff] }
 0x640   :  { %8138 = vmatprep.subr.mxu1 %v24276_v10  ;;  %7916 = vmatpush1.msra.mxu0 %v24277_v2  ;;  %v24287_v10 = vld [vmem:[#allocation261_spill] sm:$0xff] }
 0x641   :  { %8144 = vmatpush1.msra.mxu1 %v24278_v22  ;;  %7918 = vmatprep.subr.mxu0 %v24279_v58  ;;  %v24289_v22 = vld [vmem:[#allocation266_spill] sm:$0xff] }
 0x642   :  { %8150 = vmatprep.subr.mxu1 %v24280_v6  ;;  %7920 = vmatpush1.msra.mxu0 %v24281_v21  ;;  %v24291_v6 = vld [vmem:[#allocation268_spill] sm:$0xff] }
 0x643   :  { %8156 = vmatpush1.msra.mxu1 %v24282_v8  ;;  %7922 = vmatprep.subr.mxu0 %v24283_v51  ;;  %v24296_v8 = vld [vmem:[#allocation287_spill] sm:$0xff] }
 0x644   :  { %8162 = vmatprep.subr.mxu1 %v24284_v49  ;;  %7924 = vmatpush1.msra.mxu0 %v24285_v59  ;;  %v24292_v49 = vld [vmem:[#allocation271_spill] sm:$0xff] }
 0x645   :  { %8168 = vmatpush1.msra.mxu1 %v24286_v20  ;;  %7926 = vmatprep.subr.mxu0 %v24287_v10  ;;  %v24293_v20 = vld [vmem:[#allocation276_spill] sm:$0xff] }
 0x646   :  { %8174 = vmatprep.subr.mxu1 %v24288_v48  ;;  %7928 = vmatpush1.msra.mxu0 %v24289_v22  ;;  %v24294_v48 = vld [vmem:[#allocation280_spill] sm:$0xff] }
 0x647   :  { %8180 = vmatpush1.msra.mxu1 %v24290_v25  ;;  %8213 = vmatprep.mubr.f32.mxu1 %v23179_v16  ;;  %v24295_v25 = vld [vmem:[#allocation282_spill] sm:$0xff] }
 0x648   :  { %7930 = vmatprep.subr.mxu0 %v24291_v6  ;;  %8215 = vmatmul.mubr.f32.vlgmr.msra.gmra.mxu1 %v19875_v63 }
 0x649   :  { %8359 = vmatprep.subr.mxu1 %v23745_v17  ;;  %7932 = vmatpush1.msra.mxu0 %v24292_v49 }
 0x64a   :  { %8361 = vmatpush1.msra.mxu1 %v23747_v38  ;;  %7934 = vmatprep.subr.mxu0 %v24293_v20 }
 0x64b   :  { %8363 = vmatprep.subr.mxu1 %v23749_v30  ;;  %7936 = vmatpush1.msra.mxu0 %v24294_v48 }
 0x64c   :  { %8365 = vmatpush1.msra.mxu1 %v24249_v31  ;;  %7938 = vmatprep.subr.mxu0 %v24295_v25 }
 0x64d   :  { %8367 = vmatprep.subr.mxu1 %v24251_v9  ;;  %7940 = vmatpush1.msra.mxu0 %v24296_v8 }
 0x64e   :  { %8369 = vmatpush1.msra.mxu1 %v24253_v13  ;;  %7942 = vmatprep.subr.mxu0 %v24297_v1 }
 0x64f   :  { %8371 = vmatprep.subr.mxu1 %v24255_v62  ;;  %7944 = vmatpush1.msra.mxu0 %v24298_v23 }
 0x650   :  { %7977 = vmatprep.mubr.f32.mxu0 %v23179_v16  ;;  %8373 = vmatpush1.msra.mxu1 %v24257_v32 }
 0x651   :  { %7983 = vmatmul.mubr.f32.vlgmr.msra.gmra.mxu0 %v19893_v39  ;;  %8223 = vmatprep.subr.mxu0 %v24299_v3  ;;  %v24304_v39 = vld [vmem:[#allocation187_spill] sm:$0xff]  ;;  %v24305_v3 = vld [vmem:[#allocation194_spill] sm:$0xff] }
 0x652   :  { %8375 = vmatprep.subr.mxu1 %v24259_v34  ;;  %8226 = vmatpush1.msra.mxu0 %v24300_v29  ;;  %v24306_v29 = vld [vmem:[#allocation201_spill] sm:$0xff] }
 0x653   :  { %8377 = vmatpush1.msra.mxu1 %v24261_v27  ;;  %8229 = vmatprep.subr.mxu0 %v24301_v28  ;;  %v24307_v28 = vld [vmem:[#allocation206_spill] sm:$0xff] }
 0x654   :  { %8379 = vmatprep.subr.mxu1 %v24263_v19  ;;  %8232 = vmatpush1.msra.mxu0 %v24302_v43  ;;  %v24308_v43 = vld [vmem:[#allocation209_spill] sm:$0xff] }
 0x655   :  { %8381 = vmatpush1.msra.mxu1 %v24265_v37  ;;  %8235 = vmatprep.subr.mxu0 %v24303_v47  ;;  %v24309_v47 = vld [vmem:[#allocation211_spill] sm:$0xff] }
 0x656   :  { %8383 = vmatprep.subr.mxu1 %v24267_v50  ;;  %8238 = vmatpush1.msra.mxu0 %v24304_v39  ;;  %v24310_v39 = vld [vmem:[#allocation212_spill] sm:$0xff] }
 0x657   :  { %8385 = vmatpush1.msra.mxu1 %v24269_v0  ;;  %8241 = vmatprep.subr.mxu0 %v24305_v3  ;;  %v24311_v3 = vld [vmem:[#allocation217_spill] sm:$0xff] }
 0x658   :  { %8387 = vmatprep.subr.mxu1 %v24271_v12  ;;  %8244 = vmatpush1.msra.mxu0 %v24306_v29  ;;  %v24312_v29 = vld [vmem:[#allocation222_spill] sm:$0xff] }
 0x659   :  { %8389 = vmatpush1.msra.mxu1 %v24273_v60  ;;  %8247 = vmatprep.subr.mxu0 %v24307_v28  ;;  %v24313_v28 = vld [vmem:[#allocation225_spill] sm:$0xff] }
 0x65a   :  { %8391 = vmatprep.subr.mxu1 %v24275_v52  ;;  %8250 = vmatpush1.msra.mxu0 %v24308_v43  ;;  %v24314_v43 = vld [vmem:[#allocation228_spill] sm:$0xff] }
 0x65b   :  { %8393 = vmatpush1.msra.mxu1 %v24277_v2  ;;  %8253 = vmatprep.subr.mxu0 %v24309_v47  ;;  %v24315_v47 = vld [vmem:[#allocation232_spill] sm:$0xff] }
 0x65c   :  { %8395 = vmatprep.subr.mxu1 %v24279_v58  ;;  %8256 = vmatpush1.msra.mxu0 %v24310_v39  ;;  %v24316_v39 = vld [vmem:[#allocation243_spill] sm:$0xff] }
 0x65d   :  { %8397 = vmatpush1.msra.mxu1 %v24281_v21  ;;  %8259 = vmatprep.subr.mxu0 %v24311_v3  ;;  %v24317_v3 = vld [vmem:[#allocation250_spill] sm:$0xff] }
 0x65e   :  { %8399 = vmatprep.subr.mxu1 %v24283_v51  ;;  %8262 = vmatpush1.msra.mxu0 %v24312_v29  ;;  %v24318_v29 = vld [vmem:[#allocation259_spill] sm:$0xff] }
 0x65f   :  { %8401 = vmatpush1.msra.mxu1 %v24285_v59  ;;  %8265 = vmatprep.subr.mxu0 %v24313_v28  ;;  %v24319_v28 = vld [vmem:[#allocation265_spill] sm:$0xff] }
 0x660   :  { %8403 = vmatprep.subr.mxu1 %v24287_v10  ;;  %8268 = vmatpush1.msra.mxu0 %v24314_v43  ;;  %v24320_v43 = vld [vmem:[#allocation270_spill] sm:$0xff] }
 0x661   :  { %8405 = vmatpush1.msra.mxu1 %v24289_v22  ;;  %8271 = vmatprep.subr.mxu0 %v24315_v47  ;;  %v24321_v47 = vld [vmem:[#allocation274_spill] sm:$0xff] }
 0x662   :  { %8407 = vmatprep.subr.mxu1 %v24291_v6  ;;  %8274 = vmatpush1.msra.mxu0 %v24316_v39  ;;  %v24322_v39 = vld [vmem:[#allocation279_spill] sm:$0xff] }
 0x663   :  { %8409 = vmatpush1.msra.mxu1 %v24292_v49  ;;  %8277 = vmatprep.subr.mxu0 %v24317_v3  ;;  %v24362_v3 = vld [vmem:[#allocation40_spill] sm:$0xff] }
 0x664   :  { %8411 = vmatprep.subr.mxu1 %v24293_v20  ;;  %8280 = vmatpush1.msra.mxu0 %v24318_v29  ;;  %v24323_v29 = vld [vmem:[#allocation281_spill] sm:$0xff] }
 0x665   :  { %8413 = vmatpush1.msra.mxu1 %v24294_v48  ;;  %8283 = vmatprep.subr.mxu0 %v24319_v28  ;;  %v24324_v28 = vld [vmem:[#allocation286_spill] sm:$0xff] }
 0x666   :  { %8415 = vmatprep.subr.mxu1 %v24295_v25  ;;  %8286 = vmatpush1.msra.mxu0 %v24320_v43  ;;  %v24325_v43 = vld [vmem:[#allocation290_spill] sm:$0xff] }
 0x667   :  { %8417 = vmatpush1.msra.mxu1 %v24296_v8  ;;  %8289 = vmatprep.subr.mxu0 %v24321_v47  ;;  %v24326_v47 = vld [vmem:[#allocation294_spill] sm:$0xff] }
 0x668   :  { %8419 = vmatprep.subr.mxu1 %v24297_v1  ;;  %8292 = vmatpush1.msra.mxu0 %v24322_v39  ;;  %v24327_v39 = vld [vmem:[#allocation297_spill] sm:$0xff] }
 0x669   :  { %8421 = vmatpush1.msra.mxu1 %v24298_v23  ;;  %8454 = vmatprep.mubr.f32.mxu1 %v23179_v16 }
 0x66a   :  { %8295 = vmatprep.subr.mxu0 %v24323_v29  ;;  %8458 = vmatmul.mubr.f32.vlgmr.msra.gmra.mxu1 %v19885_v41  ;;  %v24328_v29 = vld [vmem:[#allocation301_spill] sm:$0xff]  ;;  %v24329_v41 = vld [vmem:[#allocation308_spill] sm:$0xff] }
 0x66b   :  { %8633 = vmatprep.subr.mxu1 %v23745_v17  ;;  %8298 = vmatpush1.msra.mxu0 %v24324_v28  ;;  %v24330_v28 = vld [vmem:[#allocation310_spill] sm:$0xff] }
 0x66c   :  { %8635 = vmatpush1.msra.mxu1 %v23747_v38  ;;  %8301 = vmatprep.subr.mxu0 %v24325_v43  ;;  %v24360_v43 = vld [vmem:[#allocation38_spill] sm:$0xff] }
 0x66d   :  { %8637 = vmatprep.subr.mxu1 %v23749_v30  ;;  %8304 = vmatpush1.msra.mxu0 %v24326_v47  ;;  %v24331_v47 = vld [vmem:[#allocation175_spill] sm:$0xff] }
 0x66e   :  { %8639 = vmatpush1.msra.mxu1 %v24249_v31  ;;  %8307 = vmatprep.subr.mxu0 %v24327_v39  ;;  %v24332_v39 = vld [vmem:[#allocation177_spill] sm:$0xff] }
 0x66f   :  { %8641 = vmatprep.subr.mxu1 %v24251_v9  ;;  %8310 = vmatpush1.msra.mxu0 %v24328_v29  ;;  %v24333_v29 = vld [vmem:[#allocation182_spill] sm:$0xff] }
 0x670   :  { %8643 = vmatpush1.msra.mxu1 %v24253_v13  ;;  %8313 = vmatprep.subr.mxu0 %v24329_v41  ;;  %v24334_v41 = vld [vmem:[#allocation186_spill] sm:$0xff]  ;;  %v24410_v13 = vld [vmem:[#allocation161_spill] sm:$0xff] }
 0x671   :  { %8645 = vmatprep.subr.mxu1 %v24255_v62  ;;  %8316 = vmatpush1.msra.mxu0 %v24330_v28  ;;  %v24335_v28 = vld [vmem:[#allocation193_spill] sm:$0xff] }
 0x672   :  { %8349 = vmatprep.mubr.f32.mxu0 %v23179_v16  ;;  %8647 = vmatpush1.msra.mxu1 %v24257_v32 }
 0x673   :  { %8352 = vmatmul.mubr.f32.vlgmr.msra.gmra.mxu0 %v19879_v44  ;;  %8467 = vmatprep.subr.mxu0 %v24331_v47  ;;  %v24336_v44 = vld [vmem:[#allocation199_spill] sm:$0xff]  ;;  %v24337_v47 = vld [vmem:[#allocation208_spill] sm:$0xff] }
 0x674   :  { %8649 = vmatprep.subr.mxu1 %v24259_v34  ;;  %8471 = vmatpush1.msra.mxu0 %v24332_v39  ;;  %v24338_v39 = vld [vmem:[#allocation215_spill] sm:$0xff] }
 0x675   :  { %8651 = vmatpush1.msra.mxu1 %v24261_v27  ;;  %8475 = vmatprep.subr.mxu0 %v24333_v29  ;;  %v24339_v29 = vld [vmem:[#allocation219_spill] sm:$0xff] }
 0x676   :  { %8653 = vmatprep.subr.mxu1 %v24263_v19  ;;  %8479 = vmatpush1.msra.mxu0 %v24334_v41  ;;  %v24340_v41 = vld [vmem:[#allocation224_spill] sm:$0xff] }
 0x677   :  { %8655 = vmatpush1.msra.mxu1 %v24265_v37  ;;  %8483 = vmatprep.subr.mxu0 %v24335_v28  ;;  %v24341_v28 = vld [vmem:[#allocation226_spill] sm:$0xff] }
 0x678   :  { %8657 = vmatprep.subr.mxu1 %v24267_v50  ;;  %8487 = vmatpush1.msra.mxu0 %v24336_v44  ;;  %v24342_v44 = vld [vmem:[#allocation227_spill] sm:$0xff]  ;;  %v24409_v50 = vld [vmem:[#allocation160_spill] sm:$0xff] }
 0x679   :  { %8659 = vmatpush1.msra.mxu1 %v24269_v0  ;;  %8491 = vmatprep.subr.mxu0 %v24337_v47  ;;  %v24343_v47 = vld [vmem:[#allocation229_spill] sm:$0xff] }
 0x67a   :  { %8661 = vmatprep.subr.mxu1 %v24271_v12  ;;  %8495 = vmatpush1.msra.mxu0 %v24338_v39  ;;  %v24344_v39 = vld [vmem:[#allocation235_spill] sm:$0xff] }
 0x67b   :  { %8663 = vmatpush1.msra.mxu1 %v24273_v60  ;;  %8499 = vmatprep.subr.mxu0 %v24339_v29  ;;  %v24345_v29 = vld [vmem:[#allocation238_spill] sm:$0xff]  ;;  %v24408_v60 = vld [vmem:[#allocation145_spill] sm:$0xff] }
 0x67c   :  { %8665 = vmatprep.subr.mxu1 %v24275_v52  ;;  %8503 = vmatpush1.msra.mxu0 %v24340_v41  ;;  %v24346_v41 = vld [vmem:[#allocation240_spill] sm:$0xff] }
 0x67d   :  { %8667 = vmatpush1.msra.mxu1 %v24277_v2  ;;  %8507 = vmatprep.subr.mxu0 %v24341_v28  ;;  %v24347_v28 = vld [vmem:[#allocation242_spill] sm:$0xff] }
 0x67e   :  { %8669 = vmatprep.subr.mxu1 %v24279_v58  ;;  %8511 = vmatpush1.msra.mxu0 %v24342_v44  ;;  %v24348_v44 = vld [vmem:[#allocation255_spill] sm:$0xff] }
 0x67f   :  { %8671 = vmatpush1.msra.mxu1 %v24281_v21  ;;  %8515 = vmatprep.subr.mxu0 %v24343_v47  ;;  %v24349_v47 = vld [vmem:[#allocation264_spill] sm:$0xff] }
 0x680   :  { %8673 = vmatprep.subr.mxu1 %v24283_v51  ;;  %8519 = vmatpush1.msra.mxu0 %v24344_v39  ;;  %v24350_v39 = vld [vmem:[#allocation273_spill] sm:$0xff] }
 0x681   :  { %8675 = vmatpush1.msra.mxu1 %v24285_v59  ;;  %8523 = vmatprep.subr.mxu0 %v24345_v29  ;;  %v24351_v29 = vld [vmem:[#allocation278_spill] sm:$0xff] }
 0x682   :  { %8677 = vmatprep.subr.mxu1 %v24287_v10  ;;  %8527 = vmatpush1.msra.mxu0 %v24346_v41  ;;  %v24352_v41 = vld [vmem:[#allocation285_spill] sm:$0xff] }
 0x683   :  { %8679 = vmatpush1.msra.mxu1 %v24289_v22  ;;  %8531 = vmatprep.subr.mxu0 %v24347_v28  ;;  %v24353_v28 = vld [vmem:[#allocation289_spill] sm:$0xff] }
 0x684   :  { %8681 = vmatprep.subr.mxu1 %v24291_v6  ;;  %8535 = vmatpush1.msra.mxu0 %v24348_v44  ;;  %v24354_v44 = vld [vmem:[#allocation293_spill] sm:$0xff]  ;;  %v24407_v6 = vld [vmem:[#allocation144_spill] sm:$0xff] }
 0x685   :  { %8683 = vmatpush1.msra.mxu1 %v24292_v49  ;;  %8539 = vmatprep.subr.mxu0 %v24349_v47  ;;  %v24358_v47 = vld [vmem:[#allocation12_spill] sm:$0xff]  ;;  %v24406_v49 = vld [vmem:[#allocation19_spill] sm:$0xff] }
 0x686   :  { %8685 = vmatprep.subr.mxu1 %v24293_v20  ;;  %8543 = vmatpush1.msra.mxu0 %v24350_v39  ;;  %v24355_v39 = vld [vmem:[#allocation296_spill] sm:$0xff]  ;;  %v219_v22 = vadd.f32 %v24407_v6, %v24406_v49 }
 0x687   :  { %8687 = vmatpush1.msra.mxu1 %v24294_v48  ;;  %8547 = vmatprep.subr.mxu0 %v24351_v29  ;;  %v24356_v29 = vld [vmem:[#allocation300_spill] sm:$0xff] }
 0x688   :  { %8689 = vmatprep.subr.mxu1 %v24295_v25  ;;  %8551 = vmatpush1.msra.mxu0 %v24352_v41  ;;  %v24357_v41 = vld [vmem:[#allocation304_spill] sm:$0xff]  ;;  %v366_v12 = vadd.f32 %v24408_v60, %v219_v22  ;;  %v24413_v22 = vld [vmem:[#allocation234_spill] sm:$0xff] }
 0x689   :  { %8691 = vmatpush1.msra.mxu1 %v24296_v8  ;;  %8555 = vmatprep.subr.mxu0 %v24353_v28  ;;  %v24359_v28 = vld [vmem:[#allocation307_spill] sm:$0xff] }
 0x68a   :  { %8693 = vmatprep.subr.mxu1 %v24297_v1  ;;  %8559 = vmatpush1.msra.mxu0 %v24354_v44  ;;  %v24361_v44 = vld [vmem:[#allocation309_spill] sm:$0xff]  ;;  %v24367_v8 = vld [vmem:[#allocation319_spill] sm:$0xff]  ;;  %v495_v37 = vadd.f32 %v24409_v50, %v366_v12 }
 0x68b   :  { %8695 = vmatpush1.msra.mxu1 %v24298_v23  ;;  %8728 = vmatprep.mubr.f32.mxu1 %v23179_v16  ;;  %v24363_v23 = vld [vmem:[#allocation312_spill] sm:$0xff]  ;;  %v24365_v1 = vld [vmem:[#allocation317_spill] sm:$0xff] }
 0x68c   :  { %8563 = vmatprep.subr.mxu0 %v24355_v39  ;;  %8730 = vmatmul.mubr.f32.vlgmr.msra.gmra.mxu1 %v19875_v63  ;;  %v24364_v39 = vld [vmem:[#allocation45_spill] sm:$0xff]  ;;  %v630_v6 = vadd.f32 %v24410_v13, %v495_v37 }
 0x68d   :  { %8567 = vmatpush1.msra.mxu0 %v24356_v29  ;;  %8624 = vmatprep.mubr.f32.mxu0 %v23179_v16  ;;  %v24366_v29 = vld [vmem:[#allocation49_spill] sm:$0xff] }
 0x68e   :  { %8571 = vmatprep.subr.mxu0 %v24357_v41  ;;  %8881 = vmatprep.subr.mxu1 %v24358_v47  ;;  %v24368_v41 = vld [vmem:[#allocation54_spill] sm:$0xff] }
 0x68f   :  { %8575 = vmatpush1.msra.mxu0 %v24359_v28  ;;  %8887 = vmatpush1.msra.mxu1 %v24360_v43  ;;  %v24369_v28 = vld [vmem:[#allocation55_spill] sm:$0xff]  ;;  %v24370_v43 = vld [vmem:[#allocation62_spill] sm:$0xff] }
 0x690   :  { %8579 = vmatprep.subr.mxu0 %v24361_v44  ;;  %8893 = vmatprep.subr.mxu1 %v24362_v3  ;;  %v24371_v3 = vld [vmem:[#allocation67_spill] sm:$0xff]  ;;  %v24405_v44 = vld [vmem:[#allocation10_spill] sm:$0xff] }
 0x691   :  { %8583 = vmatpush1.msra.mxu0 %v24363_v23  ;;  %8899 = vmatpush1.msra.mxu1 %v24364_v39  ;;  %v24372_v39 = vld [vmem:[#allocation70_spill] sm:$0xff]  ;;  %v24403_v23 = vld [vmem:[#allocation113_spill] sm:$0xff] }
 0x692   :  { %8587 = vmatprep.subr.mxu0 %v24365_v1  ;;  %8905 = vmatprep.subr.mxu1 %v24366_v29  ;;  %v24373_v29 = vld [vmem:[#allocation73_spill] sm:$0xff]  ;;  %v24401_v1 = vld [vmem:[#allocation108_spill] sm:$0xff] }
 0x693   :  { %8591 = vmatpush1.msra.mxu0 %v24367_v8  ;;  %8911 = vmatpush1.msra.mxu1 %v24368_v41  ;;  %v24374_v41 = vld [vmem:[#allocation79_spill] sm:$0xff]  ;;  %v24396_v8 = vld [vmem:[#allocation141_spill] sm:$0xff] }
 0x694   :  { %8626 = vmatmul.mubr.f32.vlgmr.msra.gmra.mxu0 %v19875_v63  ;;  %8917 = vmatprep.subr.mxu1 %v24369_v28  ;;  %v24375_v63 = vld [vmem:[#allocation83_spill] sm:$0xff]  ;;  %v24394_v28 = vld [vmem:[#allocation140_spill] sm:$0xff] }
 0x695   :  { %8923 = vmatpush1.msra.mxu1 %v24370_v43  ;;  %8769 = vmatprep.subr.mxu0 %v23697_v46  ;;  %v24376_v43 = vld [vmem:[#allocation86_spill] sm:$0xff] }
 0x696   :  { %8929 = vmatprep.subr.mxu1 %v24371_v3  ;;  %8771 = vmatpush1.msra.mxu0 %v23589_v5  ;;  %v24377_v3 = vld [vmem:[#allocation90_spill] sm:$0xff] }
 0x697   :  { %8935 = vmatpush1.msra.mxu1 %v24372_v39  ;;  %8773 = vmatprep.subr.mxu0 %v23591_v35  ;;  %v24378_v39 = vld [vmem:[#allocation93_spill] sm:$0xff] }
 0x698   :  { %8941 = vmatprep.subr.mxu1 %v24373_v29  ;;  %8775 = vmatpush1.msra.mxu0 %v23594_v56  ;;  %v24379_v29 = vld [vmem:[#allocation99_spill] sm:$0xff] }
 0x699   :  { %8947 = vmatpush1.msra.mxu1 %v24374_v41  ;;  %8777 = vmatprep.subr.mxu0 %v23597_v42  ;;  %v24380_v41 = vld [vmem:[#allocation103_spill] sm:$0xff] }
 0x69a   :  { %8953 = vmatprep.subr.mxu1 %v24375_v63  ;;  %8779 = vmatpush1.msra.mxu0 %v23600_v40  ;;  %v24381_v63 = vld [vmem:[#allocation104_spill] sm:$0xff] }
 0x69b   :  { %8959 = vmatpush1.msra.mxu1 %v24376_v43  ;;  %8781 = vmatprep.subr.mxu0 %v23602_v26  ;;  %v24382_v43 = vld [vmem:[#allocation109_spill] sm:$0xff] }
 0x69c   :  { %8965 = vmatprep.subr.mxu1 %v24377_v3  ;;  %8783 = vmatpush1.msra.mxu0 %v23605_v4  ;;  %v24383_v3 = vld [vmem:[#allocation116_spill] sm:$0xff] }
 0x69d   :  { %8971 = vmatpush1.msra.mxu1 %v24378_v39  ;;  %8785 = vmatprep.subr.mxu0 %v23607_v15  ;;  %v24384_v39 = vld [vmem:[#allocation119_spill] sm:$0xff] }
 0x69e   :  { %8977 = vmatprep.subr.mxu1 %v24379_v29  ;;  %8787 = vmatpush1.msra.mxu0 %v23610_v55  ;;  %v24385_v29 = vld [vmem:[#allocation120_spill] sm:$0xff] }
 0x69f   :  { %8983 = vmatpush1.msra.mxu1 %v24380_v41  ;;  %8789 = vmatprep.subr.mxu0 %v23612_v57  ;;  %v24386_v41 = vld [vmem:[#allocation125_spill] sm:$0xff] }
 0x6a0   :  { %8989 = vmatprep.subr.mxu1 %v24381_v63  ;;  %8791 = vmatpush1.msra.mxu0 %v23615_v36  ;;  %v24387_v63 = vld [vmem:[#allocation128_spill] sm:$0xff] }
 0x6a1   :  { %8995 = vmatpush1.msra.mxu1 %v24382_v43  ;;  %8793 = vmatprep.subr.mxu0 %v23617_v45  ;;  %v24388_v43 = vld [vmem:[#allocation130_spill] sm:$0xff] }
 0x6a2   :  { %9001 = vmatprep.subr.mxu1 %v24383_v3  ;;  %8795 = vmatpush1.msra.mxu0 %v23620_v53  ;;  %v24389_v3 = vld [vmem:[#allocation133_spill] sm:$0xff] }
 0x6a3   :  { %9007 = vmatpush1.msra.mxu1 %v24384_v39  ;;  %8797 = vmatprep.subr.mxu0 %v23622_v14  ;;  %v24390_v39 = vld [vmem:[#allocation135_spill] sm:$0xff] }
 0x6a4   :  { %9013 = vmatprep.subr.mxu1 %v24385_v29  ;;  %8799 = vmatpush1.msra.mxu0 %v23624_v24  ;;  %v24391_v29 = vld [vmem:[#allocation137_spill] sm:$0xff]  ;;  %v7361_v48 = vpop.f32.mrf.mxu1 }
 0x6a5   :  { %9019 = vmatpush1.msra.mxu1 %v24386_v41  ;;  %8801 = vmatprep.subr.mxu0 %v23626_v7  ;;  %v24392_v41 = vld [vmem:[#allocation139_spill] sm:$0xff] }
 0x6a6   :  { %9025 = vmatprep.subr.mxu1 %v24387_v63  ;;  %8803 = vmatpush1.msra.mxu0 %v23629_v33  ;;  %v24393_v63 = vld [vmem:[#allocation78_spill] sm:$0xff]  ;;  %v7363_v10 = vpop.f32.mrf.mxu1 }
 0x6a7   :  { %9031 = vmatpush1.msra.mxu1 %v24388_v43  ;;  %8805 = vmatprep.subr.mxu0 %v23631_v11  ;;  %v24395_v43 = vld [vmem:[#allocation85_spill] sm:$0xff] }
 0x6a8   :  { %9037 = vmatprep.subr.mxu1 %v24389_v3  ;;  %8807 = vmatpush1.msra.mxu0 %v23634_v61  ;;  %v24397_v3 = vld [vmem:[#allocation91_spill] sm:$0xff] }
 0x6a9   :  { %9043 = vmatpush1.msra.mxu1 %v24390_v39  ;;  %8809 = vmatprep.subr.mxu0 %v23636_v54  ;;  %v24398_v39 = vld [vmem:[#allocation92_spill] sm:$0xff] }
 0x6aa   :  { %9049 = vmatprep.subr.mxu1 %v24391_v29  ;;  %8811 = vmatpush1.msra.mxu0 %v23638_v18  ;;  %v24399_v29 = vld [vmem:[#allocation96_spill] sm:$0xff] }
 0x6ab   :  { %9055 = vmatpush1.msra.mxu1 %v24392_v41  ;;  %8813 = vmatprep.subr.mxu0 %v24393_v63  ;;  %v24400_v41 = vld [vmem:[#allocation101_spill] sm:$0xff] }
 0x6ac   :  { %9061 = vmatprep.subr.mxu1 %v24394_v28  ;;  %8815 = vmatpush1.msra.mxu0 %v24395_v43  ;;  %v24402_v28 = vld [vmem:[#allocation110_spill] sm:$0xff]  ;;  %v7129_v47 = vpop.f32.mrf.mxu0 }
 0x6ad   :  { %9067 = vmatpush1.msra.mxu1 %v24396_v8  ;;  %8817 = vmatprep.subr.mxu0 %v24397_v3  ;;  %v24404_v8 = vld [vmem:[#allocation115_spill] sm:$0xff]  ;;  %v7362_v59 = vadd.f32 %v7361_v48, %v7129_v47  ;;  %v24411_v48 = vld [vmem:[#allocation230_spill] sm:$0xff] }
 0x6ae   :  { %9100 = vmatprep.mubr.f32.mxu1 %v23179_v16  ;;  %9246 = vmatprep.subr.mxu1 %v23697_v46  ;;  %v7131_v25 = vpop.f32.mrf.mxu0  ;;  %v765_v47 = vadd.f32 %v24411_v48, %v630_v6 }
 0x6af   :  { %8819 = vmatpush1.msra.mxu0 %v24398_v39  ;;  %8864 = vmatprep.mubr.f32.mxu0 %v23179_v16  ;;  %v7364_v21 = vadd.f32 %v7363_v10, %v7131_v25 }
 0x6b0   :  { %8821 = vmatprep.subr.mxu0 %v24399_v29 }
 0x6b1   :  { %8823 = vmatpush1.msra.mxu0 %v24400_v41 }
 0x6b2   :  { %8825 = vmatprep.subr.mxu0 %v24401_v1 }
 0x6b3   :  { %8827 = vmatpush1.msra.mxu0 %v24402_v28 }
 0x6b4   :  { %8829 = vmatprep.subr.mxu0 %v24403_v23 }
 0x6b5   :  { %8831 = vmatpush1.msra.mxu0 %v24404_v8 }
 0x6b6   :  { %9110 = vmatprep.subr.mxu0 %v24405_v44 }
 0x6c4   :  { %v7604_v58 = vpop.f32.mrf.mxu1 }
 0x6c6   :  { %v7606_v44 = vpop.f32.mrf.mxu1 }
 0x6cd   :  { %v7498_v20 = vpop.f32.mrf.mxu0 }
 0x6ce   :  { %v7499_v2 = vadd.f32 %v7498_v20, %v7362_v59  ;;  %v24412_v59 = vld [vmem:[#allocation236_spill] sm:$0xff] }
 0x6cf   :  { %v7500_v51 = vpop.f32.mrf.mxu0  ;;  %v888_v9 = vadd.f32 %v24412_v59, %v765_v47 }
 0x6d0   :  { %v7501_v0 = vadd.f32 %v7500_v51, %v7364_v21  ;;  %v7605_v19 = vadd.f32 %v7604_v58, %v7499_v2 }
 0x6d2   :  { %v7607_v34 = vadd.f32 %v7606_v44, %v7501_v0 }
 0x6e6   :  { %v7876_v32 = vpop.f32.mrf.mxu1 }
 0x6e8   :  { %v7878_v25 = vpop.f32.mrf.mxu1 }
 0x6ef   :  { %v7772_v52 = vpop.f32.mrf.mxu0 }
 0x6f0   :  { %v7773_v62 = vadd.f32 %v7772_v52, %v7605_v19 }
 0x6f1   :  { %v7774_v27 = vpop.f32.mrf.mxu0 }
 0x6f2   :  { %v7775_v49 = vadd.f32 %v7774_v27, %v7607_v34  ;;  %v7877_v10 = vadd.f32 %v7876_v32, %v7773_v62 }
 0x6f4   :  { %v7879_v20 = vadd.f32 %v7878_v25, %v7775_v49  ;;  %v8736_v51 = vadd.f32 %v7877_v10, %v24413_v22 }
 0x6f6   :  { %v8737_v21 = vadd.f32 %v7879_v20, %v888_v9  ;;  %v16412_v60 = vmul.f32 -1.442695, %v8736_v51 }
 0x6f8   :  { %v16413_v12 = vmul.f32 -1.442695, %v8737_v21  ;;  %16796 = vpow2.f32 %v16412_v60  ;;  %v24414_v60 = vld [vmem:[#allocation329_spill] sm:$0xff] }
 0x6fa   :  { %16798 = vpow2.f32 %v16413_v12 }
 0x705   :  { %v16797_v44 = vpop.eup %16796 }
 0x706   :  { %v8749_v20 = vadd.f32 1.0, %v16797_v44 }
 0x707   :  { %v16799_v48 = vpop.eup %16798 }
 0x708   :  { %v8216_v2 = vpop.f32.mrf.mxu1  ;;  %v8750_v51 = vadd.f32 1.0, %v16799_v48  ;;  %16800 = vrcp.f32 %v8749_v20 }
 0x70a   :  { %v8218_v13 = vpop.f32.mrf.mxu1  ;;  %16802 = vrcp.f32 %v8750_v51  ;;  %v24420_v51 = vld [vmem:[#allocation21_spill] sm:$0xff] }
 0x711   :  { %v7984_v58 = vpop.f32.mrf.mxu0 }
 0x712   :  { %v8217_v0 = vadd.f32 %v8216_v2, %v7984_v58 }
 0x713   :  { %v7986_v52 = vpop.f32.mrf.mxu0 }
 0x714   :  { %v8219_v19 = vadd.f32 %v8218_v13, %v7986_v52  ;;  %v24415_v52 = vld [vmem:[#allocation330_spill] sm:$0xff] }
 0x715   :  { %v16801_v13 = vpop.eup %16800 }
 0x72a   :  { %v8459_v34 = vpop.f32.mrf.mxu1 }
 0x72c   :  { %v8461_v37 = vpop.f32.mrf.mxu1 }
 0x733   :  { %v8353_v50 = vpop.f32.mrf.mxu0 }
 0x734   :  { %v8354_v62 = vadd.f32 %v8353_v50, %v8217_v0  ;;  %v16803_v0 = vpop.eup %16802 }
 0x735   :  { %v8355_v27 = vpop.f32.mrf.mxu0 }
 0x736   :  { %v8356_v49 = vadd.f32 %v8355_v27, %v8219_v19  ;;  %v8460_v32 = vadd.f32 %v8459_v34, %v8354_v62  ;;  %v24416_v62 = vld [vmem:[#allocation29_spill] sm:$0xff] }
 0x738   :  { %v8462_v25 = vadd.f32 %v8461_v37, %v8356_v49  ;;  %v8759_v49 = vmul.f32 %v16803_v0, %v24416_v62  ;;  %v24429_v0 = vld [vmem:[#allocation52_spill] sm:$0xff]  ;;  %v24433_v62 = vld [vmem:[#allocation69_spill] sm:$0xff] }
 0x74c   :  { %v8731_v6 = vpop.f32.mrf.mxu1 }
 0x74e   :  { %v8733_v21 = vpop.f32.mrf.mxu1 }
 0x754   :  { %v8627_v9 = vpop.f32.mrf.mxu0 }
 0x755   :  { %v8628_v47 = vadd.f32 %v8627_v9, %v8460_v32 }
 0x756   :  { %v8629_v10 = vpop.f32.mrf.mxu0 }
 0x757   :  { %v8732_v59 = vadd.f32 %v8731_v6, %v8628_v47  ;;  %v8630_v22 = vadd.f32 %v8629_v10, %v8462_v25 }
 0x759   :  { %v8738_v12 = vadd.f32 %v8732_v59, %v24414_v60  ;;  %v8734_v58 = vadd.f32 %v8733_v21, %v8630_v22  ;;  %v24418_v59 = vld [vmem:[#allocation16_spill] sm:$0xff]  ;;  %v24419_v22 = vld [vmem:[#allocation18_spill] sm:$0xff]  ;;  %v24421_v21 = vld [vmem:[#allocation23_spill] sm:$0xff] }
 0x75a   :  { %v24422_v60 = vld [vmem:[#allocation26_spill] sm:$0xff] }
 0x75b   :  { %v16414_v2 = vmul.f32 -1.442695, %v8738_v12  ;;  %v8739_v50 = vadd.f32 %v8734_v58, %v24415_v52  ;;  %v24423_v12 = vld [vmem:[#allocation27_spill] sm:$0xff]  ;;  %v24424_v58 = vld [vmem:[#allocation32_spill] sm:$0xff] }
 0x75c   :  { %v24426_v52 = vld [vmem:[#allocation39_spill] sm:$0xff] }
 0x75d   :  { %16804 = vpow2.f32 %v16414_v2  ;;  %v24425_v2 = vld [vmem:[#allocation36_spill] sm:$0xff] }
 0x75e   :  { %16806 = vtanh.f32 %v8739_v50  ;;  %v24427_v50 = vld [vmem:[#allocation42_spill] sm:$0xff] }
 0x76a   :  { %v16805_v34 = vpop.eup %16804 }
 0x76b   :  { %v16807_v27 = vpop.eup %16806  ;;  %v8751_v19 = vadd.f32 1.0, %v16805_v34  ;;  %v24430_v34 = vld [vmem:[#allocation56_spill] sm:$0xff] }
 0x76c   :  { %v8760_v37 = vmul.f32 %v16807_v27, %v16801_v13  ;;  %v24428_v13 = vld [vmem:[#allocation47_spill] sm:$0xff]  ;;  %v24431_v27 = vld [vmem:[#allocation58_spill] sm:$0xff] }
 0x76d   :  { %16808 = vrcp.f32 %v8751_v19  ;;  %v24432_v19 = vld [vmem:[#allocation64_spill] sm:$0xff] }
 0x76e   :  { %v20306_v32 = vadd.f32 %v8760_v37, %v8759_v49  ;;  %v24434_v49 = vld [vmem:[#allocation71_spill] sm:$0xff]  ;;  %v24435_v37 = vld [vmem:[#allocation72_spill] sm:$0xff] }
 0x770   :  { %24417 = vst [vmem:[#allocation335_spill] sm:$0xff] %v20306_v32  ;;  %16810 = vtanh.f32 %v20306_v32  ;;  %v24526_v32 = vld [vmem:[#allocation325_spill] sm:$0xff] }
 0x77a   :  { %v16809_v44 = vpop.eup %16808 }
 0x77d   :  { %v16811_v6 = vpop.eup %16810 }
 0x77e   :  { %v8763_v9 = vmul.f32 %v16811_v6, %v16809_v44  ;;  %v24436_v44 = vld [vmem:[#allocation76_spill] sm:$0xff] }
 0x77f   :  { %v24437_v6 = vld [vmem:[#allocation84_spill] sm:$0xff] }
 0x780   :  { %v20309_v48 = vand.u32 4294901760, %v8763_v9 }
 0x782   :  { %9102 = vmatmul.mubr.f32.vlgmr.msra.gmra.mxu1 %v20309_v48  ;;  %v20313_v47 = vsub.f32 %v8763_v9, %v20309_v48  ;;  %v24438_v9 = vld [vmem:[#allocation88_spill] sm:$0xff] }
 0x783   :  { %9248 = vmatpush1.msra.mxu1 %v23589_v5  ;;  %9341 = vmatprep.mubr.f32.mxu1 %v23179_v16 }
 0x784   :  { %9250 = vmatprep.subr.mxu1 %v23591_v35  ;;  %v20319_v25 = vand.u32 4294901760, %v20313_v47 }
 0x785   :  { %9252 = vmatpush1.msra.mxu1 %v23594_v56 }
 0x786   :  { %9254 = vmatprep.subr.mxu1 %v23597_v42  ;;  %v8868_v10 = vsub.f32 %v20313_v47, %v20319_v25 }
 0x787   :  { %9256 = vmatpush1.msra.mxu1 %v23600_v40 }
 0x788   :  { %9258 = vmatprep.subr.mxu1 %v23602_v26  ;;  %v20327_v20 = vand.u32 4294901760, %v8868_v10  ;;  %v24439_v10 = vld [vmem:[#allocation89_spill] sm:$0xff] }
 0x789   :  { %9260 = vmatpush1.msra.mxu1 %v23605_v4 }
 0x78a   :  { %9262 = vmatprep.subr.mxu1 %v23607_v15  ;;  %8870 = vmatmul.mubr.f32.vlgmr.msra.gmra.mxu0 %v20327_v20 }
 0x78b   :  { %9113 = vmatpush1.msra.mxu0 %v24418_v59  ;;  %9264 = vmatpush1.msra.mxu1 %v23610_v55  ;;  %v24524_v59 = vld [vmem:[#allocation324_spill] sm:$0xff] }
 0x78c   :  { %9116 = vmatprep.subr.mxu0 %v24419_v22  ;;  %9266 = vmatprep.subr.mxu1 %v23612_v57  ;;  %v24522_v22 = vld [vmem:[#allocation322_spill] sm:$0xff] }
 0x78d   :  { %9119 = vmatpush1.msra.mxu0 %v24420_v51  ;;  %9268 = vmatpush1.msra.mxu1 %v23615_v36  ;;  %v24520_v51 = vld [vmem:[#allocation320_spill] sm:$0xff] }
 0x78e   :  { %9122 = vmatprep.subr.mxu0 %v24421_v21  ;;  %9270 = vmatprep.subr.mxu1 %v23617_v45  ;;  %v24518_v21 = vld [vmem:[#allocation318_spill] sm:$0xff] }
 0x78f   :  { %9125 = vmatpush1.msra.mxu0 %v24422_v60  ;;  %9272 = vmatpush1.msra.mxu1 %v23620_v53  ;;  %v24516_v60 = vld [vmem:[#allocation316_spill] sm:$0xff] }
 0x790   :  { %9128 = vmatprep.subr.mxu0 %v24423_v12  ;;  %9274 = vmatprep.subr.mxu1 %v23622_v14  ;;  %v24514_v12 = vld [vmem:[#allocation314_spill] sm:$0xff] }
 0x791   :  { %9131 = vmatpush1.msra.mxu0 %v24424_v58  ;;  %9276 = vmatpush1.msra.mxu1 %v23624_v24  ;;  %v24512_v58 = vld [vmem:[#allocation311_spill] sm:$0xff] }
 0x792   :  { %9134 = vmatprep.subr.mxu0 %v24425_v2  ;;  %9278 = vmatprep.subr.mxu1 %v23626_v7  ;;  %v24510_v2 = vld [vmem:[#allocation306_spill] sm:$0xff] }
 0x793   :  { %9137 = vmatpush1.msra.mxu0 %v24426_v52  ;;  %9280 = vmatpush1.msra.mxu1 %v23629_v33  ;;  %v24508_v52 = vld [vmem:[#allocation303_spill] sm:$0xff] }
 0x794   :  { %9140 = vmatprep.subr.mxu0 %v24427_v50  ;;  %9282 = vmatprep.subr.mxu1 %v23631_v11  ;;  %v24506_v50 = vld [vmem:[#allocation299_spill] sm:$0xff] }
 0x795   :  { %9143 = vmatpush1.msra.mxu0 %v24428_v13  ;;  %9284 = vmatpush1.msra.mxu1 %v23634_v61  ;;  %v24504_v13 = vld [vmem:[#allocation284_spill] sm:$0xff] }
 0x796   :  { %9146 = vmatprep.subr.mxu0 %v24429_v0  ;;  %9286 = vmatprep.subr.mxu1 %v23636_v54  ;;  %v24484_v0 = vld [vmem:[#allocation233_spill] sm:$0xff] }
 0x797   :  { %9149 = vmatpush1.msra.mxu0 %v24430_v34  ;;  %9288 = vmatpush1.msra.mxu1 %v23638_v18  ;;  %v24482_v34 = vld [vmem:[#allocation223_spill] sm:$0xff] }
 0x798   :  { %9152 = vmatprep.subr.mxu0 %v24431_v27  ;;  %9290 = vmatprep.subr.mxu1 %v24393_v63  ;;  %v24481_v27 = vld [vmem:[#allocation126_spill] sm:$0xff] }
 0x799   :  { %9155 = vmatpush1.msra.mxu0 %v24432_v19  ;;  %9292 = vmatpush1.msra.mxu1 %v24395_v43  ;;  %v24479_v19 = vld [vmem:[#allocation122_spill] sm:$0xff] }
 0x79a   :  { %9158 = vmatprep.subr.mxu0 %v24433_v62  ;;  %9294 = vmatprep.subr.mxu1 %v24397_v3  ;;  %v24477_v62 = vld [vmem:[#allocation117_spill] sm:$0xff] }
 0x79b   :  { %9161 = vmatpush1.msra.mxu0 %v24434_v49  ;;  %9296 = vmatpush1.msra.mxu1 %v24398_v39  ;;  %v24440_v49 = vld [vmem:[#allocation95_spill] sm:$0xff] }
 0x79c   :  { %9164 = vmatprep.subr.mxu0 %v24435_v37  ;;  %9298 = vmatprep.subr.mxu1 %v24399_v29  ;;  %v24441_v37 = vld [vmem:[#allocation100_spill] sm:$0xff] }
 0x79d   :  { %9167 = vmatpush1.msra.mxu0 %v24436_v44  ;;  %9300 = vmatpush1.msra.mxu1 %v24400_v41  ;;  %v24447_v44 = vld [vmem:[#allocation123_spill] sm:$0xff] }
 0x79e   :  { %9170 = vmatprep.subr.mxu0 %v24437_v6  ;;  %9302 = vmatprep.subr.mxu1 %v24401_v1  ;;  %v24442_v6 = vld [vmem:[#allocation105_spill] sm:$0xff] }
 0x79f   :  { %9173 = vmatpush1.msra.mxu0 %v24438_v9  ;;  %9304 = vmatpush1.msra.mxu1 %v24402_v28  ;;  %v24443_v9 = vld [vmem:[#allocation107_spill] sm:$0xff] }
 0x7a0   :  { %9176 = vmatprep.subr.mxu0 %v24439_v10  ;;  %9306 = vmatprep.subr.mxu1 %v24403_v23  ;;  %v24444_v10 = vld [vmem:[#allocation112_spill] sm:$0xff] }
 0x7a1   :  { %9179 = vmatpush1.msra.mxu0 %v24440_v49  ;;  %9308 = vmatpush1.msra.mxu1 %v24404_v8  ;;  %v24445_v49 = vld [vmem:[#allocation118_spill] sm:$0xff] }
 0x7a2   :  { %9182 = vmatprep.subr.mxu0 %v24441_v37  ;;  %9345 = vmatmul.mubr.f32.vlgmr.msra.gmra.mxu1 %v20319_v25  ;;  %v24446_v37 = vld [vmem:[#allocation121_spill] sm:$0xff] }
 0x7a3   :  { %9520 = vmatprep.subr.mxu1 %v23697_v46  ;;  %9185 = vmatpush1.msra.mxu0 %v24442_v6  ;;  %v24448_v6 = vld [vmem:[#allocation124_spill] sm:$0xff] }
 0x7a4   :  { %9522 = vmatpush1.msra.mxu1 %v23589_v5  ;;  %9188 = vmatprep.subr.mxu0 %v24443_v9  ;;  %v24454_v9 = vld [vmem:[#allocation34_spill] sm:$0xff] }
 0x7a5   :  { %9524 = vmatprep.subr.mxu1 %v23591_v35  ;;  %9191 = vmatpush1.msra.mxu0 %v24444_v10  ;;  %v24449_v10 = vld [vmem:[#allocation11_spill] sm:$0xff] }
 0x7a6   :  { %9526 = vmatpush1.msra.mxu1 %v23594_v56  ;;  %9194 = vmatprep.subr.mxu0 %v24445_v49  ;;  %v24450_v49 = vld [vmem:[#allocation22_spill] sm:$0xff] }
 0x7a7   :  { %9528 = vmatprep.subr.mxu1 %v23597_v42  ;;  %9197 = vmatpush1.msra.mxu0 %v24446_v37  ;;  %v24451_v37 = vld [vmem:[#allocation24_spill] sm:$0xff] }
 0x7a8   :  { %9530 = vmatpush1.msra.mxu1 %v23600_v40  ;;  %9200 = vmatprep.subr.mxu0 %v24447_v44  ;;  %v24452_v44 = vld [vmem:[#allocation28_spill] sm:$0xff] }
 0x7a9   :  { %9532 = vmatprep.subr.mxu1 %v23602_v26  ;;  %9203 = vmatpush1.msra.mxu0 %v24448_v6  ;;  %v24453_v6 = vld [vmem:[#allocation30_spill] sm:$0xff] }
 0x7aa   :  { %9236 = vmatprep.mubr.f32.mxu0 %v23179_v16  ;;  %9534 = vmatpush1.msra.mxu1 %v23605_v4 }
 0x7ab   :  { %9239 = vmatmul.mubr.f32.vlgmr.msra.gmra.mxu0 %v20313_v47  ;;  %9354 = vmatprep.subr.mxu0 %v24449_v10  ;;  %v24455_v10 = vld [vmem:[#allocation35_spill] sm:$0xff] }
 0x7ac   :  { %9536 = vmatprep.subr.mxu1 %v23607_v15  ;;  %9358 = vmatpush1.msra.mxu0 %v24450_v49  ;;  %v24456_v49 = vld [vmem:[#allocation41_spill] sm:$0xff] }
 0x7ad   :  { %9538 = vmatpush1.msra.mxu1 %v23610_v55  ;;  %9362 = vmatprep.subr.mxu0 %v24451_v37  ;;  %v24457_v37 = vld [vmem:[#allocation46_spill] sm:$0xff] }
 0x7ae   :  { %9540 = vmatprep.subr.mxu1 %v23612_v57  ;;  %9366 = vmatpush1.msra.mxu0 %v24452_v44  ;;  %v24458_v44 = vld [vmem:[#allocation50_spill] sm:$0xff] }
 0x7af   :  { %9542 = vmatpush1.msra.mxu1 %v23615_v36  ;;  %9370 = vmatprep.subr.mxu0 %v24453_v6  ;;  %v24459_v6 = vld [vmem:[#allocation51_spill] sm:$0xff] }
 0x7b0   :  { %9544 = vmatprep.subr.mxu1 %v23617_v45  ;;  %9374 = vmatpush1.msra.mxu0 %v24454_v9  ;;  %v24460_v9 = vld [vmem:[#allocation57_spill] sm:$0xff] }
 0x7b1   :  { %9546 = vmatpush1.msra.mxu1 %v23620_v53  ;;  %9378 = vmatprep.subr.mxu0 %v24455_v10  ;;  %v24461_v10 = vld [vmem:[#allocation63_spill] sm:$0xff] }
 0x7b2   :  { %9548 = vmatprep.subr.mxu1 %v23622_v14  ;;  %9382 = vmatpush1.msra.mxu0 %v24456_v49  ;;  %v24462_v49 = vld [vmem:[#allocation65_spill] sm:$0xff] }
 0x7b3   :  { %9550 = vmatpush1.msra.mxu1 %v23624_v24  ;;  %9386 = vmatprep.subr.mxu0 %v24457_v37  ;;  %v24463_v37 = vld [vmem:[#allocation68_spill] sm:$0xff] }
 0x7b4   :  { %9552 = vmatprep.subr.mxu1 %v23626_v7  ;;  %9390 = vmatpush1.msra.mxu0 %v24458_v44  ;;  %v24464_v44 = vld [vmem:[#allocation74_spill] sm:$0xff] }
 0x7b5   :  { %9554 = vmatpush1.msra.mxu1 %v23629_v33  ;;  %9394 = vmatprep.subr.mxu0 %v24459_v6  ;;  %v24465_v6 = vld [vmem:[#allocation80_spill] sm:$0xff] }
 0x7b6   :  { %9556 = vmatprep.subr.mxu1 %v23631_v11  ;;  %9398 = vmatpush1.msra.mxu0 %v24460_v9  ;;  %v24466_v9 = vld [vmem:[#allocation81_spill] sm:$0xff] }
 0x7b7   :  { %9558 = vmatpush1.msra.mxu1 %v23634_v61  ;;  %9402 = vmatprep.subr.mxu0 %v24461_v10  ;;  %v24467_v10 = vld [vmem:[#allocation82_spill] sm:$0xff] }
 0x7b8   :  { %9560 = vmatprep.subr.mxu1 %v23636_v54  ;;  %9406 = vmatpush1.msra.mxu0 %v24462_v49  ;;  %v24468_v49 = vld [vmem:[#allocation87_spill] sm:$0xff] }
 0x7b9   :  { %9562 = vmatpush1.msra.mxu1 %v23638_v18  ;;  %9410 = vmatprep.subr.mxu0 %v24463_v37  ;;  %v24469_v37 = vld [vmem:[#allocation94_spill] sm:$0xff] }
 0x7ba   :  { %9564 = vmatprep.subr.mxu1 %v24393_v63  ;;  %9414 = vmatpush1.msra.mxu0 %v24464_v44  ;;  %v24470_v44 = vld [vmem:[#allocation97_spill] sm:$0xff]  ;;  %v24545_v63 = vld [vmem:[#allocation183_spill] sm:$0xff] }
 0x7bb   :  { %9566 = vmatpush1.msra.mxu1 %v24395_v43  ;;  %9418 = vmatprep.subr.mxu0 %v24465_v6  ;;  %v24471_v6 = vld [vmem:[#allocation98_spill] sm:$0xff]  ;;  %v24544_v43 = vld [vmem:[#allocation179_spill] sm:$0xff] }
 0x7bc   :  { %9568 = vmatprep.subr.mxu1 %v24397_v3  ;;  %9422 = vmatpush1.msra.mxu0 %v24466_v9  ;;  %v24472_v9 = vld [vmem:[#allocation106_spill] sm:$0xff] }
 0x7bd   :  { %9570 = vmatpush1.msra.mxu1 %v24398_v39  ;;  %9426 = vmatprep.subr.mxu0 %v24467_v10  ;;  %v24475_v10 = vld [vmem:[#allocation114_spill] sm:$0xff] }
 0x7be   :  { %9572 = vmatprep.subr.mxu1 %v24399_v29  ;;  %9430 = vmatpush1.msra.mxu0 %v24468_v49  ;;  %v24473_v49 = vld [vmem:[#allocation111_spill] sm:$0xff]  ;;  %v24541_v29 = vld [vmem:[#allocation169_spill] sm:$0xff]  ;;  %v24542_v39 = vld [vmem:[#allocation170_spill] sm:$0xff] }
 0x7bf   :  { %9574 = vmatpush1.msra.mxu1 %v24400_v41  ;;  %9434 = vmatprep.subr.mxu0 %v24469_v37  ;;  %v24474_v37 = vld [vmem:[#allocation192_spill] sm:$0xff]  ;;  %v24540_v41 = vld [vmem:[#allocation298_spill] sm:$0xff] }
 0x7c0   :  { %9576 = vmatprep.subr.mxu1 %v24401_v1  ;;  %9438 = vmatpush1.msra.mxu0 %v24470_v44  ;;  %v24476_v44 = vld [vmem:[#allocation196_spill] sm:$0xff]  ;;  %v24539_v1 = vld [vmem:[#allocation295_spill] sm:$0xff]  ;;  %v24543_v3 = vld [vmem:[#allocation174_spill] sm:$0xff] }
 0x7c1   :  { %9578 = vmatpush1.msra.mxu1 %v24402_v28  ;;  %9442 = vmatprep.subr.mxu0 %v24471_v6  ;;  %v24478_v6 = vld [vmem:[#allocation203_spill] sm:$0xff]  ;;  %v24532_v28 = vld [vmem:[#allocation328_spill] sm:$0xff] }
 0x7c2   :  { %9580 = vmatprep.subr.mxu1 %v24403_v23  ;;  %9446 = vmatpush1.msra.mxu0 %v24472_v9  ;;  %v24480_v9 = vld [vmem:[#allocation214_spill] sm:$0xff]  ;;  %v24530_v23 = vld [vmem:[#allocation327_spill] sm:$0xff] }
 0x7c3   :  { %9582 = vmatpush1.msra.mxu1 %v24404_v8  ;;  %9615 = vmatprep.mubr.f32.mxu1 %v23179_v16  ;;  %v24528_v8 = vld [vmem:[#allocation326_spill] sm:$0xff] }
 0x7c4   :  { %9450 = vmatprep.subr.mxu0 %v24473_v49  ;;  %9617 = vmatmul.mubr.f32.vlgmr.msra.gmra.mxu1 %v20309_v48  ;;  %v24483_v49 = vld [vmem:[#allocation127_spill] sm:$0xff] }
 0x7c5   :  { %9736 = vmatprep.subr.mxu1 %v24474_v37  ;;  %9454 = vmatpush1.msra.mxu0 %v24475_v10  ;;  %v24485_v37 = vld [vmem:[#allocation129_spill] sm:$0xff] }
 0x7c6   :  { %9742 = vmatpush1.msra.mxu1 %v24476_v44  ;;  %9458 = vmatprep.subr.mxu0 %v24477_v62  ;;  %v24486_v10 = vld [vmem:[#allocation237_spill] sm:$0xff]  ;;  %v24487_v44 = vld [vmem:[#allocation131_spill] sm:$0xff] }
 0x7c7   :  { %9748 = vmatprep.subr.mxu1 %v24478_v6  ;;  %9462 = vmatpush1.msra.mxu0 %v24479_v19  ;;  %v24488_v6 = vld [vmem:[#allocation241_spill] sm:$0xff]  ;;  %v24500_v19 = vld [vmem:[#allocation267_spill] sm:$0xff] }
 0x7c8   :  { %9754 = vmatpush1.msra.mxu1 %v24480_v9  ;;  %9466 = vmatprep.subr.mxu0 %v24481_v27  ;;  %v24489_v27 = vld [vmem:[#allocation245_spill] sm:$0xff]  ;;  %v24498_v9 = vld [vmem:[#allocation263_spill] sm:$0xff] }
 0x7c9   :  { %9760 = vmatprep.subr.mxu1 %v24482_v34  ;;  %9470 = vmatpush1.msra.mxu0 %v24483_v49  ;;  %v24490_v49 = vld [vmem:[#allocation249_spill] sm:$0xff]  ;;  %v24496_v34 = vld [vmem:[#allocation258_spill] sm:$0xff] }
 0x7ca   :  { %9766 = vmatpush1.msra.mxu1 %v24484_v0  ;;  %9474 = vmatprep.subr.mxu0 %v24485_v37  ;;  %v24491_v37 = vld [vmem:[#allocation252_spill] sm:$0xff]  ;;  %v24502_v62 = vld [vmem:[#allocation269_spill] sm:$0xff] }
 0x7cb   :  { %9772 = vmatprep.subr.mxu1 %v24486_v10  ;;  %9478 = vmatpush1.msra.mxu0 %v24487_v44  ;;  %v24492_v44 = vld [vmem:[#allocation253_spill] sm:$0xff]  ;;  %v24493_v10 = vld [vmem:[#allocation176_spill] sm:$0xff] }
 0x7cc   :  { %9511 = vmatprep.mubr.f32.mxu0 %v23179_v16  ;;  %9778 = vmatpush1.msra.mxu1 %v24488_v6  ;;  %v24494_v6 = vld [vmem:[#allocation254_spill] sm:$0xff]  ;;  %v24495_v0 = vld [vmem:[#allocation180_spill] sm:$0xff] }
 0x7cd   :  { %9513 = vmatmul.mubr.f32.vlgmr.msra.gmra.mxu0 %v20309_v48  ;;  %9624 = vmatprep.subr.mxu0 %v23745_v17 }
 0x7ce   :  { %9784 = vmatprep.subr.mxu1 %v24489_v27  ;;  %9626 = vmatpush1.msra.mxu0 %v23747_v38  ;;  %v24497_v27 = vld [vmem:[#allocation184_spill] sm:$0xff] }
 0x7cf   :  { %9790 = vmatpush1.msra.mxu1 %v24490_v49  ;;  %9628 = vmatprep.subr.mxu0 %v23749_v30  ;;  %v24499_v49 = vld [vmem:[#allocation188_spill] sm:$0xff] }
 0x7d0   :  { %9796 = vmatprep.subr.mxu1 %v24491_v37  ;;  %9630 = vmatpush1.msra.mxu0 %v24249_v31  ;;  %v24501_v37 = vld [vmem:[#allocation191_spill] sm:$0xff] }
 0x7d1   :  { %9802 = vmatpush1.msra.mxu1 %v24492_v44  ;;  %9632 = vmatprep.subr.mxu0 %v24493_v10  ;;  %v24503_v44 = vld [vmem:[#allocation195_spill] sm:$0xff] }
 0x7d2   :  { %9808 = vmatprep.subr.mxu1 %v24494_v6  ;;  %9634 = vmatpush1.msra.mxu0 %v24495_v0  ;;  %v24505_v6 = vld [vmem:[#allocation197_spill] sm:$0xff] }
 0x7d3   :  { %9814 = vmatpush1.msra.mxu1 %v24496_v34  ;;  %9636 = vmatprep.subr.mxu0 %v24497_v27  ;;  %v24507_v34 = vld [vmem:[#allocation198_spill] sm:$0xff] }
 0x7d4   :  { %9820 = vmatprep.subr.mxu1 %v24498_v9  ;;  %9638 = vmatpush1.msra.mxu0 %v24499_v49  ;;  %v24509_v9 = vld [vmem:[#allocation202_spill] sm:$0xff] }
 0x7d5   :  { %9826 = vmatpush1.msra.mxu1 %v24500_v19  ;;  %9640 = vmatprep.subr.mxu0 %v24501_v37  ;;  %v24511_v19 = vld [vmem:[#allocation207_spill] sm:$0xff] }
 0x7d6   :  { %9832 = vmatprep.subr.mxu1 %v24502_v62  ;;  %9642 = vmatpush1.msra.mxu0 %v24503_v44  ;;  %v24513_v62 = vld [vmem:[#allocation210_spill] sm:$0xff] }
 0x7d7   :  { %9838 = vmatpush1.msra.mxu1 %v24504_v13  ;;  %9644 = vmatprep.subr.mxu0 %v24505_v6  ;;  %v24515_v13 = vld [vmem:[#allocation213_spill] sm:$0xff] }
 0x7d8   :  { %9844 = vmatprep.subr.mxu1 %v24506_v50  ;;  %9646 = vmatpush1.msra.mxu0 %v24507_v34  ;;  %v24517_v50 = vld [vmem:[#allocation218_spill] sm:$0xff] }
 0x7d9   :  { %9850 = vmatpush1.msra.mxu1 %v24508_v52  ;;  %9648 = vmatprep.subr.mxu0 %v24509_v9  ;;  %v24519_v52 = vld [vmem:[#allocation231_spill] sm:$0xff] }
 0x7da   :  { %9856 = vmatprep.subr.mxu1 %v24510_v2  ;;  %9650 = vmatpush1.msra.mxu0 %v24511_v19  ;;  %v24521_v2 = vld [vmem:[#allocation239_spill] sm:$0xff] }
 0x7db   :  { %9862 = vmatpush1.msra.mxu1 %v24512_v58  ;;  %9652 = vmatprep.subr.mxu0 %v24513_v62  ;;  %v24523_v58 = vld [vmem:[#allocation247_spill] sm:$0xff] }
 0x7dc   :  { %9868 = vmatprep.subr.mxu1 %v24514_v12  ;;  %9654 = vmatpush1.msra.mxu0 %v24515_v13  ;;  %v24525_v12 = vld [vmem:[#allocation251_spill] sm:$0xff] }
 0x7dd   :  { %9874 = vmatpush1.msra.mxu1 %v24516_v60  ;;  %9656 = vmatprep.subr.mxu0 %v24517_v50  ;;  %v24527_v60 = vld [vmem:[#allocation256_spill] sm:$0xff] }
 0x7de   :  { %9880 = vmatprep.subr.mxu1 %v24518_v21  ;;  %9658 = vmatpush1.msra.mxu0 %v24519_v52  ;;  %v24529_v21 = vld [vmem:[#allocation261_spill] sm:$0xff] }
 0x7df   :  { %9886 = vmatpush1.msra.mxu1 %v24520_v51  ;;  %9660 = vmatprep.subr.mxu0 %v24521_v2  ;;  %v24531_v51 = vld [vmem:[#allocation266_spill] sm:$0xff] }
 0x7e0   :  { %9892 = vmatprep.subr.mxu1 %v24522_v22  ;;  %9662 = vmatpush1.msra.mxu0 %v24523_v58  ;;  %v24533_v22 = vld [vmem:[#allocation268_spill] sm:$0xff] }
 0x7e1   :  { %9898 = vmatpush1.msra.mxu1 %v24524_v59  ;;  %9664 = vmatprep.subr.mxu0 %v24525_v12  ;;  %v24538_v59 = vld [vmem:[#allocation287_spill] sm:$0xff] }
 0x7e2   :  { %9904 = vmatprep.subr.mxu1 %v24526_v32  ;;  %9666 = vmatpush1.msra.mxu0 %v24527_v60  ;;  %v24534_v32 = vld [vmem:[#allocation271_spill] sm:$0xff] }
 0x7e3   :  { %9910 = vmatpush1.msra.mxu1 %v24528_v8  ;;  %9668 = vmatprep.subr.mxu0 %v24529_v21  ;;  %v24535_v8 = vld [vmem:[#allocation276_spill] sm:$0xff] }
 0x7e4   :  { %9916 = vmatprep.subr.mxu1 %v24530_v23  ;;  %9670 = vmatpush1.msra.mxu0 %v24531_v51  ;;  %v24536_v23 = vld [vmem:[#allocation280_spill] sm:$0xff] }
 0x7e5   :  { %9922 = vmatpush1.msra.mxu1 %v24532_v28  ;;  %9955 = vmatprep.mubr.f32.mxu1 %v23179_v16  ;;  %v24537_v28 = vld [vmem:[#allocation282_spill] sm:$0xff] }
 0x7e6   :  { %9672 = vmatprep.subr.mxu0 %v24533_v22  ;;  %9957 = vmatmul.mubr.f32.vlgmr.msra.gmra.mxu1 %v20309_v48 }
 0x7e7   :  { %10101 = vmatprep.subr.mxu1 %v23745_v17  ;;  %9674 = vmatpush1.msra.mxu0 %v24534_v32 }
 0x7e8   :  { %10103 = vmatpush1.msra.mxu1 %v23747_v38  ;;  %9676 = vmatprep.subr.mxu0 %v24535_v8 }
 0x7e9   :  { %10105 = vmatprep.subr.mxu1 %v23749_v30  ;;  %9678 = vmatpush1.msra.mxu0 %v24536_v23 }
 0x7ea   :  { %10107 = vmatpush1.msra.mxu1 %v24249_v31  ;;  %9680 = vmatprep.subr.mxu0 %v24537_v28 }
 0x7eb   :  { %10109 = vmatprep.subr.mxu1 %v24493_v10  ;;  %9682 = vmatpush1.msra.mxu0 %v24538_v59 }
 0x7ec   :  { %10111 = vmatpush1.msra.mxu1 %v24495_v0  ;;  %9684 = vmatprep.subr.mxu0 %v24539_v1 }
 0x7ed   :  { %10113 = vmatprep.subr.mxu1 %v24497_v27  ;;  %9686 = vmatpush1.msra.mxu0 %v24540_v41 }
 0x7ee   :  { %9719 = vmatprep.mubr.f32.mxu0 %v23179_v16  ;;  %10115 = vmatpush1.msra.mxu1 %v24499_v49 }
 0x7ef   :  { %9725 = vmatmul.mubr.f32.vlgmr.msra.gmra.mxu0 %v20327_v20  ;;  %9965 = vmatprep.subr.mxu0 %v24541_v29  ;;  %v24546_v20 = vld [vmem:[#allocation187_spill] sm:$0xff]  ;;  %v24547_v29 = vld [vmem:[#allocation194_spill] sm:$0xff] }
 0x7f0   :  { %10117 = vmatprep.subr.mxu1 %v24501_v37  ;;  %9968 = vmatpush1.msra.mxu0 %v24542_v39  ;;  %v24548_v39 = vld [vmem:[#allocation201_spill] sm:$0xff] }
 0x7f1   :  { %10119 = vmatpush1.msra.mxu1 %v24503_v44  ;;  %9971 = vmatprep.subr.mxu0 %v24543_v3  ;;  %v24549_v3 = vld [vmem:[#allocation206_spill] sm:$0xff] }
 0x7f2   :  { %10121 = vmatprep.subr.mxu1 %v24505_v6  ;;  %9974 = vmatpush1.msra.mxu0 %v24544_v43  ;;  %v24550_v43 = vld [vmem:[#allocation209_spill] sm:$0xff] }
 0x7f3   :  { %10123 = vmatpush1.msra.mxu1 %v24507_v34  ;;  %9977 = vmatprep.subr.mxu0 %v24545_v63  ;;  %v24551_v63 = vld [vmem:[#allocation211_spill] sm:$0xff] }
 0x7f4   :  { %10125 = vmatprep.subr.mxu1 %v24509_v9  ;;  %9980 = vmatpush1.msra.mxu0 %v24546_v20  ;;  %v24552_v20 = vld [vmem:[#allocation212_spill] sm:$0xff] }
 0x7f5   :  { %10127 = vmatpush1.msra.mxu1 %v24511_v19  ;;  %9983 = vmatprep.subr.mxu0 %v24547_v29  ;;  %v24553_v29 = vld [vmem:[#allocation217_spill] sm:$0xff] }
 0x7f6   :  { %10129 = vmatprep.subr.mxu1 %v24513_v62  ;;  %9986 = vmatpush1.msra.mxu0 %v24548_v39  ;;  %v24554_v39 = vld [vmem:[#allocation222_spill] sm:$0xff] }
 0x7f7   :  { %10131 = vmatpush1.msra.mxu1 %v24515_v13  ;;  %9989 = vmatprep.subr.mxu0 %v24549_v3  ;;  %v24555_v3 = vld [vmem:[#allocation225_spill] sm:$0xff] }
 0x7f8   :  { %10133 = vmatprep.subr.mxu1 %v24517_v50  ;;  %9992 = vmatpush1.msra.mxu0 %v24550_v43  ;;  %v24556_v43 = vld [vmem:[#allocation228_spill] sm:$0xff] }
 0x7f9   :  { %10135 = vmatpush1.msra.mxu1 %v24519_v52  ;;  %9995 = vmatprep.subr.mxu0 %v24551_v63  ;;  %v24557_v63 = vld [vmem:[#allocation232_spill] sm:$0xff] }
 0x7fa   :  { %10137 = vmatprep.subr.mxu1 %v24521_v2  ;;  %9998 = vmatpush1.msra.mxu0 %v24552_v20  ;;  %v24558_v20 = vld [vmem:[#allocation243_spill] sm:$0xff] }
 0x7fb   :  { %10139 = vmatpush1.msra.mxu1 %v24523_v58  ;;  %10001 = vmatprep.subr.mxu0 %v24553_v29  ;;  %v24559_v29 = vld [vmem:[#allocation250_spill] sm:$0xff] }
 0x7fc   :  { %10141 = vmatprep.subr.mxu1 %v24525_v12  ;;  %10004 = vmatpush1.msra.mxu0 %v24554_v39  ;;  %v24560_v39 = vld [vmem:[#allocation259_spill] sm:$0xff] }
 0x7fd   :  { %10143 = vmatpush1.msra.mxu1 %v24527_v60  ;;  %10007 = vmatprep.subr.mxu0 %v24555_v3  ;;  %v24561_v3 = vld [vmem:[#allocation265_spill] sm:$0xff] }
 0x7fe   :  { %10145 = vmatprep.subr.mxu1 %v24529_v21  ;;  %10010 = vmatpush1.msra.mxu0 %v24556_v43  ;;  %v24562_v43 = vld [vmem:[#allocation270_spill] sm:$0xff] }
 0x7ff   :  { %10147 = vmatpush1.msra.mxu1 %v24531_v51  ;;  %10013 = vmatprep.subr.mxu0 %v24557_v63  ;;  %v24563_v63 = vld [vmem:[#allocation274_spill] sm:$0xff] }
 0x800   :  { %10149 = vmatprep.subr.mxu1 %v24533_v22  ;;  %10016 = vmatpush1.msra.mxu0 %v24558_v20  ;;  %v24564_v20 = vld [vmem:[#allocation279_spill] sm:$0xff] }
 0x801   :  { %10151 = vmatpush1.msra.mxu1 %v24534_v32  ;;  %10019 = vmatprep.subr.mxu0 %v24559_v29  ;;  %v24604_v29 = vld [vmem:[#allocation40_spill] sm:$0xff] }
 0x802   :  { %10153 = vmatprep.subr.mxu1 %v24535_v8  ;;  %10022 = vmatpush1.msra.mxu0 %v24560_v39  ;;  %v24565_v39 = vld [vmem:[#allocation281_spill] sm:$0xff] }
 0x803   :  { %10155 = vmatpush1.msra.mxu1 %v24536_v23  ;;  %10025 = vmatprep.subr.mxu0 %v24561_v3  ;;  %v24566_v3 = vld [vmem:[#allocation286_spill] sm:$0xff] }
 0x804   :  { %10157 = vmatprep.subr.mxu1 %v24537_v28  ;;  %10028 = vmatpush1.msra.mxu0 %v24562_v43  ;;  %v24567_v43 = vld [vmem:[#allocation290_spill] sm:$0xff] }
 0x805   :  { %10159 = vmatpush1.msra.mxu1 %v24538_v59  ;;  %10031 = vmatprep.subr.mxu0 %v24563_v63  ;;  %v24568_v63 = vld [vmem:[#allocation294_spill] sm:$0xff] }
 0x806   :  { %10161 = vmatprep.subr.mxu1 %v24539_v1  ;;  %10034 = vmatpush1.msra.mxu0 %v24564_v20  ;;  %v24569_v20 = vld [vmem:[#allocation297_spill] sm:$0xff] }
 0x807   :  { %10163 = vmatpush1.msra.mxu1 %v24540_v41  ;;  %10196 = vmatprep.mubr.f32.mxu1 %v23179_v16 }
 0x808   :  { %10037 = vmatprep.subr.mxu0 %v24565_v39  ;;  %10200 = vmatmul.mubr.f32.vlgmr.msra.gmra.mxu1 %v20319_v25  ;;  %v24570_v39 = vld [vmem:[#allocation301_spill] sm:$0xff]  ;;  %v24571_v25 = vld [vmem:[#allocation308_spill] sm:$0xff] }
 0x809   :  { %10375 = vmatprep.subr.mxu1 %v23745_v17  ;;  %10040 = vmatpush1.msra.mxu0 %v24566_v3  ;;  %v24572_v3 = vld [vmem:[#allocation310_spill] sm:$0xff] }
 0x80a   :  { %10377 = vmatpush1.msra.mxu1 %v23747_v38  ;;  %10043 = vmatprep.subr.mxu0 %v24567_v43  ;;  %v24602_v43 = vld [vmem:[#allocation38_spill] sm:$0xff] }
 0x80b   :  { %10379 = vmatprep.subr.mxu1 %v23749_v30  ;;  %10046 = vmatpush1.msra.mxu0 %v24568_v63  ;;  %v24573_v63 = vld [vmem:[#allocation175_spill] sm:$0xff] }
 0x80c   :  { %10381 = vmatpush1.msra.mxu1 %v24249_v31  ;;  %10049 = vmatprep.subr.mxu0 %v24569_v20  ;;  %v24574_v20 = vld [vmem:[#allocation177_spill] sm:$0xff] }
 0x80d   :  { %10383 = vmatprep.subr.mxu1 %v24493_v10  ;;  %10052 = vmatpush1.msra.mxu0 %v24570_v39  ;;  %v24575_v39 = vld [vmem:[#allocation182_spill] sm:$0xff] }
 0x80e   :  { %10385 = vmatpush1.msra.mxu1 %v24495_v0  ;;  %10055 = vmatprep.subr.mxu0 %v24571_v25  ;;  %v24576_v25 = vld [vmem:[#allocation186_spill] sm:$0xff]  ;;  %v24652_v0 = vld [vmem:[#allocation163_spill] sm:$0xff] }
 0x80f   :  { %10387 = vmatprep.subr.mxu1 %v24497_v27  ;;  %10058 = vmatpush1.msra.mxu0 %v24572_v3  ;;  %v24577_v3 = vld [vmem:[#allocation193_spill] sm:$0xff] }
 0x810   :  { %10091 = vmatprep.mubr.f32.mxu0 %v23179_v16  ;;  %10389 = vmatpush1.msra.mxu1 %v24499_v49 }
 0x811   :  { %10094 = vmatmul.mubr.f32.vlgmr.msra.gmra.mxu0 %v20313_v47  ;;  %10209 = vmatprep.subr.mxu0 %v24573_v63  ;;  %v24578_v47 = vld [vmem:[#allocation199_spill] sm:$0xff]  ;;  %v24579_v63 = vld [vmem:[#allocation208_spill] sm:$0xff] }
 0x812   :  { %10391 = vmatprep.subr.mxu1 %v24501_v37  ;;  %10213 = vmatpush1.msra.mxu0 %v24574_v20  ;;  %v24580_v20 = vld [vmem:[#allocation215_spill] sm:$0xff] }
 0x813   :  { %10393 = vmatpush1.msra.mxu1 %v24503_v44  ;;  %10217 = vmatprep.subr.mxu0 %v24575_v39  ;;  %v24581_v39 = vld [vmem:[#allocation219_spill] sm:$0xff] }
 0x814   :  { %10395 = vmatprep.subr.mxu1 %v24505_v6  ;;  %10221 = vmatpush1.msra.mxu0 %v24576_v25  ;;  %v24582_v25 = vld [vmem:[#allocation224_spill] sm:$0xff] }
 0x815   :  { %10397 = vmatpush1.msra.mxu1 %v24507_v34  ;;  %10225 = vmatprep.subr.mxu0 %v24577_v3  ;;  %v24583_v3 = vld [vmem:[#allocation226_spill] sm:$0xff] }
 0x816   :  { %10399 = vmatprep.subr.mxu1 %v24509_v9  ;;  %10229 = vmatpush1.msra.mxu0 %v24578_v47  ;;  %v24584_v47 = vld [vmem:[#allocation227_spill] sm:$0xff]  ;;  %v24651_v9 = vld [vmem:[#allocation162_spill] sm:$0xff] }
 0x817   :  { %10401 = vmatpush1.msra.mxu1 %v24511_v19  ;;  %10233 = vmatprep.subr.mxu0 %v24579_v63  ;;  %v24585_v63 = vld [vmem:[#allocation229_spill] sm:$0xff] }
 0x818   :  { %10403 = vmatprep.subr.mxu1 %v24513_v62  ;;  %10237 = vmatpush1.msra.mxu0 %v24580_v20  ;;  %v24586_v20 = vld [vmem:[#allocation235_spill] sm:$0xff] }
 0x819   :  { %10405 = vmatpush1.msra.mxu1 %v24515_v13  ;;  %10241 = vmatprep.subr.mxu0 %v24581_v39  ;;  %v24587_v39 = vld [vmem:[#allocation238_spill] sm:$0xff]  ;;  %v24650_v13 = vld [vmem:[#allocation147_spill] sm:$0xff] }
 0x81a   :  { %10407 = vmatprep.subr.mxu1 %v24517_v50  ;;  %10245 = vmatpush1.msra.mxu0 %v24582_v25  ;;  %v24588_v25 = vld [vmem:[#allocation240_spill] sm:$0xff] }
 0x81b   :  { %10409 = vmatpush1.msra.mxu1 %v24519_v52  ;;  %10249 = vmatprep.subr.mxu0 %v24583_v3  ;;  %v24589_v3 = vld [vmem:[#allocation242_spill] sm:$0xff] }
 0x81c   :  { %10411 = vmatprep.subr.mxu1 %v24521_v2  ;;  %10253 = vmatpush1.msra.mxu0 %v24584_v47  ;;  %v24590_v47 = vld [vmem:[#allocation255_spill] sm:$0xff] }
 0x81d   :  { %10413 = vmatpush1.msra.mxu1 %v24523_v58  ;;  %10257 = vmatprep.subr.mxu0 %v24585_v63  ;;  %v24591_v63 = vld [vmem:[#allocation264_spill] sm:$0xff] }
 0x81e   :  { %10415 = vmatprep.subr.mxu1 %v24525_v12  ;;  %10261 = vmatpush1.msra.mxu0 %v24586_v20  ;;  %v24592_v20 = vld [vmem:[#allocation273_spill] sm:$0xff] }
 0x81f   :  { %10417 = vmatpush1.msra.mxu1 %v24527_v60  ;;  %10265 = vmatprep.subr.mxu0 %v24587_v39  ;;  %v24593_v39 = vld [vmem:[#allocation278_spill] sm:$0xff] }
 0x820   :  { %10419 = vmatprep.subr.mxu1 %v24529_v21  ;;  %10269 = vmatpush1.msra.mxu0 %v24588_v25  ;;  %v24594_v25 = vld [vmem:[#allocation285_spill] sm:$0xff] }
 0x821   :  { %10421 = vmatpush1.msra.mxu1 %v24531_v51  ;;  %10273 = vmatprep.subr.mxu0 %v24589_v3  ;;  %v24595_v3 = vld [vmem:[#allocation289_spill] sm:$0xff] }
 0x822   :  { %10423 = vmatprep.subr.mxu1 %v24533_v22  ;;  %10277 = vmatpush1.msra.mxu0 %v24590_v47  ;;  %v24596_v47 = vld [vmem:[#allocation293_spill] sm:$0xff]  ;;  %v24649_v22 = vld [vmem:[#allocation146_spill] sm:$0xff] }
 0x823   :  { %10425 = vmatpush1.msra.mxu1 %v24534_v32  ;;  %10281 = vmatprep.subr.mxu0 %v24591_v63  ;;  %v24600_v63 = vld [vmem:[#allocation12_spill] sm:$0xff]  ;;  %v24648_v32 = vld [vmem:[#allocation19_spill] sm:$0xff] }
 0x824   :  { %10427 = vmatprep.subr.mxu1 %v24535_v8  ;;  %10285 = vmatpush1.msra.mxu0 %v24592_v20  ;;  %v24597_v20 = vld [vmem:[#allocation296_spill] sm:$0xff]  ;;  %v230_v51 = vadd.f32 %v24649_v22, %v24648_v32 }
 0x825   :  { %10429 = vmatpush1.msra.mxu1 %v24536_v23  ;;  %10289 = vmatprep.subr.mxu0 %v24593_v39  ;;  %v24598_v39 = vld [vmem:[#allocation300_spill] sm:$0xff] }
 0x826   :  { %10431 = vmatprep.subr.mxu1 %v24537_v28  ;;  %10293 = vmatpush1.msra.mxu0 %v24594_v25  ;;  %v24599_v25 = vld [vmem:[#allocation304_spill] sm:$0xff]  ;;  %v373_v62 = vadd.f32 %v24650_v13, %v230_v51  ;;  %v24655_v51 = vld [vmem:[#allocation246_spill] sm:$0xff] }
 0x827   :  { %10433 = vmatpush1.msra.mxu1 %v24538_v59  ;;  %10297 = vmatprep.subr.mxu0 %v24595_v3  ;;  %v24601_v3 = vld [vmem:[#allocation307_spill] sm:$0xff] }
 0x828   :  { %10435 = vmatprep.subr.mxu1 %v24539_v1  ;;  %10301 = vmatpush1.msra.mxu0 %v24596_v47  ;;  %v24603_v47 = vld [vmem:[#allocation309_spill] sm:$0xff]  ;;  %v24609_v59 = vld [vmem:[#allocation319_spill] sm:$0xff]  ;;  %v503_v34 = vadd.f32 %v24651_v9, %v373_v62 }
 0x829   :  { %10437 = vmatpush1.msra.mxu1 %v24540_v41  ;;  %10470 = vmatprep.mubr.f32.mxu1 %v23179_v16  ;;  %v24605_v41 = vld [vmem:[#allocation312_spill] sm:$0xff]  ;;  %v24607_v1 = vld [vmem:[#allocation317_spill] sm:$0xff] }
 0x82a   :  { %10305 = vmatprep.subr.mxu0 %v24597_v20  ;;  %10472 = vmatmul.mubr.f32.vlgmr.msra.gmra.mxu1 %v20309_v48  ;;  %v24606_v20 = vld [vmem:[#allocation45_spill] sm:$0xff]  ;;  %v639_v22 = vadd.f32 %v24652_v0, %v503_v34 }
 0x82b   :  { %10309 = vmatpush1.msra.mxu0 %v24598_v39  ;;  %10366 = vmatprep.mubr.f32.mxu0 %v23179_v16  ;;  %v24608_v39 = vld [vmem:[#allocation49_spill] sm:$0xff] }
 0x82c   :  { %10313 = vmatprep.subr.mxu0 %v24599_v25  ;;  %10623 = vmatprep.subr.mxu1 %v24600_v63  ;;  %v24610_v25 = vld [vmem:[#allocation54_spill] sm:$0xff] }
 0x82d   :  { %10317 = vmatpush1.msra.mxu0 %v24601_v3  ;;  %10629 = vmatpush1.msra.mxu1 %v24602_v43  ;;  %v24611_v3 = vld [vmem:[#allocation55_spill] sm:$0xff]  ;;  %v24612_v43 = vld [vmem:[#allocation62_spill] sm:$0xff] }
 0x82e   :  { %10321 = vmatprep.subr.mxu0 %v24603_v47  ;;  %10635 = vmatprep.subr.mxu1 %v24604_v29  ;;  %v24613_v29 = vld [vmem:[#allocation67_spill] sm:$0xff]  ;;  %v24647_v47 = vld [vmem:[#allocation10_spill] sm:$0xff] }
 0x82f   :  { %10325 = vmatpush1.msra.mxu0 %v24605_v41  ;;  %10641 = vmatpush1.msra.mxu1 %v24606_v20  ;;  %v24614_v20 = vld [vmem:[#allocation70_spill] sm:$0xff]  ;;  %v24645_v41 = vld [vmem:[#allocation113_spill] sm:$0xff] }
 0x830   :  { %10329 = vmatprep.subr.mxu0 %v24607_v1  ;;  %10647 = vmatprep.subr.mxu1 %v24608_v39  ;;  %v24615_v39 = vld [vmem:[#allocation73_spill] sm:$0xff]  ;;  %v24643_v1 = vld [vmem:[#allocation108_spill] sm:$0xff] }
 0x831   :  { %10333 = vmatpush1.msra.mxu0 %v24609_v59  ;;  %10653 = vmatpush1.msra.mxu1 %v24610_v25  ;;  %v24616_v25 = vld [vmem:[#allocation79_spill] sm:$0xff]  ;;  %v24638_v59 = vld [vmem:[#allocation141_spill] sm:$0xff] }
 0x832   :  { %10368 = vmatmul.mubr.f32.vlgmr.msra.gmra.mxu0 %v20309_v48  ;;  %10659 = vmatprep.subr.mxu1 %v24611_v3  ;;  %v24617_v48 = vld [vmem:[#allocation83_spill] sm:$0xff]  ;;  %v24636_v3 = vld [vmem:[#allocation140_spill] sm:$0xff] }
 0x833   :  { %10665 = vmatpush1.msra.mxu1 %v24612_v43  ;;  %10511 = vmatprep.subr.mxu0 %v23697_v46  ;;  %v24618_v43 = vld [vmem:[#allocation86_spill] sm:$0xff] }
 0x834   :  { %10671 = vmatprep.subr.mxu1 %v24613_v29  ;;  %10513 = vmatpush1.msra.mxu0 %v23589_v5  ;;  %v24619_v29 = vld [vmem:[#allocation90_spill] sm:$0xff] }
 0x835   :  { %10677 = vmatpush1.msra.mxu1 %v24614_v20  ;;  %10515 = vmatprep.subr.mxu0 %v23591_v35  ;;  %v24620_v20 = vld [vmem:[#allocation93_spill] sm:$0xff] }
 0x836   :  { %10683 = vmatprep.subr.mxu1 %v24615_v39  ;;  %10517 = vmatpush1.msra.mxu0 %v23594_v56  ;;  %v24621_v39 = vld [vmem:[#allocation99_spill] sm:$0xff] }
 0x837   :  { %10689 = vmatpush1.msra.mxu1 %v24616_v25  ;;  %10519 = vmatprep.subr.mxu0 %v23597_v42  ;;  %v24622_v25 = vld [vmem:[#allocation103_spill] sm:$0xff] }
 0x838   :  { %10695 = vmatprep.subr.mxu1 %v24617_v48  ;;  %10521 = vmatpush1.msra.mxu0 %v23600_v40  ;;  %v24623_v48 = vld [vmem:[#allocation104_spill] sm:$0xff] }
 0x839   :  { %10701 = vmatpush1.msra.mxu1 %v24618_v43  ;;  %10523 = vmatprep.subr.mxu0 %v23602_v26  ;;  %v24624_v43 = vld [vmem:[#allocation109_spill] sm:$0xff] }
 0x83a   :  { %10707 = vmatprep.subr.mxu1 %v24619_v29  ;;  %10525 = vmatpush1.msra.mxu0 %v23605_v4  ;;  %v24625_v29 = vld [vmem:[#allocation116_spill] sm:$0xff] }
 0x83b   :  { %10713 = vmatpush1.msra.mxu1 %v24620_v20  ;;  %10527 = vmatprep.subr.mxu0 %v23607_v15  ;;  %v24626_v20 = vld [vmem:[#allocation119_spill] sm:$0xff] }
 0x83c   :  { %10719 = vmatprep.subr.mxu1 %v24621_v39  ;;  %10529 = vmatpush1.msra.mxu0 %v23610_v55  ;;  %v24627_v39 = vld [vmem:[#allocation120_spill] sm:$0xff] }
 0x83d   :  { %10725 = vmatpush1.msra.mxu1 %v24622_v25  ;;  %10531 = vmatprep.subr.mxu0 %v23612_v57  ;;  %v24628_v25 = vld [vmem:[#allocation125_spill] sm:$0xff] }
 0x83e   :  { %10731 = vmatprep.subr.mxu1 %v24623_v48  ;;  %10533 = vmatpush1.msra.mxu0 %v23615_v36  ;;  %v24629_v48 = vld [vmem:[#allocation128_spill] sm:$0xff] }
 0x83f   :  { %10737 = vmatpush1.msra.mxu1 %v24624_v43  ;;  %10535 = vmatprep.subr.mxu0 %v23617_v45  ;;  %v24630_v43 = vld [vmem:[#allocation130_spill] sm:$0xff] }
 0x840   :  { %10743 = vmatprep.subr.mxu1 %v24625_v29  ;;  %10537 = vmatpush1.msra.mxu0 %v23620_v53  ;;  %v24631_v29 = vld [vmem:[#allocation133_spill] sm:$0xff] }
 0x841   :  { %10749 = vmatpush1.msra.mxu1 %v24626_v20  ;;  %10539 = vmatprep.subr.mxu0 %v23622_v14  ;;  %v24632_v20 = vld [vmem:[#allocation135_spill] sm:$0xff] }
 0x842   :  { %10755 = vmatprep.subr.mxu1 %v24627_v39  ;;  %10541 = vmatpush1.msra.mxu0 %v23624_v24  ;;  %v24633_v39 = vld [vmem:[#allocation137_spill] sm:$0xff]  ;;  %v9103_v23 = vpop.f32.mrf.mxu1 }
 0x843   :  { %10761 = vmatpush1.msra.mxu1 %v24628_v25  ;;  %10543 = vmatprep.subr.mxu0 %v23626_v7  ;;  %v24634_v25 = vld [vmem:[#allocation139_spill] sm:$0xff] }
 0x844   :  { %10767 = vmatprep.subr.mxu1 %v24629_v48  ;;  %10545 = vmatpush1.msra.mxu0 %v23629_v33  ;;  %v24635_v48 = vld [vmem:[#allocation78_spill] sm:$0xff]  ;;  %v9105_v21 = vpop.f32.mrf.mxu1 }
 0x845   :  { %10773 = vmatpush1.msra.mxu1 %v24630_v43  ;;  %10547 = vmatprep.subr.mxu0 %v23631_v11  ;;  %v24637_v43 = vld [vmem:[#allocation85_spill] sm:$0xff] }
 0x846   :  { %10779 = vmatprep.subr.mxu1 %v24631_v29  ;;  %10549 = vmatpush1.msra.mxu0 %v23634_v61  ;;  %v24639_v29 = vld [vmem:[#allocation91_spill] sm:$0xff] }
 0x847   :  { %10785 = vmatpush1.msra.mxu1 %v24632_v20  ;;  %10551 = vmatprep.subr.mxu0 %v23636_v54  ;;  %v24640_v20 = vld [vmem:[#allocation92_spill] sm:$0xff] }
 0x848   :  { %10791 = vmatprep.subr.mxu1 %v24633_v39  ;;  %10553 = vmatpush1.msra.mxu0 %v23638_v18  ;;  %v24641_v39 = vld [vmem:[#allocation96_spill] sm:$0xff] }
 0x849   :  { %10797 = vmatpush1.msra.mxu1 %v24634_v25  ;;  %10555 = vmatprep.subr.mxu0 %v24635_v48  ;;  %v24642_v25 = vld [vmem:[#allocation101_spill] sm:$0xff] }
 0x84a   :  { %10803 = vmatprep.subr.mxu1 %v24636_v3  ;;  %10557 = vmatpush1.msra.mxu0 %v24637_v43  ;;  %v24644_v3 = vld [vmem:[#allocation110_spill] sm:$0xff]  ;;  %v8871_v63 = vpop.f32.mrf.mxu0 }
 0x84b   :  { %10809 = vmatpush1.msra.mxu1 %v24638_v59  ;;  %10559 = vmatprep.subr.mxu0 %v24639_v29  ;;  %v24646_v59 = vld [vmem:[#allocation115_spill] sm:$0xff]  ;;  %v9104_v60 = vadd.f32 %v9103_v23, %v8871_v63  ;;  %v24653_v23 = vld [vmem:[#allocation244_spill] sm:$0xff] }
 0x84c   :  { %10842 = vmatprep.mubr.f32.mxu1 %v23179_v16  ;;  %10988 = vmatprep.subr.mxu1 %v23697_v46  ;;  %v8873_v28 = vpop.f32.mrf.mxu0  ;;  %v772_v63 = vadd.f32 %v24653_v23, %v639_v22 }
 0x84d   :  { %10561 = vmatpush1.msra.mxu0 %v24640_v20  ;;  %10606 = vmatprep.mubr.f32.mxu0 %v23179_v16  ;;  %v9106_v58 = vadd.f32 %v9105_v21, %v8873_v28 }
 0x84e   :  { %10563 = vmatprep.subr.mxu0 %v24641_v39 }
 0x84f   :  { %10565 = vmatpush1.msra.mxu0 %v24642_v25 }
 0x850   :  { %10567 = vmatprep.subr.mxu0 %v24643_v1 }
 0x851   :  { %10569 = vmatpush1.msra.mxu0 %v24644_v3 }
 0x852   :  { %10571 = vmatprep.subr.mxu0 %v24645_v41 }
 0x853   :  { %10573 = vmatpush1.msra.mxu0 %v24646_v59 }
 0x854   :  { %10852 = vmatprep.subr.mxu0 %v24647_v47 }
 0x862   :  { %v9346_v2 = vpop.f32.mrf.mxu1 }
 0x864   :  { %v9348_v47 = vpop.f32.mrf.mxu1 }
 0x86b   :  { %v9240_v8 = vpop.f32.mrf.mxu0 }
 0x86c   :  { %v9241_v52 = vadd.f32 %v9240_v8, %v9104_v60  ;;  %v24654_v60 = vld [vmem:[#allocation248_spill] sm:$0xff] }
 0x86d   :  { %v9242_v12 = vpop.f32.mrf.mxu0  ;;  %v895_v10 = vadd.f32 %v24654_v60, %v772_v63 }
 0x86e   :  { %v9243_v19 = vadd.f32 %v9242_v12, %v9106_v58  ;;  %v9347_v6 = vadd.f32 %v9346_v2, %v9241_v52 }
 0x870   :  { %v9349_v37 = vadd.f32 %v9348_v47, %v9243_v19 }
 0x884   :  { %v9618_v49 = vpop.f32.mrf.mxu1 }
 0x886   :  { %v9620_v28 = vpop.f32.mrf.mxu1 }
 0x88d   :  { %v9514_v50 = vpop.f32.mrf.mxu0 }
 0x88e   :  { %v9515_v27 = vadd.f32 %v9514_v50, %v9347_v6 }
 0x88f   :  { %v9516_v44 = vpop.f32.mrf.mxu0 }
 0x890   :  { %v9517_v32 = vadd.f32 %v9516_v44, %v9349_v37  ;;  %v9619_v21 = vadd.f32 %v9618_v49, %v9515_v27 }
 0x892   :  { %v9621_v8 = vadd.f32 %v9620_v28, %v9517_v32  ;;  %v10478_v12 = vadd.f32 %v9619_v21, %v24655_v51 }
 0x894   :  { %v10479_v58 = vadd.f32 %v9621_v8, %v895_v10  ;;  %v16415_v13 = vmul.f32 -1.442695, %v10478_v12 }
 0x896   :  { %v16416_v62 = vmul.f32 -1.442695, %v10479_v58  ;;  %16812 = vpow2.f32 %v16415_v13  ;;  %v24656_v13 = vld [vmem:[#allocation331_spill] sm:$0xff] }
 0x898   :  { %16814 = vpow2.f32 %v16416_v62 }
 0x8a3   :  { %v16813_v47 = vpop.eup %16812 }
 0x8a4   :  { %v10491_v8 = vadd.f32 1.0, %v16813_v47 }
 0x8a5   :  { %v16815_v23 = vpop.eup %16814 }
 0x8a6   :  { %v9958_v52 = vpop.f32.mrf.mxu1  ;;  %v10492_v12 = vadd.f32 1.0, %v16815_v23  ;;  %16816 = vrcp.f32 %v10491_v8 }
 0x8a8   :  { %v9960_v0 = vpop.f32.mrf.mxu1  ;;  %16818 = vrcp.f32 %v10492_v12  ;;  %v24662_v12 = vld [vmem:[#allocation21_spill] sm:$0xff] }
 0x8af   :  { %v9726_v2 = vpop.f32.mrf.mxu0 }
 0x8b0   :  { %v9959_v34 = vadd.f32 %v9958_v52, %v9726_v2 }
 0x8b1   :  { %v9728_v50 = vpop.f32.mrf.mxu0 }
 0x8b2   :  { %v9961_v6 = vadd.f32 %v9960_v0, %v9728_v50  ;;  %v24657_v50 = vld [vmem:[#allocation332_spill] sm:$0xff] }
 0x8b3   :  { %v16817_v0 = vpop.eup %16816 }
 0x8c8   :  { %v10201_v37 = vpop.f32.mrf.mxu1 }
 0x8ca   :  { %v10203_v49 = vpop.f32.mrf.mxu1 }
 0x8d1   :  { %v10095_v19 = vpop.f32.mrf.mxu0 }
 0x8d2   :  { %v10096_v27 = vadd.f32 %v10095_v19, %v9959_v34  ;;  %v16819_v34 = vpop.eup %16818 }
 0x8d3   :  { %v10097_v44 = vpop.f32.mrf.mxu0 }
 0x8d4   :  { %v10098_v32 = vadd.f32 %v10097_v44, %v9961_v6  ;;  %v10202_v9 = vadd.f32 %v10201_v37, %v10096_v27  ;;  %v24658_v27 = vld [vmem:[#allocation335_spill] sm:$0xff] }
 0x8d6   :  { %v10204_v28 = vadd.f32 %v10203_v49, %v10098_v32  ;;  %v10501_v32 = vmul.f32 %v16819_v34, %v24658_v27  ;;  %v24671_v34 = vld [vmem:[#allocation52_spill] sm:$0xff]  ;;  %v24675_v27 = vld [vmem:[#allocation69_spill] sm:$0xff] }
 0x8ea   :  { %v10473_v22 = vpop.f32.mrf.mxu1 }
 0x8ec   :  { %v10475_v58 = vpop.f32.mrf.mxu1 }
 0x8f2   :  { %v10369_v10 = vpop.f32.mrf.mxu0 }
 0x8f3   :  { %v10370_v63 = vadd.f32 %v10369_v10, %v10202_v9 }
 0x8f4   :  { %v10371_v21 = vpop.f32.mrf.mxu0 }
 0x8f5   :  { %v10474_v60 = vadd.f32 %v10473_v22, %v10370_v63  ;;  %v10372_v51 = vadd.f32 %v10371_v21, %v10204_v28 }
 0x8f7   :  { %v10480_v62 = vadd.f32 %v10474_v60, %v24656_v13  ;;  %v10476_v2 = vadd.f32 %v10475_v58, %v10372_v51  ;;  %v24660_v60 = vld [vmem:[#allocation16_spill] sm:$0xff]  ;;  %v24661_v51 = vld [vmem:[#allocation18_spill] sm:$0xff]  ;;  %v24663_v58 = vld [vmem:[#allocation23_spill] sm:$0xff] }
 0x8f8   :  { %v24664_v13 = vld [vmem:[#allocation26_spill] sm:$0xff] }
 0x8f9   :  { %v16417_v52 = vmul.f32 -1.442695, %v10480_v62  ;;  %v10481_v19 = vadd.f32 %v10476_v2, %v24657_v50  ;;  %v24665_v62 = vld [vmem:[#allocation27_spill] sm:$0xff]  ;;  %v24666_v2 = vld [vmem:[#allocation32_spill] sm:$0xff] }
 0x8fa   :  { %v24668_v50 = vld [vmem:[#allocation39_spill] sm:$0xff] }
 0x8fb   :  { %16820 = vpow2.f32 %v16417_v52  ;;  %v24667_v52 = vld [vmem:[#allocation36_spill] sm:$0xff] }
 0x8fc   :  { %16822 = vtanh.f32 %v10481_v19  ;;  %v24669_v19 = vld [vmem:[#allocation42_spill] sm:$0xff] }
 0x908   :  { %v16821_v37 = vpop.eup %16820 }
 0x909   :  { %v16823_v44 = vpop.eup %16822  ;;  %v10493_v6 = vadd.f32 1.0, %v16821_v37  ;;  %v24672_v37 = vld [vmem:[#allocation56_spill] sm:$0xff] }
 0x90a   :  { %v10502_v49 = vmul.f32 %v16823_v44, %v16817_v0  ;;  %v24670_v0 = vld [vmem:[#allocation47_spill] sm:$0xff]  ;;  %v24673_v44 = vld [vmem:[#allocation58_spill] sm:$0xff] }
 0x90b   :  { %16824 = vrcp.f32 %v10493_v6  ;;  %v24674_v6 = vld [vmem:[#allocation64_spill] sm:$0xff] }
 0x90c   :  { %v20740_v9 = vadd.f32 %v10502_v49, %v10501_v32  ;;  %v24676_v32 = vld [vmem:[#allocation71_spill] sm:$0xff]  ;;  %v24677_v49 = vld [vmem:[#allocation72_spill] sm:$0xff] }
 0x90e   :  { %24659 = vst [vmem:[#allocation31_spill] sm:$0xff] %v20740_v9  ;;  %16826 = vtanh.f32 %v20740_v9  ;;  %v24768_v9 = vld [vmem:[#allocation325_spill] sm:$0xff] }
 0x918   :  { %v16825_v47 = vpop.eup %16824 }
 0x91b   :  { %v16827_v22 = vpop.eup %16826 }
 0x91c   :  { %v10505_v10 = vmul.f32 %v16827_v22, %v16825_v47  ;;  %v24678_v47 = vld [vmem:[#allocation76_spill] sm:$0xff] }
 0x91d   :  { %v24679_v22 = vld [vmem:[#allocation84_spill] sm:$0xff] }
 0x91e   :  { %v20743_v23 = vand.u32 4294901760, %v10505_v10 }
 0x920   :  { %10844 = vmatmul.mubr.f32.vlgmr.msra.gmra.mxu1 %v20743_v23  ;;  %v20747_v63 = vsub.f32 %v10505_v10, %v20743_v23  ;;  %v24680_v10 = vld [vmem:[#allocation88_spill] sm:$0xff] }
 0x921   :  { %10990 = vmatpush1.msra.mxu1 %v23589_v5  ;;  %11083 = vmatprep.mubr.f32.mxu1 %v23179_v16 }
 0x922   :  { %10992 = vmatprep.subr.mxu1 %v23591_v35  ;;  %v20753_v28 = vand.u32 4294901760, %v20747_v63 }
 0x923   :  { %10994 = vmatpush1.msra.mxu1 %v23594_v56 }
 0x924   :  { %10996 = vmatprep.subr.mxu1 %v23597_v42  ;;  %v10610_v21 = vsub.f32 %v20747_v63, %v20753_v28 }
 0x925   :  { %10998 = vmatpush1.msra.mxu1 %v23600_v40 }
 0x926   :  { %11000 = vmatprep.subr.mxu1 %v23602_v26  ;;  %v20761_v8 = vand.u32 4294901760, %v10610_v21  ;;  %v24681_v21 = vld [vmem:[#allocation89_spill] sm:$0xff] }
 0x927   :  { %11002 = vmatpush1.msra.mxu1 %v23605_v4 }
 0x928   :  { %11004 = vmatprep.subr.mxu1 %v23607_v15  ;;  %10612 = vmatmul.mubr.f32.vlgmr.msra.gmra.mxu0 %v20761_v8 }
 0x929   :  { %10855 = vmatpush1.msra.mxu0 %v24660_v60  ;;  %11006 = vmatpush1.msra.mxu1 %v23610_v55  ;;  %v24766_v60 = vld [vmem:[#allocation324_spill] sm:$0xff] }
 0x92a   :  { %10858 = vmatprep.subr.mxu0 %v24661_v51  ;;  %11008 = vmatprep.subr.mxu1 %v23612_v57  ;;  %v24764_v51 = vld [vmem:[#allocation322_spill] sm:$0xff] }
 0x92b   :  { %10861 = vmatpush1.msra.mxu0 %v24662_v12  ;;  %11010 = vmatpush1.msra.mxu1 %v23615_v36  ;;  %v24762_v12 = vld [vmem:[#allocation320_spill] sm:$0xff] }
 0x92c   :  { %10864 = vmatprep.subr.mxu0 %v24663_v58  ;;  %11012 = vmatprep.subr.mxu1 %v23617_v45  ;;  %v24760_v58 = vld [vmem:[#allocation318_spill] sm:$0xff] }
 0x92d   :  { %10867 = vmatpush1.msra.mxu0 %v24664_v13  ;;  %11014 = vmatpush1.msra.mxu1 %v23620_v53  ;;  %v24758_v13 = vld [vmem:[#allocation316_spill] sm:$0xff] }
 0x92e   :  { %10870 = vmatprep.subr.mxu0 %v24665_v62  ;;  %11016 = vmatprep.subr.mxu1 %v23622_v14  ;;  %v24756_v62 = vld [vmem:[#allocation314_spill] sm:$0xff] }
 0x92f   :  { %10873 = vmatpush1.msra.mxu0 %v24666_v2  ;;  %11018 = vmatpush1.msra.mxu1 %v23624_v24  ;;  %v24754_v2 = vld [vmem:[#allocation311_spill] sm:$0xff] }
 0x930   :  { %10876 = vmatprep.subr.mxu0 %v24667_v52  ;;  %11020 = vmatprep.subr.mxu1 %v23626_v7  ;;  %v24752_v52 = vld [vmem:[#allocation306_spill] sm:$0xff] }
 0x931   :  { %10879 = vmatpush1.msra.mxu0 %v24668_v50  ;;  %11022 = vmatpush1.msra.mxu1 %v23629_v33  ;;  %v24750_v50 = vld [vmem:[#allocation303_spill] sm:$0xff] }
 0x932   :  { %10882 = vmatprep.subr.mxu0 %v24669_v19  ;;  %11024 = vmatprep.subr.mxu1 %v23631_v11  ;;  %v24748_v19 = vld [vmem:[#allocation299_spill] sm:$0xff] }
 0x933   :  { %10885 = vmatpush1.msra.mxu0 %v24670_v0  ;;  %11026 = vmatpush1.msra.mxu1 %v23634_v61  ;;  %v24746_v0 = vld [vmem:[#allocation284_spill] sm:$0xff] }
 0x934   :  { %10888 = vmatprep.subr.mxu0 %v24671_v34  ;;  %11028 = vmatprep.subr.mxu1 %v23636_v54  ;;  %v24726_v34 = vld [vmem:[#allocation233_spill] sm:$0xff] }
 0x935   :  { %10891 = vmatpush1.msra.mxu0 %v24672_v37  ;;  %11030 = vmatpush1.msra.mxu1 %v23638_v18  ;;  %v24724_v37 = vld [vmem:[#allocation223_spill] sm:$0xff] }
 0x936   :  { %10894 = vmatprep.subr.mxu0 %v24673_v44  ;;  %11032 = vmatprep.subr.mxu1 %v24635_v48  ;;  %v24723_v44 = vld [vmem:[#allocation126_spill] sm:$0xff] }
 0x937   :  { %10897 = vmatpush1.msra.mxu0 %v24674_v6  ;;  %11034 = vmatpush1.msra.mxu1 %v24637_v43  ;;  %v24721_v6 = vld [vmem:[#allocation122_spill] sm:$0xff] }
 0x938   :  { %10900 = vmatprep.subr.mxu0 %v24675_v27  ;;  %11036 = vmatprep.subr.mxu1 %v24639_v29  ;;  %v24719_v27 = vld [vmem:[#allocation117_spill] sm:$0xff] }
 0x939   :  { %10903 = vmatpush1.msra.mxu0 %v24676_v32  ;;  %11038 = vmatpush1.msra.mxu1 %v24640_v20  ;;  %v24682_v32 = vld [vmem:[#allocation95_spill] sm:$0xff] }
 0x93a   :  { %10906 = vmatprep.subr.mxu0 %v24677_v49  ;;  %11040 = vmatprep.subr.mxu1 %v24641_v39  ;;  %v24683_v49 = vld [vmem:[#allocation100_spill] sm:$0xff] }
 0x93b   :  { %10909 = vmatpush1.msra.mxu0 %v24678_v47  ;;  %11042 = vmatpush1.msra.mxu1 %v24642_v25  ;;  %v24689_v47 = vld [vmem:[#allocation123_spill] sm:$0xff] }
 0x93c   :  { %10912 = vmatprep.subr.mxu0 %v24679_v22  ;;  %11044 = vmatprep.subr.mxu1 %v24643_v1  ;;  %v24684_v22 = vld [vmem:[#allocation105_spill] sm:$0xff] }
 0x93d   :  { %10915 = vmatpush1.msra.mxu0 %v24680_v10  ;;  %11046 = vmatpush1.msra.mxu1 %v24644_v3  ;;  %v24685_v10 = vld [vmem:[#allocation107_spill] sm:$0xff] }
 0x93e   :  { %10918 = vmatprep.subr.mxu0 %v24681_v21  ;;  %11048 = vmatprep.subr.mxu1 %v24645_v41  ;;  %v24686_v21 = vld [vmem:[#allocation112_spill] sm:$0xff] }
 0x93f   :  { %10921 = vmatpush1.msra.mxu0 %v24682_v32  ;;  %11050 = vmatpush1.msra.mxu1 %v24646_v59  ;;  %v24687_v32 = vld [vmem:[#allocation118_spill] sm:$0xff] }
 0x940   :  { %10924 = vmatprep.subr.mxu0 %v24683_v49  ;;  %11087 = vmatmul.mubr.f32.vlgmr.msra.gmra.mxu1 %v20753_v28  ;;  %v24688_v49 = vld [vmem:[#allocation121_spill] sm:$0xff] }
 0x941   :  { %11262 = vmatprep.subr.mxu1 %v23697_v46  ;;  %10927 = vmatpush1.msra.mxu0 %v24684_v22  ;;  %v24690_v22 = vld [vmem:[#allocation124_spill] sm:$0xff] }
 0x942   :  { %11264 = vmatpush1.msra.mxu1 %v23589_v5  ;;  %10930 = vmatprep.subr.mxu0 %v24685_v10  ;;  %v24696_v10 = vld [vmem:[#allocation34_spill] sm:$0xff] }
 0x943   :  { %11266 = vmatprep.subr.mxu1 %v23591_v35  ;;  %10933 = vmatpush1.msra.mxu0 %v24686_v21  ;;  %v24691_v21 = vld [vmem:[#allocation11_spill] sm:$0xff] }
 0x944   :  { %11268 = vmatpush1.msra.mxu1 %v23594_v56  ;;  %10936 = vmatprep.subr.mxu0 %v24687_v32  ;;  %v24692_v32 = vld [vmem:[#allocation22_spill] sm:$0xff] }
 0x945   :  { %11270 = vmatprep.subr.mxu1 %v23597_v42  ;;  %10939 = vmatpush1.msra.mxu0 %v24688_v49  ;;  %v24693_v49 = vld [vmem:[#allocation24_spill] sm:$0xff] }
 0x946   :  { %11272 = vmatpush1.msra.mxu1 %v23600_v40  ;;  %10942 = vmatprep.subr.mxu0 %v24689_v47  ;;  %v24694_v47 = vld [vmem:[#allocation28_spill] sm:$0xff] }
 0x947   :  { %11274 = vmatprep.subr.mxu1 %v23602_v26  ;;  %10945 = vmatpush1.msra.mxu0 %v24690_v22  ;;  %v24695_v22 = vld [vmem:[#allocation30_spill] sm:$0xff] }
 0x948   :  { %10978 = vmatprep.mubr.f32.mxu0 %v23179_v16  ;;  %11276 = vmatpush1.msra.mxu1 %v23605_v4 }
 0x949   :  { %10981 = vmatmul.mubr.f32.vlgmr.msra.gmra.mxu0 %v20747_v63  ;;  %11096 = vmatprep.subr.mxu0 %v24691_v21  ;;  %v24697_v21 = vld [vmem:[#allocation35_spill] sm:$0xff] }
 0x94a   :  { %11278 = vmatprep.subr.mxu1 %v23607_v15  ;;  %11100 = vmatpush1.msra.mxu0 %v24692_v32  ;;  %v24698_v32 = vld [vmem:[#allocation41_spill] sm:$0xff] }
 0x94b   :  { %11280 = vmatpush1.msra.mxu1 %v23610_v55  ;;  %11104 = vmatprep.subr.mxu0 %v24693_v49  ;;  %v24699_v49 = vld [vmem:[#allocation46_spill] sm:$0xff] }
 0x94c   :  { %11282 = vmatprep.subr.mxu1 %v23612_v57  ;;  %11108 = vmatpush1.msra.mxu0 %v24694_v47  ;;  %v24700_v47 = vld [vmem:[#allocation50_spill] sm:$0xff] }
 0x94d   :  { %11284 = vmatpush1.msra.mxu1 %v23615_v36  ;;  %11112 = vmatprep.subr.mxu0 %v24695_v22  ;;  %v24701_v22 = vld [vmem:[#allocation51_spill] sm:$0xff] }
 0x94e   :  { %11286 = vmatprep.subr.mxu1 %v23617_v45  ;;  %11116 = vmatpush1.msra.mxu0 %v24696_v10  ;;  %v24702_v10 = vld [vmem:[#allocation57_spill] sm:$0xff] }
 0x94f   :  { %11288 = vmatpush1.msra.mxu1 %v23620_v53  ;;  %11120 = vmatprep.subr.mxu0 %v24697_v21  ;;  %v24703_v21 = vld [vmem:[#allocation63_spill] sm:$0xff] }
 0x950   :  { %11290 = vmatprep.subr.mxu1 %v23622_v14  ;;  %11124 = vmatpush1.msra.mxu0 %v24698_v32  ;;  %v24704_v32 = vld [vmem:[#allocation65_spill] sm:$0xff] }
 0x951   :  { %11292 = vmatpush1.msra.mxu1 %v23624_v24  ;;  %11128 = vmatprep.subr.mxu0 %v24699_v49  ;;  %v24705_v49 = vld [vmem:[#allocation68_spill] sm:$0xff] }
 0x952   :  { %11294 = vmatprep.subr.mxu1 %v23626_v7  ;;  %11132 = vmatpush1.msra.mxu0 %v24700_v47  ;;  %v24706_v47 = vld [vmem:[#allocation74_spill] sm:$0xff] }
 0x953   :  { %11296 = vmatpush1.msra.mxu1 %v23629_v33  ;;  %11136 = vmatprep.subr.mxu0 %v24701_v22  ;;  %v24707_v22 = vld [vmem:[#allocation80_spill] sm:$0xff] }
 0x954   :  { %11298 = vmatprep.subr.mxu1 %v23631_v11  ;;  %11140 = vmatpush1.msra.mxu0 %v24702_v10  ;;  %v24708_v10 = vld [vmem:[#allocation81_spill] sm:$0xff] }
 0x955   :  { %11300 = vmatpush1.msra.mxu1 %v23634_v61  ;;  %11144 = vmatprep.subr.mxu0 %v24703_v21  ;;  %v24709_v21 = vld [vmem:[#allocation82_spill] sm:$0xff] }
 0x956   :  { %11302 = vmatprep.subr.mxu1 %v23636_v54  ;;  %11148 = vmatpush1.msra.mxu0 %v24704_v32  ;;  %v24710_v32 = vld [vmem:[#allocation87_spill] sm:$0xff] }
 0x957   :  { %11304 = vmatpush1.msra.mxu1 %v23638_v18  ;;  %11152 = vmatprep.subr.mxu0 %v24705_v49  ;;  %v24711_v49 = vld [vmem:[#allocation94_spill] sm:$0xff] }
 0x958   :  { %11306 = vmatprep.subr.mxu1 %v24635_v48  ;;  %11156 = vmatpush1.msra.mxu0 %v24706_v47  ;;  %v24712_v47 = vld [vmem:[#allocation97_spill] sm:$0xff]  ;;  %v24787_v48 = vld [vmem:[#allocation183_spill] sm:$0xff] }
 0x959   :  { %11308 = vmatpush1.msra.mxu1 %v24637_v43  ;;  %11160 = vmatprep.subr.mxu0 %v24707_v22  ;;  %v24713_v22 = vld [vmem:[#allocation98_spill] sm:$0xff]  ;;  %v24786_v43 = vld [vmem:[#allocation179_spill] sm:$0xff] }
 0x95a   :  { %11310 = vmatprep.subr.mxu1 %v24639_v29  ;;  %11164 = vmatpush1.msra.mxu0 %v24708_v10  ;;  %v24714_v10 = vld [vmem:[#allocation106_spill] sm:$0xff] }
 0x95b   :  { %11312 = vmatpush1.msra.mxu1 %v24640_v20  ;;  %11168 = vmatprep.subr.mxu0 %v24709_v21  ;;  %v24717_v21 = vld [vmem:[#allocation114_spill] sm:$0xff] }
 0x95c   :  { %11314 = vmatprep.subr.mxu1 %v24641_v39  ;;  %11172 = vmatpush1.msra.mxu0 %v24710_v32  ;;  %v24715_v32 = vld [vmem:[#allocation111_spill] sm:$0xff]  ;;  %v24783_v39 = vld [vmem:[#allocation169_spill] sm:$0xff]  ;;  %v24784_v20 = vld [vmem:[#allocation170_spill] sm:$0xff] }
 0x95d   :  { %11316 = vmatpush1.msra.mxu1 %v24642_v25  ;;  %11176 = vmatprep.subr.mxu0 %v24711_v49  ;;  %v24716_v49 = vld [vmem:[#allocation192_spill] sm:$0xff]  ;;  %v24782_v25 = vld [vmem:[#allocation298_spill] sm:$0xff] }
 0x95e   :  { %11318 = vmatprep.subr.mxu1 %v24643_v1  ;;  %11180 = vmatpush1.msra.mxu0 %v24712_v47  ;;  %v24718_v47 = vld [vmem:[#allocation196_spill] sm:$0xff]  ;;  %v24781_v1 = vld [vmem:[#allocation295_spill] sm:$0xff]  ;;  %v24785_v29 = vld [vmem:[#allocation174_spill] sm:$0xff] }
 0x95f   :  { %11320 = vmatpush1.msra.mxu1 %v24644_v3  ;;  %11184 = vmatprep.subr.mxu0 %v24713_v22  ;;  %v24720_v22 = vld [vmem:[#allocation203_spill] sm:$0xff]  ;;  %v24774_v3 = vld [vmem:[#allocation328_spill] sm:$0xff] }
 0x960   :  { %11322 = vmatprep.subr.mxu1 %v24645_v41  ;;  %11188 = vmatpush1.msra.mxu0 %v24714_v10  ;;  %v24722_v10 = vld [vmem:[#allocation214_spill] sm:$0xff]  ;;  %v24772_v41 = vld [vmem:[#allocation327_spill] sm:$0xff] }
 0x961   :  { %11324 = vmatpush1.msra.mxu1 %v24646_v59  ;;  %11357 = vmatprep.mubr.f32.mxu1 %v23179_v16  ;;  %v24770_v59 = vld [vmem:[#allocation326_spill] sm:$0xff] }
 0x962   :  { %11192 = vmatprep.subr.mxu0 %v24715_v32  ;;  %11359 = vmatmul.mubr.f32.vlgmr.msra.gmra.mxu1 %v20743_v23  ;;  %v24725_v32 = vld [vmem:[#allocation127_spill] sm:$0xff] }
 0x963   :  { %11478 = vmatprep.subr.mxu1 %v24716_v49  ;;  %11196 = vmatpush1.msra.mxu0 %v24717_v21  ;;  %v24727_v49 = vld [vmem:[#allocation129_spill] sm:$0xff] }
 0x964   :  { %11484 = vmatpush1.msra.mxu1 %v24718_v47  ;;  %11200 = vmatprep.subr.mxu0 %v24719_v27  ;;  %v24728_v21 = vld [vmem:[#allocation237_spill] sm:$0xff]  ;;  %v24729_v47 = vld [vmem:[#allocation131_spill] sm:$0xff] }
 0x965   :  { %11490 = vmatprep.subr.mxu1 %v24720_v22  ;;  %11204 = vmatpush1.msra.mxu0 %v24721_v6  ;;  %v24730_v22 = vld [vmem:[#allocation241_spill] sm:$0xff]  ;;  %v24742_v6 = vld [vmem:[#allocation267_spill] sm:$0xff] }
 0x966   :  { %11496 = vmatpush1.msra.mxu1 %v24722_v10  ;;  %11208 = vmatprep.subr.mxu0 %v24723_v44  ;;  %v24731_v44 = vld [vmem:[#allocation245_spill] sm:$0xff]  ;;  %v24740_v10 = vld [vmem:[#allocation263_spill] sm:$0xff] }
 0x967   :  { %11502 = vmatprep.subr.mxu1 %v24724_v37  ;;  %11212 = vmatpush1.msra.mxu0 %v24725_v32  ;;  %v24732_v32 = vld [vmem:[#allocation249_spill] sm:$0xff]  ;;  %v24738_v37 = vld [vmem:[#allocation258_spill] sm:$0xff] }
 0x968   :  { %11508 = vmatpush1.msra.mxu1 %v24726_v34  ;;  %11216 = vmatprep.subr.mxu0 %v24727_v49  ;;  %v24733_v49 = vld [vmem:[#allocation252_spill] sm:$0xff]  ;;  %v24744_v27 = vld [vmem:[#allocation269_spill] sm:$0xff] }
 0x969   :  { %11514 = vmatprep.subr.mxu1 %v24728_v21  ;;  %11220 = vmatpush1.msra.mxu0 %v24729_v47  ;;  %v24734_v47 = vld [vmem:[#allocation253_spill] sm:$0xff]  ;;  %v24735_v21 = vld [vmem:[#allocation176_spill] sm:$0xff] }
 0x96a   :  { %11253 = vmatprep.mubr.f32.mxu0 %v23179_v16  ;;  %11520 = vmatpush1.msra.mxu1 %v24730_v22  ;;  %v24736_v22 = vld [vmem:[#allocation254_spill] sm:$0xff]  ;;  %v24737_v34 = vld [vmem:[#allocation180_spill] sm:$0xff] }
 0x96b   :  { %11255 = vmatmul.mubr.f32.vlgmr.msra.gmra.mxu0 %v20743_v23  ;;  %11366 = vmatprep.subr.mxu0 %v23745_v17 }
 0x96c   :  { %11526 = vmatprep.subr.mxu1 %v24731_v44  ;;  %11368 = vmatpush1.msra.mxu0 %v23747_v38  ;;  %v24739_v44 = vld [vmem:[#allocation184_spill] sm:$0xff] }
 0x96d   :  { %11532 = vmatpush1.msra.mxu1 %v24732_v32  ;;  %11370 = vmatprep.subr.mxu0 %v23749_v30  ;;  %v24741_v32 = vld [vmem:[#allocation188_spill] sm:$0xff] }
 0x96e   :  { %11538 = vmatprep.subr.mxu1 %v24733_v49  ;;  %11372 = vmatpush1.msra.mxu0 %v24249_v31  ;;  %v24743_v49 = vld [vmem:[#allocation191_spill] sm:$0xff] }
 0x96f   :  { %11544 = vmatpush1.msra.mxu1 %v24734_v47  ;;  %11374 = vmatprep.subr.mxu0 %v24735_v21  ;;  %v24745_v47 = vld [vmem:[#allocation195_spill] sm:$0xff] }
 0x970   :  { %11550 = vmatprep.subr.mxu1 %v24736_v22  ;;  %11376 = vmatpush1.msra.mxu0 %v24737_v34  ;;  %v24747_v22 = vld [vmem:[#allocation197_spill] sm:$0xff] }
 0x971   :  { %11556 = vmatpush1.msra.mxu1 %v24738_v37  ;;  %11378 = vmatprep.subr.mxu0 %v24739_v44  ;;  %v24749_v37 = vld [vmem:[#allocation198_spill] sm:$0xff] }
 0x972   :  { %11562 = vmatprep.subr.mxu1 %v24740_v10  ;;  %11380 = vmatpush1.msra.mxu0 %v24741_v32  ;;  %v24751_v10 = vld [vmem:[#allocation202_spill] sm:$0xff] }
 0x973   :  { %11568 = vmatpush1.msra.mxu1 %v24742_v6  ;;  %11382 = vmatprep.subr.mxu0 %v24743_v49  ;;  %v24753_v6 = vld [vmem:[#allocation207_spill] sm:$0xff] }
 0x974   :  { %11574 = vmatprep.subr.mxu1 %v24744_v27  ;;  %11384 = vmatpush1.msra.mxu0 %v24745_v47  ;;  %v24755_v27 = vld [vmem:[#allocation210_spill] sm:$0xff] }
 0x975   :  { %11580 = vmatpush1.msra.mxu1 %v24746_v0  ;;  %11386 = vmatprep.subr.mxu0 %v24747_v22  ;;  %v24757_v0 = vld [vmem:[#allocation213_spill] sm:$0xff] }
 0x976   :  { %11586 = vmatprep.subr.mxu1 %v24748_v19  ;;  %11388 = vmatpush1.msra.mxu0 %v24749_v37  ;;  %v24759_v19 = vld [vmem:[#allocation218_spill] sm:$0xff] }
 0x977   :  { %11592 = vmatpush1.msra.mxu1 %v24750_v50  ;;  %11390 = vmatprep.subr.mxu0 %v24751_v10  ;;  %v24761_v50 = vld [vmem:[#allocation231_spill] sm:$0xff] }
 0x978   :  { %11598 = vmatprep.subr.mxu1 %v24752_v52  ;;  %11392 = vmatpush1.msra.mxu0 %v24753_v6  ;;  %v24763_v52 = vld [vmem:[#allocation239_spill] sm:$0xff] }
 0x979   :  { %11604 = vmatpush1.msra.mxu1 %v24754_v2  ;;  %11394 = vmatprep.subr.mxu0 %v24755_v27  ;;  %v24765_v2 = vld [vmem:[#allocation247_spill] sm:$0xff] }
 0x97a   :  { %11610 = vmatprep.subr.mxu1 %v24756_v62  ;;  %11396 = vmatpush1.msra.mxu0 %v24757_v0  ;;  %v24767_v62 = vld [vmem:[#allocation251_spill] sm:$0xff] }
 0x97b   :  { %11616 = vmatpush1.msra.mxu1 %v24758_v13  ;;  %11398 = vmatprep.subr.mxu0 %v24759_v19  ;;  %v24769_v13 = vld [vmem:[#allocation256_spill] sm:$0xff] }
 0x97c   :  { %11622 = vmatprep.subr.mxu1 %v24760_v58  ;;  %11400 = vmatpush1.msra.mxu0 %v24761_v50  ;;  %v24771_v58 = vld [vmem:[#allocation261_spill] sm:$0xff] }
 0x97d   :  { %11628 = vmatpush1.msra.mxu1 %v24762_v12  ;;  %11402 = vmatprep.subr.mxu0 %v24763_v52  ;;  %v24773_v12 = vld [vmem:[#allocation266_spill] sm:$0xff] }
 0x97e   :  { %11634 = vmatprep.subr.mxu1 %v24764_v51  ;;  %11404 = vmatpush1.msra.mxu0 %v24765_v2  ;;  %v24775_v51 = vld [vmem:[#allocation268_spill] sm:$0xff] }
 0x97f   :  { %11640 = vmatpush1.msra.mxu1 %v24766_v60  ;;  %11406 = vmatprep.subr.mxu0 %v24767_v62  ;;  %v24780_v60 = vld [vmem:[#allocation287_spill] sm:$0xff] }
 0x980   :  { %11646 = vmatprep.subr.mxu1 %v24768_v9  ;;  %11408 = vmatpush1.msra.mxu0 %v24769_v13  ;;  %v24776_v9 = vld [vmem:[#allocation271_spill] sm:$0xff] }
 0x981   :  { %11652 = vmatpush1.msra.mxu1 %v24770_v59  ;;  %11410 = vmatprep.subr.mxu0 %v24771_v58  ;;  %v24777_v59 = vld [vmem:[#allocation276_spill] sm:$0xff] }
 0x982   :  { %11658 = vmatprep.subr.mxu1 %v24772_v41  ;;  %11412 = vmatpush1.msra.mxu0 %v24773_v12  ;;  %v24778_v41 = vld [vmem:[#allocation280_spill] sm:$0xff] }
 0x983   :  { %11664 = vmatpush1.msra.mxu1 %v24774_v3  ;;  %11697 = vmatprep.mubr.f32.mxu1 %v23179_v16  ;;  %v24779_v3 = vld [vmem:[#allocation282_spill] sm:$0xff] }
 0x984   :  { %11414 = vmatprep.subr.mxu0 %v24775_v51  ;;  %11699 = vmatmul.mubr.f32.vlgmr.msra.gmra.mxu1 %v20743_v23 }
 0x985   :  { %11843 = vmatprep.subr.mxu1 %v23745_v17  ;;  %11416 = vmatpush1.msra.mxu0 %v24776_v9 }
 0x986   :  { %11845 = vmatpush1.msra.mxu1 %v23747_v38  ;;  %11418 = vmatprep.subr.mxu0 %v24777_v59 }
 0x987   :  { %11847 = vmatprep.subr.mxu1 %v23749_v30  ;;  %11420 = vmatpush1.msra.mxu0 %v24778_v41 }
 0x988   :  { %11849 = vmatpush1.msra.mxu1 %v24249_v31  ;;  %11422 = vmatprep.subr.mxu0 %v24779_v3 }
 0x989   :  { %11851 = vmatprep.subr.mxu1 %v24735_v21  ;;  %11424 = vmatpush1.msra.mxu0 %v24780_v60 }
 0x98a   :  { %11853 = vmatpush1.msra.mxu1 %v24737_v34  ;;  %11426 = vmatprep.subr.mxu0 %v24781_v1 }
 0x98b   :  { %11855 = vmatprep.subr.mxu1 %v24739_v44  ;;  %11428 = vmatpush1.msra.mxu0 %v24782_v25 }
 0x98c   :  { %11461 = vmatprep.mubr.f32.mxu0 %v23179_v16  ;;  %11857 = vmatpush1.msra.mxu1 %v24741_v32 }
 0x98d   :  { %11467 = vmatmul.mubr.f32.vlgmr.msra.gmra.mxu0 %v20761_v8  ;;  %11707 = vmatprep.subr.mxu0 %v24783_v39  ;;  %v24788_v8 = vld [vmem:[#allocation187_spill] sm:$0xff]  ;;  %v24789_v39 = vld [vmem:[#allocation194_spill] sm:$0xff] }
 0x98e   :  { %11859 = vmatprep.subr.mxu1 %v24743_v49  ;;  %11710 = vmatpush1.msra.mxu0 %v24784_v20  ;;  %v24790_v20 = vld [vmem:[#allocation201_spill] sm:$0xff] }
 0x98f   :  { %11861 = vmatpush1.msra.mxu1 %v24745_v47  ;;  %11713 = vmatprep.subr.mxu0 %v24785_v29  ;;  %v24791_v29 = vld [vmem:[#allocation206_spill] sm:$0xff] }
 0x990   :  { %11863 = vmatprep.subr.mxu1 %v24747_v22  ;;  %11716 = vmatpush1.msra.mxu0 %v24786_v43  ;;  %v24792_v43 = vld [vmem:[#allocation209_spill] sm:$0xff] }
 0x991   :  { %11865 = vmatpush1.msra.mxu1 %v24749_v37  ;;  %11719 = vmatprep.subr.mxu0 %v24787_v48  ;;  %v24793_v48 = vld [vmem:[#allocation211_spill] sm:$0xff] }
 0x992   :  { %11867 = vmatprep.subr.mxu1 %v24751_v10  ;;  %11722 = vmatpush1.msra.mxu0 %v24788_v8  ;;  %v24794_v8 = vld [vmem:[#allocation212_spill] sm:$0xff] }
 0x993   :  { %11869 = vmatpush1.msra.mxu1 %v24753_v6  ;;  %11725 = vmatprep.subr.mxu0 %v24789_v39  ;;  %v24795_v39 = vld [vmem:[#allocation217_spill] sm:$0xff] }
 0x994   :  { %11871 = vmatprep.subr.mxu1 %v24755_v27  ;;  %11728 = vmatpush1.msra.mxu0 %v24790_v20  ;;  %v24796_v20 = vld [vmem:[#allocation222_spill] sm:$0xff] }
 0x995   :  { %11873 = vmatpush1.msra.mxu1 %v24757_v0  ;;  %11731 = vmatprep.subr.mxu0 %v24791_v29  ;;  %v24797_v29 = vld [vmem:[#allocation225_spill] sm:$0xff] }
 0x996   :  { %11875 = vmatprep.subr.mxu1 %v24759_v19  ;;  %11734 = vmatpush1.msra.mxu0 %v24792_v43  ;;  %v24798_v43 = vld [vmem:[#allocation228_spill] sm:$0xff] }
 0x997   :  { %11877 = vmatpush1.msra.mxu1 %v24761_v50  ;;  %11737 = vmatprep.subr.mxu0 %v24793_v48  ;;  %v24799_v48 = vld [vmem:[#allocation232_spill] sm:$0xff] }
 0x998   :  { %11879 = vmatprep.subr.mxu1 %v24763_v52  ;;  %11740 = vmatpush1.msra.mxu0 %v24794_v8  ;;  %v24800_v8 = vld [vmem:[#allocation243_spill] sm:$0xff] }
 0x999   :  { %11881 = vmatpush1.msra.mxu1 %v24765_v2  ;;  %11743 = vmatprep.subr.mxu0 %v24795_v39  ;;  %v24801_v39 = vld [vmem:[#allocation250_spill] sm:$0xff] }
 0x99a   :  { %11883 = vmatprep.subr.mxu1 %v24767_v62  ;;  %11746 = vmatpush1.msra.mxu0 %v24796_v20  ;;  %v24802_v20 = vld [vmem:[#allocation259_spill] sm:$0xff] }
 0x99b   :  { %11885 = vmatpush1.msra.mxu1 %v24769_v13  ;;  %11749 = vmatprep.subr.mxu0 %v24797_v29  ;;  %v24803_v29 = vld [vmem:[#allocation265_spill] sm:$0xff] }
 0x99c   :  { %11887 = vmatprep.subr.mxu1 %v24771_v58  ;;  %11752 = vmatpush1.msra.mxu0 %v24798_v43  ;;  %v24804_v43 = vld [vmem:[#allocation270_spill] sm:$0xff] }
 0x99d   :  { %11889 = vmatpush1.msra.mxu1 %v24773_v12  ;;  %11755 = vmatprep.subr.mxu0 %v24799_v48  ;;  %v24805_v48 = vld [vmem:[#allocation274_spill] sm:$0xff] }
 0x99e   :  { %11891 = vmatprep.subr.mxu1 %v24775_v51  ;;  %11758 = vmatpush1.msra.mxu0 %v24800_v8  ;;  %v24806_v8 = vld [vmem:[#allocation279_spill] sm:$0xff] }
 0x99f   :  { %11893 = vmatpush1.msra.mxu1 %v24776_v9  ;;  %11761 = vmatprep.subr.mxu0 %v24801_v39  ;;  %v24846_v39 = vld [vmem:[#allocation40_spill] sm:$0xff] }
 0x9a0   :  { %11895 = vmatprep.subr.mxu1 %v24777_v59  ;;  %11764 = vmatpush1.msra.mxu0 %v24802_v20  ;;  %v24807_v20 = vld [vmem:[#allocation281_spill] sm:$0xff] }
 0x9a1   :  { %11897 = vmatpush1.msra.mxu1 %v24778_v41  ;;  %11767 = vmatprep.subr.mxu0 %v24803_v29  ;;  %v24808_v29 = vld [vmem:[#allocation286_spill] sm:$0xff] }
 0x9a2   :  { %11899 = vmatprep.subr.mxu1 %v24779_v3  ;;  %11770 = vmatpush1.msra.mxu0 %v24804_v43  ;;  %v24809_v43 = vld [vmem:[#allocation290_spill] sm:$0xff] }
 0x9a3   :  { %11901 = vmatpush1.msra.mxu1 %v24780_v60  ;;  %11773 = vmatprep.subr.mxu0 %v24805_v48  ;;  %v24810_v48 = vld [vmem:[#allocation294_spill] sm:$0xff] }
 0x9a4   :  { %11903 = vmatprep.subr.mxu1 %v24781_v1  ;;  %11776 = vmatpush1.msra.mxu0 %v24806_v8  ;;  %v24811_v8 = vld [vmem:[#allocation297_spill] sm:$0xff] }
 0x9a5   :  { %11905 = vmatpush1.msra.mxu1 %v24782_v25  ;;  %11938 = vmatprep.mubr.f32.mxu1 %v23179_v16 }
 0x9a6   :  { %11779 = vmatprep.subr.mxu0 %v24807_v20  ;;  %11942 = vmatmul.mubr.f32.vlgmr.msra.gmra.mxu1 %v20753_v28  ;;  %v24812_v20 = vld [vmem:[#allocation301_spill] sm:$0xff]  ;;  %v24813_v28 = vld [vmem:[#allocation308_spill] sm:$0xff] }
 0x9a7   :  { %12117 = vmatprep.subr.mxu1 %v23745_v17  ;;  %11782 = vmatpush1.msra.mxu0 %v24808_v29  ;;  %v24814_v29 = vld [vmem:[#allocation310_spill] sm:$0xff] }
 0x9a8   :  { %12119 = vmatpush1.msra.mxu1 %v23747_v38  ;;  %11785 = vmatprep.subr.mxu0 %v24809_v43  ;;  %v24844_v43 = vld [vmem:[#allocation38_spill] sm:$0xff] }
 0x9a9   :  { %12121 = vmatprep.subr.mxu1 %v23749_v30  ;;  %11788 = vmatpush1.msra.mxu0 %v24810_v48  ;;  %v24815_v48 = vld [vmem:[#allocation175_spill] sm:$0xff] }
 0x9aa   :  { %12123 = vmatpush1.msra.mxu1 %v24249_v31  ;;  %11791 = vmatprep.subr.mxu0 %v24811_v8  ;;  %v24816_v8 = vld [vmem:[#allocation177_spill] sm:$0xff] }
 0x9ab   :  { %12125 = vmatprep.subr.mxu1 %v24735_v21  ;;  %11794 = vmatpush1.msra.mxu0 %v24812_v20  ;;  %v24817_v20 = vld [vmem:[#allocation182_spill] sm:$0xff] }
 0x9ac   :  { %12127 = vmatpush1.msra.mxu1 %v24737_v34  ;;  %11797 = vmatprep.subr.mxu0 %v24813_v28  ;;  %v24818_v28 = vld [vmem:[#allocation186_spill] sm:$0xff]  ;;  %v24894_v34 = vld [vmem:[#allocation167_spill] sm:$0xff] }
 0x9ad   :  { %12129 = vmatprep.subr.mxu1 %v24739_v44  ;;  %11800 = vmatpush1.msra.mxu0 %v24814_v29  ;;  %v24819_v29 = vld [vmem:[#allocation193_spill] sm:$0xff] }
 0x9ae   :  { %11833 = vmatprep.mubr.f32.mxu0 %v23179_v16  ;;  %12131 = vmatpush1.msra.mxu1 %v24741_v32 }
 0x9af   :  { %11836 = vmatmul.mubr.f32.vlgmr.msra.gmra.mxu0 %v20747_v63  ;;  %11951 = vmatprep.subr.mxu0 %v24815_v48  ;;  %v24820_v63 = vld [vmem:[#allocation199_spill] sm:$0xff]  ;;  %v24821_v48 = vld [vmem:[#allocation208_spill] sm:$0xff] }
 0x9b0   :  { %12133 = vmatprep.subr.mxu1 %v24743_v49  ;;  %11955 = vmatpush1.msra.mxu0 %v24816_v8  ;;  %v24822_v8 = vld [vmem:[#allocation215_spill] sm:$0xff] }
 0x9b1   :  { %12135 = vmatpush1.msra.mxu1 %v24745_v47  ;;  %11959 = vmatprep.subr.mxu0 %v24817_v20  ;;  %v24823_v20 = vld [vmem:[#allocation219_spill] sm:$0xff] }
 0x9b2   :  { %12137 = vmatprep.subr.mxu1 %v24747_v22  ;;  %11963 = vmatpush1.msra.mxu0 %v24818_v28  ;;  %v24824_v28 = vld [vmem:[#allocation224_spill] sm:$0xff] }
 0x9b3   :  { %12139 = vmatpush1.msra.mxu1 %v24749_v37  ;;  %11967 = vmatprep.subr.mxu0 %v24819_v29  ;;  %v24825_v29 = vld [vmem:[#allocation226_spill] sm:$0xff] }
 0x9b4   :  { %12141 = vmatprep.subr.mxu1 %v24751_v10  ;;  %11971 = vmatpush1.msra.mxu0 %v24820_v63  ;;  %v24826_v63 = vld [vmem:[#allocation227_spill] sm:$0xff]  ;;  %v24893_v10 = vld [vmem:[#allocation166_spill] sm:$0xff] }
 0x9b5   :  { %12143 = vmatpush1.msra.mxu1 %v24753_v6  ;;  %11975 = vmatprep.subr.mxu0 %v24821_v48  ;;  %v24827_v48 = vld [vmem:[#allocation229_spill] sm:$0xff] }
 0x9b6   :  { %12145 = vmatprep.subr.mxu1 %v24755_v27  ;;  %11979 = vmatpush1.msra.mxu0 %v24822_v8  ;;  %v24828_v8 = vld [vmem:[#allocation235_spill] sm:$0xff] }
 0x9b7   :  { %12147 = vmatpush1.msra.mxu1 %v24757_v0  ;;  %11983 = vmatprep.subr.mxu0 %v24823_v20  ;;  %v24829_v20 = vld [vmem:[#allocation238_spill] sm:$0xff]  ;;  %v24892_v0 = vld [vmem:[#allocation149_spill] sm:$0xff] }
 0x9b8   :  { %12149 = vmatprep.subr.mxu1 %v24759_v19  ;;  %11987 = vmatpush1.msra.mxu0 %v24824_v28  ;;  %v24830_v28 = vld [vmem:[#allocation240_spill] sm:$0xff] }
 0x9b9   :  { %12151 = vmatpush1.msra.mxu1 %v24761_v50  ;;  %11991 = vmatprep.subr.mxu0 %v24825_v29  ;;  %v24831_v29 = vld [vmem:[#allocation242_spill] sm:$0xff] }
 0x9ba   :  { %12153 = vmatprep.subr.mxu1 %v24763_v52  ;;  %11995 = vmatpush1.msra.mxu0 %v24826_v63  ;;  %v24832_v63 = vld [vmem:[#allocation255_spill] sm:$0xff] }
 0x9bb   :  { %12155 = vmatpush1.msra.mxu1 %v24765_v2  ;;  %11999 = vmatprep.subr.mxu0 %v24827_v48  ;;  %v24833_v48 = vld [vmem:[#allocation264_spill] sm:$0xff] }
 0x9bc   :  { %12157 = vmatprep.subr.mxu1 %v24767_v62  ;;  %12003 = vmatpush1.msra.mxu0 %v24828_v8  ;;  %v24834_v8 = vld [vmem:[#allocation273_spill] sm:$0xff] }
 0x9bd   :  { %12159 = vmatpush1.msra.mxu1 %v24769_v13  ;;  %12007 = vmatprep.subr.mxu0 %v24829_v20  ;;  %v24835_v20 = vld [vmem:[#allocation278_spill] sm:$0xff] }
 0x9be   :  { %12161 = vmatprep.subr.mxu1 %v24771_v58  ;;  %12011 = vmatpush1.msra.mxu0 %v24830_v28  ;;  %v24836_v28 = vld [vmem:[#allocation285_spill] sm:$0xff] }
 0x9bf   :  { %12163 = vmatpush1.msra.mxu1 %v24773_v12  ;;  %12015 = vmatprep.subr.mxu0 %v24831_v29  ;;  %v24837_v29 = vld [vmem:[#allocation289_spill] sm:$0xff] }
 0x9c0   :  { %12165 = vmatprep.subr.mxu1 %v24775_v51  ;;  %12019 = vmatpush1.msra.mxu0 %v24832_v63  ;;  %v24838_v63 = vld [vmem:[#allocation293_spill] sm:$0xff]  ;;  %v24891_v51 = vld [vmem:[#allocation148_spill] sm:$0xff] }
 0x9c1   :  { %12167 = vmatpush1.msra.mxu1 %v24776_v9  ;;  %12023 = vmatprep.subr.mxu0 %v24833_v48  ;;  %v24842_v48 = vld [vmem:[#allocation12_spill] sm:$0xff]  ;;  %v24890_v9 = vld [vmem:[#allocation19_spill] sm:$0xff] }
 0x9c2   :  { %12169 = vmatprep.subr.mxu1 %v24777_v59  ;;  %12027 = vmatpush1.msra.mxu0 %v24834_v8  ;;  %v24839_v8 = vld [vmem:[#allocation296_spill] sm:$0xff]  ;;  %v241_v12 = vadd.f32 %v24891_v51, %v24890_v9 }
 0x9c3   :  { %12171 = vmatpush1.msra.mxu1 %v24778_v41  ;;  %12031 = vmatprep.subr.mxu0 %v24835_v20  ;;  %v24840_v20 = vld [vmem:[#allocation300_spill] sm:$0xff] }
 0x9c4   :  { %12173 = vmatprep.subr.mxu1 %v24779_v3  ;;  %12035 = vmatpush1.msra.mxu0 %v24836_v28  ;;  %v24841_v28 = vld [vmem:[#allocation304_spill] sm:$0xff]  ;;  %v380_v27 = vadd.f32 %v24892_v0, %v241_v12 }
 0x9c5   :  { %12175 = vmatpush1.msra.mxu1 %v24780_v60  ;;  %12039 = vmatprep.subr.mxu0 %v24837_v29  ;;  %v24843_v29 = vld [vmem:[#allocation307_spill] sm:$0xff]  ;;  %v24897_v12 = vld [vmem:[#allocation260_spill] sm:$0xff] }
 0x9c6   :  { %12177 = vmatprep.subr.mxu1 %v24781_v1  ;;  %12043 = vmatpush1.msra.mxu0 %v24838_v63  ;;  %v24845_v63 = vld [vmem:[#allocation309_spill] sm:$0xff]  ;;  %v24851_v60 = vld [vmem:[#allocation319_spill] sm:$0xff]  ;;  %v511_v37 = vadd.f32 %v24893_v10, %v380_v27 }
 0x9c7   :  { %12179 = vmatpush1.msra.mxu1 %v24782_v25  ;;  %12212 = vmatprep.mubr.f32.mxu1 %v23179_v16  ;;  %v24847_v25 = vld [vmem:[#allocation312_spill] sm:$0xff]  ;;  %v24849_v1 = vld [vmem:[#allocation317_spill] sm:$0xff] }
 0x9c8   :  { %12047 = vmatprep.subr.mxu0 %v24839_v8  ;;  %12214 = vmatmul.mubr.f32.vlgmr.msra.gmra.mxu1 %v20743_v23  ;;  %v24848_v8 = vld [vmem:[#allocation45_spill] sm:$0xff]  ;;  %v648_v51 = vadd.f32 %v24894_v34, %v511_v37 }
 0x9c9   :  { %12051 = vmatpush1.msra.mxu0 %v24840_v20  ;;  %12108 = vmatprep.mubr.f32.mxu0 %v23179_v16  ;;  %v24850_v20 = vld [vmem:[#allocation49_spill] sm:$0xff] }
 0x9ca   :  { %12055 = vmatprep.subr.mxu0 %v24841_v28  ;;  %12365 = vmatprep.subr.mxu1 %v24842_v48  ;;  %v24852_v28 = vld [vmem:[#allocation54_spill] sm:$0xff] }
 0x9cb   :  { %12059 = vmatpush1.msra.mxu0 %v24843_v29  ;;  %12371 = vmatpush1.msra.mxu1 %v24844_v43  ;;  %v24853_v29 = vld [vmem:[#allocation55_spill] sm:$0xff]  ;;  %v24854_v43 = vld [vmem:[#allocation62_spill] sm:$0xff] }
 0x9cc   :  { %12063 = vmatprep.subr.mxu0 %v24845_v63  ;;  %12377 = vmatprep.subr.mxu1 %v24846_v39  ;;  %v24855_v39 = vld [vmem:[#allocation67_spill] sm:$0xff]  ;;  %v24889_v63 = vld [vmem:[#allocation10_spill] sm:$0xff] }
 0x9cd   :  { %12067 = vmatpush1.msra.mxu0 %v24847_v25  ;;  %12383 = vmatpush1.msra.mxu1 %v24848_v8  ;;  %v24856_v8 = vld [vmem:[#allocation70_spill] sm:$0xff]  ;;  %v24887_v25 = vld [vmem:[#allocation113_spill] sm:$0xff] }
 0x9ce   :  { %12071 = vmatprep.subr.mxu0 %v24849_v1  ;;  %12389 = vmatprep.subr.mxu1 %v24850_v20  ;;  %v24857_v20 = vld [vmem:[#allocation73_spill] sm:$0xff]  ;;  %v24885_v1 = vld [vmem:[#allocation108_spill] sm:$0xff] }
 0x9cf   :  { %12075 = vmatpush1.msra.mxu0 %v24851_v60  ;;  %12395 = vmatpush1.msra.mxu1 %v24852_v28  ;;  %v24858_v28 = vld [vmem:[#allocation79_spill] sm:$0xff]  ;;  %v24880_v60 = vld [vmem:[#allocation141_spill] sm:$0xff] }
 0x9d0   :  { %12110 = vmatmul.mubr.f32.vlgmr.msra.gmra.mxu0 %v20743_v23  ;;  %12401 = vmatprep.subr.mxu1 %v24853_v29  ;;  %v24859_v23 = vld [vmem:[#allocation83_spill] sm:$0xff]  ;;  %v24878_v29 = vld [vmem:[#allocation140_spill] sm:$0xff] }
 0x9d1   :  { %12407 = vmatpush1.msra.mxu1 %v24854_v43  ;;  %12253 = vmatprep.subr.mxu0 %v23697_v46  ;;  %v24860_v43 = vld [vmem:[#allocation86_spill] sm:$0xff] }
 0x9d2   :  { %12413 = vmatprep.subr.mxu1 %v24855_v39  ;;  %12255 = vmatpush1.msra.mxu0 %v23589_v5  ;;  %v24861_v39 = vld [vmem:[#allocation90_spill] sm:$0xff] }
 0x9d3   :  { %12419 = vmatpush1.msra.mxu1 %v24856_v8  ;;  %12257 = vmatprep.subr.mxu0 %v23591_v35  ;;  %v24862_v8 = vld [vmem:[#allocation93_spill] sm:$0xff] }
 0x9d4   :  { %12425 = vmatprep.subr.mxu1 %v24857_v20  ;;  %12259 = vmatpush1.msra.mxu0 %v23594_v56  ;;  %v24863_v20 = vld [vmem:[#allocation99_spill] sm:$0xff] }
 0x9d5   :  { %12431 = vmatpush1.msra.mxu1 %v24858_v28  ;;  %12261 = vmatprep.subr.mxu0 %v23597_v42  ;;  %v24864_v28 = vld [vmem:[#allocation103_spill] sm:$0xff] }
 0x9d6   :  { %12437 = vmatprep.subr.mxu1 %v24859_v23  ;;  %12263 = vmatpush1.msra.mxu0 %v23600_v40  ;;  %v24865_v23 = vld [vmem:[#allocation104_spill] sm:$0xff] }
 0x9d7   :  { %12443 = vmatpush1.msra.mxu1 %v24860_v43  ;;  %12265 = vmatprep.subr.mxu0 %v23602_v26  ;;  %v24866_v43 = vld [vmem:[#allocation109_spill] sm:$0xff] }
 0x9d8   :  { %12449 = vmatprep.subr.mxu1 %v24861_v39  ;;  %12267 = vmatpush1.msra.mxu0 %v23605_v4  ;;  %v24867_v39 = vld [vmem:[#allocation116_spill] sm:$0xff] }
 0x9d9   :  { %12455 = vmatpush1.msra.mxu1 %v24862_v8  ;;  %12269 = vmatprep.subr.mxu0 %v23607_v15  ;;  %v24868_v8 = vld [vmem:[#allocation119_spill] sm:$0xff] }
 0x9da   :  { %12461 = vmatprep.subr.mxu1 %v24863_v20  ;;  %12271 = vmatpush1.msra.mxu0 %v23610_v55  ;;  %v24869_v20 = vld [vmem:[#allocation120_spill] sm:$0xff] }
 0x9db   :  { %12467 = vmatpush1.msra.mxu1 %v24864_v28  ;;  %12273 = vmatprep.subr.mxu0 %v23612_v57  ;;  %v24870_v28 = vld [vmem:[#allocation125_spill] sm:$0xff] }
 0x9dc   :  { %12473 = vmatprep.subr.mxu1 %v24865_v23  ;;  %12275 = vmatpush1.msra.mxu0 %v23615_v36  ;;  %v24871_v23 = vld [vmem:[#allocation128_spill] sm:$0xff] }
 0x9dd   :  { %12479 = vmatpush1.msra.mxu1 %v24866_v43  ;;  %12277 = vmatprep.subr.mxu0 %v23617_v45  ;;  %v24872_v43 = vld [vmem:[#allocation130_spill] sm:$0xff] }
 0x9de   :  { %12485 = vmatprep.subr.mxu1 %v24867_v39  ;;  %12279 = vmatpush1.msra.mxu0 %v23620_v53  ;;  %v24873_v39 = vld [vmem:[#allocation133_spill] sm:$0xff] }
 0x9df   :  { %12491 = vmatpush1.msra.mxu1 %v24868_v8  ;;  %12281 = vmatprep.subr.mxu0 %v23622_v14  ;;  %v24874_v8 = vld [vmem:[#allocation135_spill] sm:$0xff] }
 0x9e0   :  { %12497 = vmatprep.subr.mxu1 %v24869_v20  ;;  %12283 = vmatpush1.msra.mxu0 %v23624_v24  ;;  %v24875_v20 = vld [vmem:[#allocation137_spill] sm:$0xff]  ;;  %v10845_v41 = vpop.f32.mrf.mxu1 }
 0x9e1   :  { %12503 = vmatpush1.msra.mxu1 %v24870_v28  ;;  %12285 = vmatprep.subr.mxu0 %v23626_v7  ;;  %v24876_v28 = vld [vmem:[#allocation139_spill] sm:$0xff] }
 0x9e2   :  { %12509 = vmatprep.subr.mxu1 %v24871_v23  ;;  %12287 = vmatpush1.msra.mxu0 %v23629_v33  ;;  %v24877_v23 = vld [vmem:[#allocation78_spill] sm:$0xff]  ;;  %v10847_v58 = vpop.f32.mrf.mxu1 }
 0x9e3   :  { %12515 = vmatpush1.msra.mxu1 %v24872_v43  ;;  %12289 = vmatprep.subr.mxu0 %v23631_v11  ;;  %v24879_v43 = vld [vmem:[#allocation85_spill] sm:$0xff] }
 0x9e4   :  { %12521 = vmatprep.subr.mxu1 %v24873_v39  ;;  %12291 = vmatpush1.msra.mxu0 %v23634_v61  ;;  %v24881_v39 = vld [vmem:[#allocation91_spill] sm:$0xff] }
 0x9e5   :  { %12527 = vmatpush1.msra.mxu1 %v24874_v8  ;;  %12293 = vmatprep.subr.mxu0 %v23636_v54  ;;  %v24882_v8 = vld [vmem:[#allocation92_spill] sm:$0xff] }
 0x9e6   :  { %12533 = vmatprep.subr.mxu1 %v24875_v20  ;;  %12295 = vmatpush1.msra.mxu0 %v23638_v18  ;;  %v24883_v20 = vld [vmem:[#allocation96_spill] sm:$0xff] }
 0x9e7   :  { %12539 = vmatpush1.msra.mxu1 %v24876_v28  ;;  %12297 = vmatprep.subr.mxu0 %v24877_v23  ;;  %v24884_v28 = vld [vmem:[#allocation101_spill] sm:$0xff] }
 0x9e8   :  { %12545 = vmatprep.subr.mxu1 %v24878_v29  ;;  %12299 = vmatpush1.msra.mxu0 %v24879_v43  ;;  %v24886_v29 = vld [vmem:[#allocation110_spill] sm:$0xff]  ;;  %v10613_v48 = vpop.f32.mrf.mxu0 }
 0x9e9   :  { %12551 = vmatpush1.msra.mxu1 %v24880_v60  ;;  %12301 = vmatprep.subr.mxu0 %v24881_v39  ;;  %v24888_v60 = vld [vmem:[#allocation115_spill] sm:$0xff]  ;;  %v10846_v13 = vadd.f32 %v10845_v41, %v10613_v48  ;;  %v24895_v41 = vld [vmem:[#allocation257_spill] sm:$0xff] }
 0x9ea   :  { %12584 = vmatprep.mubr.f32.mxu1 %v23179_v16  ;;  %12730 = vmatprep.subr.mxu1 %v23697_v46  ;;  %v10615_v3 = vpop.f32.mrf.mxu0  ;;  %v779_v48 = vadd.f32 %v24895_v41, %v648_v51 }
 0x9eb   :  { %12303 = vmatpush1.msra.mxu0 %v24882_v8  ;;  %12348 = vmatprep.mubr.f32.mxu0 %v23179_v16  ;;  %v10848_v2 = vadd.f32 %v10847_v58, %v10615_v3 }
 0x9ec   :  { %12305 = vmatprep.subr.mxu0 %v24883_v20 }
 0x9ed   :  { %12307 = vmatpush1.msra.mxu0 %v24884_v28 }
 0x9ee   :  { %12309 = vmatprep.subr.mxu0 %v24885_v1 }
 0x9ef   :  { %12311 = vmatpush1.msra.mxu0 %v24886_v29 }
 0x9f0   :  { %12313 = vmatprep.subr.mxu0 %v24887_v25 }
 0x9f1   :  { %12315 = vmatpush1.msra.mxu0 %v24888_v60 }
 0x9f2   :  { %12594 = vmatprep.subr.mxu0 %v24889_v63 }
 0xa00   :  { %v11088_v52 = vpop.f32.mrf.mxu1 }
 0xa02   :  { %v11090_v63 = vpop.f32.mrf.mxu1 }
 0xa09   :  { %v10982_v59 = vpop.f32.mrf.mxu0 }
 0xa0a   :  { %v10983_v50 = vadd.f32 %v10982_v59, %v10846_v13  ;;  %v24896_v13 = vld [vmem:[#allocation262_spill] sm:$0xff] }
 0xa0b   :  { %v10984_v62 = vpop.f32.mrf.mxu0  ;;  %v902_v21 = vadd.f32 %v24896_v13, %v779_v48 }
 0xa0c   :  { %v10985_v6 = vadd.f32 %v10984_v62, %v10848_v2  ;;  %v11089_v22 = vadd.f32 %v11088_v52, %v10983_v50 }
 0xa0e   :  { %v11091_v49 = vadd.f32 %v11090_v63, %v10985_v6 }
 0xa22   :  { %v11360_v32 = vpop.f32.mrf.mxu1 }
 0xa24   :  { %v11362_v3 = vpop.f32.mrf.mxu1 }
 0xa2b   :  { %v11256_v19 = vpop.f32.mrf.mxu0 }
 0xa2c   :  { %v11257_v44 = vadd.f32 %v11256_v19, %v11089_v22 }
 0xa2d   :  { %v11258_v47 = vpop.f32.mrf.mxu0 }
 0xa2e   :  { %v11259_v9 = vadd.f32 %v11258_v47, %v11091_v49  ;;  %v11361_v58 = vadd.f32 %v11360_v32, %v11257_v44 }
 0xa30   :  { %v11363_v59 = vadd.f32 %v11362_v3, %v11259_v9  ;;  %v12220_v62 = vadd.f32 %v11361_v58, %v24897_v12 }
 0xa32   :  { %v12221_v2 = vadd.f32 %v11363_v59, %v902_v21  ;;  %v16418_v0 = vmul.f32 -1.442695, %v12220_v62 }
 0xa34   :  { %v16419_v27 = vmul.f32 -1.442695, %v12221_v2  ;;  %16828 = vpow2.f32 %v16418_v0  ;;  %v24898_v0 = vld [vmem:[#allocation13_spill] sm:$0xff] }
 0xa36   :  { %16830 = vpow2.f32 %v16419_v27 }
 0xa41   :  { %v16829_v63 = vpop.eup %16828 }
 0xa42   :  { %v12233_v59 = vadd.f32 1.0, %v16829_v63 }
 0xa43   :  { %v16831_v41 = vpop.eup %16830 }
 0xa44   :  { %v11700_v50 = vpop.f32.mrf.mxu1  ;;  %v12234_v62 = vadd.f32 1.0, %v16831_v41  ;;  %16832 = vrcp.f32 %v12233_v59 }
 0xa46   :  { %v11702_v34 = vpop.f32.mrf.mxu1  ;;  %16834 = vrcp.f32 %v12234_v62  ;;  %v24904_v62 = vld [vmem:[#allocation21_spill] sm:$0xff] }
 0xa4d   :  { %v11468_v52 = vpop.f32.mrf.mxu0 }
 0xa4e   :  { %v11701_v37 = vadd.f32 %v11700_v50, %v11468_v52 }
 0xa4f   :  { %v11470_v19 = vpop.f32.mrf.mxu0 }
 0xa50   :  { %v11703_v22 = vadd.f32 %v11702_v34, %v11470_v19  ;;  %v24899_v19 = vld [vmem:[#allocation14_spill] sm:$0xff] }
 0xa51   :  { %v16833_v34 = vpop.eup %16832 }
 0xa66   :  { %v11943_v49 = vpop.f32.mrf.mxu1 }
 0xa68   :  { %v11945_v32 = vpop.f32.mrf.mxu1 }
 0xa6f   :  { %v11837_v6 = vpop.f32.mrf.mxu0 }
 0xa70   :  { %v11838_v44 = vadd.f32 %v11837_v6, %v11701_v37  ;;  %v16835_v37 = vpop.eup %16834 }
 0xa71   :  { %v11839_v47 = vpop.f32.mrf.mxu0 }
 0xa72   :  { %v11840_v9 = vadd.f32 %v11839_v47, %v11703_v22  ;;  %v11944_v10 = vadd.f32 %v11943_v49, %v11838_v44  ;;  %v24900_v44 = vld [vmem:[#allocation31_spill] sm:$0xff] }
 0xa74   :  { %v11946_v3 = vadd.f32 %v11945_v32, %v11840_v9  ;;  %v12243_v9 = vmul.f32 %v16835_v37, %v24900_v44  ;;  %v24913_v37 = vld [vmem:[#allocation52_spill] sm:$0xff]  ;;  %v24917_v44 = vld [vmem:[#allocation69_spill] sm:$0xff] }
 0xa88   :  { %v12215_v51 = vpop.f32.mrf.mxu1 }
 0xa8a   :  { %v12217_v2 = vpop.f32.mrf.mxu1 }
 0xa90   :  { %v12111_v21 = vpop.f32.mrf.mxu0 }
 0xa91   :  { %v12112_v48 = vadd.f32 %v12111_v21, %v11944_v10 }
 0xa92   :  { %v12113_v58 = vpop.f32.mrf.mxu0 }
 0xa93   :  { %v12216_v13 = vadd.f32 %v12215_v51, %v12112_v48  ;;  %v12114_v12 = vadd.f32 %v12113_v58, %v11946_v3 }
 0xa95   :  { %v12222_v27 = vadd.f32 %v12216_v13, %v24898_v0  ;;  %v12218_v52 = vadd.f32 %v12217_v2, %v12114_v12  ;;  %v24902_v13 = vld [vmem:[#allocation16_spill] sm:$0xff]  ;;  %v24903_v12 = vld [vmem:[#allocation18_spill] sm:$0xff]  ;;  %v24905_v2 = vld [vmem:[#allocation23_spill] sm:$0xff] }
 0xa96   :  { %v24906_v0 = vld [vmem:[#allocation26_spill] sm:$0xff] }
 0xa97   :  { %v16420_v50 = vmul.f32 -1.442695, %v12222_v27  ;;  %v12223_v6 = vadd.f32 %v12218_v52, %v24899_v19  ;;  %v24907_v27 = vld [vmem:[#allocation27_spill] sm:$0xff]  ;;  %v24908_v52 = vld [vmem:[#allocation32_spill] sm:$0xff] }
 0xa98   :  { %v24910_v19 = vld [vmem:[#allocation39_spill] sm:$0xff] }
 0xa99   :  { %16836 = vpow2.f32 %v16420_v50  ;;  %v24909_v50 = vld [vmem:[#allocation36_spill] sm:$0xff] }
 0xa9a   :  { %16838 = vtanh.f32 %v12223_v6  ;;  %v24911_v6 = vld [vmem:[#allocation42_spill] sm:$0xff] }
 0xaa6   :  { %v16837_v49 = vpop.eup %16836 }
 0xaa7   :  { %v16839_v47 = vpop.eup %16838  ;;  %v12235_v22 = vadd.f32 1.0, %v16837_v49  ;;  %v24914_v49 = vld [vmem:[#allocation56_spill] sm:$0xff] }
 0xaa8   :  { %v12244_v32 = vmul.f32 %v16839_v47, %v16833_v34  ;;  %v24912_v34 = vld [vmem:[#allocation47_spill] sm:$0xff]  ;;  %v24915_v47 = vld [vmem:[#allocation58_spill] sm:$0xff] }
 0xaa9   :  { %16840 = vrcp.f32 %v12235_v22  ;;  %v24916_v22 = vld [vmem:[#allocation64_spill] sm:$0xff] }
 0xaaa   :  { %v21174_v10 = vadd.f32 %v12244_v32, %v12243_v9  ;;  %v24918_v9 = vld [vmem:[#allocation71_spill] sm:$0xff]  ;;  %v24919_v32 = vld [vmem:[#allocation72_spill] sm:$0xff] }
 0xaac   :  { %24901 = vst [vmem:[#allocation33_spill] sm:$0xff] %v21174_v10  ;;  %16842 = vtanh.f32 %v21174_v10  ;;  %v25010_v10 = vld [vmem:[#allocation325_spill] sm:$0xff] }
 0xab6   :  { %v16841_v63 = vpop.eup %16840 }
 0xab9   :  { %v16843_v51 = vpop.eup %16842 }
 0xaba   :  { %v12247_v21 = vmul.f32 %v16843_v51, %v16841_v63  ;;  %v24920_v63 = vld [vmem:[#allocation76_spill] sm:$0xff] }
 0xabb   :  { %v24921_v51 = vld [vmem:[#allocation84_spill] sm:$0xff] }
 0xabc   :  { %v21177_v41 = vand.u32 4294901760, %v12247_v21 }
 0xabe   :  { %12586 = vmatmul.mubr.f32.vlgmr.msra.gmra.mxu1 %v21177_v41  ;;  %v21181_v48 = vsub.f32 %v12247_v21, %v21177_v41  ;;  %v24922_v21 = vld [vmem:[#allocation88_spill] sm:$0xff] }
 0xabf   :  { %12732 = vmatpush1.msra.mxu1 %v23589_v5  ;;  %12825 = vmatprep.mubr.f32.mxu1 %v23179_v16 }
 0xac0   :  { %12734 = vmatprep.subr.mxu1 %v23591_v35  ;;  %v21187_v3 = vand.u32 4294901760, %v21181_v48 }
 0xac1   :  { %12736 = vmatpush1.msra.mxu1 %v23594_v56 }
 0xac2   :  { %12738 = vmatprep.subr.mxu1 %v23597_v42  ;;  %v12352_v58 = vsub.f32 %v21181_v48, %v21187_v3 }
 0xac3   :  { %12740 = vmatpush1.msra.mxu1 %v23600_v40 }
 0xac4   :  { %12742 = vmatprep.subr.mxu1 %v23602_v26  ;;  %v21195_v59 = vand.u32 4294901760, %v12352_v58  ;;  %v24923_v58 = vld [vmem:[#allocation89_spill] sm:$0xff] }
 0xac5   :  { %12744 = vmatpush1.msra.mxu1 %v23605_v4 }
 0xac6   :  { %12746 = vmatprep.subr.mxu1 %v23607_v15  ;;  %12354 = vmatmul.mubr.f32.vlgmr.msra.gmra.mxu0 %v21195_v59 }
 0xac7   :  { %12597 = vmatpush1.msra.mxu0 %v24902_v13  ;;  %12748 = vmatpush1.msra.mxu1 %v23610_v55  ;;  %v25008_v13 = vld [vmem:[#allocation324_spill] sm:$0xff] }
 0xac8   :  { %12600 = vmatprep.subr.mxu0 %v24903_v12  ;;  %12750 = vmatprep.subr.mxu1 %v23612_v57  ;;  %v25006_v12 = vld [vmem:[#allocation322_spill] sm:$0xff] }
 0xac9   :  { %12603 = vmatpush1.msra.mxu0 %v24904_v62  ;;  %12752 = vmatpush1.msra.mxu1 %v23615_v36  ;;  %v25004_v62 = vld [vmem:[#allocation320_spill] sm:$0xff] }
 0xaca   :  { %12606 = vmatprep.subr.mxu0 %v24905_v2  ;;  %12754 = vmatprep.subr.mxu1 %v23617_v45  ;;  %v25002_v2 = vld [vmem:[#allocation318_spill] sm:$0xff] }
 0xacb   :  { %12609 = vmatpush1.msra.mxu0 %v24906_v0  ;;  %12756 = vmatpush1.msra.mxu1 %v23620_v53  ;;  %v25000_v0 = vld [vmem:[#allocation316_spill] sm:$0xff] }
 0xacc   :  { %12612 = vmatprep.subr.mxu0 %v24907_v27  ;;  %12758 = vmatprep.subr.mxu1 %v23622_v14  ;;  %v24998_v27 = vld [vmem:[#allocation314_spill] sm:$0xff] }
 0xacd   :  { %12615 = vmatpush1.msra.mxu0 %v24908_v52  ;;  %12760 = vmatpush1.msra.mxu1 %v23624_v24  ;;  %v24996_v52 = vld [vmem:[#allocation311_spill] sm:$0xff] }
 0xace   :  { %12618 = vmatprep.subr.mxu0 %v24909_v50  ;;  %12762 = vmatprep.subr.mxu1 %v23626_v7  ;;  %v24994_v50 = vld [vmem:[#allocation306_spill] sm:$0xff] }
 0xacf   :  { %12621 = vmatpush1.msra.mxu0 %v24910_v19  ;;  %12764 = vmatpush1.msra.mxu1 %v23629_v33  ;;  %v24992_v19 = vld [vmem:[#allocation303_spill] sm:$0xff] }
 0xad0   :  { %12624 = vmatprep.subr.mxu0 %v24911_v6  ;;  %12766 = vmatprep.subr.mxu1 %v23631_v11  ;;  %v24990_v6 = vld [vmem:[#allocation299_spill] sm:$0xff] }
 0xad1   :  { %12627 = vmatpush1.msra.mxu0 %v24912_v34  ;;  %12768 = vmatpush1.msra.mxu1 %v23634_v61  ;;  %v24988_v34 = vld [vmem:[#allocation284_spill] sm:$0xff] }
 0xad2   :  { %12630 = vmatprep.subr.mxu0 %v24913_v37  ;;  %12770 = vmatprep.subr.mxu1 %v23636_v54  ;;  %v24968_v37 = vld [vmem:[#allocation233_spill] sm:$0xff] }
 0xad3   :  { %12633 = vmatpush1.msra.mxu0 %v24914_v49  ;;  %12772 = vmatpush1.msra.mxu1 %v23638_v18  ;;  %v24966_v49 = vld [vmem:[#allocation223_spill] sm:$0xff] }
 0xad4   :  { %12636 = vmatprep.subr.mxu0 %v24915_v47  ;;  %12774 = vmatprep.subr.mxu1 %v24877_v23  ;;  %v24965_v47 = vld [vmem:[#allocation126_spill] sm:$0xff] }
 0xad5   :  { %12639 = vmatpush1.msra.mxu0 %v24916_v22  ;;  %12776 = vmatpush1.msra.mxu1 %v24879_v43  ;;  %v24963_v22 = vld [vmem:[#allocation122_spill] sm:$0xff] }
 0xad6   :  { %12642 = vmatprep.subr.mxu0 %v24917_v44  ;;  %12778 = vmatprep.subr.mxu1 %v24881_v39  ;;  %v24961_v44 = vld [vmem:[#allocation117_spill] sm:$0xff] }
 0xad7   :  { %12645 = vmatpush1.msra.mxu0 %v24918_v9  ;;  %12780 = vmatpush1.msra.mxu1 %v24882_v8  ;;  %v24924_v9 = vld [vmem:[#allocation95_spill] sm:$0xff] }
 0xad8   :  { %12648 = vmatprep.subr.mxu0 %v24919_v32  ;;  %12782 = vmatprep.subr.mxu1 %v24883_v20  ;;  %v24925_v32 = vld [vmem:[#allocation100_spill] sm:$0xff] }
 0xad9   :  { %12651 = vmatpush1.msra.mxu0 %v24920_v63  ;;  %12784 = vmatpush1.msra.mxu1 %v24884_v28  ;;  %v24931_v63 = vld [vmem:[#allocation123_spill] sm:$0xff] }
 0xada   :  { %12654 = vmatprep.subr.mxu0 %v24921_v51  ;;  %12786 = vmatprep.subr.mxu1 %v24885_v1  ;;  %v24926_v51 = vld [vmem:[#allocation105_spill] sm:$0xff] }
 0xadb   :  { %12657 = vmatpush1.msra.mxu0 %v24922_v21  ;;  %12788 = vmatpush1.msra.mxu1 %v24886_v29  ;;  %v24927_v21 = vld [vmem:[#allocation107_spill] sm:$0xff] }
 0xadc   :  { %12660 = vmatprep.subr.mxu0 %v24923_v58  ;;  %12790 = vmatprep.subr.mxu1 %v24887_v25  ;;  %v24928_v58 = vld [vmem:[#allocation112_spill] sm:$0xff] }
 0xadd   :  { %12663 = vmatpush1.msra.mxu0 %v24924_v9  ;;  %12792 = vmatpush1.msra.mxu1 %v24888_v60  ;;  %v24929_v9 = vld [vmem:[#allocation118_spill] sm:$0xff] }
 0xade   :  { %12666 = vmatprep.subr.mxu0 %v24925_v32  ;;  %12829 = vmatmul.mubr.f32.vlgmr.msra.gmra.mxu1 %v21187_v3  ;;  %v24930_v32 = vld [vmem:[#allocation121_spill] sm:$0xff] }
 0xadf   :  { %13004 = vmatprep.subr.mxu1 %v23697_v46  ;;  %12669 = vmatpush1.msra.mxu0 %v24926_v51  ;;  %v24932_v51 = vld [vmem:[#allocation124_spill] sm:$0xff] }
 0xae0   :  { %13006 = vmatpush1.msra.mxu1 %v23589_v5  ;;  %12672 = vmatprep.subr.mxu0 %v24927_v21  ;;  %v24938_v21 = vld [vmem:[#allocation34_spill] sm:$0xff] }
 0xae1   :  { %13008 = vmatprep.subr.mxu1 %v23591_v35  ;;  %12675 = vmatpush1.msra.mxu0 %v24928_v58  ;;  %v24933_v58 = vld [vmem:[#allocation11_spill] sm:$0xff] }
 0xae2   :  { %13010 = vmatpush1.msra.mxu1 %v23594_v56  ;;  %12678 = vmatprep.subr.mxu0 %v24929_v9  ;;  %v24934_v9 = vld [vmem:[#allocation22_spill] sm:$0xff] }
 0xae3   :  { %13012 = vmatprep.subr.mxu1 %v23597_v42  ;;  %12681 = vmatpush1.msra.mxu0 %v24930_v32  ;;  %v24935_v32 = vld [vmem:[#allocation24_spill] sm:$0xff] }
 0xae4   :  { %13014 = vmatpush1.msra.mxu1 %v23600_v40  ;;  %12684 = vmatprep.subr.mxu0 %v24931_v63  ;;  %v24936_v63 = vld [vmem:[#allocation28_spill] sm:$0xff] }
 0xae5   :  { %13016 = vmatprep.subr.mxu1 %v23602_v26  ;;  %12687 = vmatpush1.msra.mxu0 %v24932_v51  ;;  %v24937_v51 = vld [vmem:[#allocation30_spill] sm:$0xff] }
 0xae6   :  { %12720 = vmatprep.mubr.f32.mxu0 %v23179_v16  ;;  %13018 = vmatpush1.msra.mxu1 %v23605_v4 }
 0xae7   :  { %12723 = vmatmul.mubr.f32.vlgmr.msra.gmra.mxu0 %v21181_v48  ;;  %12838 = vmatprep.subr.mxu0 %v24933_v58  ;;  %v24939_v58 = vld [vmem:[#allocation35_spill] sm:$0xff] }
 0xae8   :  { %13020 = vmatprep.subr.mxu1 %v23607_v15  ;;  %12842 = vmatpush1.msra.mxu0 %v24934_v9  ;;  %v24940_v9 = vld [vmem:[#allocation41_spill] sm:$0xff] }
 0xae9   :  { %13022 = vmatpush1.msra.mxu1 %v23610_v55  ;;  %12846 = vmatprep.subr.mxu0 %v24935_v32  ;;  %v24941_v32 = vld [vmem:[#allocation46_spill] sm:$0xff] }
 0xaea   :  { %13024 = vmatprep.subr.mxu1 %v23612_v57  ;;  %12850 = vmatpush1.msra.mxu0 %v24936_v63  ;;  %v24942_v63 = vld [vmem:[#allocation50_spill] sm:$0xff] }
 0xaeb   :  { %13026 = vmatpush1.msra.mxu1 %v23615_v36  ;;  %12854 = vmatprep.subr.mxu0 %v24937_v51  ;;  %v24943_v51 = vld [vmem:[#allocation51_spill] sm:$0xff] }
 0xaec   :  { %13028 = vmatprep.subr.mxu1 %v23617_v45  ;;  %12858 = vmatpush1.msra.mxu0 %v24938_v21  ;;  %v24944_v21 = vld [vmem:[#allocation57_spill] sm:$0xff] }
 0xaed   :  { %13030 = vmatpush1.msra.mxu1 %v23620_v53  ;;  %12862 = vmatprep.subr.mxu0 %v24939_v58  ;;  %v24945_v58 = vld [vmem:[#allocation63_spill] sm:$0xff] }
 0xaee   :  { %13032 = vmatprep.subr.mxu1 %v23622_v14  ;;  %12866 = vmatpush1.msra.mxu0 %v24940_v9  ;;  %v24946_v9 = vld [vmem:[#allocation65_spill] sm:$0xff] }
 0xaef   :  { %13034 = vmatpush1.msra.mxu1 %v23624_v24  ;;  %12870 = vmatprep.subr.mxu0 %v24941_v32  ;;  %v24947_v32 = vld [vmem:[#allocation68_spill] sm:$0xff] }
 0xaf0   :  { %13036 = vmatprep.subr.mxu1 %v23626_v7  ;;  %12874 = vmatpush1.msra.mxu0 %v24942_v63  ;;  %v24948_v63 = vld [vmem:[#allocation74_spill] sm:$0xff] }
 0xaf1   :  { %13038 = vmatpush1.msra.mxu1 %v23629_v33  ;;  %12878 = vmatprep.subr.mxu0 %v24943_v51  ;;  %v24949_v51 = vld [vmem:[#allocation80_spill] sm:$0xff] }
 0xaf2   :  { %13040 = vmatprep.subr.mxu1 %v23631_v11  ;;  %12882 = vmatpush1.msra.mxu0 %v24944_v21  ;;  %v24950_v21 = vld [vmem:[#allocation81_spill] sm:$0xff] }
 0xaf3   :  { %13042 = vmatpush1.msra.mxu1 %v23634_v61  ;;  %12886 = vmatprep.subr.mxu0 %v24945_v58  ;;  %v24951_v58 = vld [vmem:[#allocation82_spill] sm:$0xff] }
 0xaf4   :  { %13044 = vmatprep.subr.mxu1 %v23636_v54  ;;  %12890 = vmatpush1.msra.mxu0 %v24946_v9  ;;  %v24952_v9 = vld [vmem:[#allocation87_spill] sm:$0xff] }
 0xaf5   :  { %13046 = vmatpush1.msra.mxu1 %v23638_v18  ;;  %12894 = vmatprep.subr.mxu0 %v24947_v32  ;;  %v24953_v32 = vld [vmem:[#allocation94_spill] sm:$0xff] }
 0xaf6   :  { %13048 = vmatprep.subr.mxu1 %v24877_v23  ;;  %12898 = vmatpush1.msra.mxu0 %v24948_v63  ;;  %v24954_v63 = vld [vmem:[#allocation97_spill] sm:$0xff]  ;;  %v25029_v23 = vld [vmem:[#allocation183_spill] sm:$0xff] }
 0xaf7   :  { %13050 = vmatpush1.msra.mxu1 %v24879_v43  ;;  %12902 = vmatprep.subr.mxu0 %v24949_v51  ;;  %v24955_v51 = vld [vmem:[#allocation98_spill] sm:$0xff]  ;;  %v25028_v43 = vld [vmem:[#allocation179_spill] sm:$0xff] }
 0xaf8   :  { %13052 = vmatprep.subr.mxu1 %v24881_v39  ;;  %12906 = vmatpush1.msra.mxu0 %v24950_v21  ;;  %v24956_v21 = vld [vmem:[#allocation106_spill] sm:$0xff] }
 0xaf9   :  { %13054 = vmatpush1.msra.mxu1 %v24882_v8  ;;  %12910 = vmatprep.subr.mxu0 %v24951_v58  ;;  %v24959_v58 = vld [vmem:[#allocation114_spill] sm:$0xff] }
 0xafa   :  { %13056 = vmatprep.subr.mxu1 %v24883_v20  ;;  %12914 = vmatpush1.msra.mxu0 %v24952_v9  ;;  %v24957_v9 = vld [vmem:[#allocation111_spill] sm:$0xff]  ;;  %v25025_v20 = vld [vmem:[#allocation169_spill] sm:$0xff]  ;;  %v25026_v8 = vld [vmem:[#allocation170_spill] sm:$0xff] }
 0xafb   :  { %13058 = vmatpush1.msra.mxu1 %v24884_v28  ;;  %12918 = vmatprep.subr.mxu0 %v24953_v32  ;;  %v24958_v32 = vld [vmem:[#allocation192_spill] sm:$0xff]  ;;  %v25024_v28 = vld [vmem:[#allocation298_spill] sm:$0xff] }
 0xafc   :  { %13060 = vmatprep.subr.mxu1 %v24885_v1  ;;  %12922 = vmatpush1.msra.mxu0 %v24954_v63  ;;  %v24960_v63 = vld [vmem:[#allocation196_spill] sm:$0xff]  ;;  %v25023_v1 = vld [vmem:[#allocation295_spill] sm:$0xff]  ;;  %v25027_v39 = vld [vmem:[#allocation174_spill] sm:$0xff] }
 0xafd   :  { %13062 = vmatpush1.msra.mxu1 %v24886_v29  ;;  %12926 = vmatprep.subr.mxu0 %v24955_v51  ;;  %v24962_v51 = vld [vmem:[#allocation203_spill] sm:$0xff]  ;;  %v25016_v29 = vld [vmem:[#allocation328_spill] sm:$0xff] }
 0xafe   :  { %13064 = vmatprep.subr.mxu1 %v24887_v25  ;;  %12930 = vmatpush1.msra.mxu0 %v24956_v21  ;;  %v24964_v21 = vld [vmem:[#allocation214_spill] sm:$0xff]  ;;  %v25014_v25 = vld [vmem:[#allocation327_spill] sm:$0xff] }
 0xaff   :  { %13066 = vmatpush1.msra.mxu1 %v24888_v60  ;;  %13099 = vmatprep.mubr.f32.mxu1 %v23179_v16  ;;  %v25012_v60 = vld [vmem:[#allocation326_spill] sm:$0xff] }
 0xb00   :  { %12934 = vmatprep.subr.mxu0 %v24957_v9  ;;  %13101 = vmatmul.mubr.f32.vlgmr.msra.gmra.mxu1 %v21177_v41  ;;  %v24967_v9 = vld [vmem:[#allocation127_spill] sm:$0xff] }
 0xb01   :  { %13220 = vmatprep.subr.mxu1 %v24958_v32  ;;  %12938 = vmatpush1.msra.mxu0 %v24959_v58  ;;  %v24969_v32 = vld [vmem:[#allocation129_spill] sm:$0xff] }
 0xb02   :  { %13226 = vmatpush1.msra.mxu1 %v24960_v63  ;;  %12942 = vmatprep.subr.mxu0 %v24961_v44  ;;  %v24970_v58 = vld [vmem:[#allocation237_spill] sm:$0xff]  ;;  %v24971_v63 = vld [vmem:[#allocation131_spill] sm:$0xff] }
 0xb03   :  { %13232 = vmatprep.subr.mxu1 %v24962_v51  ;;  %12946 = vmatpush1.msra.mxu0 %v24963_v22  ;;  %v24972_v51 = vld [vmem:[#allocation241_spill] sm:$0xff]  ;;  %v24984_v22 = vld [vmem:[#allocation267_spill] sm:$0xff] }
 0xb04   :  { %13238 = vmatpush1.msra.mxu1 %v24964_v21  ;;  %12950 = vmatprep.subr.mxu0 %v24965_v47  ;;  %v24973_v47 = vld [vmem:[#allocation245_spill] sm:$0xff]  ;;  %v24982_v21 = vld [vmem:[#allocation263_spill] sm:$0xff] }
 0xb05   :  { %13244 = vmatprep.subr.mxu1 %v24966_v49  ;;  %12954 = vmatpush1.msra.mxu0 %v24967_v9  ;;  %v24974_v9 = vld [vmem:[#allocation249_spill] sm:$0xff]  ;;  %v24980_v49 = vld [vmem:[#allocation258_spill] sm:$0xff] }
 0xb06   :  { %13250 = vmatpush1.msra.mxu1 %v24968_v37  ;;  %12958 = vmatprep.subr.mxu0 %v24969_v32  ;;  %v24975_v32 = vld [vmem:[#allocation252_spill] sm:$0xff]  ;;  %v24986_v44 = vld [vmem:[#allocation269_spill] sm:$0xff] }
 0xb07   :  { %13256 = vmatprep.subr.mxu1 %v24970_v58  ;;  %12962 = vmatpush1.msra.mxu0 %v24971_v63  ;;  %v24976_v63 = vld [vmem:[#allocation253_spill] sm:$0xff]  ;;  %v24977_v58 = vld [vmem:[#allocation176_spill] sm:$0xff] }
 0xb08   :  { %12995 = vmatprep.mubr.f32.mxu0 %v23179_v16  ;;  %13262 = vmatpush1.msra.mxu1 %v24972_v51  ;;  %v24978_v51 = vld [vmem:[#allocation254_spill] sm:$0xff]  ;;  %v24979_v37 = vld [vmem:[#allocation180_spill] sm:$0xff] }
 0xb09   :  { %12997 = vmatmul.mubr.f32.vlgmr.msra.gmra.mxu0 %v21177_v41  ;;  %13108 = vmatprep.subr.mxu0 %v23745_v17 }
 0xb0a   :  { %13268 = vmatprep.subr.mxu1 %v24973_v47  ;;  %13110 = vmatpush1.msra.mxu0 %v23747_v38  ;;  %v24981_v47 = vld [vmem:[#allocation184_spill] sm:$0xff] }
 0xb0b   :  { %13274 = vmatpush1.msra.mxu1 %v24974_v9  ;;  %13112 = vmatprep.subr.mxu0 %v23749_v30  ;;  %v24983_v9 = vld [vmem:[#allocation188_spill] sm:$0xff] }
 0xb0c   :  { %13280 = vmatprep.subr.mxu1 %v24975_v32  ;;  %13114 = vmatpush1.msra.mxu0 %v24249_v31  ;;  %v24985_v32 = vld [vmem:[#allocation191_spill] sm:$0xff] }
 0xb0d   :  { %13286 = vmatpush1.msra.mxu1 %v24976_v63  ;;  %13116 = vmatprep.subr.mxu0 %v24977_v58  ;;  %v24987_v63 = vld [vmem:[#allocation195_spill] sm:$0xff] }
 0xb0e   :  { %13292 = vmatprep.subr.mxu1 %v24978_v51  ;;  %13118 = vmatpush1.msra.mxu0 %v24979_v37  ;;  %v24989_v51 = vld [vmem:[#allocation197_spill] sm:$0xff] }
 0xb0f   :  { %13298 = vmatpush1.msra.mxu1 %v24980_v49  ;;  %13120 = vmatprep.subr.mxu0 %v24981_v47  ;;  %v24991_v49 = vld [vmem:[#allocation198_spill] sm:$0xff] }
 0xb10   :  { %13304 = vmatprep.subr.mxu1 %v24982_v21  ;;  %13122 = vmatpush1.msra.mxu0 %v24983_v9  ;;  %v24993_v21 = vld [vmem:[#allocation202_spill] sm:$0xff] }
 0xb11   :  { %13310 = vmatpush1.msra.mxu1 %v24984_v22  ;;  %13124 = vmatprep.subr.mxu0 %v24985_v32  ;;  %v24995_v22 = vld [vmem:[#allocation207_spill] sm:$0xff] }
 0xb12   :  { %13316 = vmatprep.subr.mxu1 %v24986_v44  ;;  %13126 = vmatpush1.msra.mxu0 %v24987_v63  ;;  %v24997_v44 = vld [vmem:[#allocation210_spill] sm:$0xff] }
 0xb13   :  { %13322 = vmatpush1.msra.mxu1 %v24988_v34  ;;  %13128 = vmatprep.subr.mxu0 %v24989_v51  ;;  %v24999_v34 = vld [vmem:[#allocation213_spill] sm:$0xff] }
 0xb14   :  { %13328 = vmatprep.subr.mxu1 %v24990_v6  ;;  %13130 = vmatpush1.msra.mxu0 %v24991_v49  ;;  %v25001_v6 = vld [vmem:[#allocation218_spill] sm:$0xff] }
 0xb15   :  { %13334 = vmatpush1.msra.mxu1 %v24992_v19  ;;  %13132 = vmatprep.subr.mxu0 %v24993_v21  ;;  %v25003_v19 = vld [vmem:[#allocation231_spill] sm:$0xff] }
 0xb16   :  { %13340 = vmatprep.subr.mxu1 %v24994_v50  ;;  %13134 = vmatpush1.msra.mxu0 %v24995_v22  ;;  %v25005_v50 = vld [vmem:[#allocation239_spill] sm:$0xff] }
 0xb17   :  { %13346 = vmatpush1.msra.mxu1 %v24996_v52  ;;  %13136 = vmatprep.subr.mxu0 %v24997_v44  ;;  %v25007_v52 = vld [vmem:[#allocation247_spill] sm:$0xff] }
 0xb18   :  { %13352 = vmatprep.subr.mxu1 %v24998_v27  ;;  %13138 = vmatpush1.msra.mxu0 %v24999_v34  ;;  %v25009_v27 = vld [vmem:[#allocation251_spill] sm:$0xff] }
 0xb19   :  { %13358 = vmatpush1.msra.mxu1 %v25000_v0  ;;  %13140 = vmatprep.subr.mxu0 %v25001_v6  ;;  %v25011_v0 = vld [vmem:[#allocation256_spill] sm:$0xff] }
 0xb1a   :  { %13364 = vmatprep.subr.mxu1 %v25002_v2  ;;  %13142 = vmatpush1.msra.mxu0 %v25003_v19  ;;  %v25013_v2 = vld [vmem:[#allocation261_spill] sm:$0xff] }
 0xb1b   :  { %13370 = vmatpush1.msra.mxu1 %v25004_v62  ;;  %13144 = vmatprep.subr.mxu0 %v25005_v50  ;;  %v25015_v62 = vld [vmem:[#allocation266_spill] sm:$0xff] }
 0xb1c   :  { %13376 = vmatprep.subr.mxu1 %v25006_v12  ;;  %13146 = vmatpush1.msra.mxu0 %v25007_v52  ;;  %v25017_v12 = vld [vmem:[#allocation268_spill] sm:$0xff] }
 0xb1d   :  { %13382 = vmatpush1.msra.mxu1 %v25008_v13  ;;  %13148 = vmatprep.subr.mxu0 %v25009_v27  ;;  %v25022_v13 = vld [vmem:[#allocation287_spill] sm:$0xff] }
 0xb1e   :  { %13388 = vmatprep.subr.mxu1 %v25010_v10  ;;  %13150 = vmatpush1.msra.mxu0 %v25011_v0  ;;  %v25018_v10 = vld [vmem:[#allocation271_spill] sm:$0xff] }
 0xb1f   :  { %13394 = vmatpush1.msra.mxu1 %v25012_v60  ;;  %13152 = vmatprep.subr.mxu0 %v25013_v2  ;;  %v25019_v60 = vld [vmem:[#allocation276_spill] sm:$0xff] }
 0xb20   :  { %13400 = vmatprep.subr.mxu1 %v25014_v25  ;;  %13154 = vmatpush1.msra.mxu0 %v25015_v62  ;;  %v25020_v25 = vld [vmem:[#allocation280_spill] sm:$0xff] }
 0xb21   :  { %13406 = vmatpush1.msra.mxu1 %v25016_v29  ;;  %13439 = vmatprep.mubr.f32.mxu1 %v23179_v16  ;;  %v25021_v29 = vld [vmem:[#allocation282_spill] sm:$0xff] }
 0xb22   :  { %13156 = vmatprep.subr.mxu0 %v25017_v12  ;;  %13441 = vmatmul.mubr.f32.vlgmr.msra.gmra.mxu1 %v21177_v41 }
 0xb23   :  { %13585 = vmatprep.subr.mxu1 %v23745_v17  ;;  %13158 = vmatpush1.msra.mxu0 %v25018_v10 }
 0xb24   :  { %13587 = vmatpush1.msra.mxu1 %v23747_v38  ;;  %13160 = vmatprep.subr.mxu0 %v25019_v60 }
 0xb25   :  { %13589 = vmatprep.subr.mxu1 %v23749_v30  ;;  %13162 = vmatpush1.msra.mxu0 %v25020_v25 }
 0xb26   :  { %13591 = vmatpush1.msra.mxu1 %v24249_v31  ;;  %13164 = vmatprep.subr.mxu0 %v25021_v29 }
 0xb27   :  { %13593 = vmatprep.subr.mxu1 %v24977_v58  ;;  %13166 = vmatpush1.msra.mxu0 %v25022_v13 }
 0xb28   :  { %13595 = vmatpush1.msra.mxu1 %v24979_v37  ;;  %13168 = vmatprep.subr.mxu0 %v25023_v1 }
 0xb29   :  { %13597 = vmatprep.subr.mxu1 %v24981_v47  ;;  %13170 = vmatpush1.msra.mxu0 %v25024_v28 }
 0xb2a   :  { %13203 = vmatprep.mubr.f32.mxu0 %v23179_v16  ;;  %13599 = vmatpush1.msra.mxu1 %v24983_v9 }
 0xb2b   :  { %13209 = vmatmul.mubr.f32.vlgmr.msra.gmra.mxu0 %v21195_v59  ;;  %13449 = vmatprep.subr.mxu0 %v25025_v20  ;;  %v25030_v59 = vld [vmem:[#allocation187_spill] sm:$0xff]  ;;  %v25031_v20 = vld [vmem:[#allocation194_spill] sm:$0xff] }
 0xb2c   :  { %13601 = vmatprep.subr.mxu1 %v24985_v32  ;;  %13452 = vmatpush1.msra.mxu0 %v25026_v8  ;;  %v25032_v8 = vld [vmem:[#allocation201_spill] sm:$0xff] }
 0xb2d   :  { %13603 = vmatpush1.msra.mxu1 %v24987_v63  ;;  %13455 = vmatprep.subr.mxu0 %v25027_v39  ;;  %v25033_v39 = vld [vmem:[#allocation206_spill] sm:$0xff] }
 0xb2e   :  { %13605 = vmatprep.subr.mxu1 %v24989_v51  ;;  %13458 = vmatpush1.msra.mxu0 %v25028_v43  ;;  %v25034_v43 = vld [vmem:[#allocation209_spill] sm:$0xff] }
 0xb2f   :  { %13607 = vmatpush1.msra.mxu1 %v24991_v49  ;;  %13461 = vmatprep.subr.mxu0 %v25029_v23  ;;  %v25035_v23 = vld [vmem:[#allocation211_spill] sm:$0xff] }
 0xb30   :  { %13609 = vmatprep.subr.mxu1 %v24993_v21  ;;  %13464 = vmatpush1.msra.mxu0 %v25030_v59  ;;  %v25036_v59 = vld [vmem:[#allocation212_spill] sm:$0xff] }
 0xb31   :  { %13611 = vmatpush1.msra.mxu1 %v24995_v22  ;;  %13467 = vmatprep.subr.mxu0 %v25031_v20  ;;  %v25037_v20 = vld [vmem:[#allocation217_spill] sm:$0xff] }
 0xb32   :  { %13613 = vmatprep.subr.mxu1 %v24997_v44  ;;  %13470 = vmatpush1.msra.mxu0 %v25032_v8  ;;  %v25038_v8 = vld [vmem:[#allocation222_spill] sm:$0xff] }
 0xb33   :  { %13615 = vmatpush1.msra.mxu1 %v24999_v34  ;;  %13473 = vmatprep.subr.mxu0 %v25033_v39  ;;  %v25039_v39 = vld [vmem:[#allocation225_spill] sm:$0xff] }
 0xb34   :  { %13617 = vmatprep.subr.mxu1 %v25001_v6  ;;  %13476 = vmatpush1.msra.mxu0 %v25034_v43  ;;  %v25040_v43 = vld [vmem:[#allocation228_spill] sm:$0xff] }
 0xb35   :  { %13619 = vmatpush1.msra.mxu1 %v25003_v19  ;;  %13479 = vmatprep.subr.mxu0 %v25035_v23  ;;  %v25041_v23 = vld [vmem:[#allocation232_spill] sm:$0xff] }
 0xb36   :  { %13621 = vmatprep.subr.mxu1 %v25005_v50  ;;  %13482 = vmatpush1.msra.mxu0 %v25036_v59  ;;  %v25042_v59 = vld [vmem:[#allocation243_spill] sm:$0xff] }
 0xb37   :  { %13623 = vmatpush1.msra.mxu1 %v25007_v52  ;;  %13485 = vmatprep.subr.mxu0 %v25037_v20  ;;  %v25043_v20 = vld [vmem:[#allocation250_spill] sm:$0xff] }
 0xb38   :  { %13625 = vmatprep.subr.mxu1 %v25009_v27  ;;  %13488 = vmatpush1.msra.mxu0 %v25038_v8  ;;  %v25044_v8 = vld [vmem:[#allocation259_spill] sm:$0xff] }
 0xb39   :  { %13627 = vmatpush1.msra.mxu1 %v25011_v0  ;;  %13491 = vmatprep.subr.mxu0 %v25039_v39  ;;  %v25045_v39 = vld [vmem:[#allocation265_spill] sm:$0xff] }
 0xb3a   :  { %13629 = vmatprep.subr.mxu1 %v25013_v2  ;;  %13494 = vmatpush1.msra.mxu0 %v25040_v43  ;;  %v25046_v43 = vld [vmem:[#allocation270_spill] sm:$0xff] }
 0xb3b   :  { %13631 = vmatpush1.msra.mxu1 %v25015_v62  ;;  %13497 = vmatprep.subr.mxu0 %v25041_v23  ;;  %v25047_v23 = vld [vmem:[#allocation274_spill] sm:$0xff] }
 0xb3c   :  { %13633 = vmatprep.subr.mxu1 %v25017_v12  ;;  %13500 = vmatpush1.msra.mxu0 %v25042_v59  ;;  %v25048_v59 = vld [vmem:[#allocation279_spill] sm:$0xff] }
 0xb3d   :  { %13635 = vmatpush1.msra.mxu1 %v25018_v10  ;;  %13503 = vmatprep.subr.mxu0 %v25043_v20  ;;  %v25088_v20 = vld [vmem:[#allocation40_spill] sm:$0xff] }
 0xb3e   :  { %13637 = vmatprep.subr.mxu1 %v25019_v60  ;;  %13506 = vmatpush1.msra.mxu0 %v25044_v8  ;;  %v25049_v8 = vld [vmem:[#allocation281_spill] sm:$0xff] }
 0xb3f   :  { %13639 = vmatpush1.msra.mxu1 %v25020_v25  ;;  %13509 = vmatprep.subr.mxu0 %v25045_v39  ;;  %v25050_v39 = vld [vmem:[#allocation286_spill] sm:$0xff] }
 0xb40   :  { %13641 = vmatprep.subr.mxu1 %v25021_v29  ;;  %13512 = vmatpush1.msra.mxu0 %v25046_v43  ;;  %v25051_v43 = vld [vmem:[#allocation290_spill] sm:$0xff] }
 0xb41   :  { %13643 = vmatpush1.msra.mxu1 %v25022_v13  ;;  %13515 = vmatprep.subr.mxu0 %v25047_v23  ;;  %v25052_v23 = vld [vmem:[#allocation294_spill] sm:$0xff] }
 0xb42   :  { %13645 = vmatprep.subr.mxu1 %v25023_v1  ;;  %13518 = vmatpush1.msra.mxu0 %v25048_v59  ;;  %v25053_v59 = vld [vmem:[#allocation297_spill] sm:$0xff] }
 0xb43   :  { %13647 = vmatpush1.msra.mxu1 %v25024_v28  ;;  %13680 = vmatprep.mubr.f32.mxu1 %v23179_v16 }
 0xb44   :  { %13521 = vmatprep.subr.mxu0 %v25049_v8  ;;  %13684 = vmatmul.mubr.f32.vlgmr.msra.gmra.mxu1 %v21187_v3  ;;  %v25054_v8 = vld [vmem:[#allocation301_spill] sm:$0xff]  ;;  %v25055_v3 = vld [vmem:[#allocation308_spill] sm:$0xff] }
 0xb45   :  { %13859 = vmatprep.subr.mxu1 %v23745_v17  ;;  %13524 = vmatpush1.msra.mxu0 %v25050_v39  ;;  %v25056_v39 = vld [vmem:[#allocation310_spill] sm:$0xff] }
 0xb46   :  { %13861 = vmatpush1.msra.mxu1 %v23747_v38  ;;  %13527 = vmatprep.subr.mxu0 %v25051_v43  ;;  %v25086_v43 = vld [vmem:[#allocation38_spill] sm:$0xff] }
 0xb47   :  { %13863 = vmatprep.subr.mxu1 %v23749_v30  ;;  %13530 = vmatpush1.msra.mxu0 %v25052_v23  ;;  %v25057_v23 = vld [vmem:[#allocation175_spill] sm:$0xff] }
 0xb48   :  { %13865 = vmatpush1.msra.mxu1 %v24249_v31  ;;  %13533 = vmatprep.subr.mxu0 %v25053_v59  ;;  %v25058_v59 = vld [vmem:[#allocation177_spill] sm:$0xff] }
 0xb49   :  { %13867 = vmatprep.subr.mxu1 %v24977_v58  ;;  %13536 = vmatpush1.msra.mxu0 %v25054_v8  ;;  %v25059_v8 = vld [vmem:[#allocation182_spill] sm:$0xff] }
 0xb4a   :  { %13869 = vmatpush1.msra.mxu1 %v24979_v37  ;;  %13539 = vmatprep.subr.mxu0 %v25055_v3  ;;  %v25060_v3 = vld [vmem:[#allocation186_spill] sm:$0xff]  ;;  %v25136_v37 = vld [vmem:[#allocation173_spill] sm:$0xff] }
 0xb4b   :  { %13871 = vmatprep.subr.mxu1 %v24981_v47  ;;  %13542 = vmatpush1.msra.mxu0 %v25056_v39  ;;  %v25061_v39 = vld [vmem:[#allocation193_spill] sm:$0xff] }
 0xb4c   :  { %13575 = vmatprep.mubr.f32.mxu0 %v23179_v16  ;;  %13873 = vmatpush1.msra.mxu1 %v24983_v9 }
 0xb4d   :  { %13578 = vmatmul.mubr.f32.vlgmr.msra.gmra.mxu0 %v21181_v48  ;;  %13693 = vmatprep.subr.mxu0 %v25057_v23  ;;  %v25062_v48 = vld [vmem:[#allocation199_spill] sm:$0xff]  ;;  %v25063_v23 = vld [vmem:[#allocation208_spill] sm:$0xff] }
 0xb4e   :  { %13875 = vmatprep.subr.mxu1 %v24985_v32  ;;  %13697 = vmatpush1.msra.mxu0 %v25058_v59  ;;  %v25064_v59 = vld [vmem:[#allocation215_spill] sm:$0xff] }
 0xb4f   :  { %13877 = vmatpush1.msra.mxu1 %v24987_v63  ;;  %13701 = vmatprep.subr.mxu0 %v25059_v8  ;;  %v25065_v8 = vld [vmem:[#allocation219_spill] sm:$0xff] }
 0xb50   :  { %13879 = vmatprep.subr.mxu1 %v24989_v51  ;;  %13705 = vmatpush1.msra.mxu0 %v25060_v3  ;;  %v25066_v3 = vld [vmem:[#allocation224_spill] sm:$0xff] }
 0xb51   :  { %13881 = vmatpush1.msra.mxu1 %v24991_v49  ;;  %13709 = vmatprep.subr.mxu0 %v25061_v39  ;;  %v25067_v39 = vld [vmem:[#allocation226_spill] sm:$0xff] }
 0xb52   :  { %13883 = vmatprep.subr.mxu1 %v24993_v21  ;;  %13713 = vmatpush1.msra.mxu0 %v25062_v48  ;;  %v25068_v48 = vld [vmem:[#allocation227_spill] sm:$0xff] }
 0xb53   :  { %13885 = vmatpush1.msra.mxu1 %v24995_v22  ;;  %13717 = vmatprep.subr.mxu0 %v25063_v23  ;;  %v25069_v23 = vld [vmem:[#allocation229_spill] sm:$0xff]  ;;  %v25135_v21 = vld [vmem:[#allocation171_spill] sm:$0xff] }
 0xb54   :  { %13887 = vmatprep.subr.mxu1 %v24997_v44  ;;  %13721 = vmatpush1.msra.mxu0 %v25064_v59  ;;  %v25070_v59 = vld [vmem:[#allocation235_spill] sm:$0xff] }
 0xb55   :  { %13889 = vmatpush1.msra.mxu1 %v24999_v34  ;;  %13725 = vmatprep.subr.mxu0 %v25065_v8  ;;  %v25071_v8 = vld [vmem:[#allocation238_spill] sm:$0xff]  ;;  %v25134_v34 = vld [vmem:[#allocation151_spill] sm:$0xff] }
 0xb56   :  { %13891 = vmatprep.subr.mxu1 %v25001_v6  ;;  %13729 = vmatpush1.msra.mxu0 %v25066_v3  ;;  %v25072_v3 = vld [vmem:[#allocation240_spill] sm:$0xff] }
 0xb57   :  { %13893 = vmatpush1.msra.mxu1 %v25003_v19  ;;  %13733 = vmatprep.subr.mxu0 %v25067_v39  ;;  %v25073_v39 = vld [vmem:[#allocation242_spill] sm:$0xff] }
 0xb58   :  { %13895 = vmatprep.subr.mxu1 %v25005_v50  ;;  %13737 = vmatpush1.msra.mxu0 %v25068_v48  ;;  %v25074_v48 = vld [vmem:[#allocation255_spill] sm:$0xff] }
 0xb59   :  { %13897 = vmatpush1.msra.mxu1 %v25007_v52  ;;  %13741 = vmatprep.subr.mxu0 %v25069_v23  ;;  %v25075_v23 = vld [vmem:[#allocation264_spill] sm:$0xff] }
 0xb5a   :  { %13899 = vmatprep.subr.mxu1 %v25009_v27  ;;  %13745 = vmatpush1.msra.mxu0 %v25070_v59  ;;  %v25076_v59 = vld [vmem:[#allocation273_spill] sm:$0xff] }
 0xb5b   :  { %13901 = vmatpush1.msra.mxu1 %v25011_v0  ;;  %13749 = vmatprep.subr.mxu0 %v25071_v8  ;;  %v25077_v8 = vld [vmem:[#allocation278_spill] sm:$0xff] }
 0xb5c   :  { %13903 = vmatprep.subr.mxu1 %v25013_v2  ;;  %13753 = vmatpush1.msra.mxu0 %v25072_v3  ;;  %v25078_v3 = vld [vmem:[#allocation285_spill] sm:$0xff] }
 0xb5d   :  { %13905 = vmatpush1.msra.mxu1 %v25015_v62  ;;  %13757 = vmatprep.subr.mxu0 %v25073_v39  ;;  %v25079_v39 = vld [vmem:[#allocation289_spill] sm:$0xff] }
 0xb5e   :  { %13907 = vmatprep.subr.mxu1 %v25017_v12  ;;  %13761 = vmatpush1.msra.mxu0 %v25074_v48  ;;  %v25080_v48 = vld [vmem:[#allocation293_spill] sm:$0xff]  ;;  %v25133_v12 = vld [vmem:[#allocation150_spill] sm:$0xff] }
 0xb5f   :  { %13909 = vmatpush1.msra.mxu1 %v25018_v10  ;;  %13765 = vmatprep.subr.mxu0 %v25075_v23  ;;  %v25084_v23 = vld [vmem:[#allocation12_spill] sm:$0xff]  ;;  %v25132_v10 = vld [vmem:[#allocation19_spill] sm:$0xff] }
 0xb60   :  { %13911 = vmatprep.subr.mxu1 %v25019_v60  ;;  %13769 = vmatpush1.msra.mxu0 %v25076_v59  ;;  %v25081_v59 = vld [vmem:[#allocation296_spill] sm:$0xff]  ;;  %v252_v62 = vadd.f32 %v25133_v12, %v25132_v10 }
 0xb61   :  { %13913 = vmatpush1.msra.mxu1 %v25020_v25  ;;  %13773 = vmatprep.subr.mxu0 %v25077_v8  ;;  %v25082_v8 = vld [vmem:[#allocation300_spill] sm:$0xff] }
 0xb62   :  { %13915 = vmatprep.subr.mxu1 %v25021_v29  ;;  %13777 = vmatpush1.msra.mxu0 %v25078_v3  ;;  %v25083_v3 = vld [vmem:[#allocation304_spill] sm:$0xff]  ;;  %v387_v44 = vadd.f32 %v25134_v34, %v252_v62  ;;  %v25139_v62 = vld [vmem:[#allocation275_spill] sm:$0xff] }
 0xb63   :  { %13917 = vmatpush1.msra.mxu1 %v25022_v13  ;;  %13781 = vmatprep.subr.mxu0 %v25079_v39  ;;  %v25085_v39 = vld [vmem:[#allocation307_spill] sm:$0xff] }
 0xb64   :  { %13919 = vmatprep.subr.mxu1 %v25023_v1  ;;  %13785 = vmatpush1.msra.mxu0 %v25080_v48  ;;  %v25087_v48 = vld [vmem:[#allocation309_spill] sm:$0xff]  ;;  %v25093_v13 = vld [vmem:[#allocation319_spill] sm:$0xff]  ;;  %v519_v49 = vadd.f32 %v25135_v21, %v387_v44 }
 0xb65   :  { %13921 = vmatpush1.msra.mxu1 %v25024_v28  ;;  %13954 = vmatprep.mubr.f32.mxu1 %v23179_v16  ;;  %v25089_v28 = vld [vmem:[#allocation312_spill] sm:$0xff]  ;;  %v25091_v1 = vld [vmem:[#allocation317_spill] sm:$0xff] }
 0xb66   :  { %13789 = vmatprep.subr.mxu0 %v25081_v59  ;;  %13956 = vmatmul.mubr.f32.vlgmr.msra.gmra.mxu1 %v21177_v41  ;;  %v25090_v59 = vld [vmem:[#allocation45_spill] sm:$0xff]  ;;  %v657_v12 = vadd.f32 %v25136_v37, %v519_v49 }
 0xb67   :  { %13793 = vmatpush1.msra.mxu0 %v25082_v8  ;;  %13850 = vmatprep.mubr.f32.mxu0 %v23179_v16  ;;  %v25092_v8 = vld [vmem:[#allocation49_spill] sm:$0xff] }
 0xb68   :  { %13797 = vmatprep.subr.mxu0 %v25083_v3  ;;  %14107 = vmatprep.subr.mxu1 %v25084_v23  ;;  %v25094_v3 = vld [vmem:[#allocation54_spill] sm:$0xff]  ;;  %v25095_v23 = vld [vmem:[#allocation55_spill] sm:$0xff] }
 0xb69   :  { %13801 = vmatpush1.msra.mxu0 %v25085_v39  ;;  %14113 = vmatpush1.msra.mxu1 %v25086_v43  ;;  %v25096_v43 = vld [vmem:[#allocation62_spill] sm:$0xff] }
 0xb6a   :  { %13805 = vmatprep.subr.mxu0 %v25087_v48  ;;  %14119 = vmatprep.subr.mxu1 %v25088_v20  ;;  %v25097_v20 = vld [vmem:[#allocation67_spill] sm:$0xff]  ;;  %v25131_v48 = vld [vmem:[#allocation10_spill] sm:$0xff] }
 0xb6b   :  { %13809 = vmatpush1.msra.mxu0 %v25089_v28  ;;  %14125 = vmatpush1.msra.mxu1 %v25090_v59  ;;  %v25098_v59 = vld [vmem:[#allocation70_spill] sm:$0xff]  ;;  %v25129_v28 = vld [vmem:[#allocation113_spill] sm:$0xff] }
 0xb6c   :  { %13813 = vmatprep.subr.mxu0 %v25091_v1  ;;  %14131 = vmatprep.subr.mxu1 %v25092_v8  ;;  %v25099_v8 = vld [vmem:[#allocation73_spill] sm:$0xff]  ;;  %v25127_v1 = vld [vmem:[#allocation108_spill] sm:$0xff] }
 0xb6d   :  { %13817 = vmatpush1.msra.mxu0 %v25093_v13  ;;  %14137 = vmatpush1.msra.mxu1 %v25094_v3  ;;  %v25100_v3 = vld [vmem:[#allocation79_spill] sm:$0xff]  ;;  %v25122_v13 = vld [vmem:[#allocation141_spill] sm:$0xff] }
 0xb6e   :  { %13852 = vmatmul.mubr.f32.vlgmr.msra.gmra.mxu0 %v21177_v41  ;;  %14143 = vmatprep.subr.mxu1 %v25095_v23  ;;  %v25101_v41 = vld [vmem:[#allocation83_spill] sm:$0xff]  ;;  %v25102_v23 = vld [vmem:[#allocation86_spill] sm:$0xff] }
 0xb6f   :  { %14149 = vmatpush1.msra.mxu1 %v25096_v43  ;;  %13995 = vmatprep.subr.mxu0 %v23697_v46  ;;  %v25103_v43 = vld [vmem:[#allocation90_spill] sm:$0xff] }
 0xb70   :  { %14155 = vmatprep.subr.mxu1 %v25097_v20  ;;  %13997 = vmatpush1.msra.mxu0 %v23589_v5  ;;  %v25104_v20 = vld [vmem:[#allocation93_spill] sm:$0xff] }
 0xb71   :  { %14161 = vmatpush1.msra.mxu1 %v25098_v59  ;;  %13999 = vmatprep.subr.mxu0 %v23591_v35  ;;  %v25105_v59 = vld [vmem:[#allocation99_spill] sm:$0xff] }
 0xb72   :  { %14167 = vmatprep.subr.mxu1 %v25099_v8  ;;  %14001 = vmatpush1.msra.mxu0 %v23594_v56  ;;  %v25106_v8 = vld [vmem:[#allocation103_spill] sm:$0xff] }
 0xb73   :  { %14173 = vmatpush1.msra.mxu1 %v25100_v3  ;;  %14003 = vmatprep.subr.mxu0 %v23597_v42  ;;  %v25107_v3 = vld [vmem:[#allocation104_spill] sm:$0xff] }
 0xb74   :  { %14179 = vmatprep.subr.mxu1 %v25101_v41  ;;  %14005 = vmatpush1.msra.mxu0 %v23600_v40  ;;  %v25108_v41 = vld [vmem:[#allocation109_spill] sm:$0xff] }
 0xb75   :  { %14185 = vmatpush1.msra.mxu1 %v25102_v23  ;;  %14007 = vmatprep.subr.mxu0 %v23602_v26  ;;  %v25109_v23 = vld [vmem:[#allocation116_spill] sm:$0xff] }
 0xb76   :  { %14191 = vmatprep.subr.mxu1 %v25103_v43  ;;  %14009 = vmatpush1.msra.mxu0 %v23605_v4  ;;  %v25110_v43 = vld [vmem:[#allocation119_spill] sm:$0xff] }
 0xb77   :  { %14197 = vmatpush1.msra.mxu1 %v25104_v20  ;;  %14011 = vmatprep.subr.mxu0 %v23607_v15  ;;  %v25111_v20 = vld [vmem:[#allocation120_spill] sm:$0xff] }
 0xb78   :  { %14203 = vmatprep.subr.mxu1 %v25105_v59  ;;  %14013 = vmatpush1.msra.mxu0 %v23610_v55  ;;  %v25112_v59 = vld [vmem:[#allocation125_spill] sm:$0xff] }
 0xb79   :  { %14209 = vmatpush1.msra.mxu1 %v25106_v8  ;;  %14015 = vmatprep.subr.mxu0 %v23612_v57  ;;  %v25113_v8 = vld [vmem:[#allocation128_spill] sm:$0xff] }
 0xb7a   :  { %14215 = vmatprep.subr.mxu1 %v25107_v3  ;;  %14017 = vmatpush1.msra.mxu0 %v23615_v36  ;;  %v25114_v3 = vld [vmem:[#allocation130_spill] sm:$0xff] }
 0xb7b   :  { %14221 = vmatpush1.msra.mxu1 %v25108_v41  ;;  %14019 = vmatprep.subr.mxu0 %v23617_v45  ;;  %v25115_v41 = vld [vmem:[#allocation133_spill] sm:$0xff] }
 0xb7c   :  { %14227 = vmatprep.subr.mxu1 %v25109_v23  ;;  %14021 = vmatpush1.msra.mxu0 %v23620_v53  ;;  %v25116_v23 = vld [vmem:[#allocation135_spill] sm:$0xff] }
 0xb7d   :  { %14233 = vmatpush1.msra.mxu1 %v25110_v43  ;;  %14023 = vmatprep.subr.mxu0 %v23622_v14  ;;  %v25117_v43 = vld [vmem:[#allocation137_spill] sm:$0xff] }
 0xb7e   :  { %14239 = vmatprep.subr.mxu1 %v25111_v20  ;;  %14025 = vmatpush1.msra.mxu0 %v23624_v24  ;;  %v25118_v20 = vld [vmem:[#allocation139_spill] sm:$0xff]  ;;  %v12587_v25 = vpop.f32.mrf.mxu1 }
 0xb7f   :  { %14245 = vmatpush1.msra.mxu1 %v25112_v59  ;;  %14027 = vmatprep.subr.mxu0 %v23626_v7  ;;  %v25119_v59 = vld [vmem:[#allocation78_spill] sm:$0xff] }
 0xb80   :  { %14251 = vmatprep.subr.mxu1 %v25113_v8  ;;  %14029 = vmatpush1.msra.mxu0 %v23629_v33  ;;  %v25120_v8 = vld [vmem:[#allocation140_spill] sm:$0xff]  ;;  %v12589_v2 = vpop.f32.mrf.mxu1 }
 0xb81   :  { %14257 = vmatpush1.msra.mxu1 %v25114_v3  ;;  %14031 = vmatprep.subr.mxu0 %v23631_v11  ;;  %v25121_v3 = vld [vmem:[#allocation85_spill] sm:$0xff] }
 0xb82   :  { %14263 = vmatprep.subr.mxu1 %v25115_v41  ;;  %14033 = vmatpush1.msra.mxu0 %v23634_v61  ;;  %v25123_v41 = vld [vmem:[#allocation91_spill] sm:$0xff] }
 0xb83   :  { %14269 = vmatpush1.msra.mxu1 %v25116_v23  ;;  %14035 = vmatprep.subr.mxu0 %v23636_v54  ;;  %v25124_v23 = vld [vmem:[#allocation92_spill] sm:$0xff] }
 0xb84   :  { %14275 = vmatprep.subr.mxu1 %v25117_v43  ;;  %14037 = vmatpush1.msra.mxu0 %v23638_v18  ;;  %v25125_v43 = vld [vmem:[#allocation96_spill] sm:$0xff] }
 0xb85   :  { %14281 = vmatpush1.msra.mxu1 %v25118_v20  ;;  %14039 = vmatprep.subr.mxu0 %v25119_v59  ;;  %v25126_v20 = vld [vmem:[#allocation101_spill] sm:$0xff] }
 0xb86   :  { %14287 = vmatprep.subr.mxu1 %v25120_v8  ;;  %14041 = vmatpush1.msra.mxu0 %v25121_v3  ;;  %v25128_v8 = vld [vmem:[#allocation110_spill] sm:$0xff]  ;;  %v12355_v39 = vpop.f32.mrf.mxu0 }
 0xb87   :  { %14293 = vmatpush1.msra.mxu1 %v25122_v13  ;;  %14043 = vmatprep.subr.mxu0 %v25123_v41  ;;  %v25130_v13 = vld [vmem:[#allocation115_spill] sm:$0xff]  ;;  %v12588_v0 = vadd.f32 %v12587_v25, %v12355_v39  ;;  %v25137_v39 = vld [vmem:[#allocation272_spill] sm:$0xff] }
 0xb88   :  { %14326 = vmatprep.mubr.f32.mxu1 %v23179_v16  ;;  %14472 = vmatprep.subr.mxu1 %v23697_v46  ;;  %v12357_v29 = vpop.f32.mrf.mxu0  ;;  %v786_v25 = vadd.f32 %v25137_v39, %v657_v12 }
 0xb89   :  { %14045 = vmatpush1.msra.mxu0 %v25124_v23  ;;  %14090 = vmatprep.mubr.f32.mxu0 %v23179_v16  ;;  %v12590_v52 = vadd.f32 %v12589_v2, %v12357_v29 }
 0xb8a   :  { %14047 = vmatprep.subr.mxu0 %v25125_v43 }
 0xb8b   :  { %14049 = vmatpush1.msra.mxu0 %v25126_v20 }
 0xb8c   :  { %14051 = vmatprep.subr.mxu0 %v25127_v1 }
 0xb8d   :  { %14053 = vmatpush1.msra.mxu0 %v25128_v8 }
 0xb8e   :  { %14055 = vmatprep.subr.mxu0 %v25129_v28 }
 0xb8f   :  { %14057 = vmatpush1.msra.mxu0 %v25130_v13 }
 0xb90   :  { %14336 = vmatprep.subr.mxu0 %v25131_v48 }
 0xb9e   :  { %v12830_v50 = vpop.f32.mrf.mxu1 }
 0xba0   :  { %v12832_v48 = vpop.f32.mrf.mxu1 }
 0xba7   :  { %v12724_v60 = vpop.f32.mrf.mxu0 }
 0xba8   :  { %v12725_v19 = vadd.f32 %v12724_v60, %v12588_v0  ;;  %v25138_v0 = vld [vmem:[#allocation277_spill] sm:$0xff] }
 0xba9   :  { %v12726_v27 = vpop.f32.mrf.mxu0  ;;  %v909_v58 = vadd.f32 %v25138_v0, %v786_v25 }
 0xbaa   :  { %v12727_v22 = vadd.f32 %v12726_v27, %v12590_v52  ;;  %v12831_v51 = vadd.f32 %v12830_v50, %v12725_v19 }
 0xbac   :  { %v12833_v32 = vadd.f32 %v12832_v48, %v12727_v22 }
 0xbc0   :  { %v13102_v9 = vpop.f32.mrf.mxu1 }
 0xbc2   :  { %v13104_v29 = vpop.f32.mrf.mxu1 }
 0xbc9   :  { %v12998_v6 = vpop.f32.mrf.mxu0 }
 0xbca   :  { %v12999_v47 = vadd.f32 %v12998_v6, %v12831_v51 }
 0xbcb   :  { %v13000_v63 = vpop.f32.mrf.mxu0 }
 0xbcc   :  { %v13001_v10 = vadd.f32 %v13000_v63, %v12833_v32  ;;  %v13103_v2 = vadd.f32 %v13102_v9, %v12999_v47 }
 0xbce   :  { %v13105_v60 = vadd.f32 %v13104_v29, %v13001_v10  ;;  %v13962_v27 = vadd.f32 %v13103_v2, %v25139_v62 }
 0xbd0   :  { %v13963_v52 = vadd.f32 %v13105_v60, %v909_v58  ;;  %v16421_v34 = vmul.f32 -1.442695, %v13962_v27 }
 0xbd2   :  { %v16422_v44 = vmul.f32 -1.442695, %v13963_v52  ;;  %16844 = vpow2.f32 %v16421_v34  ;;  %v25140_v34 = vld [vmem:[#allocation333_spill] sm:$0xff] }
 0xbd4   :  { %16846 = vpow2.f32 %v16422_v44 }
 0xbdf   :  { %v16845_v48 = vpop.eup %16844 }
 0xbe0   :  { %v13975_v60 = vadd.f32 1.0, %v16845_v48 }
 0xbe1   :  { %v16847_v39 = vpop.eup %16846 }
 0xbe2   :  { %v13442_v19 = vpop.f32.mrf.mxu1  ;;  %v13976_v27 = vadd.f32 1.0, %v16847_v39  ;;  %16848 = vrcp.f32 %v13975_v60 }
 0xbe4   :  { %v13444_v37 = vpop.f32.mrf.mxu1  ;;  %16850 = vrcp.f32 %v13976_v27  ;;  %v25145_v27 = vld [vmem:[#allocation21_spill] sm:$0xff] }
 0xbeb   :  { %v13210_v50 = vpop.f32.mrf.mxu0 }
 0xbec   :  { %v13443_v49 = vadd.f32 %v13442_v19, %v13210_v50 }
 0xbed   :  { %v13212_v6 = vpop.f32.mrf.mxu0 }
 0xbee   :  { %v13445_v51 = vadd.f32 %v13444_v37, %v13212_v6  ;;  %v25141_v6 = vld [vmem:[#allocation15_spill] sm:$0xff] }
 0xbef   :  { %v16849_v37 = vpop.eup %16848 }
 0xc04   :  { %v13685_v32 = vpop.f32.mrf.mxu1 }
 0xc06   :  { %v13687_v9 = vpop.f32.mrf.mxu1 }
 0xc0d   :  { %v13579_v22 = vpop.f32.mrf.mxu0 }
 0xc0e   :  { %v13580_v47 = vadd.f32 %v13579_v22, %v13443_v49  ;;  %v16851_v49 = vpop.eup %16850 }
 0xc0f   :  { %v13581_v63 = vpop.f32.mrf.mxu0 }
 0xc10   :  { %v13582_v10 = vadd.f32 %v13581_v63, %v13445_v51  ;;  %v13686_v21 = vadd.f32 %v13685_v32, %v13580_v47  ;;  %v25142_v47 = vld [vmem:[#allocation33_spill] sm:$0xff] }
 0xc12   :  { %v13688_v29 = vadd.f32 %v13687_v9, %v13582_v10  ;;  %v13985_v10 = vmul.f32 %v16851_v49, %v25142_v47  ;;  %v25154_v49 = vld [vmem:[#allocation52_spill] sm:$0xff]  ;;  %v25158_v47 = vld [vmem:[#allocation69_spill] sm:$0xff] }
 0xc26   :  { %v13957_v12 = vpop.f32.mrf.mxu1 }
 0xc28   :  { %v13959_v52 = vpop.f32.mrf.mxu1 }
 0xc2e   :  { %v13853_v58 = vpop.f32.mrf.mxu0 }
 0xc2f   :  { %v13854_v25 = vadd.f32 %v13853_v58, %v13686_v21 }
 0xc30   :  { %v13855_v2 = vpop.f32.mrf.mxu0 }
 0xc31   :  { %v13958_v0 = vadd.f32 %v13957_v12, %v13854_v25  ;;  %v13856_v62 = vadd.f32 %v13855_v2, %v13688_v29 }
 0xc33   :  { %v13964_v44 = vadd.f32 %v13958_v0, %v25140_v34  ;;  %v13960_v50 = vadd.f32 %v13959_v52, %v13856_v62  ;;  %v25143_v0 = vld [vmem:[#allocation16_spill] sm:$0xff]  ;;  %v25144_v62 = vld [vmem:[#allocation18_spill] sm:$0xff]  ;;  %v25146_v52 = vld [vmem:[#allocation23_spill] sm:$0xff] }
 0xc34   :  { %v25147_v34 = vld [vmem:[#allocation26_spill] sm:$0xff] }
 0xc35   :  { %v16423_v19 = vmul.f32 -1.442695, %v13964_v44  ;;  %v13965_v22 = vadd.f32 %v13960_v50, %v25141_v6  ;;  %v25148_v44 = vld [vmem:[#allocation27_spill] sm:$0xff]  ;;  %v25149_v50 = vld [vmem:[#allocation32_spill] sm:$0xff] }
 0xc36   :  { %v25151_v6 = vld [vmem:[#allocation39_spill] sm:$0xff] }
 0xc37   :  { %16852 = vpow2.f32 %v16423_v19  ;;  %v25150_v19 = vld [vmem:[#allocation36_spill] sm:$0xff] }
 0xc38   :  { %16854 = vtanh.f32 %v13965_v22  ;;  %v25152_v22 = vld [vmem:[#allocation42_spill] sm:$0xff] }
 0xc44   :  { %v16853_v32 = vpop.eup %16852 }
 0xc45   :  { %v16855_v63 = vpop.eup %16854  ;;  %v13977_v51 = vadd.f32 1.0, %v16853_v32  ;;  %v25155_v32 = vld [vmem:[#allocation56_spill] sm:$0xff] }
 0xc46   :  { %v13986_v9 = vmul.f32 %v16855_v63, %v16849_v37  ;;  %v25153_v37 = vld [vmem:[#allocation47_spill] sm:$0xff]  ;;  %v25156_v63 = vld [vmem:[#allocation58_spill] sm:$0xff] }
 0xc47   :  { %16856 = vrcp.f32 %v13977_v51  ;;  %v25157_v51 = vld [vmem:[#allocation64_spill] sm:$0xff] }
 0xc48   :  { %v21608_v21 = vadd.f32 %v13986_v9, %v13985_v10  ;;  %v25159_v10 = vld [vmem:[#allocation71_spill] sm:$0xff]  ;;  %v25160_v9 = vld [vmem:[#allocation72_spill] sm:$0xff] }
 0xc4a   :  { %16858 = vtanh.f32 %v21608_v21 }
 0xc54   :  { %v16857_v48 = vpop.eup %16856 }
 0xc57   :  { %v16859_v12 = vpop.eup %16858 }
 0xc58   :  { %v13989_v58 = vmul.f32 %v16859_v12, %v16857_v48  ;;  %v25161_v48 = vld [vmem:[#allocation76_spill] sm:$0xff] }
 0xc59   :  { %v25162_v12 = vld [vmem:[#allocation84_spill] sm:$0xff] }
 0xc5a   :  { %v21611_v39 = vand.u32 4294901760, %v13989_v58 }
 0xc5c   :  { %14328 = vmatmul.mubr.f32.vlgmr.msra.gmra.mxu1 %v21611_v39  ;;  %v21615_v25 = vsub.f32 %v13989_v58, %v21611_v39  ;;  %v25163_v58 = vld [vmem:[#allocation88_spill] sm:$0xff] }
 0xc5d   :  { %14474 = vmatpush1.msra.mxu1 %v23589_v5  ;;  %14567 = vmatprep.mubr.f32.mxu1 %v23179_v16 }
 0xc5e   :  { %14476 = vmatprep.subr.mxu1 %v23591_v35  ;;  %v21621_v29 = vand.u32 4294901760, %v21615_v25 }
 0xc5f   :  { %14478 = vmatpush1.msra.mxu1 %v23594_v56 }
 0xc60   :  { %14480 = vmatprep.subr.mxu1 %v23597_v42  ;;  %v14094_v2 = vsub.f32 %v21615_v25, %v21621_v29 }
 0xc61   :  { %14482 = vmatpush1.msra.mxu1 %v23600_v40 }
 0xc62   :  { %14484 = vmatprep.subr.mxu1 %v23602_v26  ;;  %v21629_v60 = vand.u32 4294901760, %v14094_v2  ;;  %v25164_v2 = vld [vmem:[#allocation89_spill] sm:$0xff] }
 0xc63   :  { %14486 = vmatpush1.msra.mxu1 %v23605_v4 }
 0xc64   :  { %14488 = vmatprep.subr.mxu1 %v23607_v15  ;;  %14096 = vmatmul.mubr.f32.vlgmr.msra.gmra.mxu0 %v21629_v60 }
 0xc65   :  { %14339 = vmatpush1.msra.mxu0 %v25143_v0  ;;  %14490 = vmatpush1.msra.mxu1 %v23610_v55  ;;  %v25165_v0 = vld [vmem:[#allocation95_spill] sm:$0xff] }
 0xc66   :  { %14342 = vmatprep.subr.mxu0 %v25144_v62  ;;  %14492 = vmatprep.subr.mxu1 %v23612_v57  ;;  %v25166_v62 = vld [vmem:[#allocation100_spill] sm:$0xff] }
 0xc67   :  { %14345 = vmatpush1.msra.mxu0 %v25145_v27  ;;  %14494 = vmatpush1.msra.mxu1 %v23615_v36  ;;  %v25167_v27 = vld [vmem:[#allocation105_spill] sm:$0xff] }
 0xc68   :  { %14348 = vmatprep.subr.mxu0 %v25146_v52  ;;  %14496 = vmatprep.subr.mxu1 %v23617_v45  ;;  %v25168_v52 = vld [vmem:[#allocation107_spill] sm:$0xff] }
 0xc69   :  { %14351 = vmatpush1.msra.mxu0 %v25147_v34  ;;  %14498 = vmatpush1.msra.mxu1 %v23620_v53  ;;  %v25169_v34 = vld [vmem:[#allocation112_spill] sm:$0xff] }
 0xc6a   :  { %14354 = vmatprep.subr.mxu0 %v25148_v44  ;;  %14500 = vmatprep.subr.mxu1 %v23622_v14  ;;  %v25170_v44 = vld [vmem:[#allocation118_spill] sm:$0xff] }
 0xc6b   :  { %14357 = vmatpush1.msra.mxu0 %v25149_v50  ;;  %14502 = vmatpush1.msra.mxu1 %v23624_v24  ;;  %v25171_v50 = vld [vmem:[#allocation121_spill] sm:$0xff] }
 0xc6c   :  { %14360 = vmatprep.subr.mxu0 %v25150_v19  ;;  %14504 = vmatprep.subr.mxu1 %v23626_v7  ;;  %v25201_v19 = vld [vmem:[#allocation196_spill] sm:$0xff] }
 0xc6d   :  { %14363 = vmatpush1.msra.mxu0 %v25151_v6  ;;  %14506 = vmatpush1.msra.mxu1 %v23629_v33  ;;  %v25203_v6 = vld [vmem:[#allocation203_spill] sm:$0xff] }
 0xc6e   :  { %14366 = vmatprep.subr.mxu0 %v25152_v22  ;;  %14508 = vmatprep.subr.mxu1 %v23631_v11  ;;  %v25205_v22 = vld [vmem:[#allocation214_spill] sm:$0xff] }
 0xc6f   :  { %14369 = vmatpush1.msra.mxu0 %v25153_v37  ;;  %14510 = vmatpush1.msra.mxu1 %v23634_v61  ;;  %v25207_v37 = vld [vmem:[#allocation223_spill] sm:$0xff] }
 0xc70   :  { %14372 = vmatprep.subr.mxu0 %v25154_v49  ;;  %14512 = vmatprep.subr.mxu1 %v23636_v54  ;;  %v25208_v49 = vld [vmem:[#allocation127_spill] sm:$0xff] }
 0xc71   :  { %14375 = vmatpush1.msra.mxu0 %v25155_v32  ;;  %14514 = vmatpush1.msra.mxu1 %v23638_v18  ;;  %v25209_v32 = vld [vmem:[#allocation233_spill] sm:$0xff] }
 0xc72   :  { %14378 = vmatprep.subr.mxu0 %v25156_v63  ;;  %14516 = vmatprep.subr.mxu1 %v25119_v59  ;;  %v25210_v63 = vld [vmem:[#allocation129_spill] sm:$0xff] }
 0xc73   :  { %14381 = vmatpush1.msra.mxu0 %v25157_v51  ;;  %14518 = vmatpush1.msra.mxu1 %v25121_v3  ;;  %v25211_v51 = vld [vmem:[#allocation237_spill] sm:$0xff] }
 0xc74   :  { %14384 = vmatprep.subr.mxu0 %v25158_v47  ;;  %14520 = vmatprep.subr.mxu1 %v25123_v41  ;;  %v25212_v47 = vld [vmem:[#allocation131_spill] sm:$0xff] }
 0xc75   :  { %14387 = vmatpush1.msra.mxu0 %v25159_v10  ;;  %14522 = vmatpush1.msra.mxu1 %v25124_v23  ;;  %v25213_v10 = vld [vmem:[#allocation241_spill] sm:$0xff] }
 0xc76   :  { %14390 = vmatprep.subr.mxu0 %v25160_v9  ;;  %14524 = vmatprep.subr.mxu1 %v25125_v43  ;;  %v25214_v9 = vld [vmem:[#allocation245_spill] sm:$0xff] }
 0xc77   :  { %14393 = vmatpush1.msra.mxu0 %v25161_v48  ;;  %14526 = vmatpush1.msra.mxu1 %v25126_v20  ;;  %v25215_v48 = vld [vmem:[#allocation249_spill] sm:$0xff] }
 0xc78   :  { %14396 = vmatprep.subr.mxu0 %v25162_v12  ;;  %14528 = vmatprep.subr.mxu1 %v25127_v1  ;;  %v25216_v12 = vld [vmem:[#allocation252_spill] sm:$0xff] }
 0xc79   :  { %14399 = vmatpush1.msra.mxu0 %v25163_v58  ;;  %14530 = vmatpush1.msra.mxu1 %v25128_v8  ;;  %v25217_v58 = vld [vmem:[#allocation253_spill] sm:$0xff] }
 0xc7a   :  { %14402 = vmatprep.subr.mxu0 %v25164_v2  ;;  %14532 = vmatprep.subr.mxu1 %v25129_v28  ;;  %v25218_v2 = vld [vmem:[#allocation176_spill] sm:$0xff] }
 0xc7b   :  { %14405 = vmatpush1.msra.mxu0 %v25165_v0  ;;  %14534 = vmatpush1.msra.mxu1 %v25130_v13  ;;  %v25219_v0 = vld [vmem:[#allocation254_spill] sm:$0xff] }
 0xc7c   :  { %14408 = vmatprep.subr.mxu0 %v25166_v62  ;;  %14571 = vmatmul.mubr.f32.vlgmr.msra.gmra.mxu1 %v21621_v29  ;;  %v25220_v62 = vld [vmem:[#allocation180_spill] sm:$0xff] }
 0xc7d   :  { %14746 = vmatprep.subr.mxu1 %v23697_v46  ;;  %14411 = vmatpush1.msra.mxu0 %v25167_v27  ;;  %v25172_v46 = vld [vmem:[#allocation123_spill] sm:$0xff]  ;;  %v25221_v27 = vld [vmem:[#allocation258_spill] sm:$0xff] }
 0xc7e   :  { %14748 = vmatpush1.msra.mxu1 %v23589_v5  ;;  %14414 = vmatprep.subr.mxu0 %v25168_v52  ;;  %v25173_v5 = vld [vmem:[#allocation124_spill] sm:$0xff] }
 0xc7f   :  { %14750 = vmatprep.subr.mxu1 %v23591_v35  ;;  %14417 = vmatpush1.msra.mxu0 %v25169_v34  ;;  %v25176_v35 = vld [vmem:[#allocation24_spill] sm:$0xff]  ;;  %v25223_v34 = vld [vmem:[#allocation263_spill] sm:$0xff] }
 0xc80   :  { %14752 = vmatpush1.msra.mxu1 %v23594_v56  ;;  %14420 = vmatprep.subr.mxu0 %v25170_v44  ;;  %v25174_v56 = vld [vmem:[#allocation11_spill] sm:$0xff]  ;;  %v25222_v52 = vld [vmem:[#allocation184_spill] sm:$0xff] }
 0xc81   :  { %14754 = vmatprep.subr.mxu1 %v23597_v42  ;;  %14423 = vmatpush1.msra.mxu0 %v25171_v50  ;;  %v25175_v42 = vld [vmem:[#allocation22_spill] sm:$0xff]  ;;  %v25224_v44 = vld [vmem:[#allocation188_spill] sm:$0xff]  ;;  %v25225_v50 = vld [vmem:[#allocation267_spill] sm:$0xff] }
 0xc82   :  { %14756 = vmatpush1.msra.mxu1 %v23600_v40  ;;  %14426 = vmatprep.subr.mxu0 %v25172_v46  ;;  %v25178_v40 = vld [vmem:[#allocation30_spill] sm:$0xff]  ;;  %v25226_v46 = vld [vmem:[#allocation191_spill] sm:$0xff] }
 0xc83   :  { %14758 = vmatprep.subr.mxu1 %v23602_v26  ;;  %14429 = vmatpush1.msra.mxu0 %v25173_v5  ;;  %v25177_v26 = vld [vmem:[#allocation28_spill] sm:$0xff]  ;;  %v25227_v5 = vld [vmem:[#allocation269_spill] sm:$0xff] }
 0xc84   :  { %14462 = vmatprep.mubr.f32.mxu0 %v23179_v16  ;;  %14760 = vmatpush1.msra.mxu1 %v23605_v4  ;;  %v25179_v4 = vld [vmem:[#allocation34_spill] sm:$0xff] }
 0xc85   :  { %14465 = vmatmul.mubr.f32.vlgmr.msra.gmra.mxu0 %v21615_v25  ;;  %14580 = vmatprep.subr.mxu0 %v25174_v56  ;;  %v25228_v56 = vld [vmem:[#allocation195_spill] sm:$0xff] }
 0xc86   :  { %14762 = vmatprep.subr.mxu1 %v23607_v15  ;;  %14584 = vmatpush1.msra.mxu0 %v25175_v42  ;;  %v25180_v15 = vld [vmem:[#allocation35_spill] sm:$0xff]  ;;  %v25229_v42 = vld [vmem:[#allocation284_spill] sm:$0xff] }
 0xc87   :  { %14764 = vmatpush1.msra.mxu1 %v23610_v55  ;;  %14588 = vmatprep.subr.mxu0 %v25176_v35  ;;  %v25181_v55 = vld [vmem:[#allocation41_spill] sm:$0xff] }
 0xc88   :  { %14766 = vmatprep.subr.mxu1 %v23612_v57  ;;  %14592 = vmatpush1.msra.mxu0 %v25177_v26  ;;  %v25182_v57 = vld [vmem:[#allocation46_spill] sm:$0xff]  ;;  %v25230_v35 = vld [vmem:[#allocation197_spill] sm:$0xff]  ;;  %v25231_v26 = vld [vmem:[#allocation299_spill] sm:$0xff] }
 0xc89   :  { %14768 = vmatpush1.msra.mxu1 %v23615_v36  ;;  %14596 = vmatprep.subr.mxu0 %v25178_v40  ;;  %v25183_v36 = vld [vmem:[#allocation50_spill] sm:$0xff] }
 0xc8a   :  { %14770 = vmatprep.subr.mxu1 %v23617_v45  ;;  %14600 = vmatpush1.msra.mxu0 %v25179_v4  ;;  %v25184_v45 = vld [vmem:[#allocation51_spill] sm:$0xff]  ;;  %v25232_v40 = vld [vmem:[#allocation198_spill] sm:$0xff] }
 0xc8b   :  { %14772 = vmatpush1.msra.mxu1 %v23620_v53  ;;  %14604 = vmatprep.subr.mxu0 %v25180_v15  ;;  %v25185_v53 = vld [vmem:[#allocation57_spill] sm:$0xff]  ;;  %v25233_v4 = vld [vmem:[#allocation303_spill] sm:$0xff]  ;;  %v25234_v15 = vld [vmem:[#allocation202_spill] sm:$0xff] }
 0xc8c   :  { %14774 = vmatprep.subr.mxu1 %v23622_v14  ;;  %14608 = vmatpush1.msra.mxu0 %v25181_v55  ;;  %v25186_v14 = vld [vmem:[#allocation63_spill] sm:$0xff]  ;;  %v25235_v55 = vld [vmem:[#allocation306_spill] sm:$0xff] }
 0xc8d   :  { %14776 = vmatpush1.msra.mxu1 %v23624_v24  ;;  %14612 = vmatprep.subr.mxu0 %v25182_v57  ;;  %v25187_v24 = vld [vmem:[#allocation65_spill] sm:$0xff]  ;;  %v25236_v57 = vld [vmem:[#allocation207_spill] sm:$0xff] }
 0xc8e   :  { %14778 = vmatprep.subr.mxu1 %v23626_v7  ;;  %14616 = vmatpush1.msra.mxu0 %v25183_v36  ;;  %v25188_v7 = vld [vmem:[#allocation68_spill] sm:$0xff]  ;;  %v25237_v36 = vld [vmem:[#allocation311_spill] sm:$0xff] }
 0xc8f   :  { %14780 = vmatpush1.msra.mxu1 %v23629_v33  ;;  %14620 = vmatprep.subr.mxu0 %v25184_v45  ;;  %v25189_v33 = vld [vmem:[#allocation74_spill] sm:$0xff] }
 0xc90   :  { %14782 = vmatprep.subr.mxu1 %v23631_v11  ;;  %14624 = vmatpush1.msra.mxu0 %v25185_v53  ;;  %v25190_v11 = vld [vmem:[#allocation80_spill] sm:$0xff]  ;;  %v25238_v45 = vld [vmem:[#allocation210_spill] sm:$0xff] }
 0xc91   :  { %14784 = vmatpush1.msra.mxu1 %v23634_v61  ;;  %14628 = vmatprep.subr.mxu0 %v25186_v14  ;;  %v25191_v61 = vld [vmem:[#allocation81_spill] sm:$0xff]  ;;  %v25239_v53 = vld [vmem:[#allocation314_spill] sm:$0xff] }
 0xc92   :  { %14786 = vmatprep.subr.mxu1 %v23636_v54  ;;  %14632 = vmatpush1.msra.mxu0 %v25187_v24  ;;  %v25192_v54 = vld [vmem:[#allocation82_spill] sm:$0xff]  ;;  %v25240_v14 = vld [vmem:[#allocation213_spill] sm:$0xff]  ;;  %v25241_v24 = vld [vmem:[#allocation316_spill] sm:$0xff] }
 0xc93   :  { %14788 = vmatpush1.msra.mxu1 %v23638_v18  ;;  %14636 = vmatprep.subr.mxu0 %v25188_v7  ;;  %v25193_v18 = vld [vmem:[#allocation87_spill] sm:$0xff]  ;;  %v25242_v7 = vld [vmem:[#allocation218_spill] sm:$0xff] }
 0xc94   :  { %14790 = vmatprep.subr.mxu1 %v25119_v59  ;;  %14640 = vmatpush1.msra.mxu0 %v25189_v33  ;;  %v25194_v59 = vld [vmem:[#allocation94_spill] sm:$0xff] }
 0xc95   :  { %14792 = vmatpush1.msra.mxu1 %v25121_v3  ;;  %14644 = vmatprep.subr.mxu0 %v25190_v11  ;;  %v25195_v3 = vld [vmem:[#allocation97_spill] sm:$0xff]  ;;  %v25243_v33 = vld [vmem:[#allocation318_spill] sm:$0xff]  ;;  %v25244_v11 = vld [vmem:[#allocation231_spill] sm:$0xff] }
 0xc96   :  { %14794 = vmatprep.subr.mxu1 %v25123_v41  ;;  %14648 = vmatpush1.msra.mxu0 %v25191_v61  ;;  %v25196_v41 = vld [vmem:[#allocation98_spill] sm:$0xff]  ;;  %v25245_v61 = vld [vmem:[#allocation320_spill] sm:$0xff] }
 0xc97   :  { %14796 = vmatpush1.msra.mxu1 %v25124_v23  ;;  %14652 = vmatprep.subr.mxu0 %v25192_v54  ;;  %v25197_v23 = vld [vmem:[#allocation106_spill] sm:$0xff]  ;;  %v25246_v54 = vld [vmem:[#allocation239_spill] sm:$0xff] }
 0xc98   :  { %14798 = vmatprep.subr.mxu1 %v25125_v43  ;;  %14656 = vmatpush1.msra.mxu0 %v25193_v18  ;;  %v25198_v43 = vld [vmem:[#allocation111_spill] sm:$0xff]  ;;  %v25247_v18 = vld [vmem:[#allocation322_spill] sm:$0xff] }
 0xc99   :  { %14800 = vmatpush1.msra.mxu1 %v25126_v20  ;;  %14660 = vmatprep.subr.mxu0 %v25194_v59  ;;  %v25199_v20 = vld [vmem:[#allocation192_spill] sm:$0xff]  ;;  %v25248_v59 = vld [vmem:[#allocation247_spill] sm:$0xff] }
 0xc9a   :  { %14802 = vmatprep.subr.mxu1 %v25127_v1  ;;  %14664 = vmatpush1.msra.mxu0 %v25195_v3  ;;  %v25200_v1 = vld [vmem:[#allocation114_spill] sm:$0xff]  ;;  %v25249_v3 = vld [vmem:[#allocation324_spill] sm:$0xff] }
 0xc9b   :  { %14804 = vmatpush1.msra.mxu1 %v25128_v8  ;;  %14668 = vmatprep.subr.mxu0 %v25196_v41  ;;  %v25202_v8 = vld [vmem:[#allocation117_spill] sm:$0xff]  ;;  %v25250_v41 = vld [vmem:[#allocation251_spill] sm:$0xff] }
 0xc9c   :  { %14806 = vmatprep.subr.mxu1 %v25129_v28  ;;  %14672 = vmatpush1.msra.mxu0 %v25197_v23  ;;  %v25204_v28 = vld [vmem:[#allocation122_spill] sm:$0xff]  ;;  %v25251_v23 = vld [vmem:[#allocation325_spill] sm:$0xff] }
 0xc9d   :  { %14808 = vmatpush1.msra.mxu1 %v25130_v13  ;;  %14841 = vmatprep.mubr.f32.mxu1 %v23179_v16  ;;  %v25206_v13 = vld [vmem:[#allocation126_spill] sm:$0xff] }
 0xc9e   :  { %14676 = vmatprep.subr.mxu0 %v25198_v43  ;;  %14843 = vmatmul.mubr.f32.vlgmr.msra.gmra.mxu1 %v21611_v39  ;;  %v25252_v43 = vld [vmem:[#allocation256_spill] sm:$0xff] }
 0xc9f   :  { %14962 = vmatprep.subr.mxu1 %v25199_v20  ;;  %14680 = vmatpush1.msra.mxu0 %v25200_v1  ;;  %v25253_v20 = vld [vmem:[#allocation326_spill] sm:$0xff]  ;;  %v25254_v1 = vld [vmem:[#allocation261_spill] sm:$0xff] }
 0xca0   :  { %14968 = vmatpush1.msra.mxu1 %v25201_v19  ;;  %14684 = vmatprep.subr.mxu0 %v25202_v8  ;;  %v25255_v19 = vld [vmem:[#allocation327_spill] sm:$0xff]  ;;  %v25256_v8 = vld [vmem:[#allocation266_spill] sm:$0xff] }
 0xca1   :  { %14974 = vmatprep.subr.mxu1 %v25203_v6  ;;  %14688 = vmatpush1.msra.mxu0 %v25204_v28  ;;  %v25257_v6 = vld [vmem:[#allocation328_spill] sm:$0xff] }
 0xca2   :  { %14980 = vmatpush1.msra.mxu1 %v25205_v22  ;;  %14692 = vmatprep.subr.mxu0 %v25206_v13  ;;  %v25258_v28 = vld [vmem:[#allocation268_spill] sm:$0xff]  ;;  %v25259_v22 = vld [vmem:[#allocation271_spill] sm:$0xff] }
 0xca3   :  { %14986 = vmatprep.subr.mxu1 %v25207_v37  ;;  %14696 = vmatpush1.msra.mxu0 %v25208_v49  ;;  %v25260_v13 = vld [vmem:[#allocation276_spill] sm:$0xff]  ;;  %v25262_v49 = vld [vmem:[#allocation282_spill] sm:$0xff] }
 0xca4   :  { %14992 = vmatpush1.msra.mxu1 %v25209_v32  ;;  %14700 = vmatprep.subr.mxu0 %v25210_v63  ;;  %v25261_v37 = vld [vmem:[#allocation280_spill] sm:$0xff]  ;;  %v25263_v32 = vld [vmem:[#allocation287_spill] sm:$0xff] }
 0xca5   :  { %14998 = vmatprep.subr.mxu1 %v25211_v51  ;;  %14704 = vmatpush1.msra.mxu0 %v25212_v47  ;;  %v25264_v63 = vld [vmem:[#allocation295_spill] sm:$0xff]  ;;  %v25265_v51 = vld [vmem:[#allocation298_spill] sm:$0xff]  ;;  %v25266_v47 = vld [vmem:[#allocation169_spill] sm:$0xff] }
 0xca6   :  { %14737 = vmatprep.mubr.f32.mxu0 %v23179_v16  ;;  %15004 = vmatpush1.msra.mxu1 %v25213_v10  ;;  %v25267_v10 = vld [vmem:[#allocation170_spill] sm:$0xff] }
 0xca7   :  { %14739 = vmatmul.mubr.f32.vlgmr.msra.gmra.mxu0 %v21611_v39  ;;  %14850 = vmatprep.subr.mxu0 %v23745_v17 }
 0xca8   :  { %15010 = vmatprep.subr.mxu1 %v25214_v9  ;;  %14852 = vmatpush1.msra.mxu0 %v23747_v38  ;;  %v25268_v9 = vld [vmem:[#allocation174_spill] sm:$0xff] }
 0xca9   :  { %15016 = vmatpush1.msra.mxu1 %v25215_v48  ;;  %14854 = vmatprep.subr.mxu0 %v23749_v30  ;;  %v25269_v48 = vld [vmem:[#allocation179_spill] sm:$0xff] }
 0xcaa   :  { %15022 = vmatprep.subr.mxu1 %v25216_v12  ;;  %14856 = vmatpush1.msra.mxu0 %v24249_v31  ;;  %v25270_v12 = vld [vmem:[#allocation183_spill] sm:$0xff] }
 0xcab   :  { %15028 = vmatpush1.msra.mxu1 %v25217_v58  ;;  %14858 = vmatprep.subr.mxu0 %v25218_v2  ;;  %v25272_v58 = vld [vmem:[#allocation194_spill] sm:$0xff] }
 0xcac   :  { %15034 = vmatprep.subr.mxu1 %v25219_v0  ;;  %14860 = vmatpush1.msra.mxu0 %v25220_v62  ;;  %v25273_v0 = vld [vmem:[#allocation201_spill] sm:$0xff] }
 0xcad   :  { %15040 = vmatpush1.msra.mxu1 %v25221_v27  ;;  %14862 = vmatprep.subr.mxu0 %v25222_v52  ;;  %v25274_v27 = vld [vmem:[#allocation206_spill] sm:$0xff] }
 0xcae   :  { %15046 = vmatprep.subr.mxu1 %v25223_v34  ;;  %14864 = vmatpush1.msra.mxu0 %v25224_v44  ;;  %v25275_v34 = vld [vmem:[#allocation209_spill] sm:$0xff] }
 0xcaf   :  { %15052 = vmatpush1.msra.mxu1 %v25225_v50  ;;  %14866 = vmatprep.subr.mxu0 %v25226_v46  ;;  %v25276_v50 = vld [vmem:[#allocation211_spill] sm:$0xff] }
 0xcb0   :  { %15058 = vmatprep.subr.mxu1 %v25227_v5  ;;  %14868 = vmatpush1.msra.mxu0 %v25228_v56  ;;  %v25277_v5 = vld [vmem:[#allocation212_spill] sm:$0xff] }
 0xcb1   :  { %15064 = vmatpush1.msra.mxu1 %v25229_v42  ;;  %14870 = vmatprep.subr.mxu0 %v25230_v35  ;;  %v25278_v42 = vld [vmem:[#allocation217_spill] sm:$0xff] }
 0xcb2   :  { %15070 = vmatprep.subr.mxu1 %v25231_v26  ;;  %14872 = vmatpush1.msra.mxu0 %v25232_v40  ;;  %v25279_v26 = vld [vmem:[#allocation222_spill] sm:$0xff] }
 0xcb3   :  { %15076 = vmatpush1.msra.mxu1 %v25233_v4  ;;  %14874 = vmatprep.subr.mxu0 %v25234_v15  ;;  %v25280_v4 = vld [vmem:[#allocation225_spill] sm:$0xff] }
 0xcb4   :  { %15082 = vmatprep.subr.mxu1 %v25235_v55  ;;  %14876 = vmatpush1.msra.mxu0 %v25236_v57  ;;  %v25281_v55 = vld [vmem:[#allocation228_spill] sm:$0xff] }
 0xcb5   :  { %15088 = vmatpush1.msra.mxu1 %v25237_v36  ;;  %14878 = vmatprep.subr.mxu0 %v25238_v45  ;;  %v25282_v36 = vld [vmem:[#allocation232_spill] sm:$0xff] }
 0xcb6   :  { %15094 = vmatprep.subr.mxu1 %v25239_v53  ;;  %14880 = vmatpush1.msra.mxu0 %v25240_v14  ;;  %v25283_v53 = vld [vmem:[#allocation243_spill] sm:$0xff] }
 0xcb7   :  { %15100 = vmatpush1.msra.mxu1 %v25241_v24  ;;  %14882 = vmatprep.subr.mxu0 %v25242_v7  ;;  %v25284_v24 = vld [vmem:[#allocation250_spill] sm:$0xff] }
 0xcb8   :  { %15106 = vmatprep.subr.mxu1 %v25243_v33  ;;  %14884 = vmatpush1.msra.mxu0 %v25244_v11  ;;  %v25285_v33 = vld [vmem:[#allocation259_spill] sm:$0xff] }
 0xcb9   :  { %15112 = vmatpush1.msra.mxu1 %v25245_v61  ;;  %14886 = vmatprep.subr.mxu0 %v25246_v54  ;;  %v25286_v61 = vld [vmem:[#allocation265_spill] sm:$0xff] }
 0xcba   :  { %15118 = vmatprep.subr.mxu1 %v25247_v18  ;;  %14888 = vmatpush1.msra.mxu0 %v25248_v59  ;;  %v25287_v18 = vld [vmem:[#allocation270_spill] sm:$0xff] }
 0xcbb   :  { %15124 = vmatpush1.msra.mxu1 %v25249_v3  ;;  %14890 = vmatprep.subr.mxu0 %v25250_v41  ;;  %v25288_v3 = vld [vmem:[#allocation274_spill] sm:$0xff] }
 0xcbc   :  { %15130 = vmatprep.subr.mxu1 %v25251_v23  ;;  %14892 = vmatpush1.msra.mxu0 %v25252_v43  ;;  %v25289_v23 = vld [vmem:[#allocation279_spill] sm:$0xff] }
 0xcbd   :  { %15136 = vmatpush1.msra.mxu1 %v25253_v20  ;;  %14894 = vmatprep.subr.mxu0 %v25254_v1  ;;  %v25290_v20 = vld [vmem:[#allocation281_spill] sm:$0xff] }
 0xcbe   :  { %15142 = vmatprep.subr.mxu1 %v25255_v19  ;;  %14896 = vmatpush1.msra.mxu0 %v25256_v8  ;;  %v25291_v19 = vld [vmem:[#allocation286_spill] sm:$0xff] }
 0xcbf   :  { %15148 = vmatpush1.msra.mxu1 %v25257_v6  ;;  %15181 = vmatprep.mubr.f32.mxu1 %v23179_v16  ;;  %v25292_v6 = vld [vmem:[#allocation290_spill] sm:$0xff] }
 0xcc0   :  { %14898 = vmatprep.subr.mxu0 %v25258_v28  ;;  %15183 = vmatmul.mubr.f32.vlgmr.msra.gmra.mxu1 %v21611_v39 }
 0xcc1   :  { %15327 = vmatprep.subr.mxu1 %v23745_v17  ;;  %14900 = vmatpush1.msra.mxu0 %v25259_v22 }
 0xcc2   :  { %15329 = vmatpush1.msra.mxu1 %v23747_v38  ;;  %14902 = vmatprep.subr.mxu0 %v25260_v13 }
 0xcc3   :  { %15331 = vmatprep.subr.mxu1 %v23749_v30  ;;  %14904 = vmatpush1.msra.mxu0 %v25261_v37 }
 0xcc4   :  { %15333 = vmatpush1.msra.mxu1 %v24249_v31  ;;  %14906 = vmatprep.subr.mxu0 %v25262_v49 }
 0xcc5   :  { %15335 = vmatprep.subr.mxu1 %v25218_v2  ;;  %14908 = vmatpush1.msra.mxu0 %v25263_v32 }
 0xcc6   :  { %15337 = vmatpush1.msra.mxu1 %v25220_v62  ;;  %14910 = vmatprep.subr.mxu0 %v25264_v63 }
 0xcc7   :  { %15339 = vmatprep.subr.mxu1 %v25222_v52  ;;  %14912 = vmatpush1.msra.mxu0 %v25265_v51 }
 0xcc8   :  { %14945 = vmatprep.mubr.f32.mxu0 %v23179_v16  ;;  %15341 = vmatpush1.msra.mxu1 %v25224_v44 }
 0xcc9   :  { %14951 = vmatmul.mubr.f32.vlgmr.msra.gmra.mxu0 %v21629_v60  ;;  %15191 = vmatprep.subr.mxu0 %v25266_v47  ;;  %v25271_v60 = vld [vmem:[#allocation187_spill] sm:$0xff]  ;;  %v25293_v47 = vld [vmem:[#allocation294_spill] sm:$0xff] }
 0xcca   :  { %15343 = vmatprep.subr.mxu1 %v25226_v46  ;;  %15194 = vmatpush1.msra.mxu0 %v25267_v10  ;;  %v25294_v10 = vld [vmem:[#allocation297_spill] sm:$0xff] }
 0xccb   :  { %15345 = vmatpush1.msra.mxu1 %v25228_v56  ;;  %15197 = vmatprep.subr.mxu0 %v25268_v9  ;;  %v25295_v9 = vld [vmem:[#allocation301_spill] sm:$0xff] }
 0xccc   :  { %15347 = vmatprep.subr.mxu1 %v25230_v35  ;;  %15200 = vmatpush1.msra.mxu0 %v25269_v48  ;;  %v15747_v48 = vld [vmem:[#allocation5 + $0x78] sm:$0xff] }
 0xccd   :  { %15349 = vmatpush1.msra.mxu1 %v25232_v40  ;;  %15203 = vmatprep.subr.mxu0 %v25270_v12  ;;  %v21965_v12 = vand.u32 4294901760, %v15747_v48 }
 0xcce   :  { %15351 = vmatprep.subr.mxu1 %v25234_v15  ;;  %15206 = vmatpush1.msra.mxu0 %v25271_v60  ;;  %v15746_v60 = vld [vmem:[#allocation5 + $0x70] sm:$0xff] }
 0xccf   :  { %15353 = vmatpush1.msra.mxu1 %v25236_v57  ;;  %15209 = vmatprep.subr.mxu0 %v25272_v58  ;;  %v21968_v58 = vsub.f32 %v15747_v48, %v21965_v12  ;;  %v15735_v48 = vld [vmem:[#allocation5 + $0x18] sm:$0xff] }
 0xcd0   :  { %15355 = vmatprep.subr.mxu1 %v25238_v45  ;;  %15212 = vmatpush1.msra.mxu0 %v25273_v0  ;;  %v21970_v0 = vand.u32 4294901760, %v15746_v60 }
 0xcd1   :  { %15357 = vmatpush1.msra.mxu1 %v25240_v14  ;;  %15215 = vmatprep.subr.mxu0 %v25274_v27  ;;  %v15745_v27 = vld [vmem:[#allocation5 + $0x68] sm:$0xff] }
 0xcd2   :  { %15359 = vmatprep.subr.mxu1 %v25242_v7  ;;  %15218 = vmatpush1.msra.mxu0 %v25275_v34  ;;  %v15849_v34 = vand.u32 4294901760, %v21968_v58 }
 0xcd3   :  { %15361 = vmatpush1.msra.mxu1 %v25244_v11  ;;  %15221 = vmatprep.subr.mxu0 %v25276_v50  ;;  %v21978_v50 = vand.u32 4294901760, %v15745_v27 }
 0xcd4   :  { %15363 = vmatprep.subr.mxu1 %v25246_v54  ;;  %15224 = vmatpush1.msra.mxu0 %v25277_v5  ;;  %v15744_v5 = vld [vmem:[#allocation5 + $0x60] sm:$0xff] }
 0xcd5   :  { %15365 = vmatpush1.msra.mxu1 %v25248_v59  ;;  %15227 = vmatprep.subr.mxu0 %v25278_v42  ;;  %v15850_v42 = vsub.f32 %v21968_v58, %v15849_v34 }
 0xcd6   :  { %15367 = vmatprep.subr.mxu1 %v25250_v41  ;;  %15230 = vmatpush1.msra.mxu0 %v25279_v26 }
 0xcd7   :  { %15369 = vmatpush1.msra.mxu1 %v25252_v43  ;;  %15233 = vmatprep.subr.mxu0 %v25280_v4  ;;  %v21987_v4 = vsub.f32 %v15745_v27, %v21978_v50 }
 0xcd8   :  { %15371 = vmatprep.subr.mxu1 %v25254_v1  ;;  %15236 = vmatpush1.msra.mxu0 %v25281_v55  ;;  %v21989_v55 = vand.u32 4294901760, %v15744_v5 }
 0xcd9   :  { %15373 = vmatpush1.msra.mxu1 %v25256_v8  ;;  %15239 = vmatprep.subr.mxu0 %v25282_v36  ;;  %v15743_v36 = vld [vmem:[#allocation5 + $0x58] sm:$0xff] }
 0xcda   :  { %15375 = vmatprep.subr.mxu1 %v25258_v28  ;;  %15242 = vmatpush1.msra.mxu0 %v25283_v53  ;;  %v15851_v53 = vand.u32 4294901760, %v15850_v42  ;;  %v15734_v42 = vld [vmem:[#allocation5 + $0x10] sm:$0xff] }
 0xcdb   :  { %15377 = vmatpush1.msra.mxu1 %v25259_v22  ;;  %15245 = vmatprep.subr.mxu0 %v25284_v24 }
 0xcdc   :  { %15379 = vmatprep.subr.mxu1 %v25260_v13  ;;  %15248 = vmatpush1.msra.mxu0 %v25285_v33  ;;  %v15863_v33 = vand.u32 4294901760, %v21987_v4 }
 0xcdd   :  { %15381 = vmatpush1.msra.mxu1 %v25261_v37  ;;  %15251 = vmatprep.subr.mxu0 %v25286_v61  ;;  %v21998_v61 = vsub.f32 %v15744_v5, %v21989_v55 }
 0xcde   :  { %15383 = vmatprep.subr.mxu1 %v25262_v49  ;;  %15254 = vmatpush1.msra.mxu0 %v25287_v18  ;;  %v22001_v18 = vand.u32 4294901760, %v15743_v36 }
 0xcdf   :  { %15385 = vmatpush1.msra.mxu1 %v25263_v32  ;;  %15257 = vmatprep.subr.mxu0 %v25288_v3  ;;  %v15742_v3 = vld [vmem:[#allocation5 + $0x50] sm:$0xff] }
 0xce0   :  { %15387 = vmatprep.subr.mxu1 %v25264_v63  ;;  %15260 = vmatpush1.msra.mxu0 %v25289_v23 }
 0xce1   :  { %15389 = vmatpush1.msra.mxu1 %v25265_v51  ;;  %15422 = vmatprep.mubr.f32.mxu1 %v23179_v16 }
 0xce2   :  { %15263 = vmatprep.subr.mxu0 %v25290_v20  ;;  %15426 = vmatmul.mubr.f32.vlgmr.msra.gmra.mxu1 %v21621_v29  ;;  %v25300_v29 = vld [vmem:[#allocation182_spill] sm:$0xff]  ;;  %v15864_v20 = vsub.f32 %v21987_v4, %v15863_v33 }
 0xce3   :  { %15601 = vmatprep.subr.mxu1 %v23745_v17  ;;  %15266 = vmatpush1.msra.mxu0 %v25291_v19  ;;  %v25296_v17 = vld [vmem:[#allocation308_spill] sm:$0xff]  ;;  %v23127_v19 = vand.u32 4294901760, %v21998_v61 }
 0xce4   :  { %15603 = vmatpush1.msra.mxu1 %v23747_v38  ;;  %15269 = vmatprep.subr.mxu0 %v25292_v6  ;;  %v25297_v38 = vld [vmem:[#allocation310_spill] sm:$0xff]  ;;  %v22008_v6 = vand.u32 4294901760, %v15742_v3 }
 0xce5   :  { %15605 = vmatprep.subr.mxu1 %v23749_v30  ;;  %15272 = vmatpush1.msra.mxu0 %v25293_v47  ;;  %v25298_v30 = vld [vmem:[#allocation175_spill] sm:$0xff]  ;;  %v22012_v47 = vsub.f32 %v15743_v36, %v22001_v18  ;;  %v15733_v36 = vld [vmem:[#allocation5 + $0x8] sm:$0xff] }
 0xce6   :  { %15607 = vmatpush1.msra.mxu1 %v24249_v31  ;;  %15275 = vmatprep.subr.mxu0 %v25294_v10  ;;  %v25299_v31 = vld [vmem:[#allocation177_spill] sm:$0xff]  ;;  %v15741_v10 = vld [vmem:[#allocation5 + $0x48] sm:$0xff] }
 0xce7   :  { %15609 = vmatprep.subr.mxu1 %v25218_v2  ;;  %15278 = vmatpush1.msra.mxu0 %v25295_v9  ;;  %v25301_v2 = vld [vmem:[#allocation186_spill] sm:$0xff]  ;;  %v15865_v9 = vand.u32 4294901760, %v15864_v20 }
 0xce8   :  { %15611 = vmatpush1.msra.mxu1 %v25220_v62  ;;  %15281 = vmatprep.subr.mxu0 %v25296_v17  ;;  %v25302_v62 = vld [vmem:[#allocation193_spill] sm:$0xff]  ;;  %v15871_v17 = vsub.f32 %v21998_v61, %v23127_v19 }
 0xce9   :  { %15613 = vmatprep.subr.mxu1 %v25222_v52  ;;  %15284 = vmatpush1.msra.mxu0 %v25297_v38  ;;  %v25304_v52 = vld [vmem:[#allocation208_spill] sm:$0xff]  ;;  %v22019_v38 = vsub.f32 %v15742_v3, %v22008_v6  ;;  %v22097_v3 = vand.u32 4294901760, %v15734_v42 }
 0xcea   :  { %15317 = vmatprep.mubr.f32.mxu0 %v23179_v16  ;;  %15615 = vmatpush1.msra.mxu1 %v25224_v44  ;;  %v25305_v44 = vld [vmem:[#allocation215_spill] sm:$0xff] }
 0xceb   :  { %15320 = vmatmul.mubr.f32.vlgmr.msra.gmra.mxu0 %v21615_v25  ;;  %15435 = vmatprep.subr.mxu0 %v25298_v30  ;;  %v25303_v25 = vld [vmem:[#allocation199_spill] sm:$0xff]  ;;  %v22021_v30 = vand.u32 4294901760, %v15741_v10 }
 0xcec   :  { %15617 = vmatprep.subr.mxu1 %v25226_v46  ;;  %15439 = vmatpush1.msra.mxu0 %v25299_v31  ;;  %v25306_v46 = vld [vmem:[#allocation219_spill] sm:$0xff]  ;;  %v23126_v31 = vand.u32 4294901760, %v22012_v47 }
 0xced   :  { %15619 = vmatpush1.msra.mxu1 %v25228_v56  ;;  %15443 = vmatprep.subr.mxu0 %v25300_v29  ;;  %v25307_v56 = vld [vmem:[#allocation224_spill] sm:$0xff]  ;;  %v15740_v29 = vld [vmem:[#allocation5 + $0x40] sm:$0xff] }
 0xcee   :  { %15621 = vmatprep.subr.mxu1 %v25230_v35  ;;  %15447 = vmatpush1.msra.mxu0 %v25301_v2  ;;  %v25308_v35 = vld [vmem:[#allocation226_spill] sm:$0xff]  ;;  %v15872_v2 = vand.u32 4294901760, %v15871_v17 }
 0xcef   :  { %15623 = vmatpush1.msra.mxu1 %v25232_v40  ;;  %15451 = vmatprep.subr.mxu0 %v25302_v62  ;;  %v25309_v40 = vld [vmem:[#allocation227_spill] sm:$0xff]  ;;  %v23125_v62 = vand.u32 4294901760, %v22019_v38 }
 0xcf0   :  { %15625 = vmatprep.subr.mxu1 %v25234_v15  ;;  %15455 = vmatpush1.msra.mxu0 %v25303_v25  ;;  %v25310_v15 = vld [vmem:[#allocation229_spill] sm:$0xff]  ;;  %v22029_v25 = vsub.f32 %v15741_v10, %v22021_v30 }
 0xcf1   :  { %15627 = vmatpush1.msra.mxu1 %v25236_v57  ;;  %15459 = vmatprep.subr.mxu0 %v25304_v52  ;;  %v25311_v57 = vld [vmem:[#allocation235_spill] sm:$0xff]  ;;  %v22031_v52 = vand.u32 4294901760, %v15740_v29 }
 0xcf2   :  { %15629 = vmatprep.subr.mxu1 %v25238_v45  ;;  %15463 = vmatpush1.msra.mxu0 %v25305_v44  ;;  %v25312_v45 = vld [vmem:[#allocation238_spill] sm:$0xff]  ;;  %v15878_v44 = vsub.f32 %v22012_v47, %v23126_v31  ;;  %v25334_v31 = vld [vmem:[#allocation181_spill] sm:$0xff] }
 0xcf3   :  { %15631 = vmatpush1.msra.mxu1 %v25240_v14  ;;  %15467 = vmatprep.subr.mxu0 %v25306_v46  ;;  %v25313_v14 = vld [vmem:[#allocation240_spill] sm:$0xff] }
 0xcf4   :  { %15633 = vmatprep.subr.mxu1 %v25242_v7  ;;  %15471 = vmatpush1.msra.mxu0 %v25307_v56  ;;  %v25314_v7 = vld [vmem:[#allocation242_spill] sm:$0xff]  ;;  %v15739_v46 = vld [vmem:[#allocation5 + $0x38] sm:$0xff]  ;;  %v15885_v56 = vsub.f32 %v22019_v38, %v23125_v62 }
 0xcf5   :  { %15635 = vmatpush1.msra.mxu1 %v25244_v11  ;;  %15475 = vmatprep.subr.mxu0 %v25308_v35  ;;  %v25315_v11 = vld [vmem:[#allocation255_spill] sm:$0xff]  ;;  %v23124_v35 = vand.u32 4294901760, %v22029_v25 }
 0xcf6   :  { %15637 = vmatprep.subr.mxu1 %v25246_v54  ;;  %15479 = vmatpush1.msra.mxu0 %v25309_v40  ;;  %v25316_v54 = vld [vmem:[#allocation264_spill] sm:$0xff]  ;;  %v22044_v40 = vsub.f32 %v15740_v29, %v22031_v52 }
 0xcf7   :  { %15639 = vmatpush1.msra.mxu1 %v25248_v59  ;;  %15483 = vmatprep.subr.mxu0 %v25310_v15  ;;  %v25317_v59 = vld [vmem:[#allocation273_spill] sm:$0xff]  ;;  %v22046_v15 = vand.u32 4294901760, %v15739_v46 }
 0xcf8   :  { %15641 = vmatprep.subr.mxu1 %v25250_v41  ;;  %15487 = vmatpush1.msra.mxu0 %v25311_v57  ;;  %v25318_v41 = vld [vmem:[#allocation278_spill] sm:$0xff]  ;;  %v15879_v57 = vand.u32 4294901760, %v15878_v44 }
 0xcf9   :  { %15643 = vmatpush1.msra.mxu1 %v25252_v43  ;;  %15491 = vmatprep.subr.mxu0 %v25312_v45  ;;  %v25319_v43 = vld [vmem:[#allocation285_spill] sm:$0xff]  ;;  %v15738_v45 = vld [vmem:[#allocation5 + $0x30] sm:$0xff] }
 0xcfa   :  { %15645 = vmatprep.subr.mxu1 %v25254_v1  ;;  %15495 = vmatpush1.msra.mxu0 %v25313_v14  ;;  %v25320_v1 = vld [vmem:[#allocation289_spill] sm:$0xff]  ;;  %v15886_v14 = vand.u32 4294901760, %v15885_v56 }
 0xcfb   :  { %15647 = vmatpush1.msra.mxu1 %v25256_v8  ;;  %15499 = vmatprep.subr.mxu0 %v25314_v7  ;;  %v25321_v8 = vld [vmem:[#allocation293_spill] sm:$0xff]  ;;  %v15892_v7 = vsub.f32 %v22029_v25, %v23124_v35 }
 0xcfc   :  { %15649 = vmatprep.subr.mxu1 %v25258_v28  ;;  %15503 = vmatpush1.msra.mxu0 %v25315_v11  ;;  %v25322_v28 = vld [vmem:[#allocation296_spill] sm:$0xff]  ;;  %v23123_v11 = vand.u32 4294901760, %v22044_v40 }
 0xcfd   :  { %15651 = vmatpush1.msra.mxu1 %v25259_v22  ;;  %15507 = vmatprep.subr.mxu0 %v25316_v54  ;;  %v25323_v22 = vld [vmem:[#allocation300_spill] sm:$0xff]  ;;  %v22056_v54 = vsub.f32 %v15739_v46, %v22046_v15 }
 0xcfe   :  { %15653 = vmatprep.subr.mxu1 %v25260_v13  ;;  %15511 = vmatpush1.msra.mxu0 %v25317_v59  ;;  %v25324_v13 = vld [vmem:[#allocation304_spill] sm:$0xff]  ;;  %v22059_v59 = vand.u32 4294901760, %v15738_v45 }
 0xcff   :  { %15655 = vmatpush1.msra.mxu1 %v25261_v37  ;;  %15515 = vmatprep.subr.mxu0 %v25318_v41  ;;  %v25325_v37 = vld [vmem:[#allocation307_spill] sm:$0xff]  ;;  %v15737_v41 = vld [vmem:[#allocation5 + $0x28] sm:$0xff] }
 0xd00   :  { %15657 = vmatprep.subr.mxu1 %v25262_v49  ;;  %15519 = vmatpush1.msra.mxu0 %v25319_v43  ;;  %v25326_v49 = vld [vmem:[#allocation309_spill] sm:$0xff]  ;;  %v15893_v43 = vand.u32 4294901760, %v15892_v7 }
 0xd01   :  { %15659 = vmatpush1.msra.mxu1 %v25263_v32  ;;  %15523 = vmatprep.subr.mxu0 %v25320_v1  ;;  %v25327_v32 = vld [vmem:[#allocation312_spill] sm:$0xff]  ;;  %v15899_v1 = vsub.f32 %v22044_v40, %v23123_v11 }
 0xd02   :  { %15661 = vmatprep.subr.mxu1 %v25264_v63  ;;  %15527 = vmatpush1.msra.mxu0 %v25321_v8  ;;  %v25328_v63 = vld [vmem:[#allocation317_spill] sm:$0xff]  ;;  %v23122_v8 = vand.u32 4294901760, %v22056_v54 }
 0xd03   :  { %15663 = vmatpush1.msra.mxu1 %v25265_v51  ;;  %15696 = vmatprep.mubr.f32.mxu1 %v23179_v16  ;;  %v25329_v51 = vld [vmem:[#allocation319_spill] sm:$0xff] }
 0xd04   :  { %15531 = vmatprep.subr.mxu0 %v25322_v28  ;;  %15698 = vmatmul.mubr.f32.vlgmr.msra.gmra.mxu1 %v21611_v39  ;;  %v22067_v28 = vand.u32 4294901760, %v15737_v41 }
 0xd05   :  { %15535 = vmatpush1.msra.mxu0 %v25323_v22  ;;  %15592 = vmatprep.mubr.f32.mxu0 %v23179_v16  ;;  %v22071_v22 = vsub.f32 %v15738_v45, %v22059_v59 }
 0xd06   :  { %15539 = vmatprep.subr.mxu0 %v25324_v13  ;;  %16565 = vmatprep.subr.mxu1 %v23179_v16  ;;  %v15736_v13 = vld [vmem:[#allocation5 + $0x20] sm:$0xff] }
 0xd07   :  { %15543 = vmatpush1.msra.mxu0 %v25325_v37  ;;  %16566 = vmatpush3.msra.mxu1 %v15851_v53  ;;  %v15900_v37 = vand.u32 4294901760, %v15899_v1 }
 0xd08   :  { %15547 = vmatprep.subr.mxu0 %v25326_v49  ;;  %16567 = vmatprep.subr.mxu1 %v23179_v16  ;;  %v15906_v49 = vsub.f32 %v22056_v54, %v23122_v8 }
 0xd09   :  { %15551 = vmatpush1.msra.mxu0 %v25327_v32  ;;  %v22079_v32 = vsub.f32 %v15737_v41, %v22067_v28  ;;  %16597 = vmatprep.mubr.msk.f32.mxu1 %vm16928_vm1, %v23179_v16 }
 0xd0a   :  { %15555 = vmatprep.subr.mxu0 %v25328_v63  ;;  %v22081_v63 = vand.u32 4294901760, %v15736_v13 }
 0xd0b   :  { %15559 = vmatpush1.msra.mxu0 %v25329_v51  ;;  %v23121_v51 = vand.u32 4294901760, %v22071_v22  ;;  %v23120_v27 = vand.u32 4294901760, %v22079_v32 }
 0xd0c   :  { %15594 = vmatmul.mubr.f32.vlgmr.msra.gmra.mxu0 %v21611_v39  ;;  %16530 = vmatprep.subr.mxu0 %v23179_v16  ;;  %v21976_v39 = vsub.f32 %v15746_v60, %v21970_v0  ;;  %v15907_v60 = vand.u32 4294901760, %v15906_v49  ;;  %v22089_v5 = vsub.f32 %v15736_v13, %v22081_v63 }
 0xd0d   :  { %16531 = vmatpush3.msra.mxu0 %v21965_v12  ;;  %v15913_v53 = vsub.f32 %v22071_v22, %v23121_v51  ;;  %v15920_v20 = vsub.f32 %v22079_v32, %v23120_v27  ;;  %16562 = vmatprep.mubr.msk.f32.mxu0 %vm16928_vm1, %v23179_v16 }
 0xd0e   :  { %16532 = vmatprep.subr.mxu0 %v23179_v16  ;;  %v15856_v26 = vand.u32 4294901760, %v21976_v39  ;;  %v23119_v10 = vand.u32 4294901760, %v22089_v5 }
 0xd0f   :  { %16533 = vmatpush3.msra.mxu0 %v21970_v0  ;;  %v15914_v17 = vand.u32 4294901760, %v15913_v53  ;;  %v15921_v46 = vand.u32 4294901760, %v15920_v20 }
 0xd10   :  { %16534 = vmatprep.subr.mxu0 %v23179_v16  ;;  %v15857_v24 = vsub.f32 %v21976_v39, %v15856_v26  ;;  %v15927_v56 = vsub.f32 %v22089_v5, %v23119_v10 }
 0xd11   :  { %16535 = vmatpush3.msra.mxu0 %v21978_v50 }
 0xd12   :  { %16536 = vmatprep.subr.mxu0 %v23179_v16  ;;  %v15858_v23 = vand.u32 4294901760, %v15857_v24  ;;  %v22095_v24 = vand.u32 4294901760, %v15735_v48  ;;  %v15928_v41 = vand.u32 4294901760, %v15927_v56  ;;  %v25330_v56 = vld [vmem:[#allocation19_spill] sm:$0xff] }
 0xd13   :  { %16537 = vmatpush3.msra.mxu0 %v21989_v55 }
 0xd14   :  { %16538 = vmatprep.subr.mxu0 %v23179_v16  ;;  %16568 = vmatpush3.msra.mxu1 %v15858_v23  ;;  %v22099_v23 = vand.u32 4294901760, %v15733_v36  ;;  %v22109_v29 = vsub.f32 %v15735_v48, %v22095_v24 }
 0xd15   :  { %16539 = vmatpush3.msra.mxu0 %v22001_v18  ;;  %16569 = vmatprep.subr.mxu1 %v23179_v16 }
 0xd16   :  { %16540 = vmatprep.subr.mxu0 %v23179_v16  ;;  %16570 = vmatpush3.msra.mxu1 %v15865_v9  ;;  %v15732_v9 = vld [vmem:[#allocation5] sm:$0xff]  ;;  %v22115_v44 = vsub.f32 %v15733_v36, %v22099_v23 }
 0xd17   :  { %16541 = vmatpush3.msra.mxu0 %v22008_v6  ;;  %16571 = vmatprep.subr.mxu1 %v23179_v16  ;;  %v22126_v7 = vand.u32 4294901760, %v15732_v9 }
 0xd18   :  { %16542 = vmatprep.subr.mxu0 %v23179_v16  ;;  %16572 = vmatpush3.msra.mxu1 %v15872_v2  ;;  %v22112_v2 = vsub.f32 %v15734_v42, %v22097_v3 }
 0xd19   :  { %16543 = vmatpush3.msra.mxu0 %v22021_v30  ;;  %16573 = vmatprep.subr.mxu1 %v23179_v16 }
 0xd1a   :  { %16544 = vmatprep.subr.mxu0 %v23179_v16  ;;  %16574 = vmatpush3.msra.mxu1 %v15879_v57  ;;  %v23118_v57 = vand.u32 4294901760, %v22109_v29  ;;  %v23117_v45 = vand.u32 4294901760, %v22112_v2 }
 0xd1b   :  { %16545 = vmatpush3.msra.mxu0 %v22031_v52  ;;  %16575 = vmatprep.subr.mxu1 %v23179_v16 }
 0xd1c   :  { %16546 = vmatprep.subr.mxu0 %v23179_v16  ;;  %16576 = vmatpush3.msra.mxu1 %v15886_v14  ;;  %v23116_v14 = vand.u32 4294901760, %v22115_v44  ;;  %v15941_v1 = vsub.f32 %v22112_v2, %v23117_v45 }
 0xd1d   :  { %16547 = vmatpush3.msra.mxu0 %v22046_v15  ;;  %16577 = vmatprep.subr.mxu1 %v23179_v16 }
 0xd1e   :  { %16548 = vmatprep.subr.mxu0 %v23179_v16  ;;  %16578 = vmatpush3.msra.mxu1 %v15893_v43  ;;  %v15934_v43 = vsub.f32 %v22109_v29, %v23118_v57  ;;  %v15948_v13 = vsub.f32 %v22115_v44, %v23116_v14  ;;  %v15942_v48 = vand.u32 4294901760, %v15941_v1 }
 0xd1f   :  { %16549 = vmatpush3.msra.mxu0 %v22059_v59  ;;  %16579 = vmatprep.subr.mxu1 %v23179_v16 }
 0xd20   :  { %16550 = vmatprep.subr.mxu0 %v23179_v16  ;;  %16580 = vmatpush3.msra.mxu1 %v15900_v37  ;;  %v22141_v37 = vsub.f32 %v15732_v9, %v22126_v7  ;;  %v15935_v49 = vand.u32 4294901760, %v15934_v43  ;;  %v15949_v42 = vand.u32 4294901760, %v15948_v13 }
 0xd21   :  { %16551 = vmatpush3.msra.mxu0 %v22067_v28  ;;  %16581 = vmatprep.subr.mxu1 %v23179_v16 }
 0xd22   :  { %16552 = vmatprep.subr.mxu0 %v23179_v16  ;;  %16582 = vmatpush3.msra.mxu1 %v15907_v60  ;;  %v23115_v60 = vand.u32 4294901760, %v22141_v37 }
 0xd23   :  { %16553 = vmatpush3.msra.mxu0 %v22081_v63  ;;  %16583 = vmatprep.subr.mxu1 %v23179_v16 }
 0xd24   :  { %16554 = vmatprep.subr.mxu0 %v23179_v16  ;;  %16584 = vmatpush3.msra.mxu1 %v15914_v17  ;;  %v15955_v36 = vsub.f32 %v22141_v37, %v23115_v60  ;;  %v14097_v20 = vpop.f32.mrf.mxu0  ;;  %v14329_v17 = vpop.f32.mrf.mxu1 }
 0xd25   :  { %16555 = vmatpush3.msra.mxu0 %v22095_v24  ;;  %16585 = vmatprep.subr.mxu1 %v23179_v16  ;;  %v14330_v13 = vadd.f32 %v14329_v17, %v14097_v20  ;;  %v25335_v20 = vld [vmem:[#allocation288_spill] sm:$0xff] }
 0xd26   :  { %16556 = vmatprep.subr.mxu0 %v23179_v16  ;;  %16586 = vmatpush3.msra.mxu1 %v15921_v46  ;;  %v15956_v53 = vand.u32 4294901760, %v15955_v36  ;;  %v14099_v9 = vpop.f32.mrf.mxu0  ;;  %v14331_v1 = vpop.f32.mrf.mxu1 }
 0xd27   :  { %16557 = vmatpush3.msra.mxu0 %v22097_v3  ;;  %16587 = vmatprep.subr.mxu1 %v23179_v16 }
 0xd28   :  { %16558 = vmatprep.subr.mxu0 %v23179_v16  ;;  %16588 = vmatpush3.msra.mxu1 %v15928_v41  ;;  %v25331_v41 = vld [vmem:[#allocation152_spill] sm:$0xff] }
 0xd29   :  { %16559 = vmatpush3.msra.mxu0 %v22099_v23  ;;  %16589 = vmatprep.subr.mxu1 %v23179_v16  ;;  %v263_v43 = vadd.f32 %v25331_v41, %v25330_v56 }
 0xd2a   :  { %16560 = vmatprep.subr.mxu0 %v23179_v16  ;;  %16590 = vmatpush3.msra.mxu1 %v15935_v49 }
 0xd2b   :  { %16561 = vmatpush3.msra.mxu0 %v22126_v7  ;;  %16591 = vmatprep.subr.mxu1 %v23179_v16 }
 0xd2c   :  { %16592 = vmatpush3.msra.mxu1 %v15942_v48  ;;  %16600 = vmatprep.subr.mxu0 %v23179_v16  ;;  %v14332_v48 = vadd.f32 %v14331_v1, %v14099_v9 }
 0xd2d   :  { %16593 = vmatprep.subr.mxu1 %v23179_v16 }
 0xd2e   :  { %16594 = vmatpush3.msra.mxu1 %v15949_v42  ;;  %v25332_v42 = vld [vmem:[#allocation153_spill] sm:$0xff] }
 0xd2f   :  { %16595 = vmatprep.subr.mxu1 %v23179_v16  ;;  %v394_v45 = vadd.f32 %v25332_v42, %v263_v43  ;;  %v25337_v43 = vld [vmem:[#allocation291_spill] sm:$0xff] }
 0xd30   :  { %16596 = vmatpush3.msra.mxu1 %v15956_v53  ;;  %v25333_v53 = vld [vmem:[#allocation178_spill] sm:$0xff] }
 0xd31   :  { %16635 = vmatprep.subr.mxu1 %v23179_v16  ;;  %v527_v10 = vadd.f32 %v25333_v53, %v394_v45 }
 0xd33   :  { %v666_v56 = vadd.f32 %v25334_v31, %v527_v10 }
 0xd35   :  { %v793_v17 = vadd.f32 %v25335_v20, %v666_v56 }
 0xd3c   :  { %v14572_v36 = vpop.f32.mrf.mxu1 }
 0xd3e   :  { %v14574_v27 = vpop.f32.mrf.mxu1 }
 0xd45   :  { %v14466_v46 = vpop.f32.mrf.mxu0 }
 0xd46   :  { %v14467_v60 = vadd.f32 %v14466_v46, %v14330_v13  ;;  %v25336_v13 = vld [vmem:[#allocation292_spill] sm:$0xff] }
 0xd47   :  { %v14468_v49 = vpop.f32.mrf.mxu0  ;;  %v916_v19 = vadd.f32 %v25336_v13, %v793_v17 }
 0xd48   :  { %v14469_v57 = vadd.f32 %v14468_v49, %v14332_v48  ;;  %v14573_v51 = vadd.f32 %v14572_v36, %v14467_v60 }
 0xd4a   :  { %v14575_v11 = vadd.f32 %v14574_v27, %v14469_v57 }
 0xd5e   :  { %v14844_v35 = vpop.f32.mrf.mxu1 }
 0xd60   :  { %v14846_v9 = vpop.f32.mrf.mxu1 }
 0xd67   :  { %v14740_v14 = vpop.f32.mrf.mxu0 }
 0xd68   :  { %v14741_v62 = vadd.f32 %v14740_v14, %v14573_v51 }
 0xd69   :  { %v14742_v8 = vpop.f32.mrf.mxu0 }
 0xd6a   :  { %v14743_v41 = vadd.f32 %v14742_v8, %v14575_v11  ;;  %v14845_v1 = vadd.f32 %v14844_v35, %v14741_v62 }
 0xd6c   :  { %v14847_v46 = vadd.f32 %v14846_v9, %v14743_v41  ;;  %v15704_v49 = vadd.f32 %v14845_v1, %v25337_v43 }
 0xd6e   :  { %v15705_v48 = vadd.f32 %v14847_v46, %v916_v19  ;;  %v16424_v45 = vmul.f32 -1.442695, %v15704_v49 }
 0xd70   :  { %v16425_v42 = vmul.f32 -1.442695, %v15705_v48  ;;  %16860 = vpow2.f32 %v16424_v45  ;;  %v25338_v45 = vld [vmem:[#allocation334_spill] sm:$0xff] }
 0xd72   :  { %16862 = vpow2.f32 %v16425_v42 }
 0xd7d   :  { %v16861_v56 = vpop.eup %16860 }
 0xd7e   :  { %v15717_v46 = vadd.f32 1.0, %v16861_v56 }
 0xd7f   :  { %v16863_v20 = vpop.eup %16862 }
 0xd80   :  { %v15184_v27 = vpop.f32.mrf.mxu1  ;;  %v15718_v49 = vadd.f32 1.0, %v16863_v20  ;;  %16864 = vrcp.f32 %v15717_v46 }
 0xd82   :  { %v15186_v31 = vpop.f32.mrf.mxu1  ;;  %16866 = vrcp.f32 %v15718_v49 }
 0xd89   :  { %v14952_v60 = vpop.f32.mrf.mxu0 }
 0xd8a   :  { %v15185_v11 = vadd.f32 %v15184_v27, %v14952_v60 }
 0xd8b   :  { %v14954_v51 = vpop.f32.mrf.mxu0 }
 0xd8c   :  { %v15187_v14 = vadd.f32 %v15186_v31, %v14954_v51  ;;  %v25339_v51 = vld [vmem:[#allocation17_spill] sm:$0xff] }
 0xd8d   :  { %v16865_v31 = vpop.eup %16864 }
 0xda2   :  { %v15427_v8 = vpop.f32.mrf.mxu1 }
 0xda4   :  { %v15429_v36 = vpop.f32.mrf.mxu1 }
 0xdab   :  { %v15321_v57 = vpop.f32.mrf.mxu0 }
 0xdac   :  { %v15322_v62 = vadd.f32 %v15321_v57, %v15185_v11  ;;  %v16867_v11 = vpop.eup %16866 }
 0xdad   :  { %v15323_v10 = vpop.f32.mrf.mxu0 }
 0xdae   :  { %v15324_v35 = vadd.f32 %v15323_v10, %v15187_v14  ;;  %v15428_v53 = vadd.f32 %v15427_v8, %v15322_v62  ;;  %v15727_v62 = vmul.f32 %v16867_v11, %v21608_v21 }
 0xdb0   :  { %v15430_v9 = vadd.f32 %v15429_v36, %v15324_v35 }
 0xdc4   :  { %v15699_v41 = vpop.f32.mrf.mxu1 }
 0xdc6   :  { %v15701_v48 = vpop.f32.mrf.mxu1 }
 0xdcc   :  { %v15595_v19 = vpop.f32.mrf.mxu0 }
 0xdcd   :  { %v15596_v17 = vadd.f32 %v15595_v19, %v15428_v53 }
 0xdce   :  { %v15597_v1 = vpop.f32.mrf.mxu0 }
 0xdcf   :  { %v15700_v13 = vadd.f32 %v15699_v41, %v15596_v17  ;;  %v15598_v43 = vadd.f32 %v15597_v1, %v15430_v9 }
 0xdd1   :  { %v15706_v42 = vadd.f32 %v15700_v13, %v25338_v45  ;;  %v15702_v60 = vadd.f32 %v15701_v48, %v15598_v43 }
 0xdd3   :  { %v16426_v27 = vmul.f32 -1.442695, %v15706_v42  ;;  %v15707_v57 = vadd.f32 %v15702_v60, %v25339_v51 }
 0xdd5   :  { %16868 = vpow2.f32 %v16426_v27 }
 0xdd6   :  { %16870 = vtanh.f32 %v15707_v57 }
 0xde2   :  { %v16869_v8 = vpop.eup %16868 }
 0xde3   :  { %v16871_v10 = vpop.eup %16870  ;;  %v15719_v14 = vadd.f32 1.0, %v16869_v8 }
 0xde4   :  { %v15728_v35 = vmul.f32 %v16871_v10, %v16865_v31 }
 0xde5   :  { %16872 = vrcp.f32 %v15719_v14 }
 0xde6   :  { %v15729_v36 = vadd.f32 %v15728_v35, %v15727_v62 }
 0xde8   :  { %16874 = vtanh.f32 %v15729_v36 }
 0xdf2   :  { %v16873_v53 = vpop.eup %16872 }
 0xdf5   :  { %v16875_v56 = vpop.eup %16874 }
 0xdf6   :  { %v15731_v41 = vmul.f32 %v16875_v56, %v16873_v53 }
 0xdf8   :  { %v22172_v19 = vand.u32 4294901760, %v15731_v41 }
 0xdfa   :  { %v22175_v20 = vsub.f32 %v15731_v41, %v22172_v19  ;;  %16598 = vmatmul.mubr.f32.vlgmr.msra.gmra.mxu1 %v22172_v19 }
 0xdfb   :  { %16636 = vmatpush3.msra.mxu1 %v21965_v12  ;;  %16667 = vmatprep.mubr.msk.f32.mxu1 %vm16928_vm1, %v23179_v16 }
 0xdfc   :  { %16637 = vmatprep.subr.mxu1 %v23179_v16  ;;  %v15838_v21 = vand.u32 4294901760, %v22175_v20 }
 0xdfd   :  { %16638 = vmatpush3.msra.mxu1 %v21970_v0 }
 0xdfe   :  { %16639 = vmatprep.subr.mxu1 %v23179_v16  ;;  %v15839_v17 = vsub.f32 %v22175_v20, %v15838_v21 }
 0xdff   :  { %16640 = vmatpush3.msra.mxu1 %v21978_v50 }
 0xe00   :  { %16641 = vmatprep.subr.mxu1 %v23179_v16  ;;  %v15840_v9 = vand.u32 4294901760, %v15839_v17 }
 0xe01   :  { %16642 = vmatpush3.msra.mxu1 %v21989_v55 }
 0xe02   :  { %16643 = vmatprep.subr.mxu1 %v23179_v16  ;;  %16563 = vmatmul.mubr.f32.vlgmr.msra.gmra.mxu0 %v15840_v9 }
 0xe03   :  { %16601 = vmatpush3.msra.mxu0 %v21968_v58  ;;  %16644 = vmatpush3.msra.mxu1 %v22001_v18  ;;  %v25341_v58 = vand.u32 4294901760, %v22012_v47 }
 0xe04   :  { %16602 = vmatprep.subr.mxu0 %v23179_v16  ;;  %16645 = vmatprep.subr.mxu1 %v23179_v16 }
 0xe05   :  { %16603 = vmatpush3.msra.mxu0 %v21976_v39  ;;  %16646 = vmatpush3.msra.mxu1 %v22008_v6  ;;  %v25344_v39 = vand.u32 4294901760, %v22044_v40 }
 0xe06   :  { %16604 = vmatprep.subr.mxu0 %v23179_v16  ;;  %16647 = vmatprep.subr.mxu1 %v23179_v16 }
 0xe07   :  { %16605 = vmatpush3.msra.mxu0 %v21987_v4  ;;  %16648 = vmatpush3.msra.mxu1 %v22021_v30  ;;  %v25347_v4 = vand.u32 4294901760, %v22079_v32 }
 0xe08   :  { %16606 = vmatprep.subr.mxu0 %v23179_v16  ;;  %16649 = vmatprep.subr.mxu1 %v23179_v16 }
 0xe09   :  { %16607 = vmatpush3.msra.mxu0 %v21998_v61  ;;  %16650 = vmatpush3.msra.mxu1 %v22031_v52 }
 0xe0a   :  { %16608 = vmatprep.subr.mxu0 %v23179_v16  ;;  %16651 = vmatprep.subr.mxu1 %v23179_v16 }
 0xe0b   :  { %16609 = vmatpush3.msra.mxu0 %v22012_v47  ;;  %16652 = vmatpush3.msra.mxu1 %v22046_v15 }
 0xe0c   :  { %16610 = vmatprep.subr.mxu0 %v23179_v16  ;;  %16653 = vmatprep.subr.mxu1 %v23179_v16 }
 0xe0d   :  { %16611 = vmatpush3.msra.mxu0 %v22019_v38  ;;  %16654 = vmatpush3.msra.mxu1 %v22059_v59 }
 0xe0e   :  { %16612 = vmatprep.subr.mxu0 %v23179_v16  ;;  %16655 = vmatprep.subr.mxu1 %v23179_v16 }
 0xe0f   :  { %16613 = vmatpush3.msra.mxu0 %v22029_v25  ;;  %16656 = vmatpush3.msra.mxu1 %v22067_v28 }
 0xe10   :  { %16614 = vmatprep.subr.mxu0 %v23179_v16  ;;  %16657 = vmatprep.subr.mxu1 %v23179_v16 }
 0xe11   :  { %16615 = vmatpush3.msra.mxu0 %v22044_v40  ;;  %16658 = vmatpush3.msra.mxu1 %v22081_v63 }
 0xe12   :  { %16616 = vmatprep.subr.mxu0 %v23179_v16  ;;  %16659 = vmatprep.subr.mxu1 %v23179_v16 }
 0xe13   :  { %16617 = vmatpush3.msra.mxu0 %v22056_v54  ;;  %16660 = vmatpush3.msra.mxu1 %v22095_v24 }
 0xe14   :  { %16618 = vmatprep.subr.mxu0 %v23179_v16  ;;  %16661 = vmatprep.subr.mxu1 %v23179_v16 }
 0xe15   :  { %16619 = vmatpush3.msra.mxu0 %v22071_v22  ;;  %16662 = vmatpush3.msra.mxu1 %v22097_v3 }
 0xe16   :  { %16620 = vmatprep.subr.mxu0 %v23179_v16  ;;  %16663 = vmatprep.subr.mxu1 %v23179_v16 }
 0xe17   :  { %16621 = vmatpush3.msra.mxu0 %v22079_v32  ;;  %16664 = vmatpush3.msra.mxu1 %v22099_v23 }
 0xe18   :  { %16622 = vmatprep.subr.mxu0 %v23179_v16  ;;  %16665 = vmatprep.subr.mxu1 %v23179_v16 }
 0xe19   :  { %16623 = vmatpush3.msra.mxu0 %v22089_v5  ;;  %16666 = vmatpush3.msra.mxu1 %v22126_v7 }
 0xe1a   :  { %16624 = vmatprep.subr.mxu0 %v23179_v16  ;;  %16668 = vmatmul.mubr.f32.vlgmr.msra.gmra.mxu1 %v15838_v21 }
 0xe1b   :  { %16705 = vmatprep.subr.mxu1 %v23179_v16  ;;  %16625 = vmatpush3.msra.mxu0 %v22109_v29 }
 0xe1c   :  { %16706 = vmatpush3.msra.mxu1 %v21965_v12  ;;  %16626 = vmatprep.subr.mxu0 %v23179_v16  ;;  %v25340_v12 = vand.u32 4294901760, %v21998_v61  ;;  %v25350_v61 = vand.u32 4294901760, %v22112_v2 }
 0xe1d   :  { %16707 = vmatprep.subr.mxu1 %v23179_v16  ;;  %16627 = vmatpush3.msra.mxu0 %v22112_v2 }
 0xe1e   :  { %16708 = vmatpush3.msra.mxu1 %v21970_v0  ;;  %16628 = vmatprep.subr.mxu0 %v23179_v16  ;;  %v25342_v0 = vand.u32 4294901760, %v22019_v38 }
 0xe1f   :  { %16709 = vmatprep.subr.mxu1 %v23179_v16  ;;  %16629 = vmatpush3.msra.mxu0 %v22115_v44 }
 0xe20   :  { %16710 = vmatpush3.msra.mxu1 %v21978_v50  ;;  %16630 = vmatprep.subr.mxu0 %v23179_v16  ;;  %v25345_v50 = vand.u32 4294901760, %v22056_v54 }
 0xe21   :  { %16711 = vmatprep.subr.mxu1 %v23179_v16  ;;  %16631 = vmatpush3.msra.mxu0 %v22141_v37 }
 0xe22   :  { %16632 = vmatprep.mubr.msk.f32.mxu0 %vm16928_vm1, %v23179_v16  ;;  %16712 = vmatpush3.msra.mxu1 %v21989_v55  ;;  %v25348_v55 = vand.u32 4294901760, %v22089_v5 }
 0xe23   :  { %16633 = vmatmul.mubr.f32.vlgmr.msra.gmra.mxu0 %v22175_v20  ;;  %16670 = vmatprep.subr.mxu0 %v23179_v16 }
 0xe24   :  { %16713 = vmatprep.subr.mxu1 %v23179_v16  ;;  %16671 = vmatpush3.msra.mxu0 %v15849_v34  ;;  %v25343_v34 = vand.u32 4294901760, %v22029_v25 }
 0xe25   :  { %16714 = vmatpush3.msra.mxu1 %v22001_v18  ;;  %16672 = vmatprep.subr.mxu0 %v23179_v16  ;;  %v25351_v18 = vand.u32 4294901760, %v22115_v44 }
 0xe26   :  { %16715 = vmatprep.subr.mxu1 %v23179_v16  ;;  %16673 = vmatpush3.msra.mxu0 %v15856_v26  ;;  %v25346_v26 = vand.u32 4294901760, %v22071_v22 }
 0xe27   :  { %16716 = vmatpush3.msra.mxu1 %v22008_v6  ;;  %16674 = vmatprep.subr.mxu0 %v23179_v16  ;;  %v25352_v6 = vand.u32 4294901760, %v22141_v37 }
 0xe28   :  { %16717 = vmatprep.subr.mxu1 %v23179_v16  ;;  %16675 = vmatpush3.msra.mxu0 %v15863_v33  ;;  %v25349_v33 = vand.u32 4294901760, %v22109_v29 }
 0xe29   :  { %16718 = vmatpush3.msra.mxu1 %v22021_v30  ;;  %16676 = vmatprep.subr.mxu0 %v23179_v16 }
 0xe2a   :  { %16719 = vmatprep.subr.mxu1 %v23179_v16  ;;  %16677 = vmatpush3.msra.mxu0 %v25340_v12 }
 0xe2b   :  { %16720 = vmatpush3.msra.mxu1 %v22031_v52  ;;  %16678 = vmatprep.subr.mxu0 %v23179_v16 }
 0xe2c   :  { %16721 = vmatprep.subr.mxu1 %v23179_v16  ;;  %16679 = vmatpush3.msra.mxu0 %v25341_v58 }
 0xe2d   :  { %16722 = vmatpush3.msra.mxu1 %v22046_v15  ;;  %16680 = vmatprep.subr.mxu0 %v23179_v16 }
 0xe2e   :  { %16723 = vmatprep.subr.mxu1 %v23179_v16  ;;  %16681 = vmatpush3.msra.mxu0 %v25342_v0 }
 0xe2f   :  { %16724 = vmatpush3.msra.mxu1 %v22059_v59  ;;  %16682 = vmatprep.subr.mxu0 %v23179_v16  ;;  %v16427_v59 = vld [vmem:[%s22344_s5] ss:$0 sm:$0xff] }
 0xe30   :  { %16725 = vmatprep.subr.mxu1 %v23179_v16  ;;  %16683 = vmatpush3.msra.mxu0 %v25343_v34 }
 0xe31   :  { %16726 = vmatpush3.msra.mxu1 %v22067_v28  ;;  %16684 = vmatprep.subr.mxu0 %v23179_v16 }
 0xe32   :  { %16727 = vmatprep.subr.mxu1 %v23179_v16  ;;  %16685 = vmatpush3.msra.mxu0 %v25344_v39 }
 0xe33   :  { %16728 = vmatpush3.msra.mxu1 %v22081_v63  ;;  %16686 = vmatprep.subr.mxu0 %v23179_v16 }
 0xe34   :  { %16729 = vmatprep.subr.mxu1 %v23179_v16  ;;  %16687 = vmatpush3.msra.mxu0 %v25345_v50 }
 0xe35   :  { %16730 = vmatpush3.msra.mxu1 %v22095_v24  ;;  %16688 = vmatprep.subr.mxu0 %v23179_v16 }
 0xe36   :  { %16731 = vmatprep.subr.mxu1 %v23179_v16  ;;  %16689 = vmatpush3.msra.mxu0 %v25346_v26 }
 0xe37   :  { %16732 = vmatpush3.msra.mxu1 %v22097_v3  ;;  %16690 = vmatprep.subr.mxu0 %v23179_v16 }
 0xe38   :  { %16733 = vmatprep.subr.mxu1 %v23179_v16  ;;  %16691 = vmatpush3.msra.mxu0 %v25347_v4 }
 0xe39   :  { %16734 = vmatpush3.msra.mxu1 %v22099_v23  ;;  %16692 = vmatprep.subr.mxu0 %v23179_v16 }
 0xe3a   :  { %16735 = vmatprep.subr.mxu1 %v23179_v16  ;;  %16693 = vmatpush3.msra.mxu0 %v25348_v55 }
 0xe3b   :  { %16736 = vmatpush3.msra.mxu1 %v22126_v7  ;;  %16737 = vmatprep.mubr.msk.f32.mxu1 %vm16928_vm1, %v23179_v16 }
 0xe3c   :  { %16694 = vmatprep.subr.mxu0 %v23179_v16  ;;  %16738 = vmatmul.mubr.f32.vlgmr.msra.gmra.mxu1 %v22172_v19 }
 0xe3d   :  { %16695 = vmatpush3.msra.mxu0 %v25349_v33  ;;  %16702 = vmatprep.mubr.msk.f32.mxu0 %vm16928_vm1, %v23179_v16 }
 0xe3e   :  { %16696 = vmatprep.subr.mxu0 %v23179_v16 }
 0xe3f   :  { %16697 = vmatpush3.msra.mxu0 %v25350_v61 }
 0xe40   :  { %16698 = vmatprep.subr.mxu0 %v23179_v16 }
 0xe41   :  { %16699 = vmatpush3.msra.mxu0 %v25351_v18 }
 0xe42   :  { %16700 = vmatprep.subr.mxu0 %v23179_v16 }
 0xe43   :  { %16701 = vmatpush3.msra.mxu0 %v25352_v6 }
 0xe44   :  { %16703 = vmatmul.mubr.f32.vlgmr.msra.gmra.mxu0 %v22172_v19 }
 0xeba   :  { %v15993_v47 = vpop.f32.mrf.mxu1 }
 0xebc   :  { %v16599_v38 = vpop.f32.mrf.mxu1 }
 0xec2   :  { %v15842_v30 = vpop.f32.mrf.mxu0 }
 0xec3   :  { %v15843_v28 = vadd.f32 %v16427_v59, %v15842_v30 }
 0xec4   :  { %v16564_v25 = vpop.f32.mrf.mxu0 }
 0xec5   :  { %v15994_v16 = vadd.f32 %v15993_v47, %v15843_v28 }
 0xeda   :  { %v16186_v52 = vpop.f32.mrf.mxu1 }
 0xedc   :  { %v16669_v40 = vpop.f32.mrf.mxu1 }
 0xee3   :  { %v16097_v15 = vpop.f32.mrf.mxu0 }
 0xee4   :  { %v16098_v63 = vadd.f32 %v16097_v15, %v15994_v16 }
 0xee5   :  { %v16634_v54 = vpop.f32.mrf.mxu0 }
 0xee6   :  { %v16187_v5 = vadd.f32 %v16186_v52, %v16098_v63 }
 0xefc   :  { %v16392_v22 = vpop.f32.mrf.mxu1 }
 0xefe   :  { %v16739_v32 = vpop.f32.mrf.mxu1 }
 0xf04   :  { %v16305_v24 = vpop.f32.mrf.mxu0 }
 0xf05   :  { %v16306_v3 = vadd.f32 %v16305_v24, %v16187_v5 }
 0xf06   :  { %v16704_v23 = vpop.f32.mrf.mxu0 }
 0xf07   :  { %v16393_v29 = vadd.f32 %v16392_v22, %v16306_v3 }
 0xf09   :  { %16396 = vst [vmem:[%s22345_s6] sm:$0xff] %v16393_v29 }
 0xf0a   :  { %16401 = vsyncpa [#allocation4], 1 }
 0xf0b   :  { %16402 = vsyncpa [#allocation6], 1 }

</bundles_post_ra>
